<compile_context>
chip_gen: v7x
topology: tpu7x:2x2x1
jax: 0.10.0
libtpu: 0.0.40
codegen_flags: <defaults>
</compile_context>

<pallas_src>
import functools

import jax
import jax.numpy as jnp
import numpy as np
from jax import lax
from jax.experimental import pallas as pl
from jax.experimental.pallas import tpu as pltpu


def _round_up(x, m):
    return ((x + m - 1) // m) * m


# ----------------------------------------------------------------------------
# Pallas kernels
# ----------------------------------------------------------------------------

def _pw_kernel(relu, has_res, *refs):
    """Fused 1x1 conv (matmul; BN scale pre-folded into W) + bias (+residual) (+ReLU).

    x / residual arrive pre-cast to bf16 (half the HBM bytes of f32); accumulation and
    the epilogue stay f32.
    """
    if has_res:
        x_ref, w_ref, b_ref, r_ref, o_ref = refs
    else:
        x_ref, w_ref, b_ref, o_ref = refs
    y = jnp.dot(x_ref[...], w_ref[...], preferred_element_type=jnp.float32)
    y = y + b_ref[...]                                      # folded-BN bias (f32 epilogue)
    if has_res:
        y = y + r_ref[...].astype(jnp.float32)
    if relu:
        y = jnp.maximum(y, 0.0)
    o_ref[...] = y.astype(o_ref.dtype)


def pointwise_conv_bn(x2d, w_bf16, bias, residual=None, relu=True,
                      out_dtype=jnp.bfloat16, tm=512):
    """x2d: (M, Cin) rows @ w: (Cin, Cout).  bf16 inputs, lane-dense Cout output.

    tm is capped at ceil(M/2) so the grid always has >= 2 steps when M allows it
    (keeps both v7x TensorCores busy).  On v5e/v6e with large feature maps tm may be
    raised to 1024 (128 MiB VMEM) for a small extra roofline gain.
    """
    M, Cin = x2d.shape
    Cout = w_bf16.shape[1]
    x2d = x2d.astype(jnp.bfloat16)              # no-op if producer already bf16 (fuses)
    if residual is not None:
        residual = residual.astype(jnp.bfloat16)

    tm = min(tm, max(8, _round_up((M + 1) // 2, 8)))
    Mp = _round_up(M, tm)
    if Mp != M:
        x2d = jnp.pad(x2d, ((0, Mp - M), (0, 0)))
        if residual is not None:
            residual = jnp.pad(residual, ((0, Mp - M), (0, 0)))
    grid = (Mp // tm,)

    b2 = bias.reshape(1, Cout).astype(jnp.float32)

    in_specs = [
        pl.BlockSpec((tm, Cin), lambda i: (i, 0)),
        pl.BlockSpec((Cin, Cout), lambda i: (0, 0)),
        pl.BlockSpec((1, Cout), lambda i: (0, 0)),
    ]
    args = [x2d, w_bf16, b2]
    if residual is not None:
        in_specs.append(pl.BlockSpec((tm, Cout), lambda i: (i, 0)))
        args.append(residual)

    bytes_accessed = (Mp * Cin * 2 + Cin * Cout * 2
                      + Mp * Cout * np.dtype(out_dtype).itemsize)
    if residual is not None:
        bytes_accessed += Mp * Cout * 2
    cost = pl.CostEstimate(flops=2 * Mp * Cin * Cout, transcendentals=0,
                           bytes_accessed=int(bytes_accessed))

    out = pl.pallas_call(
        functools.partial(_pw_kernel, relu, residual is not None),
        out_shape=jax.ShapeDtypeStruct((Mp, Cout), out_dtype),
        grid=grid,
        in_specs=in_specs,
        out_specs=pl.BlockSpec((tm, Cout), lambda i: (i, 0)),
        compiler_params=pltpu.CompilerParams(dimension_semantics=("parallel",)),
        cost_estimate=cost,
    )(*args)
    return out[:M] if Mp != M else out


def _conv3x3_kernel(x_ref, w_ref, b_ref, o_ref, xpad_ref):
    """3x3 conv (stride 1, pad 1) + bias + ReLU on a block of B frames.

    * The zero-padded image lives in a persistent bf16 VMEM scratch; pad strips and the
      image region are all rewritten every step (no concat-built copies, and safe under
      "parallel" grid semantics because every scratch element is written each step).
    * In the flattened row-major view, row i's right halo doubles as row i+1's left
      halo, so each 3x3 column tap is a flat offset of +/-1 and each row tap is +Wp.
    * kw-im2col: the three kw-shifted images are concatenated along channels once
      (K = 3*Cin fills the 256-deep MXU on v6e/v7x), then every kh tap is a
      sublane-ALIGNED slice (offset kh*Wp, with Wp % 8 == 0).
    * Accumulation is a value chain seeded with the broadcast bias -> no f32 scratch
      read-modify-writes; on v7x the chained matmuls can accumulate in the MRB.
    Junk output columns (j >= W) are computed on otherwise-idle lanes and dropped;
    negligible waste at ResNet's 56/28 spatial sizes.
    """
    B, H, W, Cin = x_ref.shape
    Cout = o_ref.shape[-1]
    Wp = xpad_ref.shape[2]
    R = H * Wp                           # output rows per frame (incl. junk cols)
    Lc = (H + 2) * Wp                    # window length covering all kh shifts

    # Build the padded image in the scratch: 2 zero rows top/bottom, zero cols W..Wp-1.
    xpad_ref[:, 0:2, :, :] = jnp.zeros((B, 2, Wp, Cin), jnp.bfloat16)
    xpad_ref[:, H + 2:H + 4, :, :] = jnp.zeros((B, 2, Wp, Cin), jnp.bfloat16)
    xpad_ref[:, 2:H + 2, W:Wp, :] = jnp.zeros((B, H, Wp - W, Cin), jnp.bfloat16)
    xpad_ref[:, 2:H + 2, 0:W, :] = x_ref[...].astype(jnp.bfloat16)

    xf = xpad_ref[...].reshape(B, (H + 4) * Wp, Cin)     # layout-free (Wp % 8 == 0)

    # kw-im2col: channel blocks are the kw = 0/1/2 shifted images (only 2 unaligned
    # slices per step instead of 6 unaligned tap slices).
    xcat = jnp.concatenate(
        [xf[:, Wp - 1:Wp - 1 + Lc, :],
         xf[:, Wp:Wp + Lc, :],
         xf[:, Wp + 1:Wp + 1 + Lc, :]], axis=-1)         # (B, Lc, 3*Cin)

    acc = jnp.broadcast_to(b_ref[...], (B * R, Cout)).astype(jnp.float32)
    for kh in range(3):                                   # kh*Wp is sublane-aligned
        patch = xcat[:, kh * Wp:kh * Wp + R, :].reshape(B * R, 3 * Cin)
        acc = acc + jnp.dot(patch, w_ref[kh], preferred_element_type=jnp.float32)

    y = jnp.maximum(acc, 0.0).reshape(B, H, Wp, Cout)[:, :, :W, :]   # drop junk cols
    o_ref[...] = y.astype(o_ref.dtype)


def conv3x3_bn_relu(x_nhwc, w_hwio_bf16, bias, out_dtype=jnp.bfloat16,
                    frames_per_step=4):
    """3x3 conv + folded-BN bias + ReLU.  N is padded up to a multiple of
    frames_per_step (cdiv grid) instead of shrinking the per-step frame count.
    On v7x at large spatial sizes, drop frames_per_step to 2 (or raise
    vmem_limit_bytes) to stay within the 32 MiB default scoped VMEM."""
    N, H, W, Cin = x_nhwc.shape
    Cout = w_hwio_bf16.shape[-1]
    x_nhwc = x_nhwc.astype(jnp.bfloat16)
    B = max(1, min(frames_per_step, N))
    Np = _round_up(N, B)
    if Np != N:
        x_nhwc = jnp.pad(x_nhwc, ((0, Np - N), (0, 0), (0, 0), (0, 0)))
    Wp = _round_up(W + 2, 8)
    w3k = w_hwio_bf16.reshape(3, 3 * Cin, Cout)          # fold kw into K (free reshape)
    b2 = bias.reshape(1, Cout).astype(jnp.float32)

    cost = pl.CostEstimate(
        flops=2 * 9 * Np * H * W * Cin * Cout, transcendentals=0,
        bytes_accessed=int(Np * H * W * Cin * 2 + 9 * Cin * Cout * 2
                           + Np * H * W * Cout * np.dtype(out_dtype).itemsize))

    out = pl.pallas_call(
        _conv3x3_kernel,
        out_shape=jax.ShapeDtypeStruct((Np, H, W, Cout), out_dtype),
        grid=(Np // B,),
        in_specs=[
            pl.BlockSpec((B, H, W, Cin), lambda n: (n, 0, 0, 0)),
            pl.BlockSpec((3, 3 * Cin, Cout), lambda n: (0, 0, 0)),
            pl.BlockSpec((1, Cout), lambda n: (0, 0)),
        ],
        out_specs=pl.BlockSpec((B, H, W, Cout), lambda n: (n, 0, 0, 0)),
        scratch_shapes=[pltpu.VMEM((B, H + 4, Wp, Cin), jnp.bfloat16)],
        compiler_params=pltpu.CompilerParams(dimension_semantics=("parallel",)),
        cost_estimate=cost,
    )(x_nhwc, w3k, b2)
    return out[:N] if Np != N else out


# ----------------------------------------------------------------------------
# JAX glue (temporal shift, BN folding, block wrapper)
# ----------------------------------------------------------------------------

def fold_bn(gamma, beta, mean, var, eps=1e-5):
    scale = gamma / jnp.sqrt(var + eps)
    bias = beta - mean * scale
    return scale, bias


def shift_nhwc(x_nhwc, n_segment, fold_div=3):
    """TSM temporal shift, NHWC, single concatenate (no zeros+scatter passes)."""
    nt, h, w, c = x_nhwc.shape
    n_batch = nt // n_segment
    x5 = x_nhwc.reshape(n_batch, n_segment, h, w, c)
    fold = c // fold_div
    z = jnp.zeros((n_batch, 1, h, w, fold), x_nhwc.dtype)
    left = jnp.concatenate([x5[:, 1:, ..., :fold], z], axis=1)            # shift left
    right = jnp.concatenate([z, x5[:, :-1, ..., fold:2 * fold]], axis=1)  # shift right
    rest = x5[..., 2 * fold:]
    return jnp.concatenate([left, right, rest], axis=-1).reshape(nt, h, w, c)


def bottleneck_forward(x_nchw, params, n_segment=8, fold_div=8, place='blockres'):
    """Pallas-backed Bottleneck forward (stride=1, downsample=None, use_sda=False)."""
    nt, c_in, H, W = x_nchw.shape
    # One transpose + bf16 cast; XLA fuses the cast with the transpose/shift so the
    # Pallas kernels DMA half the bytes.
    x_nhwc = jnp.transpose(x_nchw, (0, 2, 3, 1)).astype(jnp.bfloat16)
    out_nhwc = shift_nhwc(x_nhwc, n_segment, fold_div) if place == 'blockres' else x_nhwc
    # TODO(synk): keeping activations NHWC across blocks / fusing the temporal shift
    # into conv1's index_map (scalar prefetch of segment indices) would remove these
    # XLA passes entirely; not done here to keep the NCHW PyTorch interface.

    M = nt * H * W
    planes = params['w1'].shape[1]

    # conv1 (1x1) + bn1 + relu  -> bf16 activations
    y2d = pointwise_conv_bn(out_nhwc.reshape(M, c_in), params['w1'], params['b1'],
                            relu=True, out_dtype=jnp.bfloat16)
    y = y2d.reshape(nt, H, W, planes)

    # conv2 (3x3, stride 1, pad 1) + bn2 + relu  (use_sda=False -> no SDA)
    y = conv3x3_bn_relu(y, params['w2'], params['b2'], out_dtype=jnp.bfloat16)

    # conv3 (1x1) + bn3 + residual add + relu  (downsample=None -> residual = x)
    o2d = pointwise_conv_bn(y.reshape(M, planes), params['w3'], params['b3'],
                            residual=x_nhwc.reshape(M, c_in), relu=True,
                            out_dtype=x_nchw.dtype)
    out = o2d.reshape(nt, H, W, c_in)
    if place == 'block':
        out = shift_nhwc(out, n_segment, fold_div)
    return jnp.transpose(out, (0, 3, 1, 2))
    # TODO(synk): stride>1 / downsample branch and the SDA sub-module are not used in
    # this configuration and are not implemented.


# ----------------------------------------------------------------------------
# Pure-JAX/XLA reference (same bf16 quantization points, f32 math)
# ----------------------------------------------------------------------------

def shift_ref_nchw(x, n_segment, fold_div=3):
    nt, c, h, w = x.shape
    x5 = x.reshape(nt // n_segment, n_segment, c, h, w)
    fold = c // fold_div
    out = jnp.zeros_like(x5)
    out = out.at[:, :-1, :fold].set(x5[:, 1:, :fold])
    out = out.at[:, 1:, fold:2 * fold].set(x5[:, :-1, fold:2 * fold])
    out = out.at[:, :, 2 * fold:].set(x5[:, :, 2 * fold:])
    return out.reshape(nt, c, h, w)


def reference_forward(x_nchw, params_f32, n_segment=8, fold_div=8, place='blockres'):
    def q(a):  # mirror the kernels' bf16 rounding points
        return a.astype(jnp.bfloat16).astype(jnp.float32)

    residual = q(jnp.transpose(x_nchw, (0, 2, 3, 1)))   # kernel path bf16-casts x once
    out = shift_ref_nchw(x_nchw, n_segment, fold_div) if place == 'blockres' else x_nchw
    xin = q(jnp.transpose(out, (0, 2, 3, 1)))
    dn = ('NHWC', 'HWIO', 'NHWC')
    hp = lax.Precision.HIGHEST

    cin = xin.shape[-1]
    planes = params_f32['w1'].shape[1]
    w1 = q(params_f32['w1']).reshape(1, 1, cin, planes)
    y = lax.conv_general_dilated(xin, w1, (1, 1), 'VALID',
                                 dimension_numbers=dn, precision=hp)
    y = q(jnp.maximum(y + params_f32['b1'], 0.0))

    y = lax.conv_general_dilated(y, q(params_f32['w2']), (1, 1), ((1, 1), (1, 1)),
                                 dimension_numbers=dn, precision=hp)
    y = q(jnp.maximum(y + params_f32['b2'], 0.0))

    cout = params_f32['w3'].shape[1]
    w3 = q(params_f32['w3']).reshape(1, 1, planes, cout)
    y = lax.conv_general_dilated(y, w3, (1, 1), 'VALID',
                                 dimension_numbers=dn, precision=hp)
    y = jnp.maximum(y + params_f32['b3'] + residual, 0.0)
    y = jnp.transpose(y, (0, 3, 1, 2))
    if place == 'block':
        y = shift_ref_nchw(y, n_segment, fold_div)
    return y


# ----------------------------------------------------------------------------
# Main
# ----------------------------------------------------------------------------

if __name__ == "__main__":
    key = jax.random.PRNGKey(0)
    n_segment = 8
    planes = 128                      # lane-dense channel widths (ResNet-50 layer2 config)
    expansion = 4
    inplanes = planes * expansion     # 512 -> residual add valid (downsample=None)
    nt, H, W = n_segment, 8, 8        # one clip of 8 frames
    fold_div = 8

    ks = jax.random.split(key, 8)
    w1_oihw = jax.random.normal(ks[0], (planes, inplanes, 1, 1), jnp.float32) * 0.05
    w2_oihw = jax.random.normal(ks[1], (planes, planes, 3, 3), jnp.float32) * 0.05
    w3_oihw = jax.random.normal(ks[2], (planes * expansion, planes, 1, 1), jnp.float32) * 0.05

    def make_bn(k, C):
        k1, k2, k3, k4 = jax.random.split(k, 4)
        gamma = jax.random.uniform(k1, (C,), jnp.float32, 0.5, 1.5)
        beta = jax.random.normal(k2, (C,), jnp.float32) * 0.1
        mean = jax.random.normal(k3, (C,), jnp.float32) * 0.1
        var = jax.random.uniform(k4, (C,), jnp.float32, 0.5, 1.5)
        return fold_bn(gamma, beta, mean, var)

    s1, b1 = make_bn(ks[3], planes)
    s2, b2 = make_bn(ks[4], planes)
    s3, b3 = make_bn(ks[5], planes * expansion)

    # One-time weight prep: convert layouts, fold BN scale into the weights, cast bf16.
    w1_mat = jnp.transpose(w1_oihw[:, :, 0, 0], (1, 0)) * s1[None, :]          # (Cin, Cout)
    w2_hwio = jnp.transpose(w2_oihw, (2, 3, 1, 0)) * s2[None, None, None, :]   # HWIO
    w3_mat = jnp.transpose(w3_oihw[:, :, 0, 0], (1, 0)) * s3[None, :]          # (Cin, Cout)

    params = {
        'w1': w1_mat.astype(jnp.bfloat16), 'b1': b1,
        'w2': w2_hwio.astype(jnp.bfloat16), 'b2': b2,
        'w3': w3_mat.astype(jnp.bfloat16), 'b3': b3,
    }
    params_f32 = {'w1': w1_mat, 'b1': b1, 'w2': w2_hwio, 'b2': b2,
                  'w3': w3_mat, 'b3': b3}

    x = jax.random.normal(ks[6], (nt, inplanes, H, W), jnp.float32)   # NCHW like PyTorch

    fwd = jax.jit(functools.partial(bottleneck_forward, n_segment=n_segment,
                                    fold_div=fold_div, place='blockres'))
    out = jax.block_until_ready(fwd(x, params))

    ref = jax.block_until_ready(
        reference_forward(x, params_f32, n_segment=n_segment,
                          fold_div=fold_div, place='blockres'))

    assert out.shape == (nt, inplanes, H, W), out.shape
    # bf16 matmul inputs / bf16 intermediate activations -> compare at 2e-2.
    np.testing.assert_allclose(np.asarray(out), np.asarray(ref), rtol=2e-2, atol=2e-2)
    print("KERNEL_OK")
</pallas_src>

<mosaic_0001>
module attributes {stable_mosaic.version = 11 : i64} {
  func.func @_conv3x3_kernel(%arg0: i32, %arg1: memref<4x8x8x128xbf16, #tpu.memory_space<vmem>>, %arg2: memref<3x384x128xbf16, #tpu.memory_space<vmem>>, %arg3: memref<1x128xf32, #tpu.memory_space<vmem>>, %arg4: memref<4x8x8x128xbf16, #tpu.memory_space<vmem>>, %arg5: memref<4x12x16x128xbf16, #tpu.memory_space<vmem>>) attributes {dimension_semantics = [#tpu.dimension_semantics<parallel>], iteration_bounds = array<i64: 2>, scalar_prefetch = 0 : i64, scratch_operands = 1 : i64, tpu.core_type = #tpu.core_type<tc>, window_params = [{transform_indices = @transform_0, window_bounds = array<i64: 4, 8, 8, 128>}, {pipeline_mode = #tpu.pipeline_mode<synchronous>, transform_indices = @transform_1, window_bounds = array<i64: 3, 384, 128>}, {pipeline_mode = #tpu.pipeline_mode<synchronous>, transform_indices = @transform_2, window_bounds = array<i64: 1, 128>}, {transform_indices = @transform_3, window_bounds = array<i64: 4, 8, 8, 128>}]} {
    %cst = arith.constant 0.000000e+00 : bf16
    %0 = vector.broadcast %cst : bf16 to vector<4x2x16x128xbf16>
    %c0 = arith.constant 0 : index
    %c0_0 = arith.constant 0 : index
    %c0_1 = arith.constant 0 : index
    %c0_2 = arith.constant 0 : index
    %1 = vector.load %arg5[%c0, %c0_0, %c0_1, %c0_2] : memref<4x12x16x128xbf16, #tpu.memory_space<vmem>>, vector<4x2x16x128xbf16>
    tpu.vector_store %arg5[%c0, %c0_0, %c0_1, %c0_2], %0 {strides = array<i32>} : memref<4x12x16x128xbf16, #tpu.memory_space<vmem>>, vector<4x2x16x128xbf16>,
    %cst_3 = arith.constant 0.000000e+00 : bf16
    %2 = vector.broadcast %cst_3 : bf16 to vector<4x2x16x128xbf16>
    %c0_4 = arith.constant 0 : index
    %c10 = arith.constant 10 : index
    %c0_5 = arith.constant 0 : index
    %c0_6 = arith.constant 0 : index
    %3 = vector.load %arg5[%c0_4, %c10, %c0_5, %c0_6] : memref<4x12x16x128xbf16, #tpu.memory_space<vmem>>, vector<4x2x16x128xbf16>
    tpu.vector_store %arg5[%c0_4, %c10, %c0_5, %c0_6], %2 {strides = array<i32>} : memref<4x12x16x128xbf16, #tpu.memory_space<vmem>>, vector<4x2x16x128xbf16>,
    %cst_7 = arith.constant 0.000000e+00 : bf16
    %4 = vector.broadcast %cst_7 : bf16 to vector<4x8x8x128xbf16>
    %c0_8 = arith.constant 0 : index
    %c2 = arith.constant 2 : index
    %c8 = arith.constant 8 : index
    %c0_9 = arith.constant 0 : index
    %5 = vector.load %arg5[%c0_8, %c2, %c8, %c0_9] : memref<4x12x16x128xbf16, #tpu.memory_space<vmem>>, vector<4x8x8x128xbf16>
    tpu.vector_store %arg5[%c0_8, %c2, %c8, %c0_9], %4 {strides = array<i32>} : memref<4x12x16x128xbf16, #tpu.memory_space<vmem>>, vector<4x8x8x128xbf16>,
    %c0_10 = arith.constant 0 : index
    %c0_11 = arith.constant 0 : index
    %c0_12 = arith.constant 0 : index
    %c0_13 = arith.constant 0 : index
    %6 = vector.load %arg1[%c0_10, %c0_11, %c0_12, %c0_13] : memref<4x8x8x128xbf16, #tpu.memory_space<vmem>>, vector<4x8x8x128xbf16>
    %c0_14 = arith.constant 0 : index
    %c2_15 = arith.constant 2 : index
    %c0_16 = arith.constant 0 : index
    %c0_17 = arith.constant 0 : index
    %7 = vector.load %arg5[%c0_14, %c2_15, %c0_16, %c0_17] : memref<4x12x16x128xbf16, #tpu.memory_space<vmem>>, vector<4x8x8x128xbf16>
    tpu.vector_store %arg5[%c0_14, %c2_15, %c0_16, %c0_17], %6 {strides = array<i32>} : memref<4x12x16x128xbf16, #tpu.memory_space<vmem>>, vector<4x8x8x128xbf16>,
    %c0_18 = arith.constant 0 : index
    %c0_19 = arith.constant 0 : index
    %c0_20 = arith.constant 0 : index
    %c0_21 = arith.constant 0 : index
    %8 = vector.load %arg5[%c0_18, %c0_19, %c0_20, %c0_21] : memref<4x12x16x128xbf16, #tpu.memory_space<vmem>>, vector<4x12x16x128xbf16>
    %9 = vector.shape_cast %8 : vector<4x12x16x128xbf16> to vector<4x192x128xbf16>
    %10 = vector.extract_strided_slice %9 {offsets = [0, 15, 0], sizes = [4, 160, 128], strides = [1, 1, 1]} : vector<4x192x128xbf16> to vector<4x160x128xbf16>
    %11 = vector.extract_strided_slice %9 {offsets = [0, 16, 0], sizes = [4, 160, 128], strides = [1, 1, 1]} : vector<4x192x128xbf16> to vector<4x160x128xbf16>
    %12 = vector.extract_strided_slice %9 {offsets = [0, 17, 0], sizes = [4, 160, 128], strides = [1, 1, 1]} : vector<4x192x128xbf16> to vector<4x160x128xbf16>
    %13 = tpu.concatenate %10, %11, %12 in 2 : vector<4x160x128xbf16>, vector<4x160x128xbf16>, vector<4x160x128xbf16> -> vector<4x160x384xbf16>
    %c0_22 = arith.constant 0 : index
    %c0_23 = arith.constant 0 : index
    %14 = vector.load %arg3[%c0_22, %c0_23] : memref<1x128xf32, #tpu.memory_space<vmem>>, vector<1x128xf32>
    %15 = vector.shape_cast %14 : vector<1x128xf32> to vector<1x128xf32>
    %16 = vector.broadcast %15 : vector<1x128xf32> to vector<512x128xf32>
    %17 = vector.extract_strided_slice %13 {offsets = [0, 0, 0], sizes = [4, 128, 384], strides = [1, 1, 1]} : vector<4x160x384xbf16> to vector<4x128x384xbf16>
    %18 = vector.shape_cast %17 : vector<4x128x384xbf16> to vector<512x384xbf16>
    %c0_24 = arith.constant 0 : index
    %c0_25 = arith.constant 0 : index
    %c0_26 = arith.constant 0 : index
    %19 = vector.load %arg2[%c0_24, %c0_25, %c0_26] : memref<3x384x128xbf16, #tpu.memory_space<vmem>>, vector<1x384x128xbf16>
    %20 = vector.shape_cast %19 : vector<1x384x128xbf16> to vector<384x128xbf16>
    %cst_27 = arith.constant dense<0.000000e+00> : vector<512x128xf32>
    %21 = tpu.matmul %18, %20, %cst_27 {dimension_numbers = #tpu.dot_dimension_numbers<[1], [0], [0], [1], [0, 0, 1, 1], [], []>} : vector<512x384xbf16>, vector<384x128xbf16>, vector<512x128xf32> -> vector<512x128xf32>
    %22 = arith.addf %16, %21 : vector<512x128xf32>
    %23 = vector.extract_strided_slice %13 {offsets = [0, 16, 0], sizes = [4, 128, 384], strides = [1, 1, 1]} : vector<4x160x384xbf16> to vector<4x128x384xbf16>
    %24 = vector.shape_cast %23 : vector<4x128x384xbf16> to vector<512x384xbf16>
    %c1 = arith.constant 1 : index
    %c0_28 = arith.constant 0 : index
    %c0_29 = arith.constant 0 : index
    %25 = vector.load %arg2[%c1, %c0_28, %c0_29] : memref<3x384x128xbf16, #tpu.memory_space<vmem>>, vector<1x384x128xbf16>
    %26 = vector.shape_cast %25 : vector<1x384x128xbf16> to vector<384x128xbf16>
    %cst_30 = arith.constant dense<0.000000e+00> : vector<512x128xf32>
    %27 = tpu.matmul %24, %26, %cst_30 {dimension_numbers = #tpu.dot_dimension_numbers<[1], [0], [0], [1], [0, 0, 1, 1], [], []>} : vector<512x384xbf16>, vector<384x128xbf16>, vector<512x128xf32> -> vector<512x128xf32>
    %28 = arith.addf %22, %27 : vector<512x128xf32>
    %29 = vector.extract_strided_slice %13 {offsets = [0, 32, 0], sizes = [4, 128, 384], strides = [1, 1, 1]} : vector<4x160x384xbf16> to vector<4x128x384xbf16>
    %30 = vector.shape_cast %29 : vector<4x128x384xbf16> to vector<512x384xbf16>
    %c2_31 = arith.constant 2 : index
    %c0_32 = arith.constant 0 : index
    %c0_33 = arith.constant 0 : index
    %31 = vector.load %arg2[%c2_31, %c0_32, %c0_33] : memref<3x384x128xbf16, #tpu.memory_space<vmem>>, vector<1x384x128xbf16>
    %32 = vector.shape_cast %31 : vector<1x384x128xbf16> to vector<384x128xbf16>
    %cst_34 = arith.constant dense<0.000000e+00> : vector<512x128xf32>
    %33 = tpu.matmul %30, %32, %cst_34 {dimension_numbers = #tpu.dot_dimension_numbers<[1], [0], [0], [1], [0, 0, 1, 1], [], []>} : vector<512x384xbf16>, vector<384x128xbf16>, vector<512x128xf32> -> vector<512x128xf32>
    %34 = arith.addf %28, %33 : vector<512x128xf32>
    %cst_35 = arith.constant 0.000000e+00 : f32
    %35 = vector.broadcast %cst_35 : f32 to vector<512x128xf32>
    %36 = arith.maximumf %34, %35 : vector<512x128xf32>
    %37 = vector.shape_cast %36 : vector<512x128xf32> to vector<4x8x16x128xf32>
    %38 = vector.extract_strided_slice %37 {offsets = [0, 0, 0, 0], sizes = [4, 8, 8, 128], strides = [1, 1, 1, 1]} : vector<4x8x16x128xf32> to vector<4x8x8x128xf32>
    %39 = arith.truncf %38 : vector<4x8x8x128xf32> to vector<4x8x8x128xbf16>
    %c0_36 = arith.constant 0 : index
    %c0_37 = arith.constant 0 : index
    %c0_38 = arith.constant 0 : index
    %c0_39 = arith.constant 0 : index
    %40 = vector.load %arg4[%c0_36, %c0_37, %c0_38, %c0_39] : memref<4x8x8x128xbf16, #tpu.memory_space<vmem>>, vector<4x8x8x128xbf16>
    tpu.vector_store %arg4[%c0_36, %c0_37, %c0_38, %c0_39], %39 {strides = array<i32>} : memref<4x8x8x128xbf16, #tpu.memory_space<vmem>>, vector<4x8x8x128xbf16>,
    return
  }
  func.func @transform_0(%arg0: i32) -> (i32, i32, i32, i32) {
    %c0_i32 = arith.constant 0 : i32
    %c0_i32_0 = arith.constant 0 : i32
    %c0_i32_1 = arith.constant 0 : i32
    %c0_i32_2 = arith.constant 0 : i32
    return %arg0, %c0_i32, %c0_i32_0, %c0_i32_1 : i32, i32, i32, i32
  }
  func.func @transform_1(%arg0: i32) -> (i32, i32, i32) {
    %c0_i32 = arith.constant 0 : i32
    %c0_i32_0 = arith.constant 0 : i32
    %c0_i32_1 = arith.constant 0 : i32
    %c0_i32_2 = arith.constant 0 : i32
    return %c0_i32, %c0_i32_0, %c0_i32_1 : i32, i32, i32
  }
  func.func @transform_2(%arg0: i32) -> (i32, i32) {
    %c0_i32 = arith.constant 0 : i32
    %c0_i32_0 = arith.constant 0 : i32
    %c0_i32_1 = arith.constant 0 : i32
    return %c0_i32, %c0_i32_0 : i32, i32
  }
  func.func @transform_3(%arg0: i32) -> (i32, i32, i32, i32) {
    %c0_i32 = arith.constant 0 : i32
    %c0_i32_0 = arith.constant 0 : i32
    %c0_i32_1 = arith.constant 0 : i32
    %c0_i32_2 = arith.constant 0 : i32
    return %arg0, %c0_i32, %c0_i32_0, %c0_i32_1 : i32, i32, i32, i32
  }
}

module attributes {stable_mosaic.version = 11 : i64} {
  func.func @_pw_kernel(%arg0: i32, %arg1: memref<256x512xbf16, #tpu.memory_space<vmem>>, %arg2: memref<512x128xbf16, #tpu.memory_space<vmem>>, %arg3: memref<1x128xf32, #tpu.memory_space<vmem>>, %arg4: memref<256x128xbf16, #tpu.memory_space<vmem>>) attributes {dimension_semantics = [#tpu.dimension_semantics<parallel>], iteration_bounds = array<i64: 2>, scalar_prefetch = 0 : i64, scratch_operands = 0 : i64, tpu.core_type = #tpu.core_type<tc>, window_params = [{transform_indices = @transform_0, window_bounds = array<i64: 256, 512>}, {pipeline_mode = #tpu.pipeline_mode<synchronous>, transform_indices = @transform_1, window_bounds = array<i64: 512, 128>}, {pipeline_mode = #tpu.pipeline_mode<synchronous>, transform_indices = @transform_2, window_bounds = array<i64: 1, 128>}, {transform_indices = @transform_3, window_bounds = array<i64: 256, 128>}]} {
    %c0 = arith.constant 0 : index
    %c0_0 = arith.constant 0 : index
    %0 = vector.load %arg1[%c0, %c0_0] : memref<256x512xbf16, #tpu.memory_space<vmem>>, vector<256x512xbf16>
    %c0_1 = arith.constant 0 : index
    %c0_2 = arith.constant 0 : index
    %1 = vector.load %arg2[%c0_1, %c0_2] : memref<512x128xbf16, #tpu.memory_space<vmem>>, vector<512x128xbf16>
    %cst = arith.constant dense<0.000000e+00> : vector<256x128xf32>
    %2 = tpu.matmul %0, %1, %cst {dimension_numbers = #tpu.dot_dimension_numbers<[1], [0], [0], [1], [0, 0, 1, 1], [], []>} : vector<256x512xbf16>, vector<512x128xbf16>, vector<256x128xf32> -> vector<256x128xf32>
    %c0_3 = arith.constant 0 : index
    %c0_4 = arith.constant 0 : index
    %3 = vector.load %arg3[%c0_3, %c0_4] : memref<1x128xf32, #tpu.memory_space<vmem>>, vector<1x128xf32>
    %4 = vector.broadcast %3 : vector<1x128xf32> to vector<256x128xf32>
    %5 = arith.addf %2, %4 : vector<256x128xf32>
    %cst_5 = arith.constant 0.000000e+00 : f32
    %6 = vector.broadcast %cst_5 : f32 to vector<256x128xf32>
    %7 = arith.maximumf %5, %6 : vector<256x128xf32>
    %8 = arith.truncf %7 : vector<256x128xf32> to vector<256x128xbf16>
    %c0_6 = arith.constant 0 : index
    %c0_7 = arith.constant 0 : index
    %9 = vector.load %arg4[%c0_6, %c0_7] : memref<256x128xbf16, #tpu.memory_space<vmem>>, vector<256x128xbf16>
    tpu.vector_store %arg4[%c0_6, %c0_7], %8 {strides = array<i32>} : memref<256x128xbf16, #tpu.memory_space<vmem>>, vector<256x128xbf16>,
    return
  }
  func.func @transform_0(%arg0: i32) -> (i32, i32) {
    %c0_i32 = arith.constant 0 : i32
    %c0_i32_0 = arith.constant 0 : i32
    return %arg0, %c0_i32 : i32, i32
  }
  func.func @transform_1(%arg0: i32) -> (i32, i32) {
    %c0_i32 = arith.constant 0 : i32
    %c0_i32_0 = arith.constant 0 : i32
    %c0_i32_1 = arith.constant 0 : i32
    return %c0_i32, %c0_i32_0 : i32, i32
  }
  func.func @transform_2(%arg0: i32) -> (i32, i32) {
    %c0_i32 = arith.constant 0 : i32
    %c0_i32_0 = arith.constant 0 : i32
    %c0_i32_1 = arith.constant 0 : i32
    return %c0_i32, %c0_i32_0 : i32, i32
  }
  func.func @transform_3(%arg0: i32) -> (i32, i32) {
    %c0_i32 = arith.constant 0 : i32
    %c0_i32_0 = arith.constant 0 : i32
    return %arg0, %c0_i32 : i32, i32
  }
}

module attributes {stable_mosaic.version = 11 : i64} {
  func.func @_pw_kernel(%arg0: i32, %arg1: memref<256x128xbf16, #tpu.memory_space<vmem>>, %arg2: memref<128x512xbf16, #tpu.memory_space<vmem>>, %arg3: memref<1x512xf32, #tpu.memory_space<vmem>>, %arg4: memref<256x512xbf16, #tpu.memory_space<vmem>>, %arg5: memref<256x512xf32, #tpu.memory_space<vmem>>) attributes {dimension_semantics = [#tpu.dimension_semantics<parallel>], iteration_bounds = array<i64: 2>, scalar_prefetch = 0 : i64, scratch_operands = 0 : i64, tpu.core_type = #tpu.core_type<tc>, window_params = [{transform_indices = @transform_0, window_bounds = array<i64: 256, 128>}, {pipeline_mode = #tpu.pipeline_mode<synchronous>, transform_indices = @transform_1, window_bounds = array<i64: 128, 512>}, {pipeline_mode = #tpu.pipeline_mode<synchronous>, transform_indices = @transform_2, window_bounds = array<i64: 1, 512>}, {transform_indices = @transform_3, window_bounds = array<i64: 256, 512>}, {transform_indices = @transform_4, window_bounds = array<i64: 256, 512>}]} {
    %c0 = arith.constant 0 : index
    %c0_0 = arith.constant 0 : index
    %0 = vector.load %arg1[%c0, %c0_0] : memref<256x128xbf16, #tpu.memory_space<vmem>>, vector<256x128xbf16>
    %c0_1 = arith.constant 0 : index
    %c0_2 = arith.constant 0 : index
    %1 = vector.load %arg2[%c0_1, %c0_2] : memref<128x512xbf16, #tpu.memory_space<vmem>>, vector<128x512xbf16>
    %cst = arith.constant dense<0.000000e+00> : vector<256x512xf32>
    %2 = tpu.matmul %0, %1, %cst {dimension_numbers = #tpu.dot_dimension_numbers<[1], [0], [0], [1], [0, 0, 1, 1], [], []>} : vector<256x128xbf16>, vector<128x512xbf16>, vector<256x512xf32> -> vector<256x512xf32>
    %c0_3 = arith.constant 0 : index
    %c0_4 = arith.constant 0 : index
    %3 = vector.load %arg3[%c0_3, %c0_4] : memref<1x512xf32, #tpu.memory_space<vmem>>, vector<1x512xf32>
    %4 = vector.broadcast %3 : vector<1x512xf32> to vector<256x512xf32>
    %5 = arith.addf %2, %4 : vector<256x512xf32>
    %c0_5 = arith.constant 0 : index
    %c0_6 = arith.constant 0 : index
    %6 = vector.load %arg4[%c0_5, %c0_6] : memref<256x512xbf16, #tpu.memory_space<vmem>>, vector<256x512xbf16>
    %7 = arith.extf %6 : vector<256x512xbf16> to vector<256x512xf32>
    %8 = arith.addf %5, %7 : vector<256x512xf32>
    %cst_7 = arith.constant 0.000000e+00 : f32
    %9 = vector.broadcast %cst_7 : f32 to vector<256x512xf32>
    %10 = arith.maximumf %8, %9 : vector<256x512xf32>
    %c0_8 = arith.constant 0 : index
    %c0_9 = arith.constant 0 : index
    %11 = vector.load %arg5[%c0_8, %c0_9] : memref<256x512xf32, #tpu.memory_space<vmem>>, vector<256x512xf32>
    tpu.vector_store %arg5[%c0_8, %c0_9], %10 {strides = array<i32>} : memref<256x512xf32, #tpu.memory_space<vmem>>, vector<256x512xf32>,
    return
  }
  func.func @transform_0(%arg0: i32) -> (i32, i32) {
    %c0_i32 = arith.constant 0 : i32
    %c0_i32_0 = arith.constant 0 : i32
    return %arg0, %c0_i32 : i32, i32
  }
  func.func @transform_1(%arg0: i32) -> (i32, i32) {
    %c0_i32 = arith.constant 0 : i32
    %c0_i32_0 = arith.constant 0 : i32
    %c0_i32_1 = arith.constant 0 : i32
    return %c0_i32, %c0_i32_0 : i32, i32
  }
  func.func @transform_2(%arg0: i32) -> (i32, i32) {
    %c0_i32 = arith.constant 0 : i32
    %c0_i32_0 = arith.constant 0 : i32
    %c0_i32_1 = arith.constant 0 : i32
    return %c0_i32, %c0_i32_0 : i32, i32
  }
  func.func @transform_3(%arg0: i32) -> (i32, i32) {
    %c0_i32 = arith.constant 0 : i32
    %c0_i32_0 = arith.constant 0 : i32
    return %arg0, %c0_i32 : i32, i32
  }
  func.func @transform_4(%arg0: i32) -> (i32, i32) {
    %c0_i32 = arith.constant 0 : i32
    %c0_i32_0 = arith.constant 0 : i32
    return %arg0, %c0_i32 : i32, i32
  }
}

</mosaic_0001>

<bundles_post_ra>
// kernel: bottleneck_forward.3
= control target key start
LH: loop header
LB: loop body
LE: loop exit
PB: predicated region body
PF: predicated region fallthrough
CT: control target
= control target key end

     0   :  { %s2052_s12 = smov 0   ;;  %s2292_s0 = inlined_call_operand.vmem [shape: bf16[512,512], index: 0, kind: input, shape index: {}]   ;;  %s2293_s1 = inlined_call_operand.vmem [shape: bf16[512,128], index: 1, kind: input, shape index: {}]   ;;  %s2294_s2 = inlined_call_operand.vmem [shape: f32[1,128], index: 2, kind: input, shape index: {}]   ;;  %s2295_s3 = inlined_call_operand.vmem [shape: bf16[512,128], index: 3, kind: output, shape index: {}]  }
   0x1 LB: > { %s1395_s13 = sadd.s32 4294967295, %s2030_s12   ;;  %p1399_p0 = scmp.ge.s32.totalorder %s2030_s12, 1  ;;  %s2030_s12 = sphi %s2052_s12, %s13_s12  }
   0x2   : > { %p139_p1 = scmp.lt.s32.totalorder %s2030_s12, 3 }
   0x4   : > { %p140_p2 = pnand %p1399_p0, %p139_p1 }
   0x5   : > { %v1896_v0 = vld [vmem:[%s2293_s1 + $0x40] sm:$0xff] (!%p140_p2)   ;;  %v1900_v4 = vld [vmem:[%s2293_s1 + $0x48] sm:$0xff] (!%p140_p2)   ;;  %v1904_v8 = vld [vmem:[%s2293_s1 + $0x50] sm:$0xff] (!%p140_p2)   ;;  %s1400_s21 = sshll.u32 (!%p140_p2), %s1395_s13, 5 }
   0x6   : > { %143 = sbr.rel (%p140_p2) target bundleno = 385 (0x181), region = 32  ;;  %v1897_v1 = vld [vmem:[%s2293_s1 + $0xc0] sm:$0xff] (!%p140_p2)   ;;  %1664 = vmatprep.subr.bf16.mxu0 (!%p140_p2), %v1896_v0  ;;  %v1901_v5 = vld [vmem:[%s2293_s1 + $0xc8] sm:$0xff] (!%p140_p2)   ;;  %v1905_v9 = vld [vmem:[%s2293_s1 + $0xd0] sm:$0xff] (!%p140_p2)   ;;  %p165_p3 = scmp.lt.s32.totalorder (!%p140_p2), %s1400_s21, 63 }
   0x7   : > { %v1898_v2 = vld [vmem:[%s2293_s1] sm:$0xff] (!%p140_p2)   ;;  %1776 = vmatprep.subr.bf16.mxu1 (!%p140_p2), %v1897_v1  ;;  %v1902_v6 = vld [vmem:[%s2293_s1 + $0x8] sm:$0xff] (!%p140_p2)   ;;  %v1906_v10 = vld [vmem:[%s2293_s1 + $0x10] sm:$0xff] (!%p140_p2)  }
   0x8   : > { %v1899_v3 = vld [vmem:[%s2293_s1 + $0x80] sm:$0xff] (!%p140_p2)   ;;  %1665 = vmatpush3.bf16.msra.mxu0 (!%p140_p2), %v1898_v2  ;;  %v1903_v7 = vld [vmem:[%s2293_s1 + $0x88] sm:$0xff] (!%p140_p2)   ;;  %v1907_v11 = vld [vmem:[%s2293_s1 + $0x90] sm:$0xff] (!%p140_p2)  }
   0x9   : > { %1777 = vmatpush3.bf16.msra.mxu1 (!%p140_p2), %v1899_v3  ;;  %1666 = vmatprep.subr.bf16.mxu0 (!%p140_p2), %v1900_v4  ;;  %v1908_v12 = vld [vmem:[%s2293_s1 + $0x58] sm:$0xff] (!%p140_p2)   ;;  %v1912_v16 = vld [vmem:[%s2293_s1 + $0x60] sm:$0xff] (!%p140_p2)   ;;  %v1916_v20 = vld [vmem:[%s2293_s1 + $0x68] sm:$0xff] (!%p140_p2)  }
   0xa   : > { %1778 = vmatprep.subr.bf16.mxu1 (!%p140_p2), %v1901_v5  ;;  %v1909_v13 = vld [vmem:[%s2293_s1 + $0xd8] sm:$0xff] (!%p140_p2)   ;;  %v1913_v17 = vld [vmem:[%s2293_s1 + $0xe0] sm:$0xff] (!%p140_p2)   ;;  %v1917_v21 = vld [vmem:[%s2293_s1 + $0xe8] sm:$0xff] (!%p140_p2)  }
   0xb   : > { %v1910_v14 = vld [vmem:[%s2293_s1 + $0x18] sm:$0xff] (!%p140_p2)   ;;  %v1914_v18 = vld [vmem:[%s2293_s1 + $0x20] sm:$0xff] (!%p140_p2)   ;;  %v1918_v22 = vld [vmem:[%s2293_s1 + $0x28] sm:$0xff] (!%p140_p2)  }
   0xc   : > { %1667 = vmatpush3.bf16.msra.mxu0 (!%p140_p2), %v1902_v6  ;;  %v1911_v15 = vld [vmem:[%s2293_s1 + $0x98] sm:$0xff] (!%p140_p2)   ;;  %v1915_v19 = vld [vmem:[%s2293_s1 + $0xa0] sm:$0xff] (!%p140_p2)   ;;  %v1919_v23 = vld [vmem:[%s2293_s1 + $0xa8] sm:$0xff] (!%p140_p2)  }
   0xd   : > { %1779 = vmatpush3.bf16.msra.mxu1 %v1903_v7  ;;  %1668 = vmatprep.subr.bf16.mxu0 %v1904_v8  ;;  %s2297_s21 = smov (!%p165_p3, %s1400_s21), 63  ;;  %v1920_v24 = vld [vmem:[%s2293_s1 + $0x70] sm:$0xff]   ;;  %v1924_v28 = vld [vmem:[%s2293_s1 + $0x78] sm:$0xff]  }
   0xe   : > { %1780 = vmatprep.subr.bf16.mxu1 %v1905_v9  ;;  %v1921_v25 = vld [vmem:[%s2293_s1 + $0xf0] sm:$0xff]   ;;  %s1536_s18 = sshll.u32 %s2297_s21, 4  ;;  %v1925_v29 = vld [vmem:[%s2293_s1 + $0xf8] sm:$0xff]   ;;  %s1404_s7 = sshll.u32 %s2297_s21, 2 }
   0xf   : > { %v1922_v26 = vld [vmem:[%s2293_s1 + $0x30] sm:$0xff]   ;;  %s2158_s28 = scalar_lea.vmem %s2292_s0, %s1536_s18  ;;  %v1926_v30 = vld [vmem:[%s2293_s1 + $0x38] sm:$0xff]   ;;  %s2241_s10 = scalar_lea.vmem %s2295_s3, %s1404_s7 }
  0x10   : > { %1669 = vmatpush3.bf16.msra.mxu0 %v1906_v10  ;;  %v1923_v27 = vld [vmem:[%s2293_s1 + $0xb0] sm:$0xff]   ;;  %v1927_v31 = vld [vmem:[%s2293_s1 + $0xb8] sm:$0xff]  }
  0x11   : > { %1781 = vmatpush3.bf16.msra.mxu1 %v1907_v11  ;;  %1670 = vmatprep.subr.bf16.mxu0 %v1908_v12  ;;  %v1928_v32 = vld [vmem:[%s2158_s28] ss:$16 sps:$4 sm:$0xff]   ;;  %v1930_v33 = vld [vmem:[%s2158_s28 + $0x4] ss:$16 sps:$4 sm:$0xff]   ;;  %v1931_v34 = vld [vmem:[%s2158_s28 + $0x8] ss:$16 sps:$4 sm:$0xff]  }
  0x12   : > { %1782 = vmatprep.subr.bf16.mxu1 %v1909_v13  ;;  %v1933_v35 = vld [vmem:[%s2158_s28 + $0xc] ss:$16 sps:$4 sm:$0xff]   ;;  %857 = vmatprep.mubr.bf16.mxu0 %v1930_v33  ;;  %v1934_v36 = vld [vmem:[%s2158_s28 + $0x24] ss:$16 sps:$4 sm:$0xff]   ;;  %v1938_v38 = vld [vmem:[%s2158_s28 + $0x20] ss:$16 sps:$4 sm:$0xff]  }
  0x13   : > { %1018 = vmatprep.mubr.bf16.mxu1 %v1933_v35  ;;  %v1936_v37 = vld [vmem:[%s2158_s28 + $0x2c] ss:$16 sps:$4 sm:$0xff]   ;;  %v1939_v39 = vld [vmem:[%s2158_s28 + $0x28] ss:$16 sps:$4 sm:$0xff]   ;;  %v1940_v40 = vld [vmem:[%s2158_s28 + $0x44] ss:$16 sps:$4 sm:$0xff]  }
  0x14   : > { %1671 = vmatpush3.bf16.msra.mxu0 %v1910_v14  ;;  %v1942_v41 = vld [vmem:[%s2158_s28 + $0x4c] ss:$16 sps:$4 sm:$0xff]   ;;  %v1944_v42 = vld [vmem:[%s2158_s28 + $0x40] ss:$16 sps:$4 sm:$0xff]   ;;  %v1945_v43 = vld [vmem:[%s2158_s28 + $0x48] ss:$16 sps:$4 sm:$0xff]  }
  0x15   : > { %1783 = vmatpush3.bf16.msra.mxu1 %v1911_v15  ;;  %1672 = vmatprep.subr.bf16.mxu0 %v1912_v16  ;;  %v1946_v44 = vld [vmem:[%s2158_s28 + $0x64] ss:$16 sps:$4 sm:$0xff]   ;;  %v1948_v45 = vld [vmem:[%s2158_s28 + $0x6c] ss:$16 sps:$4 sm:$0xff]   ;;  %v1950_v46 = vld [vmem:[%s2158_s28 + $0x60] ss:$16 sps:$4 sm:$0xff]  }
  0x16   : > { %1784 = vmatprep.subr.bf16.mxu1 %v1913_v17  ;;  %v1951_v47 = vld [vmem:[%s2158_s28 + $0x68] ss:$16 sps:$4 sm:$0xff]   ;;  %v1952_v48 = vld [vmem:[%s2158_s28 + $0x84] ss:$16 sps:$4 sm:$0xff]   ;;  %v1954_v49 = vld [vmem:[%s2158_s28 + $0x8c] ss:$16 sps:$4 sm:$0xff]  }
  0x17   : > { %v1956_v50 = vld [vmem:[%s2158_s28 + $0x80] ss:$16 sps:$4 sm:$0xff]   ;;  %v1957_v51 = vld [vmem:[%s2158_s28 + $0x88] ss:$16 sps:$4 sm:$0xff]   ;;  %v1958_v52 = vld [vmem:[%s2158_s28 + $0xa4] ss:$16 sps:$4 sm:$0xff]  }
  0x18   : > { %1673 = vmatpush3.bf16.msra.mxu0 %v1914_v18  ;;  %v1960_v53 = vld [vmem:[%s2158_s28 + $0xac] ss:$16 sps:$4 sm:$0xff]   ;;  %v1962_v54 = vld [vmem:[%s2158_s28 + $0xa0] ss:$16 sps:$4 sm:$0xff]   ;;  %v1963_v55 = vld [vmem:[%s2158_s28 + $0xa8] ss:$16 sps:$4 sm:$0xff]  }
  0x19   : > { %1785 = vmatpush3.bf16.msra.mxu1 %v1915_v19  ;;  %1674 = vmatprep.subr.bf16.mxu0 %v1916_v20  ;;  %v1964_v56 = vld [vmem:[%s2158_s28 + $0xc4] ss:$16 sps:$4 sm:$0xff]   ;;  %v1966_v57 = vld [vmem:[%s2158_s28 + $0xcc] ss:$16 sps:$4 sm:$0xff]   ;;  %v1968_v58 = vld [vmem:[%s2158_s28 + $0xc0] ss:$16 sps:$4 sm:$0xff]  }
  0x1a   : > { %1786 = vmatprep.subr.bf16.mxu1 %v1917_v21  ;;  %v1969_v59 = vld [vmem:[%s2158_s28 + $0xc8] ss:$16 sps:$4 sm:$0xff]   ;;  %v1970_v60 = vld [vmem:[%s2158_s28 + $0xe4] ss:$16 sps:$4 sm:$0xff]   ;;  %v1972_v61 = vld [vmem:[%s2158_s28 + $0xec] ss:$16 sps:$4 sm:$0xff]  }
  0x1b   : > { %v1974_v62 = vld [vmem:[%s2158_s28 + $0xe0] ss:$16 sps:$4 sm:$0xff]   ;;  %v1975_v63 = vld [vmem:[%s2158_s28 + $0xe8] ss:$16 sps:$4 sm:$0xff]   ;;  %v1976_v0 = vld [vmem:[%s2158_s28 + $0x104] ss:$16 sps:$4 sm:$0xff]  }
  0x1c   : > { %1675 = vmatpush3.bf16.msra.mxu0 %v1918_v22  ;;  %v1978_v1 = vld [vmem:[%s2158_s28 + $0x10c] ss:$16 sps:$4 sm:$0xff]   ;;  %v1980_v2 = vld [vmem:[%s2158_s28 + $0x100] ss:$16 sps:$4 sm:$0xff]   ;;  %v1981_v3 = vld [vmem:[%s2158_s28 + $0x108] ss:$16 sps:$4 sm:$0xff]  }
  0x1d   : > { %1787 = vmatpush3.bf16.msra.mxu1 %v1919_v23  ;;  %1676 = vmatprep.subr.bf16.mxu0 %v1920_v24  ;;  %v1982_v4 = vld [vmem:[%s2158_s28 + $0x124] ss:$16 sps:$4 sm:$0xff]   ;;  %v1984_v5 = vld [vmem:[%s2158_s28 + $0x12c] ss:$16 sps:$4 sm:$0xff]   ;;  %v1986_v6 = vld [vmem:[%s2158_s28 + $0x120] ss:$16 sps:$4 sm:$0xff]  }
  0x1e   : > { %1788 = vmatprep.subr.bf16.mxu1 %v1921_v25  ;;  %v1987_v7 = vld [vmem:[%s2158_s28 + $0x128] ss:$16 sps:$4 sm:$0xff]   ;;  %v1988_v8 = vld [vmem:[%s2158_s28 + $0x144] ss:$16 sps:$4 sm:$0xff]   ;;  %v1990_v9 = vld [vmem:[%s2158_s28 + $0x14c] ss:$16 sps:$4 sm:$0xff]  }
  0x1f   : > { %v1992_v10 = vld [vmem:[%s2158_s28 + $0x140] ss:$16 sps:$4 sm:$0xff]   ;;  %v1993_v11 = vld [vmem:[%s2158_s28 + $0x148] ss:$16 sps:$4 sm:$0xff]   ;;  %v1994_v12 = vld [vmem:[%s2158_s28 + $0x164] ss:$16 sps:$4 sm:$0xff]  }
  0x20   : > { %1677 = vmatpush3.bf16.msra.mxu0 %v1922_v26  ;;  %v1996_v13 = vld [vmem:[%s2158_s28 + $0x16c] ss:$16 sps:$4 sm:$0xff]   ;;  %v1998_v14 = vld [vmem:[%s2158_s28 + $0x160] ss:$16 sps:$4 sm:$0xff]   ;;  %v1999_v15 = vld [vmem:[%s2158_s28 + $0x168] ss:$16 sps:$4 sm:$0xff]  }
  0x21   : > { %1789 = vmatpush3.bf16.msra.mxu1 %v1923_v27  ;;  %1678 = vmatprep.subr.bf16.mxu0 %v1924_v28  ;;  %v2000_v16 = vld [vmem:[%s2158_s28 + $0x184] ss:$16 sps:$4 sm:$0xff]   ;;  %v2002_v17 = vld [vmem:[%s2158_s28 + $0x18c] ss:$16 sps:$4 sm:$0xff]   ;;  %v2004_v18 = vld [vmem:[%s2158_s28 + $0x180] ss:$16 sps:$4 sm:$0xff]  }
  0x22   : > { %1790 = vmatprep.subr.bf16.mxu1 %v1925_v29  ;;  %v2005_v19 = vld [vmem:[%s2158_s28 + $0x188] ss:$16 sps:$4 sm:$0xff]   ;;  %v2006_v20 = vld [vmem:[%s2158_s28 + $0x1a4] ss:$16 sps:$4 sm:$0xff]   ;;  %v2008_v21 = vld [vmem:[%s2158_s28 + $0x1ac] ss:$16 sps:$4 sm:$0xff]  }
  0x23   : > { %v2010_v22 = vld [vmem:[%s2158_s28 + $0x1a0] ss:$16 sps:$4 sm:$0xff]   ;;  %v2011_v23 = vld [vmem:[%s2158_s28 + $0x1a8] ss:$16 sps:$4 sm:$0xff]   ;;  %v2012_v24 = vld [vmem:[%s2158_s28 + $0x1c4] ss:$16 sps:$4 sm:$0xff]  }
  0x24   : > { %1679 = vmatpush3.bf16.msra.mxu0 %v1926_v30  ;;  %v2014_v25 = vld [vmem:[%s2158_s28 + $0x1cc] ss:$16 sps:$4 sm:$0xff]   ;;  %v2016_v26 = vld [vmem:[%s2158_s28 + $0x1c0] ss:$16 sps:$4 sm:$0xff]   ;;  %v2017_v27 = vld [vmem:[%s2158_s28 + $0x1c8] ss:$16 sps:$4 sm:$0xff]  }
  0x25   : > { %1791 = vmatpush3.bf16.msra.mxu1 %v1927_v31  ;;  %v2018_v28 = vld [vmem:[%s2158_s28 + $0x1e4] ss:$16 sps:$4 sm:$0xff]   ;;  %v2020_v29 = vld [vmem:[%s2158_s28 + $0x1ec] ss:$16 sps:$4 sm:$0xff]   ;;  %v2022_v30 = vld [vmem:[%s2158_s28 + $0x1e0] ss:$16 sps:$4 sm:$0xff]  }
  0x26   : > { %v2023_v31 = vld [vmem:[%s2158_s28 + $0x1e8] ss:$16 sps:$4 sm:$0xff]  }
  0x27   : > { %858 = vmatmul.mubr.bf16.vlgmr.msra.gmra.mrb[0].mxu0 %v1928_v32 }
  0x28   : > { %1019 = vmatmul.mubr.bf16.vlgmr.msra.gmra.mrb[0].mxu1 %v1931_v34  ;;  %865 = vmatprep.mubr.bf16.mxu0 %v1934_v36  ;;  %v2233_v34 = vld [vmem:[%s2294_s2] ss:$0 sm:$0xff] }
  0x29   : > { %1026 = vmatprep.mubr.bf16.mxu1 %v1936_v37 }
  0x2f   : > { %866 = vmatmul.mubr.bf16.gmra.mrb[4].mxu0 %v1938_v38 }
  0x30   : > { %1027 = vmatmul.mubr.bf16.gmra.mrb[4].mxu1 %v1939_v39  ;;  %873 = vmatprep.mubr.bf16.mxu0 %v1940_v40 }
  0x31   : > { %1034 = vmatprep.mubr.bf16.mxu1 %v1942_v41 }
  0x37   : > { %874 = vmatmul.mubr.bf16.gmra.mrb[8].mxu0 %v1944_v42 }
  0x38   : > { %1035 = vmatmul.mubr.bf16.gmra.mrb[8].mxu1 %v1945_v43  ;;  %881 = vmatprep.mubr.bf16.mxu0 %v1946_v44 }
  0x39   : > { %1042 = vmatprep.mubr.bf16.mxu1 %v1948_v45 }
  0x3f   : > { %882 = vmatmul.mubr.bf16.gmra.mrb[12].mxu0 %v1950_v46 }
  0x40   : > { %1043 = vmatmul.mubr.bf16.gmra.mrb[12].mxu1 %v1951_v47  ;;  %889 = vmatprep.mubr.bf16.mxu0 %v1952_v48 }
  0x41   : > { %1050 = vmatprep.mubr.bf16.mxu1 %v1954_v49 }
  0x47   : > { %890 = vmatmul.mubr.bf16.gmra.mrb[16].mxu0 %v1956_v50 }
  0x48   : > { %1051 = vmatmul.mubr.bf16.gmra.mrb[16].mxu1 %v1957_v51  ;;  %897 = vmatprep.mubr.bf16.mxu0 %v1958_v52 }
  0x49   : > { %1058 = vmatprep.mubr.bf16.mxu1 %v1960_v53 }
  0x4f   : > { %898 = vmatmul.mubr.bf16.gmra.mrb[20].mxu0 %v1962_v54 }
  0x50   : > { %1059 = vmatmul.mubr.bf16.gmra.mrb[20].mxu1 %v1963_v55  ;;  %905 = vmatprep.mubr.bf16.mxu0 %v1964_v56 }
  0x51   : > { %1066 = vmatprep.mubr.bf16.mxu1 %v1966_v57 }
  0x57   : > { %906 = vmatmul.mubr.bf16.gmra.mrb[24].mxu0 %v1968_v58 }
  0x58   : > { %1067 = vmatmul.mubr.bf16.gmra.mrb[24].mxu1 %v1969_v59  ;;  %913 = vmatprep.mubr.bf16.mxu0 %v1970_v60 }
  0x59   : > { %1074 = vmatprep.mubr.bf16.mxu1 %v1972_v61 }
  0x5f   : > { %914 = vmatmul.mubr.bf16.gmra.mrb[28].mxu0 %v1974_v62 }
  0x60   : > { %1075 = vmatmul.mubr.bf16.gmra.mrb[28].mxu1 %v1975_v63  ;;  %921 = vmatprep.mubr.bf16.mxu0 %v1976_v0 }
  0x61   : > { %1082 = vmatprep.mubr.bf16.mxu1 %v1978_v1 }
  0x67   : > { %922 = vmatmul.mubr.bf16.gmra.mrb[32].mxu0 %v1980_v2 }
  0x68   : > { %1083 = vmatmul.mubr.bf16.gmra.mrb[32].mxu1 %v1981_v3  ;;  %929 = vmatprep.mubr.bf16.mxu0 %v1982_v4 }
  0x69   : > { %1090 = vmatprep.mubr.bf16.mxu1 %v1984_v5 }
  0x6f   : > { %930 = vmatmul.mubr.bf16.gmra.mrb[36].mxu0 %v1986_v6 }
  0x70   : > { %1091 = vmatmul.mubr.bf16.gmra.mrb[36].mxu1 %v1987_v7  ;;  %937 = vmatprep.mubr.bf16.mxu0 %v1988_v8 }
  0x71   : > { %1098 = vmatprep.mubr.bf16.mxu1 %v1990_v9 }
  0x77   : > { %938 = vmatmul.mubr.bf16.gmra.mrb[40].mxu0 %v1992_v10 }
  0x78   : > { %1099 = vmatmul.mubr.bf16.gmra.mrb[40].mxu1 %v1993_v11  ;;  %945 = vmatprep.mubr.bf16.mxu0 %v1994_v12 }
  0x79   : > { %1106 = vmatprep.mubr.bf16.mxu1 %v1996_v13 }
  0x7f   : > { %946 = vmatmul.mubr.bf16.gmra.mrb[44].mxu0 %v1998_v14 }
  0x80   : > { %1107 = vmatmul.mubr.bf16.gmra.mrb[44].mxu1 %v1999_v15  ;;  %953 = vmatprep.mubr.bf16.mxu0 %v2000_v16 }
  0x81   : > { %1114 = vmatprep.mubr.bf16.mxu1 %v2002_v17 }
  0x87   : > { %954 = vmatmul.mubr.bf16.gmra.mrb[48].mxu0 %v2004_v18 }
  0x88   : > { %1115 = vmatmul.mubr.bf16.gmra.mrb[48].mxu1 %v2005_v19  ;;  %961 = vmatprep.mubr.bf16.mxu0 %v2006_v20 }
  0x89   : > { %1122 = vmatprep.mubr.bf16.mxu1 %v2008_v21 }
  0x8f   : > { %962 = vmatmul.mubr.bf16.gmra.mrb[52].mxu0 %v2010_v22 }
  0x90   : > { %1123 = vmatmul.mubr.bf16.gmra.mrb[52].mxu1 %v2011_v23  ;;  %969 = vmatprep.mubr.bf16.mxu0 %v2012_v24 }
  0x91   : > { %1130 = vmatprep.mubr.bf16.mxu1 %v2014_v25 }
  0x97   : > { %970 = vmatmul.mubr.bf16.gmra.mrb[56].mxu0 %v2016_v26 }
  0x98   : > { %1131 = vmatmul.mubr.bf16.gmra.mrb[56].mxu1 %v2017_v27  ;;  %977 = vmatprep.mubr.bf16.mxu0 %v2018_v28 }
  0x99   : > { %1138 = vmatprep.mubr.bf16.mxu1 %v2020_v29 }
  0x9f   : > { %978 = vmatmul.mubr.bf16.gmra.mrb[60].mxu0 %v2022_v30 }
  0xa0   : > { %1139 = vmatmul.mubr.bf16.gmra.mrb[60].mxu1 %v2023_v31 }
  0xfa   : > { %v1680_v32 = vpop.f32.mrb[0].mxu0 }
  0xfb   : > { %v1792_v33 = vpop.f32.mrb[0].mxu1  ;;  %v1681_v35 = vpop.f32.mrb[1].mxu0 }
  0xfc   : > { %v1682_v36 = vadd.f32 %v1681_v35, %v1680_v32  ;;  %v1793_v37 = vpop.f32.mrb[1].mxu1  ;;  %v1683_v38 = vpop.f32.mrb[2].mxu0 }
  0xfd   : > { %v1794_v39 = vadd.f32 %v1793_v37, %v1792_v33  ;;  %v1795_v40 = vpop.f32.mrb[2].mxu1  ;;  %v1684_v41 = vpop.f32.mrb[3].mxu0 }
  0xfe   : > { %v860_v42 = vadd.f32 %v1682_v36, %v2233_v34  ;;  %v1685_v43 = vadd.f32 %v1684_v41, %v1683_v38  ;;  %v1796_v44 = vpop.f32.mrb[3].mxu1 }
  0xff   : > { %v1797_v45 = vadd.f32 %v1796_v44, %v1795_v40 }
 0x100   : > { %v1021_v46 = vadd.f32 %v1794_v39, %v860_v42  ;;  %v863_v47 = vadd.f32 %v1685_v43, %v2233_v34 }
 0x102   : > { %v1024_v48 = vadd.f32 %v1797_v45, %v863_v47  ;;  %v1686_v49 = vpop.f32.mrb[4].mxu0  ;;  %v1147_v52 = vmax.f32 %v1021_v46, 0.0 }
 0x103   : > { %v1798_v50 = vpop.f32.mrb[4].mxu1  ;;  %v1687_v51 = vpop.f32.mrb[5].mxu0 }
 0x104   : > { %v1148_v53 = vmax.f32 %v1024_v48, 0.0  ;;  %v1688_v54 = vadd.f32 %v1687_v51, %v1686_v49  ;;  %v1799_v55 = vpop.f32.mrb[5].mxu1  ;;  %v1689_v56 = vpop.f32.mrb[6].mxu0 }
 0x105   : > { %v1800_v57 = vadd.f32 %v1799_v55, %v1798_v50  ;;  %v1801_v58 = vpop.f32.mrb[6].mxu1  ;;  %v1690_v59 = vpop.f32.mrb[7].mxu0 }
 0x106   : > { %v1572_v60 = vpack.c.bf16 %v1148_v53, %v1147_v52  ;;  %v868_v61 = vadd.f32 %v1688_v54, %v2233_v34  ;;  %v1691_v62 = vadd.f32 %v1690_v59, %v1689_v56  ;;  %v1802_v63 = vpop.f32.mrb[7].mxu1 }
 0x107   : > { %v1803_v0 = vadd.f32 %v1802_v63, %v1801_v58 }
 0x108   : > { %1573 = vst [vmem:[%s2241_s10] sm:$0xff] %v1572_v60   ;;  %v1029_v1 = vadd.f32 %v1800_v57, %v868_v61  ;;  %v871_v2 = vadd.f32 %v1691_v62, %v2233_v34 }
 0x10a   : > { %v1032_v3 = vadd.f32 %v1803_v0, %v871_v2  ;;  %v1692_v4 = vpop.f32.mrb[8].mxu0  ;;  %v1149_v7 = vmax.f32 %v1029_v1, 0.0 }
 0x10b   : > { %v1804_v5 = vpop.f32.mrb[8].mxu1  ;;  %v1693_v6 = vpop.f32.mrb[9].mxu0 }
 0x10c   : > { %v1150_v8 = vmax.f32 %v1032_v3, 0.0  ;;  %v1694_v9 = vadd.f32 %v1693_v6, %v1692_v4  ;;  %v1805_v10 = vpop.f32.mrb[9].mxu1  ;;  %v1695_v11 = vpop.f32.mrb[10].mxu0 }
 0x10d   : > { %v1806_v12 = vadd.f32 %v1805_v10, %v1804_v5  ;;  %v1807_v13 = vpop.f32.mrb[10].mxu1  ;;  %v1696_v14 = vpop.f32.mrb[11].mxu0 }
 0x10e   : > { %v1577_v15 = vpack.c.bf16 %v1150_v8, %v1149_v7  ;;  %v876_v16 = vadd.f32 %v1694_v9, %v2233_v34  ;;  %v1697_v17 = vadd.f32 %v1696_v14, %v1695_v11  ;;  %v1808_v18 = vpop.f32.mrb[11].mxu1 }
 0x10f   : > { %v1809_v19 = vadd.f32 %v1808_v18, %v1807_v13 }
 0x110   : > { %1649 = vst [vmem:[%s2241_s10 + $0x8] sm:$0xff] %v1577_v15   ;;  %v1037_v20 = vadd.f32 %v1806_v12, %v876_v16  ;;  %v879_v21 = vadd.f32 %v1697_v17, %v2233_v34 }
 0x112   : > { %v1040_v22 = vadd.f32 %v1809_v19, %v879_v21  ;;  %v1698_v23 = vpop.f32.mrb[12].mxu0  ;;  %v1151_v26 = vmax.f32 %v1037_v20, 0.0 }
 0x113   : > { %v1810_v24 = vpop.f32.mrb[12].mxu1  ;;  %v1699_v25 = vpop.f32.mrb[13].mxu0 }
 0x114   : > { %v1152_v27 = vmax.f32 %v1040_v22, 0.0  ;;  %v1700_v28 = vadd.f32 %v1699_v25, %v1698_v23  ;;  %v1811_v29 = vpop.f32.mrb[13].mxu1  ;;  %v1701_v30 = vpop.f32.mrb[14].mxu0 }
 0x115   : > { %v1812_v31 = vadd.f32 %v1811_v29, %v1810_v24  ;;  %v1813_v32 = vpop.f32.mrb[14].mxu1  ;;  %v1702_v33 = vpop.f32.mrb[15].mxu0 }
 0x116   : > { %v1582_v35 = vpack.c.bf16 %v1152_v27, %v1151_v26  ;;  %v884_v36 = vadd.f32 %v1700_v28, %v2233_v34  ;;  %v1703_v37 = vadd.f32 %v1702_v33, %v1701_v30  ;;  %v1814_v38 = vpop.f32.mrb[15].mxu1 }
 0x117   : > { %v1815_v39 = vadd.f32 %v1814_v38, %v1813_v32 }
 0x118   : > { %1650 = vst [vmem:[%s2241_s10 + $0x10] sm:$0xff] %v1582_v35   ;;  %v1045_v40 = vadd.f32 %v1812_v31, %v884_v36  ;;  %v887_v41 = vadd.f32 %v1703_v37, %v2233_v34 }
 0x11a   : > { %v1048_v42 = vadd.f32 %v1815_v39, %v887_v41  ;;  %v1704_v43 = vpop.f32.mrb[16].mxu0  ;;  %v1153_v46 = vmax.f32 %v1045_v40, 0.0 }
 0x11b   : > { %v1816_v44 = vpop.f32.mrb[16].mxu1  ;;  %v1705_v45 = vpop.f32.mrb[17].mxu0 }
 0x11c   : > { %v1154_v47 = vmax.f32 %v1048_v42, 0.0  ;;  %v1706_v48 = vadd.f32 %v1705_v45, %v1704_v43  ;;  %v1817_v49 = vpop.f32.mrb[17].mxu1  ;;  %v1707_v50 = vpop.f32.mrb[18].mxu0 }
 0x11d   : > { %v1818_v51 = vadd.f32 %v1817_v49, %v1816_v44  ;;  %v1819_v52 = vpop.f32.mrb[18].mxu1  ;;  %v1708_v53 = vpop.f32.mrb[19].mxu0 }
 0x11e   : > { %v1587_v54 = vpack.c.bf16 %v1154_v47, %v1153_v46  ;;  %v892_v55 = vadd.f32 %v1706_v48, %v2233_v34  ;;  %v1709_v56 = vadd.f32 %v1708_v53, %v1707_v50  ;;  %v1820_v57 = vpop.f32.mrb[19].mxu1 }
 0x11f   : > { %v1821_v58 = vadd.f32 %v1820_v57, %v1819_v52 }
 0x120   : > { %1651 = vst [vmem:[%s2241_s10 + $0x18] sm:$0xff] %v1587_v54   ;;  %v1053_v59 = vadd.f32 %v1818_v51, %v892_v55  ;;  %v895_v60 = vadd.f32 %v1709_v56, %v2233_v34 }
 0x122   : > { %v1056_v61 = vadd.f32 %v1821_v58, %v895_v60  ;;  %v1710_v62 = vpop.f32.mrb[20].mxu0  ;;  %v1155_v1 = vmax.f32 %v1053_v59, 0.0 }
 0x123   : > { %v1822_v63 = vpop.f32.mrb[20].mxu1  ;;  %v1711_v0 = vpop.f32.mrb[21].mxu0 }
 0x124   : > { %v1156_v2 = vmax.f32 %v1056_v61, 0.0  ;;  %v1712_v3 = vadd.f32 %v1711_v0, %v1710_v62  ;;  %v1823_v4 = vpop.f32.mrb[21].mxu1  ;;  %v1713_v5 = vpop.f32.mrb[22].mxu0 }
 0x125   : > { %v1824_v6 = vadd.f32 %v1823_v4, %v1822_v63  ;;  %v1825_v7 = vpop.f32.mrb[22].mxu1  ;;  %v1714_v8 = vpop.f32.mrb[23].mxu0 }
 0x126   : > { %v1592_v9 = vpack.c.bf16 %v1156_v2, %v1155_v1  ;;  %v900_v10 = vadd.f32 %v1712_v3, %v2233_v34  ;;  %v1715_v11 = vadd.f32 %v1714_v8, %v1713_v5  ;;  %v1826_v12 = vpop.f32.mrb[23].mxu1 }
 0x127   : > { %v1827_v13 = vadd.f32 %v1826_v12, %v1825_v7 }
 0x128   : > { %1652 = vst [vmem:[%s2241_s10 + $0x20] sm:$0xff] %v1592_v9   ;;  %v1061_v14 = vadd.f32 %v1824_v6, %v900_v10  ;;  %v903_v15 = vadd.f32 %v1715_v11, %v2233_v34 }
 0x12a   : > { %v1064_v16 = vadd.f32 %v1827_v13, %v903_v15  ;;  %v1716_v17 = vpop.f32.mrb[24].mxu0  ;;  %v1157_v20 = vmax.f32 %v1061_v14, 0.0 }
 0x12b   : > { %v1828_v18 = vpop.f32.mrb[24].mxu1  ;;  %v1717_v19 = vpop.f32.mrb[25].mxu0 }
 0x12c   : > { %v1158_v21 = vmax.f32 %v1064_v16, 0.0  ;;  %v1718_v22 = vadd.f32 %v1717_v19, %v1716_v17  ;;  %v1829_v23 = vpop.f32.mrb[25].mxu1  ;;  %v1719_v24 = vpop.f32.mrb[26].mxu0 }
 0x12d   : > { %v1830_v25 = vadd.f32 %v1829_v23, %v1828_v18  ;;  %v1831_v26 = vpop.f32.mrb[26].mxu1  ;;  %v1720_v27 = vpop.f32.mrb[27].mxu0 }
 0x12e   : > { %v1597_v28 = vpack.c.bf16 %v1158_v21, %v1157_v20  ;;  %v908_v29 = vadd.f32 %v1718_v22, %v2233_v34  ;;  %v1721_v30 = vadd.f32 %v1720_v27, %v1719_v24  ;;  %v1832_v31 = vpop.f32.mrb[27].mxu1 }
 0x12f   : > { %v1833_v32 = vadd.f32 %v1832_v31, %v1831_v26 }
 0x130   : > { %1653 = vst [vmem:[%s2241_s10 + $0x28] sm:$0xff] %v1597_v28   ;;  %v1069_v33 = vadd.f32 %v1830_v25, %v908_v29  ;;  %v911_v35 = vadd.f32 %v1721_v30, %v2233_v34 }
 0x132   : > { %v1072_v36 = vadd.f32 %v1833_v32, %v911_v35  ;;  %v1722_v37 = vpop.f32.mrb[28].mxu0  ;;  %v1159_v40 = vmax.f32 %v1069_v33, 0.0 }
 0x133   : > { %v1834_v38 = vpop.f32.mrb[28].mxu1  ;;  %v1723_v39 = vpop.f32.mrb[29].mxu0 }
 0x134   : > { %v1160_v41 = vmax.f32 %v1072_v36, 0.0  ;;  %v1724_v42 = vadd.f32 %v1723_v39, %v1722_v37  ;;  %v1835_v43 = vpop.f32.mrb[29].mxu1  ;;  %v1725_v44 = vpop.f32.mrb[30].mxu0 }
 0x135   : > { %v1836_v45 = vadd.f32 %v1835_v43, %v1834_v38  ;;  %v1837_v46 = vpop.f32.mrb[30].mxu1  ;;  %v1726_v47 = vpop.f32.mrb[31].mxu0 }
 0x136   : > { %v1602_v48 = vpack.c.bf16 %v1160_v41, %v1159_v40  ;;  %v916_v49 = vadd.f32 %v1724_v42, %v2233_v34  ;;  %v1727_v50 = vadd.f32 %v1726_v47, %v1725_v44  ;;  %v1838_v51 = vpop.f32.mrb[31].mxu1 }
 0x137   : > { %v1839_v52 = vadd.f32 %v1838_v51, %v1837_v46 }
 0x138   : > { %1654 = vst [vmem:[%s2241_s10 + $0x30] sm:$0xff] %v1602_v48   ;;  %v1077_v53 = vadd.f32 %v1836_v45, %v916_v49  ;;  %v919_v54 = vadd.f32 %v1727_v50, %v2233_v34 }
 0x13a   : > { %v1080_v55 = vadd.f32 %v1839_v52, %v919_v54  ;;  %v1728_v56 = vpop.f32.mrb[32].mxu0  ;;  %v1161_v59 = vmax.f32 %v1077_v53, 0.0 }
 0x13b   : > { %v1840_v57 = vpop.f32.mrb[32].mxu1  ;;  %v1729_v58 = vpop.f32.mrb[33].mxu0 }
 0x13c   : > { %v1162_v60 = vmax.f32 %v1080_v55, 0.0  ;;  %v1730_v61 = vadd.f32 %v1729_v58, %v1728_v56  ;;  %v1841_v62 = vpop.f32.mrb[33].mxu1  ;;  %v1731_v63 = vpop.f32.mrb[34].mxu0 }
 0x13d   : > { %v1842_v0 = vadd.f32 %v1841_v62, %v1840_v57  ;;  %v1843_v1 = vpop.f32.mrb[34].mxu1  ;;  %v1732_v2 = vpop.f32.mrb[35].mxu0 }
 0x13e   : > { %v1607_v3 = vpack.c.bf16 %v1162_v60, %v1161_v59  ;;  %v924_v4 = vadd.f32 %v1730_v61, %v2233_v34  ;;  %v1733_v5 = vadd.f32 %v1732_v2, %v1731_v63  ;;  %v1844_v6 = vpop.f32.mrb[35].mxu1 }
 0x13f   : > { %v1845_v7 = vadd.f32 %v1844_v6, %v1843_v1 }
 0x140   : > { %1655 = vst [vmem:[%s2241_s10 + $0x38] sm:$0xff] %v1607_v3   ;;  %v1085_v8 = vadd.f32 %v1842_v0, %v924_v4  ;;  %v927_v9 = vadd.f32 %v1733_v5, %v2233_v34 }
 0x142   : > { %v1088_v10 = vadd.f32 %v1845_v7, %v927_v9  ;;  %v1734_v11 = vpop.f32.mrb[36].mxu0  ;;  %v1163_v14 = vmax.f32 %v1085_v8, 0.0 }
 0x143   : > { %v1846_v12 = vpop.f32.mrb[36].mxu1  ;;  %v1735_v13 = vpop.f32.mrb[37].mxu0 }
 0x144   : > { %v1164_v15 = vmax.f32 %v1088_v10, 0.0  ;;  %v1736_v16 = vadd.f32 %v1735_v13, %v1734_v11  ;;  %v1847_v17 = vpop.f32.mrb[37].mxu1  ;;  %v1737_v18 = vpop.f32.mrb[38].mxu0 }
 0x145   : > { %v1848_v19 = vadd.f32 %v1847_v17, %v1846_v12  ;;  %v1849_v20 = vpop.f32.mrb[38].mxu1  ;;  %v1738_v21 = vpop.f32.mrb[39].mxu0 }
 0x146   : > { %v1612_v22 = vpack.c.bf16 %v1164_v15, %v1163_v14  ;;  %v932_v23 = vadd.f32 %v1736_v16, %v2233_v34  ;;  %v1739_v24 = vadd.f32 %v1738_v21, %v1737_v18  ;;  %v1850_v25 = vpop.f32.mrb[39].mxu1 }
 0x147   : > { %v1851_v26 = vadd.f32 %v1850_v25, %v1849_v20 }
 0x148   : > { %1656 = vst [vmem:[%s2241_s10 + $0x40] sm:$0xff] %v1612_v22   ;;  %v1093_v27 = vadd.f32 %v1848_v19, %v932_v23  ;;  %v935_v28 = vadd.f32 %v1739_v24, %v2233_v34 }
 0x14a   : > { %v1096_v29 = vadd.f32 %v1851_v26, %v935_v28  ;;  %v1740_v30 = vpop.f32.mrb[40].mxu0  ;;  %v1165_v33 = vmax.f32 %v1093_v27, 0.0 }
 0x14b   : > { %v1852_v31 = vpop.f32.mrb[40].mxu1  ;;  %v1741_v32 = vpop.f32.mrb[41].mxu0 }
 0x14c   : > { %v1166_v35 = vmax.f32 %v1096_v29, 0.0  ;;  %v1742_v36 = vadd.f32 %v1741_v32, %v1740_v30  ;;  %v1853_v37 = vpop.f32.mrb[41].mxu1  ;;  %v1743_v38 = vpop.f32.mrb[42].mxu0 }
 0x14d   : > { %v1854_v39 = vadd.f32 %v1853_v37, %v1852_v31  ;;  %v1855_v40 = vpop.f32.mrb[42].mxu1  ;;  %v1744_v41 = vpop.f32.mrb[43].mxu0 }
 0x14e   : > { %v1617_v42 = vpack.c.bf16 %v1166_v35, %v1165_v33  ;;  %v940_v43 = vadd.f32 %v1742_v36, %v2233_v34  ;;  %v1745_v44 = vadd.f32 %v1744_v41, %v1743_v38  ;;  %v1856_v45 = vpop.f32.mrb[43].mxu1 }
 0x14f   : > { %v1857_v46 = vadd.f32 %v1856_v45, %v1855_v40 }
 0x150   : > { %1657 = vst [vmem:[%s2241_s10 + $0x48] sm:$0xff] %v1617_v42   ;;  %v1101_v47 = vadd.f32 %v1854_v39, %v940_v43  ;;  %v943_v48 = vadd.f32 %v1745_v44, %v2233_v34 }
 0x152   : > { %v1104_v49 = vadd.f32 %v1857_v46, %v943_v48  ;;  %v1746_v50 = vpop.f32.mrb[44].mxu0  ;;  %v1167_v53 = vmax.f32 %v1101_v47, 0.0 }
 0x153   : > { %v1858_v51 = vpop.f32.mrb[44].mxu1  ;;  %v1747_v52 = vpop.f32.mrb[45].mxu0 }
 0x154   : > { %v1168_v54 = vmax.f32 %v1104_v49, 0.0  ;;  %v1748_v55 = vadd.f32 %v1747_v52, %v1746_v50  ;;  %v1859_v56 = vpop.f32.mrb[45].mxu1  ;;  %v1749_v57 = vpop.f32.mrb[46].mxu0 }
 0x155   : > { %v1860_v58 = vadd.f32 %v1859_v56, %v1858_v51  ;;  %v1861_v59 = vpop.f32.mrb[46].mxu1  ;;  %v1750_v60 = vpop.f32.mrb[47].mxu0 }
 0x156   : > { %v1622_v61 = vpack.c.bf16 %v1168_v54, %v1167_v53  ;;  %v948_v62 = vadd.f32 %v1748_v55, %v2233_v34  ;;  %v1751_v63 = vadd.f32 %v1750_v60, %v1749_v57  ;;  %v1862_v0 = vpop.f32.mrb[47].mxu1 }
 0x157   : > { %v1863_v1 = vadd.f32 %v1862_v0, %v1861_v59 }
 0x158   : > { %1658 = vst [vmem:[%s2241_s10 + $0x50] sm:$0xff] %v1622_v61   ;;  %v1109_v2 = vadd.f32 %v1860_v58, %v948_v62  ;;  %v951_v3 = vadd.f32 %v1751_v63, %v2233_v34 }
 0x15a   : > { %v1112_v4 = vadd.f32 %v1863_v1, %v951_v3  ;;  %v1752_v5 = vpop.f32.mrb[48].mxu0  ;;  %v1169_v8 = vmax.f32 %v1109_v2, 0.0 }
 0x15b   : > { %v1864_v6 = vpop.f32.mrb[48].mxu1  ;;  %v1753_v7 = vpop.f32.mrb[49].mxu0 }
 0x15c   : > { %v1170_v9 = vmax.f32 %v1112_v4, 0.0  ;;  %v1754_v10 = vadd.f32 %v1753_v7, %v1752_v5  ;;  %v1865_v11 = vpop.f32.mrb[49].mxu1  ;;  %v1755_v12 = vpop.f32.mrb[50].mxu0 }
 0x15d   : > { %v1866_v13 = vadd.f32 %v1865_v11, %v1864_v6  ;;  %v1867_v14 = vpop.f32.mrb[50].mxu1  ;;  %v1756_v15 = vpop.f32.mrb[51].mxu0 }
 0x15e   : > { %v1627_v16 = vpack.c.bf16 %v1170_v9, %v1169_v8  ;;  %v956_v17 = vadd.f32 %v1754_v10, %v2233_v34  ;;  %v1757_v18 = vadd.f32 %v1756_v15, %v1755_v12  ;;  %v1868_v19 = vpop.f32.mrb[51].mxu1 }
 0x15f   : > { %v1869_v20 = vadd.f32 %v1868_v19, %v1867_v14 }
 0x160   : > { %1659 = vst [vmem:[%s2241_s10 + $0x58] sm:$0xff] %v1627_v16   ;;  %v1117_v21 = vadd.f32 %v1866_v13, %v956_v17  ;;  %v959_v22 = vadd.f32 %v1757_v18, %v2233_v34 }
 0x162   : > { %v1120_v23 = vadd.f32 %v1869_v20, %v959_v22  ;;  %v1758_v24 = vpop.f32.mrb[52].mxu0  ;;  %v1171_v27 = vmax.f32 %v1117_v21, 0.0 }
 0x163   : > { %v1870_v25 = vpop.f32.mrb[52].mxu1  ;;  %v1759_v26 = vpop.f32.mrb[53].mxu0 }
 0x164   : > { %v1172_v28 = vmax.f32 %v1120_v23, 0.0  ;;  %v1760_v29 = vadd.f32 %v1759_v26, %v1758_v24  ;;  %v1871_v30 = vpop.f32.mrb[53].mxu1  ;;  %v1761_v31 = vpop.f32.mrb[54].mxu0 }
 0x165   : > { %v1872_v32 = vadd.f32 %v1871_v30, %v1870_v25  ;;  %v1873_v33 = vpop.f32.mrb[54].mxu1  ;;  %v1762_v35 = vpop.f32.mrb[55].mxu0 }
 0x166   : > { %v1632_v36 = vpack.c.bf16 %v1172_v28, %v1171_v27  ;;  %v964_v37 = vadd.f32 %v1760_v29, %v2233_v34  ;;  %v1763_v38 = vadd.f32 %v1762_v35, %v1761_v31  ;;  %v1874_v39 = vpop.f32.mrb[55].mxu1 }
 0x167   : > { %v1875_v40 = vadd.f32 %v1874_v39, %v1873_v33 }
 0x168   : > { %1660 = vst [vmem:[%s2241_s10 + $0x60] sm:$0xff] %v1632_v36   ;;  %v1125_v41 = vadd.f32 %v1872_v32, %v964_v37  ;;  %v967_v42 = vadd.f32 %v1763_v38, %v2233_v34 }
 0x16a   : > { %v1128_v43 = vadd.f32 %v1875_v40, %v967_v42  ;;  %v1764_v44 = vpop.f32.mrb[56].mxu0  ;;  %v1173_v47 = vmax.f32 %v1125_v41, 0.0 }
 0x16b   : > { %v1876_v45 = vpop.f32.mrb[56].mxu1  ;;  %v1765_v46 = vpop.f32.mrb[57].mxu0 }
 0x16c   : > { %v1174_v48 = vmax.f32 %v1128_v43, 0.0  ;;  %v1766_v49 = vadd.f32 %v1765_v46, %v1764_v44  ;;  %v1877_v50 = vpop.f32.mrb[57].mxu1  ;;  %v1767_v51 = vpop.f32.mrb[58].mxu0 }
 0x16d   : > { %v1878_v52 = vadd.f32 %v1877_v50, %v1876_v45  ;;  %v1879_v53 = vpop.f32.mrb[58].mxu1  ;;  %v1768_v54 = vpop.f32.mrb[59].mxu0 }
 0x16e   : > { %v1637_v55 = vpack.c.bf16 %v1174_v48, %v1173_v47  ;;  %v972_v56 = vadd.f32 %v1766_v49, %v2233_v34  ;;  %v1769_v57 = vadd.f32 %v1768_v54, %v1767_v51  ;;  %v1880_v58 = vpop.f32.mrb[59].mxu1 }
 0x16f   : > { %v1881_v59 = vadd.f32 %v1880_v58, %v1879_v53 }
 0x170   : > { %1661 = vst [vmem:[%s2241_s10 + $0x68] sm:$0xff] %v1637_v55   ;;  %v1133_v60 = vadd.f32 %v1878_v52, %v972_v56  ;;  %v975_v61 = vadd.f32 %v1769_v57, %v2233_v34 }
 0x172   : > { %v1136_v62 = vadd.f32 %v1881_v59, %v975_v61  ;;  %v1770_v63 = vpop.f32.mrb[60].mxu0  ;;  %v1175_v2 = vmax.f32 %v1133_v60, 0.0 }
 0x173   : > { %v1882_v0 = vpop.f32.mrb[60].mxu1  ;;  %v1771_v1 = vpop.f32.mrb[61].mxu0 }
 0x174   : > { %v1176_v3 = vmax.f32 %v1136_v62, 0.0  ;;  %v1772_v4 = vadd.f32 %v1771_v1, %v1770_v63  ;;  %v1883_v5 = vpop.f32.mrb[61].mxu1  ;;  %v1773_v6 = vpop.f32.mrb[62].mxu0 }
 0x175   : > { %v1884_v7 = vadd.f32 %v1883_v5, %v1882_v0  ;;  %v1885_v8 = vpop.f32.mrb[62].mxu1  ;;  %v1774_v9 = vpop.f32.mrb[63].mxu0 }
 0x176   : > { %v1642_v10 = vpack.c.bf16 %v1176_v3, %v1175_v2  ;;  %v980_v11 = vadd.f32 %v1772_v4, %v2233_v34  ;;  %v1775_v12 = vadd.f32 %v1774_v9, %v1773_v6  ;;  %v1886_v13 = vpop.f32.mrb[63].mxu1 }
 0x177   : > { %v1887_v14 = vadd.f32 %v1886_v13, %v1885_v8 }
 0x178   : > { %1662 = vst [vmem:[%s2241_s10 + $0x70] sm:$0xff] %v1642_v10   ;;  %v1141_v15 = vadd.f32 %v1884_v7, %v980_v11  ;;  %v983_v16 = vadd.f32 %v1775_v12, %v2233_v34 }
 0x17a   : > { %v1144_v17 = vadd.f32 %v1887_v14, %v983_v16  ;;  %v1177_v18 = vmax.f32 %v1141_v15, 0.0 }
 0x17c   : > { %v1178_v19 = vmax.f32 %v1144_v17, 0.0 }
 0x17e   : > { %v1647_v20 = vpack.c.bf16 %v1178_v19, %v1177_v18 }
 0x180   : > { %1663 = vst [vmem:[%s2241_s10 + $0x78] sm:$0xff] %v1647_v20  }
 0x181 PF: > { %s13_s12 = sadd.s32 1, %s2030_s12  }
 0x182   : > { %p10_p4 = scmp.ge.s32.totalorder %s13_s12, 4  }
 0x184   :  { %12 = sbr.rel (!%p10_p4) target bundleno = 1 (0x1), region = 62 }

// kernel: bottleneck_forward.5
= control target key start
LH: loop header
LB: loop body
LE: loop exit
PB: predicated region body
PF: predicated region fallthrough
CT: control target
= control target key end

     0   :  { %9 = vsyncpa [#allocation3], 0  ;;  %s2482_s0 = inlined_call_operand.vmem [shape: bf16[512,128], index: 0, kind: input, shape index: {}]   ;;  %s2483_s1 = inlined_call_operand.vmem [shape: bf16[128,512], index: 1, kind: input, shape index: {}]   ;;  %s2484_s2 = inlined_call_operand.vmem [shape: f32[1,512], index: 2, kind: input, shape index: {}]   ;;  %s2485_s3 = inlined_call_operand.vmem [shape: bf16[512,512], index: 3, kind: input, shape index: {}]   ;;  %s2486_s4 = inlined_call_operand.hbm [shape: f32[512,512], index: 4, kind: output, shape index: {}]  }
   0x1   :  { %11 = vsyncpa [#allocation3 + $0x1], 0  ;;  %s1884_s15 = smov 0   ;;  %s1886_s16 = smov 0  }
   0x2   :  { %s1888_s17 = smov 0   ;;  %s1890_s18 = smov 0  }
   0x3 LB: > { %s1905_s19 = sadd.s32 4294967295, %s1853_s18   ;;  %s1618_s20 = sadd.s32 4294967294, %s1853_s18   ;;  %s1853_s18 = sphi %s1890_s18, %s2492_s18   ;;  %s1849_s17 = sphi %s1888_s17, %s2491_s17   ;;  %s1845_s16 = sphi %s1886_s16, %s2490_s16   ;;  %s1841_s15 = sphi %s1884_s15, %s2489_s15  }
   0x4   : > { %s1909_s21 = sadd.s32 1, %s1853_s18   ;;  %s118_s22 = sadd.s32 1, %s1849_s17 }
   0x5   : > { %s115_s23 = ssub.s32 %s1853_s18, %s1909_s21  ;;  %p128_p0 = scmp.ne.s32.totalorder %s1849_s17, %s1845_s16 }
   0x6   : > { %p116_p1 = scmp.eq.s32.totalorder %s115_s23, 0  ;;  %p129_p2 = scmp.eq.s32.totalorder %s1905_s19, 1 }
   0x7   : > { %p134_p3 = scmp.ne.s32.totalorder %s1845_s16, %s1841_s15  ;;  %p135_p4 = scmp.eq.s32.totalorder %s1618_s20, 1 }
   0x8   : > { %s1920_s24 = scalar_select %p116_p1, %s1849_s17, %s118_s22  }
   0x9   : > { %p1922_p5 = por %p129_p2, %p128_p0  ;;  %p1926_p6 = por %p135_p4, %p134_p3 }
   0xa   : > { %p1621_p7 = scmp.ge.s32.totalorder %s1853_s18, 1  ;;  %p178_p8 = scmp.lt.s32.totalorder %s1853_s18, 3 }
   0xc   : > { %p179_p9 = pnand %p1621_p7, %p178_p8 }
   0xd   : > { %v1727_v0 = vld [vmem:[%s2483_s1 + $0x4] ss:$16 sps:$4 sm:$0xff] (!%p179_p9)   ;;  %v1729_v1 = vld [vmem:[%s2483_s1 + $0xc] ss:$16 sps:$4 sm:$0xff] (!%p179_p9)   ;;  %v1855_v2 = vmov (!%p179_p9), 0   ;;  %s1623_s28 = sshll.u32 (!%p179_p9), %s1905_s19, 5  ;;  %v291_v49 = vlaneseq (!%p179_p9) }
   0xe   : > { %182 = sbr.rel (%p179_p9) target bundleno = 403 (0x193), region = 36  ;;  %599 = vmatprep.mubr.bf16.mxu0 (!%p179_p9), %v1855_v2  ;;  %792 = vmatprep.mubr.bf16.mxu1 (!%p179_p9), %v1855_v2  ;;  %v1731_v3 = vld [vmem:[%s2483_s1] ss:$16 sps:$4 sm:$0xff] (!%p179_p9)   ;;  %v1732_v4 = vld [vmem:[%s2483_s1 + $0x8] ss:$16 sps:$4 sm:$0xff] (!%p179_p9)   ;;  %p211_p10 = scmp.lt.s32.totalorder (!%p179_p9), %s1623_s28, 63 }
   0xf   : > { %567 = vmatprep.subr.bf16.mxu0 (!%p179_p9), %v1727_v0  ;;  %760 = vmatprep.subr.bf16.mxu1 (!%p179_p9), %v1729_v1  ;;  %v1733_v5 = vld [vmem:[%s2483_s1 + $0x24] ss:$16 sps:$4 sm:$0xff] (!%p179_p9)   ;;  %v1735_v6 = vld [vmem:[%s2483_s1 + $0x2c] ss:$16 sps:$4 sm:$0xff] (!%p179_p9)   ;;  %v1737_v7 = vld [vmem:[%s2483_s1 + $0x20] ss:$16 sps:$4 sm:$0xff] (!%p179_p9)  }
  0x10   : > { %568 = vmatpush1.bf16.msra.mxu0 (!%p179_p9), %v1731_v3  ;;  %761 = vmatpush1.bf16.msra.mxu1 (!%p179_p9), %v1732_v4  ;;  %v1738_v8 = vld [vmem:[%s2483_s1 + $0x28] ss:$16 sps:$4 sm:$0xff] (!%p179_p9)   ;;  %v1739_v9 = vld [vmem:[%s2483_s1 + $0x44] ss:$16 sps:$4 sm:$0xff] (!%p179_p9)   ;;  %v1741_v10 = vld [vmem:[%s2483_s1 + $0x4c] ss:$16 sps:$4 sm:$0xff] (!%p179_p9)  }
  0x11   : > { %569 = vmatprep.subr.bf16.mxu0 (!%p179_p9), %v1733_v5  ;;  %762 = vmatprep.subr.bf16.mxu1 (!%p179_p9), %v1735_v6  ;;  %v1743_v11 = vld [vmem:[%s2483_s1 + $0x40] ss:$16 sps:$4 sm:$0xff] (!%p179_p9)   ;;  %v1744_v12 = vld [vmem:[%s2483_s1 + $0x48] ss:$16 sps:$4 sm:$0xff] (!%p179_p9)   ;;  %v1745_v13 = vld [vmem:[%s2483_s1 + $0x64] ss:$16 sps:$4 sm:$0xff] (!%p179_p9)  }
  0x12   : > { %v1747_v14 = vld [vmem:[%s2483_s1 + $0x6c] ss:$16 sps:$4 sm:$0xff] (!%p179_p9)   ;;  %v1749_v15 = vld [vmem:[%s2483_s1 + $0x60] ss:$16 sps:$4 sm:$0xff] (!%p179_p9)   ;;  %v1750_v16 = vld [vmem:[%s2483_s1 + $0x68] ss:$16 sps:$4 sm:$0xff] (!%p179_p9)  }
  0x13   : > { %v1751_v17 = vld [vmem:[%s2483_s1 + $0x84] ss:$16 sps:$4 sm:$0xff] (!%p179_p9)   ;;  %v1753_v18 = vld [vmem:[%s2483_s1 + $0x8c] ss:$16 sps:$4 sm:$0xff] (!%p179_p9)   ;;  %v1755_v19 = vld [vmem:[%s2483_s1 + $0x80] ss:$16 sps:$4 sm:$0xff] (!%p179_p9)  }
  0x14   : > { %570 = vmatpush1.bf16.msra.mxu0 (!%p179_p9), %v1737_v7  ;;  %763 = vmatpush1.bf16.msra.mxu1 (!%p179_p9), %v1738_v8  ;;  %v1756_v20 = vld [vmem:[%s2483_s1 + $0x88] ss:$16 sps:$4 sm:$0xff] (!%p179_p9)   ;;  %v1757_v21 = vld [vmem:[%s2483_s1 + $0xa4] ss:$16 sps:$4 sm:$0xff] (!%p179_p9)   ;;  %v1759_v22 = vld [vmem:[%s2483_s1 + $0xac] ss:$16 sps:$4 sm:$0xff] (!%p179_p9)  }
  0x15   : > { %571 = vmatprep.subr.bf16.mxu0 %v1739_v9  ;;  %764 = vmatprep.subr.bf16.mxu1 %v1741_v10  ;;  %s2494_s28 = smov (!%p211_p10, %s1623_s28), 63  ;;  %v1761_v23 = vld [vmem:[%s2483_s1 + $0xa0] ss:$16 sps:$4 sm:$0xff]   ;;  %v1762_v24 = vld [vmem:[%s2483_s1 + $0xa8] ss:$16 sps:$4 sm:$0xff]   ;;  %v292_v50 = vshrl.u32 %v291_v49, 7 }
  0x16   : > { %s1624_s13 = sshll.u32 %s2494_s28, 2  ;;  %v1763_v25 = vld [vmem:[%s2483_s1 + $0xc4] ss:$16 sps:$4 sm:$0xff]   ;;  %v1765_v26 = vld [vmem:[%s2483_s1 + $0xcc] ss:$16 sps:$4 sm:$0xff]   ;;  %s1682_s5 = sshll.u32 %s2494_s28, 4 }
  0x17   : > { %s2016_s6 = scalar_lea.vmem %s2482_s0, %s1624_s13  ;;  %v1767_v27 = vld [vmem:[%s2483_s1 + $0xc0] ss:$16 sps:$4 sm:$0xff]   ;;  %v1768_v28 = vld [vmem:[%s2483_s1 + $0xc8] ss:$16 sps:$4 sm:$0xff]   ;;  %v1769_v29 = vld [vmem:[%s2483_s1 + $0xe4] ss:$16 sps:$4 sm:$0xff]   ;;  %s2089_s9 = scalar_lea.vmem %s2485_s3, %s1682_s5 }
  0x18   : > { %572 = vmatpush1.bf16.msra.mxu0 %v1743_v11  ;;  %765 = vmatpush1.bf16.msra.mxu1 %v1744_v12  ;;  %v1771_v30 = vld [vmem:[%s2483_s1 + $0xec] ss:$16 sps:$4 sm:$0xff]   ;;  %v1773_v31 = vld [vmem:[%s2483_s1 + $0xe0] ss:$16 sps:$4 sm:$0xff]   ;;  %v1774_v32 = vld [vmem:[%s2483_s1 + $0xe8] ss:$16 sps:$4 sm:$0xff]  }
  0x19   : > { %573 = vmatprep.subr.bf16.mxu0 %v1745_v13  ;;  %766 = vmatprep.subr.bf16.mxu1 %v1747_v14  ;;  %v1775_v33 = vld [vmem:[%s2016_s6] sm:$0xff]   ;;  %v1776_v34 = vld [vmem:[%s2016_s6 + $0x8] sm:$0xff]   ;;  %v1777_v35 = vld [vmem:[%s2016_s6 + $0x10] sm:$0xff]   ;;  %v293_v51 = vsub.s32 0, %v292_v50  ;;  %v301_v52 = vsub.s32 2, %v292_v50  ;;  %v297_v54 = vsub.s32 1, %v292_v50 }
  0x1a   : > { %v1778_v36 = vld [vmem:[%s2016_s6 + $0x18] sm:$0xff]   ;;  %v1779_v37 = vld [vmem:[%s2016_s6 + $0x20] sm:$0xff]   ;;  %v1780_v38 = vld [vmem:[%s2016_s6 + $0x28] sm:$0xff]   ;;  %v305_v55 = vsub.s32 3, %v292_v50  ;;  %s207_s28 = sand.u32 1, %s1845_s16   ;;  %s1684_s14 = sshll.u32 %s1905_s19, 14 }
  0x1b   : > { %v1781_v39 = vld [vmem:[%s2016_s6 + $0x30] sm:$0xff]   ;;  %v1782_v40 = vld [vmem:[%s2016_s6 + $0x38] sm:$0xff]   ;;  %v1783_v41 = vld [vmem:[%s2016_s6 + $0x40] sm:$0xff]   ;;  %s2429_s22 = scalar_lea.hbm %s2486_s4, %s1684_s14  ;;  %s2441_s23 = scalar_lea.sflag [#allocation3], %s207_s28 }
  0x1c   : > { %574 = vmatpush1.bf16.msra.mxu0 %v1749_v15  ;;  %767 = vmatpush1.bf16.msra.mxu1 %v1750_v16  ;;  %v1784_v42 = vld [vmem:[%s2016_s6 + $0x48] sm:$0xff]   ;;  %v1785_v43 = vld [vmem:[%s2016_s6 + $0x50] sm:$0xff]   ;;  %v1786_v44 = vld [vmem:[%s2016_s6 + $0x58] sm:$0xff]   ;;  %s1856_s29 = smov [#allocation2]  }
  0x1d   : > { %575 = vmatprep.subr.bf16.mxu0 %v1751_v17  ;;  %768 = vmatprep.subr.bf16.mxu1 %v1753_v18  ;;  %v1787_v45 = vld [vmem:[%s2016_s6 + $0x60] sm:$0xff]   ;;  %v1788_v46 = vld [vmem:[%s2016_s6 + $0x68] sm:$0xff]   ;;  %v1789_v47 = vld [vmem:[%s2016_s6 + $0x70] sm:$0xff]   ;;  %s1795_s30 = sshll.u32 %s1856_s29, 4  ;;  %s1796_s30 = int_to_ptr.vmem [resolvable:$false] %s1795_s30 }
  0x1e   : > { %v1790_v48 = vld [vmem:[%s2016_s6 + $0x78] sm:$0xff]   ;;  %v289_v53 = vld [vmem:[%s2484_s2] sm:$0xf]  ;;  %v954_v57 = vld [vmem:[%s2089_s9 + $0x8] sm:$0xff]  ;;  %s2109_s6 = sshll.u32 %s207_s28, 10  ;;  %s1797_s5 = scalar_lea.vmem %s1796_s30, 32768 }
  0x1f   : > { %v953_v56 = vld [vmem:[%s2089_s9] sm:$0xff]  ;;  %v2096_v58 = vrot.slane %v289_v53, %v293_v51  ;;  %v2098_v59 = vrot.slane %v289_v53, %v301_v52  ;;  %v2101_v60 = vrot.slane %v289_v53, %v297_v54  ;;  %v2103_v61 = vrot.slane %v289_v53, %v305_v55  ;;  %v955_v62 = vld [vmem:[%s2089_s9 + $0x10] sm:$0xff]  ;;  %v956_v63 = vld [vmem:[%s2089_s9 + $0x18] sm:$0xff]  ;;  %s2124_s12 = scalar_lea.vmem [#allocation2], %s2109_s6 }
  0x20   : > { %576 = vmatpush1.bf16.msra.mxu0 %v1755_v19  ;;  %769 = vmatpush1.bf16.msra.mxu1 %v1756_v20  ;;  %v1017_v0 = vunpack.c.l.bf16 %v953_v56  ;;  %v1019_v1 = vunpack.c.l.bf16 %v954_v57  ;;  %v1018_v4 = vunpack.c.h.bf16 %v953_v56  ;;  %v1020_v5 = vunpack.c.h.bf16 %v954_v57  ;;  %s1544_s13 = sshll.u32 %s2124_s12, 4  ;;  %s2431_s13 = int_to_ptr.vmem [resolvable:$true] %s1544_s13 }
  0x21   : > { %577 = vmatprep.subr.bf16.mxu0 %v1757_v21  ;;  %770 = vmatprep.subr.bf16.mxu1 %v1759_v22  ;;  %v1021_v10 = vunpack.c.l.bf16 %v955_v62  ;;  %v1023_v11 = vunpack.c.l.bf16 %v956_v63  ;;  %v1022_v16 = vunpack.c.h.bf16 %v955_v62  ;;  %v1024_v17 = vunpack.c.h.bf16 %v956_v63  ;;  %s1791_s27 = scalar_lea.vmem %s2431_s13, 16384  ;;  %p1798_p0 = scmp.lt.s32.totalorder %s2431_s13, %s1796_s30 }
  0x22   : > { %p1792_p11 = scmp.ne.s32.totalorder %s2431_s13, %s1791_s27  ;;  %p1799_p1 = scmp.lt.s32.totalorder %s1797_s5, %s1791_s27 }
  0x24   : > { %578 = vmatpush1.bf16.msra.mxu0 %v1761_v23  ;;  %771 = vmatpush1.bf16.msra.mxu1 %v1762_v24  ;;  %p1793_p12 = pnand %p1792_p11, %p1922_p5  ;;  %p1800_p2 = por %p1799_p1, %p1798_p0 }
  0x25   : > { %579 = vmatprep.subr.bf16.mxu0 %v1763_v25  ;;  %772 = vmatprep.subr.bf16.mxu1 %v1765_v26 }
  0x26   : > { %p1794_p13 = pneg %p1793_p12 }
  0x28   : > { %580 = vmatpush1.bf16.msra.mxu0 %v1767_v27  ;;  %773 = vmatpush1.bf16.msra.mxu1 %v1768_v28  ;;  %v957_v28 = vld [vmem:[%s2089_s9 + $0x20] sm:$0xff]  ;;  %p1801_p3 = pnand %p1800_p2, %p1794_p13 }
  0x29   : > { %581 = vmatprep.subr.bf16.mxu0 %v1769_v29  ;;  %774 = vmatprep.subr.bf16.mxu1 %v1771_v30  ;;  %v958_v29 = vld [vmem:[%s2089_s9 + $0x28] sm:$0xff] }
  0x2a   : > { %v1028_v49 = vunpack.c.h.bf16 %v958_v29 }
  0x2c   : > { %582 = vmatpush1.bf16.msra.mxu0 %v1773_v31  ;;  %775 = vmatpush1.bf16.msra.mxu1 %v1774_v32 }
  0x2f   : > { %600 = vmatmul.mubr.bf16.vlgmr.msra.gmra.mrb[0].mxu0 %v1775_v33  ;;  %793 = vmatmul.mubr.bf16.vlgmr.msra.gmra.mrb[0].mxu1 %v1775_v33 }
  0x30   : > { %609 = vmatprep.mubr.bf16.mxu0 %v1855_v2  ;;  %802 = vmatprep.mubr.bf16.mxu1 %v1855_v2 }
  0x37   : > { %610 = vmatmul.mubr.bf16.gmra.mrb[4].mxu0 %v1776_v34  ;;  %803 = vmatmul.mubr.bf16.gmra.mrb[4].mxu1 %v1776_v34 }
  0x38   : > { %619 = vmatprep.mubr.bf16.mxu0 %v1855_v2  ;;  %812 = vmatprep.mubr.bf16.mxu1 %v1855_v2 }
  0x3f   : > { %620 = vmatmul.mubr.bf16.gmra.mrb[8].mxu0 %v1777_v35  ;;  %813 = vmatmul.mubr.bf16.gmra.mrb[8].mxu1 %v1777_v35 }
  0x40   : > { %629 = vmatprep.mubr.bf16.mxu0 %v1855_v2  ;;  %822 = vmatprep.mubr.bf16.mxu1 %v1855_v2 }
  0x47   : > { %630 = vmatmul.mubr.bf16.gmra.mrb[12].mxu0 %v1778_v36  ;;  %823 = vmatmul.mubr.bf16.gmra.mrb[12].mxu1 %v1778_v36 }
  0x48   : > { %639 = vmatprep.mubr.bf16.mxu0 %v1855_v2  ;;  %832 = vmatprep.mubr.bf16.mxu1 %v1855_v2 }
  0x4f   : > { %640 = vmatmul.mubr.bf16.gmra.mrb[16].mxu0 %v1779_v37  ;;  %833 = vmatmul.mubr.bf16.gmra.mrb[16].mxu1 %v1779_v37 }
  0x50   : > { %649 = vmatprep.mubr.bf16.mxu0 %v1855_v2  ;;  %842 = vmatprep.mubr.bf16.mxu1 %v1855_v2 }
  0x57   : > { %650 = vmatmul.mubr.bf16.gmra.mrb[20].mxu0 %v1780_v38  ;;  %843 = vmatmul.mubr.bf16.gmra.mrb[20].mxu1 %v1780_v38  ;;  %v959_v38 = vld [vmem:[%s2089_s9 + $0x30] sm:$0xff] }
  0x58   : > { %659 = vmatprep.mubr.bf16.mxu0 %v1855_v2  ;;  %852 = vmatprep.mubr.bf16.mxu1 %v1855_v2  ;;  %v1029_v54 = vunpack.c.l.bf16 %v959_v38 }
  0x5f   : > { %660 = vmatmul.mubr.bf16.gmra.mrb[24].mxu0 %v1781_v39  ;;  %853 = vmatmul.mubr.bf16.gmra.mrb[24].mxu1 %v1781_v39  ;;  %v960_v39 = vld [vmem:[%s2089_s9 + $0x38] sm:$0xff] }
  0x60   : > { %669 = vmatprep.mubr.bf16.mxu0 %v1855_v2  ;;  %862 = vmatprep.mubr.bf16.mxu1 %v1855_v2  ;;  %v1031_v55 = vunpack.c.l.bf16 %v960_v39 }
  0x67   : > { %670 = vmatmul.mubr.bf16.gmra.mrb[28].mxu0 %v1782_v40  ;;  %863 = vmatmul.mubr.bf16.gmra.mrb[28].mxu1 %v1782_v40 }
  0x68   : > { %679 = vmatprep.mubr.bf16.mxu0 %v1855_v2  ;;  %872 = vmatprep.mubr.bf16.mxu1 %v1855_v2 }
  0x6f   : > { %680 = vmatmul.mubr.bf16.gmra.mrb[32].mxu0 %v1783_v41  ;;  %873 = vmatmul.mubr.bf16.gmra.mrb[32].mxu1 %v1783_v41 }
  0x70   : > { %689 = vmatprep.mubr.bf16.mxu0 %v1855_v2  ;;  %882 = vmatprep.mubr.bf16.mxu1 %v1855_v2 }
  0x77   : > { %690 = vmatmul.mubr.bf16.gmra.mrb[36].mxu0 %v1784_v42  ;;  %883 = vmatmul.mubr.bf16.gmra.mrb[36].mxu1 %v1784_v42  ;;  %v1025_v42 = vunpack.c.l.bf16 %v957_v28 }
  0x78   : > { %699 = vmatprep.mubr.bf16.mxu0 %v1855_v2  ;;  %892 = vmatprep.mubr.bf16.mxu1 %v1855_v2 }
  0x7f   : > { %700 = vmatmul.mubr.bf16.gmra.mrb[40].mxu0 %v1785_v43  ;;  %893 = vmatmul.mubr.bf16.gmra.mrb[40].mxu1 %v1785_v43  ;;  %v1027_v43 = vunpack.c.l.bf16 %v958_v29 }
  0x80   : > { %709 = vmatprep.mubr.bf16.mxu0 %v1855_v2  ;;  %902 = vmatprep.mubr.bf16.mxu1 %v1855_v2 }
  0x87   : > { %710 = vmatmul.mubr.bf16.gmra.mrb[44].mxu0 %v1786_v44  ;;  %903 = vmatmul.mubr.bf16.gmra.mrb[44].mxu1 %v1786_v44 }
  0x88   : > { %719 = vmatprep.mubr.bf16.mxu0 %v1855_v2  ;;  %912 = vmatprep.mubr.bf16.mxu1 %v1855_v2 }
  0x8f   : > { %720 = vmatmul.mubr.bf16.gmra.mrb[48].mxu0 %v1787_v45  ;;  %913 = vmatmul.mubr.bf16.gmra.mrb[48].mxu1 %v1787_v45 }
  0x90   : > { %729 = vmatprep.mubr.bf16.mxu0 %v1855_v2  ;;  %922 = vmatprep.mubr.bf16.mxu1 %v1855_v2 }
  0x97   : > { %730 = vmatmul.mubr.bf16.gmra.mrb[52].mxu0 %v1788_v46  ;;  %923 = vmatmul.mubr.bf16.gmra.mrb[52].mxu1 %v1788_v46 }
  0x98   : > { %739 = vmatprep.mubr.bf16.mxu0 %v1855_v2  ;;  %932 = vmatprep.mubr.bf16.mxu1 %v1855_v2 }
  0x9f   : > { %740 = vmatmul.mubr.bf16.gmra.mrb[56].mxu0 %v1789_v47  ;;  %933 = vmatmul.mubr.bf16.gmra.mrb[56].mxu1 %v1789_v47 }
  0xa0   : > { %749 = vmatprep.mubr.bf16.mxu0 %v1855_v2  ;;  %942 = vmatprep.mubr.bf16.mxu1 %v1855_v2 }
  0xa7   : > { %750 = vmatmul.mubr.bf16.gmra.mrb[60].mxu0 %v1790_v48  ;;  %943 = vmatmul.mubr.bf16.gmra.mrb[60].mxu1 %v1790_v48  ;;  %v1026_v48 = vunpack.c.h.bf16 %v957_v28 }
 0x102   : > { %v601_v2 = vpop.f32.mrb[0].mxu0  ;;  %v794_v3 = vpop.f32.mrb[0].mxu1 }
 0x103   : > { %v602_v6 = vadd.f32 %v601_v2, %v2096_v58  ;;  %v795_v7 = vadd.f32 %v794_v3, %v2098_v59  ;;  %v603_v8 = vpop.f32.mrb[1].mxu0  ;;  %v796_v9 = vpop.f32.mrb[1].mxu1 }
 0x104   : > { %v604_v12 = vadd.f32 %v603_v8, %v2101_v60  ;;  %v797_v13 = vadd.f32 %v796_v9, %v2103_v61  ;;  %v605_v14 = vpop.f32.mrb[2].mxu0  ;;  %v798_v15 = vpop.f32.mrb[2].mxu1 }
 0x105   : > { %v1145_v18 = vadd.f32 %v1017_v0, %v602_v6  ;;  %v1147_v19 = vadd.f32 %v1019_v1, %v795_v7  ;;  %v606_v20 = vadd.f32 %v605_v14, %v2096_v58  ;;  %v799_v21 = vadd.f32 %v798_v15, %v2098_v59  ;;  %v607_v22 = vpop.f32.mrb[3].mxu0  ;;  %v800_v23 = vpop.f32.mrb[3].mxu1 }
 0x106   : > { %v1146_v24 = vadd.f32 %v1018_v4, %v604_v12  ;;  %v1148_v25 = vadd.f32 %v1020_v5, %v797_v13  ;;  %v608_v26 = vadd.f32 %v607_v22, %v2101_v60  ;;  %v801_v27 = vadd.f32 %v800_v23, %v2103_v61  ;;  %v961_v12 = vld [vmem:[%s2089_s9 + $0x40] sm:$0xff]  ;;  %v962_v13 = vld [vmem:[%s2089_s9 + $0x48] sm:$0xff]  ;;  %v963_v22 = vld [vmem:[%s2089_s9 + $0x50] sm:$0xff] }
 0x107   : > { %v1273_v30 = vmax.f32 %v1145_v18, 0.0  ;;  %v1275_v31 = vmax.f32 %v1147_v19, 0.0  ;;  %v1149_v32 = vadd.f32 %v1021_v10, %v606_v20  ;;  %v1151_v33 = vadd.f32 %v1023_v11, %v799_v21  ;;  %v964_v23 = vld [vmem:[%s2089_s9 + $0x58] sm:$0xff] }
 0x108   : > { %v1274_v34 = vmax.f32 %v1146_v24, 0.0  ;;  %v1276_v35 = vmax.f32 %v1148_v25, 0.0  ;;  %v1150_v36 = vadd.f32 %v1022_v16, %v608_v26  ;;  %v1152_v37 = vadd.f32 %v1024_v17, %v801_v27 }
 0x109   : > { %1401 = vst [vmem:[%s2124_s12] sm:$0xff] %v1273_v30  ;;  %1403 = vst [vmem:[%s2124_s12 + $0x10] sm:$0xff] %v1275_v31  ;;  %v1277_v40 = vmax.f32 %v1149_v32, 0.0  ;;  %v1279_v41 = vmax.f32 %v1151_v33, 0.0  ;;  %v1030_v0 = vunpack.c.h.bf16 %v959_v38  ;;  %v1032_v1 = vunpack.c.h.bf16 %v960_v39 }
 0x10a   : > { %1402 = vst [vmem:[%s2124_s12 + $0x8] sm:$0xff] %v1274_v34  ;;  %1404 = vst [vmem:[%s2124_s12 + $0x18] sm:$0xff] %v1276_v35  ;;  %v1278_v44 = vmax.f32 %v1150_v36, 0.0  ;;  %v1280_v45 = vmax.f32 %v1152_v37, 0.0  ;;  %v611_v46 = vpop.f32.mrb[4].mxu0  ;;  %v804_v47 = vpop.f32.mrb[4].mxu1  ;;  %v1033_v26 = vunpack.c.l.bf16 %v961_v12  ;;  %v1035_v27 = vunpack.c.l.bf16 %v962_v13 }
 0x10b   : > { %1405 = vst [vmem:[%s2124_s12 + $0x20] sm:$0xff] %v1277_v40  ;;  %1407 = vst [vmem:[%s2124_s12 + $0x30] sm:$0xff] %v1279_v41  ;;  %v612_v50 = vadd.f32 %v611_v46, %v2096_v58  ;;  %v805_v51 = vadd.f32 %v804_v47, %v2098_v59  ;;  %v613_v52 = vpop.f32.mrb[5].mxu0  ;;  %v806_v53 = vpop.f32.mrb[5].mxu1  ;;  %v1034_v32 = vunpack.c.h.bf16 %v961_v12  ;;  %v1036_v33 = vunpack.c.h.bf16 %v962_v13 }
 0x10c   : > { %1406 = vst [vmem:[%s2124_s12 + $0x28] sm:$0xff] %v1278_v44  ;;  %1408 = vst [vmem:[%s2124_s12 + $0x38] sm:$0xff] %v1280_v45  ;;  %v614_v56 = vadd.f32 %v613_v52, %v2101_v60  ;;  %v807_v57 = vadd.f32 %v806_v53, %v2103_v61  ;;  %v615_v62 = vpop.f32.mrb[6].mxu0  ;;  %v808_v63 = vpop.f32.mrb[6].mxu1  ;;  %v1037_v38 = vunpack.c.l.bf16 %v963_v22  ;;  %v1039_v39 = vunpack.c.l.bf16 %v964_v23 }
 0x10d   : > { %v1153_v2 = vadd.f32 %v1025_v42, %v612_v50  ;;  %v1155_v3 = vadd.f32 %v1027_v43, %v805_v51  ;;  %v616_v4 = vadd.f32 %v615_v62, %v2096_v58  ;;  %v809_v5 = vadd.f32 %v808_v63, %v2098_v59  ;;  %v617_v6 = vpop.f32.mrb[7].mxu0  ;;  %v810_v7 = vpop.f32.mrb[7].mxu1 }
 0x10e   : > { %v1154_v8 = vadd.f32 %v1026_v48, %v614_v56  ;;  %v1156_v9 = vadd.f32 %v1028_v49, %v807_v57  ;;  %v618_v10 = vadd.f32 %v617_v6, %v2101_v60  ;;  %v811_v11 = vadd.f32 %v810_v7, %v2103_v61  ;;  %v965_v56 = vld [vmem:[%s2089_s9 + $0x60] sm:$0xff]  ;;  %v966_v57 = vld [vmem:[%s2089_s9 + $0x68] sm:$0xff]  ;;  %v967_v6 = vld [vmem:[%s2089_s9 + $0x70] sm:$0xff] }
 0x10f   : > { %v1281_v14 = vmax.f32 %v1153_v2, 0.0  ;;  %v1283_v15 = vmax.f32 %v1155_v3, 0.0  ;;  %v1157_v16 = vadd.f32 %v1029_v54, %v616_v4  ;;  %v1159_v17 = vadd.f32 %v1031_v55, %v809_v5  ;;  %v968_v7 = vld [vmem:[%s2089_s9 + $0x78] sm:$0xff] }
 0x110   : > { %v1282_v18 = vmax.f32 %v1154_v8, 0.0  ;;  %v1284_v19 = vmax.f32 %v1156_v9, 0.0  ;;  %v1158_v20 = vadd.f32 %v1030_v0, %v618_v10  ;;  %v1160_v21 = vadd.f32 %v1032_v1, %v811_v11 }
 0x111   : > { %1409 = vst [vmem:[%s2124_s12 + $0x40] sm:$0xff] %v1281_v14  ;;  %1411 = vst [vmem:[%s2124_s12 + $0x50] sm:$0xff] %v1283_v15  ;;  %v1285_v24 = vmax.f32 %v1157_v16, 0.0  ;;  %v1287_v25 = vmax.f32 %v1159_v17, 0.0  ;;  %v1038_v44 = vunpack.c.h.bf16 %v963_v22  ;;  %v1040_v45 = vunpack.c.h.bf16 %v964_v23 }
 0x112   : > { %1410 = vst [vmem:[%s2124_s12 + $0x48] sm:$0xff] %v1282_v18  ;;  %1412 = vst [vmem:[%s2124_s12 + $0x58] sm:$0xff] %v1284_v19  ;;  %v1286_v28 = vmax.f32 %v1158_v20, 0.0  ;;  %v1288_v29 = vmax.f32 %v1160_v21, 0.0  ;;  %v621_v30 = vpop.f32.mrb[8].mxu0  ;;  %v814_v31 = vpop.f32.mrb[8].mxu1  ;;  %v1041_v10 = vunpack.c.l.bf16 %v965_v56  ;;  %v1043_v11 = vunpack.c.l.bf16 %v966_v57 }
 0x113   : > { %1413 = vst [vmem:[%s2124_s12 + $0x60] sm:$0xff] %v1285_v24  ;;  %1415 = vst [vmem:[%s2124_s12 + $0x70] sm:$0xff] %v1287_v25  ;;  %v622_v34 = vadd.f32 %v621_v30, %v2096_v58  ;;  %v815_v35 = vadd.f32 %v814_v31, %v2098_v59  ;;  %v623_v36 = vpop.f32.mrb[9].mxu0  ;;  %v816_v37 = vpop.f32.mrb[9].mxu1  ;;  %v1042_v16 = vunpack.c.h.bf16 %v965_v56  ;;  %v1044_v17 = vunpack.c.h.bf16 %v966_v57 }
 0x114   : > { %1414 = vst [vmem:[%s2124_s12 + $0x68] sm:$0xff] %v1286_v28  ;;  %1416 = vst [vmem:[%s2124_s12 + $0x78] sm:$0xff] %v1288_v29  ;;  %v624_v40 = vadd.f32 %v623_v36, %v2101_v60  ;;  %v817_v41 = vadd.f32 %v816_v37, %v2103_v61  ;;  %v625_v42 = vpop.f32.mrb[10].mxu0  ;;  %v818_v43 = vpop.f32.mrb[10].mxu1  ;;  %v1045_v22 = vunpack.c.l.bf16 %v967_v6  ;;  %v1047_v23 = vunpack.c.l.bf16 %v968_v7 }
 0x115   : > { %v1161_v46 = vadd.f32 %v1033_v26, %v622_v34  ;;  %v1163_v47 = vadd.f32 %v1035_v27, %v815_v35  ;;  %v626_v48 = vadd.f32 %v625_v42, %v2096_v58  ;;  %v819_v49 = vadd.f32 %v818_v43, %v2098_v59  ;;  %v627_v50 = vpop.f32.mrb[11].mxu0  ;;  %v820_v51 = vpop.f32.mrb[11].mxu1 }
 0x116   : > { %v1162_v52 = vadd.f32 %v1034_v32, %v624_v40  ;;  %v1164_v53 = vadd.f32 %v1036_v33, %v817_v41  ;;  %v628_v54 = vadd.f32 %v627_v50, %v2101_v60  ;;  %v821_v55 = vadd.f32 %v820_v51, %v2103_v61  ;;  %v969_v40 = vld [vmem:[%s2089_s9 + $0x80] sm:$0xff]  ;;  %v970_v41 = vld [vmem:[%s2089_s9 + $0x88] sm:$0xff]  ;;  %v971_v50 = vld [vmem:[%s2089_s9 + $0x90] sm:$0xff] }
 0x117   : > { %v1289_v62 = vmax.f32 %v1161_v46, 0.0  ;;  %v1291_v63 = vmax.f32 %v1163_v47, 0.0  ;;  %v1165_v0 = vadd.f32 %v1037_v38, %v626_v48  ;;  %v1167_v1 = vadd.f32 %v1039_v39, %v819_v49  ;;  %v972_v51 = vld [vmem:[%s2089_s9 + $0x98] sm:$0xff] }
 0x118   : > { %v1290_v2 = vmax.f32 %v1162_v52, 0.0  ;;  %v1292_v3 = vmax.f32 %v1164_v53, 0.0  ;;  %v1166_v4 = vadd.f32 %v1038_v44, %v628_v54  ;;  %v1168_v5 = vadd.f32 %v1040_v45, %v821_v55 }
 0x119   : > { %1417 = vst [vmem:[%s2124_s12 + $0x80] sm:$0xff] %v1289_v62  ;;  %1419 = vst [vmem:[%s2124_s12 + $0x90] sm:$0xff] %v1291_v63  ;;  %v1293_v8 = vmax.f32 %v1165_v0, 0.0  ;;  %v1295_v9 = vmax.f32 %v1167_v1, 0.0  ;;  %v1046_v28 = vunpack.c.h.bf16 %v967_v6  ;;  %v1048_v29 = vunpack.c.h.bf16 %v968_v7 }
 0x11a   : > { %1418 = vst [vmem:[%s2124_s12 + $0x88] sm:$0xff] %v1290_v2  ;;  %1420 = vst [vmem:[%s2124_s12 + $0x98] sm:$0xff] %v1292_v3  ;;  %v1294_v12 = vmax.f32 %v1166_v4, 0.0  ;;  %v1296_v13 = vmax.f32 %v1168_v5, 0.0  ;;  %v631_v14 = vpop.f32.mrb[12].mxu0  ;;  %v824_v15 = vpop.f32.mrb[12].mxu1  ;;  %v1049_v54 = vunpack.c.l.bf16 %v969_v40  ;;  %v1051_v55 = vunpack.c.l.bf16 %v970_v41 }
 0x11b   : > { %1421 = vst [vmem:[%s2124_s12 + $0xa0] sm:$0xff] %v1293_v8  ;;  %1423 = vst [vmem:[%s2124_s12 + $0xb0] sm:$0xff] %v1295_v9  ;;  %v632_v18 = vadd.f32 %v631_v14, %v2096_v58  ;;  %v825_v19 = vadd.f32 %v824_v15, %v2098_v59  ;;  %v633_v20 = vpop.f32.mrb[13].mxu0  ;;  %v826_v21 = vpop.f32.mrb[13].mxu1  ;;  %v1050_v0 = vunpack.c.h.bf16 %v969_v40  ;;  %v1052_v1 = vunpack.c.h.bf16 %v970_v41 }
 0x11c   : > { %1422 = vst [vmem:[%s2124_s12 + $0xa8] sm:$0xff] %v1294_v12  ;;  %1424 = vst [vmem:[%s2124_s12 + $0xb8] sm:$0xff] %v1296_v13  ;;  %v634_v24 = vadd.f32 %v633_v20, %v2101_v60  ;;  %v827_v25 = vadd.f32 %v826_v21, %v2103_v61  ;;  %v635_v26 = vpop.f32.mrb[14].mxu0  ;;  %v828_v27 = vpop.f32.mrb[14].mxu1  ;;  %v1053_v6 = vunpack.c.l.bf16 %v971_v50  ;;  %v1055_v7 = vunpack.c.l.bf16 %v972_v51 }
 0x11d   : > { %v1169_v30 = vadd.f32 %v1041_v10, %v632_v18  ;;  %v1171_v31 = vadd.f32 %v1043_v11, %v825_v19  ;;  %v636_v32 = vadd.f32 %v635_v26, %v2096_v58  ;;  %v829_v33 = vadd.f32 %v828_v27, %v2098_v59  ;;  %v637_v34 = vpop.f32.mrb[15].mxu0  ;;  %v830_v35 = vpop.f32.mrb[15].mxu1 }
 0x11e   : > { %v1170_v36 = vadd.f32 %v1042_v16, %v634_v24  ;;  %v1172_v37 = vadd.f32 %v1044_v17, %v827_v25  ;;  %v638_v38 = vadd.f32 %v637_v34, %v2101_v60  ;;  %v831_v39 = vadd.f32 %v830_v35, %v2103_v61  ;;  %v973_v24 = vld [vmem:[%s2089_s9 + $0xa0] sm:$0xff]  ;;  %v974_v25 = vld [vmem:[%s2089_s9 + $0xa8] sm:$0xff]  ;;  %v975_v34 = vld [vmem:[%s2089_s9 + $0xb0] sm:$0xff] }
 0x11f   : > { %v1297_v42 = vmax.f32 %v1169_v30, 0.0  ;;  %v1299_v43 = vmax.f32 %v1171_v31, 0.0  ;;  %v1173_v44 = vadd.f32 %v1045_v22, %v636_v32  ;;  %v1175_v45 = vadd.f32 %v1047_v23, %v829_v33  ;;  %v976_v35 = vld [vmem:[%s2089_s9 + $0xb8] sm:$0xff] }
 0x120   : > { %v1298_v46 = vmax.f32 %v1170_v36, 0.0  ;;  %v1300_v47 = vmax.f32 %v1172_v37, 0.0  ;;  %v1174_v48 = vadd.f32 %v1046_v28, %v638_v38  ;;  %v1176_v49 = vadd.f32 %v1048_v29, %v831_v39 }
 0x121   : > { %1425 = vst [vmem:[%s2124_s12 + $0xc0] sm:$0xff] %v1297_v42  ;;  %1427 = vst [vmem:[%s2124_s12 + $0xd0] sm:$0xff] %v1299_v43  ;;  %v1301_v52 = vmax.f32 %v1173_v44, 0.0  ;;  %v1303_v53 = vmax.f32 %v1175_v45, 0.0  ;;  %v1054_v12 = vunpack.c.h.bf16 %v971_v50  ;;  %v1056_v13 = vunpack.c.h.bf16 %v972_v51 }
 0x122   : > { %1426 = vst [vmem:[%s2124_s12 + $0xc8] sm:$0xff] %v1298_v46  ;;  %1428 = vst [vmem:[%s2124_s12 + $0xd8] sm:$0xff] %v1300_v47  ;;  %v1302_v56 = vmax.f32 %v1174_v48, 0.0  ;;  %v1304_v57 = vmax.f32 %v1176_v49, 0.0  ;;  %v641_v62 = vpop.f32.mrb[16].mxu0  ;;  %v834_v63 = vpop.f32.mrb[16].mxu1  ;;  %v1057_v38 = vunpack.c.l.bf16 %v973_v24  ;;  %v1059_v39 = vunpack.c.l.bf16 %v974_v25 }
 0x123   : > { %1429 = vst [vmem:[%s2124_s12 + $0xe0] sm:$0xff] %v1301_v52  ;;  %1431 = vst [vmem:[%s2124_s12 + $0xf0] sm:$0xff] %v1303_v53  ;;  %v642_v2 = vadd.f32 %v641_v62, %v2096_v58  ;;  %v835_v3 = vadd.f32 %v834_v63, %v2098_v59  ;;  %v643_v4 = vpop.f32.mrb[17].mxu0  ;;  %v836_v5 = vpop.f32.mrb[17].mxu1  ;;  %v1058_v44 = vunpack.c.h.bf16 %v973_v24  ;;  %v1060_v45 = vunpack.c.h.bf16 %v974_v25 }
 0x124   : > { %1430 = vst [vmem:[%s2124_s12 + $0xe8] sm:$0xff] %v1302_v56  ;;  %1432 = vst [vmem:[%s2124_s12 + $0xf8] sm:$0xff] %v1304_v57  ;;  %v644_v8 = vadd.f32 %v643_v4, %v2101_v60  ;;  %v837_v9 = vadd.f32 %v836_v5, %v2103_v61  ;;  %v645_v10 = vpop.f32.mrb[18].mxu0  ;;  %v838_v11 = vpop.f32.mrb[18].mxu1  ;;  %v1061_v50 = vunpack.c.l.bf16 %v975_v34  ;;  %v1063_v51 = vunpack.c.l.bf16 %v976_v35 }
 0x125   : > { %v1177_v14 = vadd.f32 %v1049_v54, %v642_v2  ;;  %v1179_v15 = vadd.f32 %v1051_v55, %v835_v3  ;;  %v646_v16 = vadd.f32 %v645_v10, %v2096_v58  ;;  %v839_v17 = vadd.f32 %v838_v11, %v2098_v59  ;;  %v647_v18 = vpop.f32.mrb[19].mxu0  ;;  %v840_v19 = vpop.f32.mrb[19].mxu1 }
 0x126   : > { %v1178_v20 = vadd.f32 %v1050_v0, %v644_v8  ;;  %v1180_v21 = vadd.f32 %v1052_v1, %v837_v9  ;;  %v648_v22 = vadd.f32 %v647_v18, %v2101_v60  ;;  %v841_v23 = vadd.f32 %v840_v19, %v2103_v61  ;;  %v977_v8 = vld [vmem:[%s2089_s9 + $0xc0] sm:$0xff]  ;;  %v978_v9 = vld [vmem:[%s2089_s9 + $0xc8] sm:$0xff]  ;;  %v979_v18 = vld [vmem:[%s2089_s9 + $0xd0] sm:$0xff] }
 0x127   : > { %v1305_v26 = vmax.f32 %v1177_v14, 0.0  ;;  %v1307_v27 = vmax.f32 %v1179_v15, 0.0  ;;  %v1181_v28 = vadd.f32 %v1053_v6, %v646_v16  ;;  %v1183_v29 = vadd.f32 %v1055_v7, %v839_v17  ;;  %v980_v19 = vld [vmem:[%s2089_s9 + $0xd8] sm:$0xff] }
 0x128   : > { %v1306_v30 = vmax.f32 %v1178_v20, 0.0  ;;  %v1308_v31 = vmax.f32 %v1180_v21, 0.0  ;;  %v1182_v32 = vadd.f32 %v1054_v12, %v648_v22  ;;  %v1184_v33 = vadd.f32 %v1056_v13, %v841_v23 }
 0x129   : > { %1433 = vst [vmem:[%s2124_s12 + $0x100] sm:$0xff] %v1305_v26  ;;  %1435 = vst [vmem:[%s2124_s12 + $0x110] sm:$0xff] %v1307_v27  ;;  %v1309_v36 = vmax.f32 %v1181_v28, 0.0  ;;  %v1311_v37 = vmax.f32 %v1183_v29, 0.0  ;;  %v1062_v56 = vunpack.c.h.bf16 %v975_v34  ;;  %v1064_v57 = vunpack.c.h.bf16 %v976_v35 }
 0x12a   : > { %1434 = vst [vmem:[%s2124_s12 + $0x108] sm:$0xff] %v1306_v30  ;;  %1436 = vst [vmem:[%s2124_s12 + $0x118] sm:$0xff] %v1308_v31  ;;  %v1310_v40 = vmax.f32 %v1182_v32, 0.0  ;;  %v1312_v41 = vmax.f32 %v1184_v33, 0.0  ;;  %v651_v42 = vpop.f32.mrb[20].mxu0  ;;  %v844_v43 = vpop.f32.mrb[20].mxu1  ;;  %v1065_v22 = vunpack.c.l.bf16 %v977_v8  ;;  %v1067_v23 = vunpack.c.l.bf16 %v978_v9 }
 0x12b   : > { %1437 = vst [vmem:[%s2124_s12 + $0x120] sm:$0xff] %v1309_v36  ;;  %1439 = vst [vmem:[%s2124_s12 + $0x130] sm:$0xff] %v1311_v37  ;;  %v652_v46 = vadd.f32 %v651_v42, %v2096_v58  ;;  %v845_v47 = vadd.f32 %v844_v43, %v2098_v59  ;;  %v653_v48 = vpop.f32.mrb[21].mxu0  ;;  %v846_v49 = vpop.f32.mrb[21].mxu1  ;;  %v1066_v28 = vunpack.c.h.bf16 %v977_v8  ;;  %v1068_v29 = vunpack.c.h.bf16 %v978_v9 }
 0x12c   : > { %1438 = vst [vmem:[%s2124_s12 + $0x128] sm:$0xff] %v1310_v40  ;;  %1440 = vst [vmem:[%s2124_s12 + $0x138] sm:$0xff] %v1312_v41  ;;  %v654_v52 = vadd.f32 %v653_v48, %v2101_v60  ;;  %v847_v53 = vadd.f32 %v846_v49, %v2103_v61  ;;  %v655_v54 = vpop.f32.mrb[22].mxu0  ;;  %v848_v55 = vpop.f32.mrb[22].mxu1  ;;  %v1069_v34 = vunpack.c.l.bf16 %v979_v18  ;;  %v1071_v35 = vunpack.c.l.bf16 %v980_v19 }
 0x12d   : > { %v1185_v62 = vadd.f32 %v1057_v38, %v652_v46  ;;  %v1187_v63 = vadd.f32 %v1059_v39, %v845_v47  ;;  %v656_v0 = vadd.f32 %v655_v54, %v2096_v58  ;;  %v849_v1 = vadd.f32 %v848_v55, %v2098_v59  ;;  %v657_v2 = vpop.f32.mrb[23].mxu0  ;;  %v850_v3 = vpop.f32.mrb[23].mxu1 }
 0x12e   : > { %v1186_v4 = vadd.f32 %v1058_v44, %v654_v52  ;;  %v1188_v5 = vadd.f32 %v1060_v45, %v847_v53  ;;  %v658_v6 = vadd.f32 %v657_v2, %v2101_v60  ;;  %v851_v7 = vadd.f32 %v850_v3, %v2103_v61  ;;  %v981_v52 = vld [vmem:[%s2089_s9 + $0xe0] sm:$0xff]  ;;  %v982_v53 = vld [vmem:[%s2089_s9 + $0xe8] sm:$0xff]  ;;  %v983_v2 = vld [vmem:[%s2089_s9 + $0xf0] sm:$0xff] }
 0x12f   : > { %v1313_v10 = vmax.f32 %v1185_v62, 0.0  ;;  %v1315_v11 = vmax.f32 %v1187_v63, 0.0  ;;  %v1189_v12 = vadd.f32 %v1061_v50, %v656_v0  ;;  %v1191_v13 = vadd.f32 %v1063_v51, %v849_v1  ;;  %v984_v3 = vld [vmem:[%s2089_s9 + $0xf8] sm:$0xff] }
 0x130   : > { %v1314_v14 = vmax.f32 %v1186_v4, 0.0  ;;  %v1316_v15 = vmax.f32 %v1188_v5, 0.0  ;;  %v1190_v16 = vadd.f32 %v1062_v56, %v658_v6  ;;  %v1192_v17 = vadd.f32 %v1064_v57, %v851_v7 }
 0x131   : > { %1441 = vst [vmem:[%s2124_s12 + $0x140] sm:$0xff] %v1313_v10  ;;  %1443 = vst [vmem:[%s2124_s12 + $0x150] sm:$0xff] %v1315_v11  ;;  %v1317_v20 = vmax.f32 %v1189_v12, 0.0  ;;  %v1319_v21 = vmax.f32 %v1191_v13, 0.0  ;;  %v1070_v40 = vunpack.c.h.bf16 %v979_v18  ;;  %v1072_v41 = vunpack.c.h.bf16 %v980_v19 }
 0x132   : > { %1442 = vst [vmem:[%s2124_s12 + $0x148] sm:$0xff] %v1314_v14  ;;  %1444 = vst [vmem:[%s2124_s12 + $0x158] sm:$0xff] %v1316_v15  ;;  %v1318_v24 = vmax.f32 %v1190_v16, 0.0  ;;  %v1320_v25 = vmax.f32 %v1192_v17, 0.0  ;;  %v661_v26 = vpop.f32.mrb[24].mxu0  ;;  %v854_v27 = vpop.f32.mrb[24].mxu1  ;;  %v1073_v6 = vunpack.c.l.bf16 %v981_v52  ;;  %v1075_v7 = vunpack.c.l.bf16 %v982_v53 }
 0x133   : > { %1445 = vst [vmem:[%s2124_s12 + $0x160] sm:$0xff] %v1317_v20  ;;  %1447 = vst [vmem:[%s2124_s12 + $0x170] sm:$0xff] %v1319_v21  ;;  %v662_v30 = vadd.f32 %v661_v26, %v2096_v58  ;;  %v855_v31 = vadd.f32 %v854_v27, %v2098_v59  ;;  %v663_v32 = vpop.f32.mrb[25].mxu0  ;;  %v856_v33 = vpop.f32.mrb[25].mxu1  ;;  %v1074_v12 = vunpack.c.h.bf16 %v981_v52  ;;  %v1076_v13 = vunpack.c.h.bf16 %v982_v53 }
 0x134   : > { %1446 = vst [vmem:[%s2124_s12 + $0x168] sm:$0xff] %v1318_v24  ;;  %1448 = vst [vmem:[%s2124_s12 + $0x178] sm:$0xff] %v1320_v25  ;;  %v664_v36 = vadd.f32 %v663_v32, %v2101_v60  ;;  %v857_v37 = vadd.f32 %v856_v33, %v2103_v61  ;;  %v665_v38 = vpop.f32.mrb[26].mxu0  ;;  %v858_v39 = vpop.f32.mrb[26].mxu1  ;;  %v1077_v18 = vunpack.c.l.bf16 %v983_v2  ;;  %v1079_v19 = vunpack.c.l.bf16 %v984_v3 }
 0x135   : > { %v1193_v42 = vadd.f32 %v1065_v22, %v662_v30  ;;  %v1195_v43 = vadd.f32 %v1067_v23, %v855_v31  ;;  %v666_v44 = vadd.f32 %v665_v38, %v2096_v58  ;;  %v859_v45 = vadd.f32 %v858_v39, %v2098_v59  ;;  %v667_v46 = vpop.f32.mrb[27].mxu0  ;;  %v860_v47 = vpop.f32.mrb[27].mxu1 }
 0x136   : > { %v1194_v48 = vadd.f32 %v1066_v28, %v664_v36  ;;  %v1196_v49 = vadd.f32 %v1068_v29, %v857_v37  ;;  %v668_v50 = vadd.f32 %v667_v46, %v2101_v60  ;;  %v861_v51 = vadd.f32 %v860_v47, %v2103_v61  ;;  %v985_v36 = vld [vmem:[%s2089_s9 + $0x100] sm:$0xff]  ;;  %v986_v37 = vld [vmem:[%s2089_s9 + $0x108] sm:$0xff]  ;;  %v987_v46 = vld [vmem:[%s2089_s9 + $0x110] sm:$0xff] }
 0x137   : > { %v1321_v54 = vmax.f32 %v1193_v42, 0.0  ;;  %v1323_v55 = vmax.f32 %v1195_v43, 0.0  ;;  %v1197_v56 = vadd.f32 %v1069_v34, %v666_v44  ;;  %v1199_v57 = vadd.f32 %v1071_v35, %v859_v45  ;;  %v988_v47 = vld [vmem:[%s2089_s9 + $0x118] sm:$0xff] }
 0x138   : > { %v1322_v62 = vmax.f32 %v1194_v48, 0.0  ;;  %v1324_v63 = vmax.f32 %v1196_v49, 0.0  ;;  %v1198_v0 = vadd.f32 %v1070_v40, %v668_v50  ;;  %v1200_v1 = vadd.f32 %v1072_v41, %v861_v51 }
 0x139   : > { %1449 = vst [vmem:[%s2124_s12 + $0x180] sm:$0xff] %v1321_v54  ;;  %1451 = vst [vmem:[%s2124_s12 + $0x190] sm:$0xff] %v1323_v55  ;;  %v1325_v4 = vmax.f32 %v1197_v56, 0.0  ;;  %v1327_v5 = vmax.f32 %v1199_v57, 0.0  ;;  %v1078_v24 = vunpack.c.h.bf16 %v983_v2  ;;  %v1080_v25 = vunpack.c.h.bf16 %v984_v3 }
 0x13a   : > { %1450 = vst [vmem:[%s2124_s12 + $0x188] sm:$0xff] %v1322_v62  ;;  %1452 = vst [vmem:[%s2124_s12 + $0x198] sm:$0xff] %v1324_v63  ;;  %v1326_v8 = vmax.f32 %v1198_v0, 0.0  ;;  %v1328_v9 = vmax.f32 %v1200_v1, 0.0  ;;  %v671_v10 = vpop.f32.mrb[28].mxu0  ;;  %v864_v11 = vpop.f32.mrb[28].mxu1  ;;  %v1081_v50 = vunpack.c.l.bf16 %v985_v36  ;;  %v1083_v51 = vunpack.c.l.bf16 %v986_v37 }
 0x13b   : > { %1453 = vst [vmem:[%s2124_s12 + $0x1a0] sm:$0xff] %v1325_v4  ;;  %1455 = vst [vmem:[%s2124_s12 + $0x1b0] sm:$0xff] %v1327_v5  ;;  %v672_v14 = vadd.f32 %v671_v10, %v2096_v58  ;;  %v865_v15 = vadd.f32 %v864_v11, %v2098_v59  ;;  %v673_v16 = vpop.f32.mrb[29].mxu0  ;;  %v866_v17 = vpop.f32.mrb[29].mxu1  ;;  %v1082_v56 = vunpack.c.h.bf16 %v985_v36  ;;  %v1084_v57 = vunpack.c.h.bf16 %v986_v37 }
 0x13c   : > { %1454 = vst [vmem:[%s2124_s12 + $0x1a8] sm:$0xff] %v1326_v8  ;;  %1456 = vst [vmem:[%s2124_s12 + $0x1b8] sm:$0xff] %v1328_v9  ;;  %v674_v20 = vadd.f32 %v673_v16, %v2101_v60  ;;  %v867_v21 = vadd.f32 %v866_v17, %v2103_v61  ;;  %v675_v22 = vpop.f32.mrb[30].mxu0  ;;  %v868_v23 = vpop.f32.mrb[30].mxu1  ;;  %v1085_v2 = vunpack.c.l.bf16 %v987_v46  ;;  %v1087_v3 = vunpack.c.l.bf16 %v988_v47 }
 0x13d   : > { %v1201_v26 = vadd.f32 %v1073_v6, %v672_v14  ;;  %v1203_v27 = vadd.f32 %v1075_v7, %v865_v15  ;;  %v676_v28 = vadd.f32 %v675_v22, %v2096_v58  ;;  %v869_v29 = vadd.f32 %v868_v23, %v2098_v59  ;;  %v677_v30 = vpop.f32.mrb[31].mxu0  ;;  %v870_v31 = vpop.f32.mrb[31].mxu1 }
 0x13e   : > { %v1202_v32 = vadd.f32 %v1074_v12, %v674_v20  ;;  %v1204_v33 = vadd.f32 %v1076_v13, %v867_v21  ;;  %v678_v34 = vadd.f32 %v677_v30, %v2101_v60  ;;  %v871_v35 = vadd.f32 %v870_v31, %v2103_v61  ;;  %v989_v20 = vld [vmem:[%s2089_s9 + $0x120] sm:$0xff]  ;;  %v990_v21 = vld [vmem:[%s2089_s9 + $0x128] sm:$0xff]  ;;  %v991_v30 = vld [vmem:[%s2089_s9 + $0x130] sm:$0xff] }
 0x13f   : > { %v1329_v38 = vmax.f32 %v1201_v26, 0.0  ;;  %v1331_v39 = vmax.f32 %v1203_v27, 0.0  ;;  %v1205_v40 = vadd.f32 %v1077_v18, %v676_v28  ;;  %v1207_v41 = vadd.f32 %v1079_v19, %v869_v29  ;;  %v992_v31 = vld [vmem:[%s2089_s9 + $0x138] sm:$0xff] }
 0x140   : > { %v1330_v42 = vmax.f32 %v1202_v32, 0.0  ;;  %v1332_v43 = vmax.f32 %v1204_v33, 0.0  ;;  %v1206_v44 = vadd.f32 %v1078_v24, %v678_v34  ;;  %v1208_v45 = vadd.f32 %v1080_v25, %v871_v35 }
 0x141   : > { %1457 = vst [vmem:[%s2124_s12 + $0x1c0] sm:$0xff] %v1329_v38  ;;  %1459 = vst [vmem:[%s2124_s12 + $0x1d0] sm:$0xff] %v1331_v39  ;;  %v1333_v48 = vmax.f32 %v1205_v40, 0.0  ;;  %v1335_v49 = vmax.f32 %v1207_v41, 0.0  ;;  %v1086_v8 = vunpack.c.h.bf16 %v987_v46  ;;  %v1088_v9 = vunpack.c.h.bf16 %v988_v47 }
 0x142   : > { %1458 = vst [vmem:[%s2124_s12 + $0x1c8] sm:$0xff] %v1330_v42  ;;  %1460 = vst [vmem:[%s2124_s12 + $0x1d8] sm:$0xff] %v1332_v43  ;;  %v1334_v52 = vmax.f32 %v1206_v44, 0.0  ;;  %v1336_v53 = vmax.f32 %v1208_v45, 0.0  ;;  %v681_v54 = vpop.f32.mrb[32].mxu0  ;;  %v874_v55 = vpop.f32.mrb[32].mxu1  ;;  %v1089_v34 = vunpack.c.l.bf16 %v989_v20  ;;  %v1091_v35 = vunpack.c.l.bf16 %v990_v21 }
 0x143   : > { %1461 = vst [vmem:[%s2124_s12 + $0x1e0] sm:$0xff] %v1333_v48  ;;  %1463 = vst [vmem:[%s2124_s12 + $0x1f0] sm:$0xff] %v1335_v49  ;;  %v682_v62 = vadd.f32 %v681_v54, %v2096_v58  ;;  %v875_v63 = vadd.f32 %v874_v55, %v2098_v59  ;;  %v683_v0 = vpop.f32.mrb[33].mxu0  ;;  %v876_v1 = vpop.f32.mrb[33].mxu1  ;;  %v1090_v40 = vunpack.c.h.bf16 %v989_v20  ;;  %v1092_v41 = vunpack.c.h.bf16 %v990_v21 }
 0x144   : > { %1462 = vst [vmem:[%s2124_s12 + $0x1e8] sm:$0xff] %v1334_v52  ;;  %1464 = vst [vmem:[%s2124_s12 + $0x1f8] sm:$0xff] %v1336_v53  ;;  %v684_v4 = vadd.f32 %v683_v0, %v2101_v60  ;;  %v877_v5 = vadd.f32 %v876_v1, %v2103_v61  ;;  %v685_v6 = vpop.f32.mrb[34].mxu0  ;;  %v878_v7 = vpop.f32.mrb[34].mxu1  ;;  %v1093_v46 = vunpack.c.l.bf16 %v991_v30  ;;  %v1095_v47 = vunpack.c.l.bf16 %v992_v31 }
 0x145   : > { %v1209_v10 = vadd.f32 %v1081_v50, %v682_v62  ;;  %v1211_v11 = vadd.f32 %v1083_v51, %v875_v63  ;;  %v686_v12 = vadd.f32 %v685_v6, %v2096_v58  ;;  %v879_v13 = vadd.f32 %v878_v7, %v2098_v59  ;;  %v687_v14 = vpop.f32.mrb[35].mxu0  ;;  %v880_v15 = vpop.f32.mrb[35].mxu1 }
 0x146   : > { %v1210_v16 = vadd.f32 %v1082_v56, %v684_v4  ;;  %v1212_v17 = vadd.f32 %v1084_v57, %v877_v5  ;;  %v688_v18 = vadd.f32 %v687_v14, %v2101_v60  ;;  %v881_v19 = vadd.f32 %v880_v15, %v2103_v61  ;;  %v993_v4 = vld [vmem:[%s2089_s9 + $0x140] sm:$0xff]  ;;  %v994_v5 = vld [vmem:[%s2089_s9 + $0x148] sm:$0xff]  ;;  %v995_v14 = vld [vmem:[%s2089_s9 + $0x150] sm:$0xff] }
 0x147   : > { %v1337_v22 = vmax.f32 %v1209_v10, 0.0  ;;  %v1339_v23 = vmax.f32 %v1211_v11, 0.0  ;;  %v1213_v24 = vadd.f32 %v1085_v2, %v686_v12  ;;  %v1215_v25 = vadd.f32 %v1087_v3, %v879_v13  ;;  %v996_v15 = vld [vmem:[%s2089_s9 + $0x158] sm:$0xff] }
 0x148   : > { %v1338_v26 = vmax.f32 %v1210_v16, 0.0  ;;  %v1340_v27 = vmax.f32 %v1212_v17, 0.0  ;;  %v1214_v28 = vadd.f32 %v1086_v8, %v688_v18  ;;  %v1216_v29 = vadd.f32 %v1088_v9, %v881_v19 }
 0x149   : > { %1465 = vst [vmem:[%s2124_s12 + $0x200] sm:$0xff] %v1337_v22  ;;  %1467 = vst [vmem:[%s2124_s12 + $0x210] sm:$0xff] %v1339_v23  ;;  %v1341_v32 = vmax.f32 %v1213_v24, 0.0  ;;  %v1343_v33 = vmax.f32 %v1215_v25, 0.0  ;;  %v1094_v52 = vunpack.c.h.bf16 %v991_v30  ;;  %v1096_v53 = vunpack.c.h.bf16 %v992_v31 }
 0x14a   : > { %1466 = vst [vmem:[%s2124_s12 + $0x208] sm:$0xff] %v1338_v26  ;;  %1468 = vst [vmem:[%s2124_s12 + $0x218] sm:$0xff] %v1340_v27  ;;  %v1342_v36 = vmax.f32 %v1214_v28, 0.0  ;;  %v1344_v37 = vmax.f32 %v1216_v29, 0.0  ;;  %v691_v38 = vpop.f32.mrb[36].mxu0  ;;  %v884_v39 = vpop.f32.mrb[36].mxu1  ;;  %v1097_v18 = vunpack.c.l.bf16 %v993_v4  ;;  %v1099_v19 = vunpack.c.l.bf16 %v994_v5 }
 0x14b   : > { %1469 = vst [vmem:[%s2124_s12 + $0x220] sm:$0xff] %v1341_v32  ;;  %1471 = vst [vmem:[%s2124_s12 + $0x230] sm:$0xff] %v1343_v33  ;;  %v692_v42 = vadd.f32 %v691_v38, %v2096_v58  ;;  %v885_v43 = vadd.f32 %v884_v39, %v2098_v59  ;;  %v693_v44 = vpop.f32.mrb[37].mxu0  ;;  %v886_v45 = vpop.f32.mrb[37].mxu1  ;;  %v1098_v24 = vunpack.c.h.bf16 %v993_v4  ;;  %v1100_v25 = vunpack.c.h.bf16 %v994_v5 }
 0x14c   : > { %1470 = vst [vmem:[%s2124_s12 + $0x228] sm:$0xff] %v1342_v36  ;;  %1472 = vst [vmem:[%s2124_s12 + $0x238] sm:$0xff] %v1344_v37  ;;  %v694_v48 = vadd.f32 %v693_v44, %v2101_v60  ;;  %v887_v49 = vadd.f32 %v886_v45, %v2103_v61  ;;  %v695_v50 = vpop.f32.mrb[38].mxu0  ;;  %v888_v51 = vpop.f32.mrb[38].mxu1  ;;  %v1101_v30 = vunpack.c.l.bf16 %v995_v14  ;;  %v1103_v31 = vunpack.c.l.bf16 %v996_v15 }
 0x14d   : > { %v1217_v54 = vadd.f32 %v1089_v34, %v692_v42  ;;  %v1219_v55 = vadd.f32 %v1091_v35, %v885_v43  ;;  %v696_v56 = vadd.f32 %v695_v50, %v2096_v58  ;;  %v889_v57 = vadd.f32 %v888_v51, %v2098_v59  ;;  %v697_v62 = vpop.f32.mrb[39].mxu0  ;;  %v890_v63 = vpop.f32.mrb[39].mxu1 }
 0x14e   : > { %v1218_v0 = vadd.f32 %v1090_v40, %v694_v48  ;;  %v1220_v1 = vadd.f32 %v1092_v41, %v887_v49  ;;  %v698_v2 = vadd.f32 %v697_v62, %v2101_v60  ;;  %v891_v3 = vadd.f32 %v890_v63, %v2103_v61  ;;  %v997_v48 = vld [vmem:[%s2089_s9 + $0x160] sm:$0xff]  ;;  %v998_v49 = vld [vmem:[%s2089_s9 + $0x168] sm:$0xff]  ;;  %v999_v62 = vld [vmem:[%s2089_s9 + $0x170] sm:$0xff] }
 0x14f   : > { %v1345_v6 = vmax.f32 %v1217_v54, 0.0  ;;  %v1347_v7 = vmax.f32 %v1219_v55, 0.0  ;;  %v1221_v8 = vadd.f32 %v1093_v46, %v696_v56  ;;  %v1223_v9 = vadd.f32 %v1095_v47, %v889_v57  ;;  %v1000_v63 = vld [vmem:[%s2089_s9 + $0x178] sm:$0xff] }
 0x150   : > { %v1346_v10 = vmax.f32 %v1218_v0, 0.0  ;;  %v1348_v11 = vmax.f32 %v1220_v1, 0.0  ;;  %v1222_v12 = vadd.f32 %v1094_v52, %v698_v2  ;;  %v1224_v13 = vadd.f32 %v1096_v53, %v891_v3 }
 0x151   : > { %1473 = vst [vmem:[%s2124_s12 + $0x240] sm:$0xff] %v1345_v6  ;;  %1475 = vst [vmem:[%s2124_s12 + $0x250] sm:$0xff] %v1347_v7  ;;  %v1349_v16 = vmax.f32 %v1221_v8, 0.0  ;;  %v1351_v17 = vmax.f32 %v1223_v9, 0.0  ;;  %v1102_v36 = vunpack.c.h.bf16 %v995_v14  ;;  %v1104_v37 = vunpack.c.h.bf16 %v996_v15 }
 0x152   : > { %1474 = vst [vmem:[%s2124_s12 + $0x248] sm:$0xff] %v1346_v10  ;;  %1476 = vst [vmem:[%s2124_s12 + $0x258] sm:$0xff] %v1348_v11  ;;  %v1350_v20 = vmax.f32 %v1222_v12, 0.0  ;;  %v1352_v21 = vmax.f32 %v1224_v13, 0.0  ;;  %v701_v22 = vpop.f32.mrb[40].mxu0  ;;  %v894_v23 = vpop.f32.mrb[40].mxu1  ;;  %v1105_v2 = vunpack.c.l.bf16 %v997_v48  ;;  %v1107_v3 = vunpack.c.l.bf16 %v998_v49 }
 0x153   : > { %1477 = vst [vmem:[%s2124_s12 + $0x260] sm:$0xff] %v1349_v16  ;;  %1479 = vst [vmem:[%s2124_s12 + $0x270] sm:$0xff] %v1351_v17  ;;  %v702_v26 = vadd.f32 %v701_v22, %v2096_v58  ;;  %v895_v27 = vadd.f32 %v894_v23, %v2098_v59  ;;  %v703_v28 = vpop.f32.mrb[41].mxu0  ;;  %v896_v29 = vpop.f32.mrb[41].mxu1  ;;  %v1106_v8 = vunpack.c.h.bf16 %v997_v48  ;;  %v1108_v9 = vunpack.c.h.bf16 %v998_v49 }
 0x154   : > { %1478 = vst [vmem:[%s2124_s12 + $0x268] sm:$0xff] %v1350_v20  ;;  %1480 = vst [vmem:[%s2124_s12 + $0x278] sm:$0xff] %v1352_v21  ;;  %v704_v32 = vadd.f32 %v703_v28, %v2101_v60  ;;  %v897_v33 = vadd.f32 %v896_v29, %v2103_v61  ;;  %v705_v34 = vpop.f32.mrb[42].mxu0  ;;  %v898_v35 = vpop.f32.mrb[42].mxu1  ;;  %v1109_v14 = vunpack.c.l.bf16 %v999_v62  ;;  %v1111_v15 = vunpack.c.l.bf16 %v1000_v63 }
 0x155   : > { %v1225_v38 = vadd.f32 %v1097_v18, %v702_v26  ;;  %v1227_v39 = vadd.f32 %v1099_v19, %v895_v27  ;;  %v706_v40 = vadd.f32 %v705_v34, %v2096_v58  ;;  %v899_v41 = vadd.f32 %v898_v35, %v2098_v59  ;;  %v707_v42 = vpop.f32.mrb[43].mxu0  ;;  %v900_v43 = vpop.f32.mrb[43].mxu1 }
 0x156   : > { %v1226_v44 = vadd.f32 %v1098_v24, %v704_v32  ;;  %v1228_v45 = vadd.f32 %v1100_v25, %v897_v33  ;;  %v708_v46 = vadd.f32 %v707_v42, %v2101_v60  ;;  %v901_v47 = vadd.f32 %v900_v43, %v2103_v61  ;;  %v1001_v32 = vld [vmem:[%s2089_s9 + $0x180] sm:$0xff]  ;;  %v1002_v33 = vld [vmem:[%s2089_s9 + $0x188] sm:$0xff]  ;;  %v1003_v42 = vld [vmem:[%s2089_s9 + $0x190] sm:$0xff] }
 0x157   : > { %v1353_v50 = vmax.f32 %v1225_v38, 0.0  ;;  %v1355_v51 = vmax.f32 %v1227_v39, 0.0  ;;  %v1229_v52 = vadd.f32 %v1101_v30, %v706_v40  ;;  %v1231_v53 = vadd.f32 %v1103_v31, %v899_v41  ;;  %v1004_v43 = vld [vmem:[%s2089_s9 + $0x198] sm:$0xff] }
 0x158   : > { %v1354_v54 = vmax.f32 %v1226_v44, 0.0  ;;  %v1356_v55 = vmax.f32 %v1228_v45, 0.0  ;;  %v1230_v56 = vadd.f32 %v1102_v36, %v708_v46  ;;  %v1232_v57 = vadd.f32 %v1104_v37, %v901_v47 }
 0x159   : > { %1481 = vst [vmem:[%s2124_s12 + $0x280] sm:$0xff] %v1353_v50  ;;  %1483 = vst [vmem:[%s2124_s12 + $0x290] sm:$0xff] %v1355_v51  ;;  %v1357_v0 = vmax.f32 %v1229_v52, 0.0  ;;  %v1359_v1 = vmax.f32 %v1231_v53, 0.0  ;;  %v1110_v20 = vunpack.c.h.bf16 %v999_v62  ;;  %v1112_v21 = vunpack.c.h.bf16 %v1000_v63 }
 0x15a   : > { %1482 = vst [vmem:[%s2124_s12 + $0x288] sm:$0xff] %v1354_v54  ;;  %1484 = vst [vmem:[%s2124_s12 + $0x298] sm:$0xff] %v1356_v55  ;;  %v1358_v4 = vmax.f32 %v1230_v56, 0.0  ;;  %v1360_v5 = vmax.f32 %v1232_v57, 0.0  ;;  %v711_v6 = vpop.f32.mrb[44].mxu0  ;;  %v904_v7 = vpop.f32.mrb[44].mxu1  ;;  %v1113_v46 = vunpack.c.l.bf16 %v1001_v32  ;;  %v1115_v47 = vunpack.c.l.bf16 %v1002_v33 }
 0x15b   : > { %1485 = vst [vmem:[%s2124_s12 + $0x2a0] sm:$0xff] %v1357_v0  ;;  %1487 = vst [vmem:[%s2124_s12 + $0x2b0] sm:$0xff] %v1359_v1  ;;  %v712_v10 = vadd.f32 %v711_v6, %v2096_v58  ;;  %v905_v11 = vadd.f32 %v904_v7, %v2098_v59  ;;  %v713_v12 = vpop.f32.mrb[45].mxu0  ;;  %v906_v13 = vpop.f32.mrb[45].mxu1  ;;  %v1114_v52 = vunpack.c.h.bf16 %v1001_v32  ;;  %v1116_v53 = vunpack.c.h.bf16 %v1002_v33 }
 0x15c   : > { %1486 = vst [vmem:[%s2124_s12 + $0x2a8] sm:$0xff] %v1358_v4  ;;  %1488 = vst [vmem:[%s2124_s12 + $0x2b8] sm:$0xff] %v1360_v5  ;;  %v714_v16 = vadd.f32 %v713_v12, %v2101_v60  ;;  %v907_v17 = vadd.f32 %v906_v13, %v2103_v61  ;;  %v715_v18 = vpop.f32.mrb[46].mxu0  ;;  %v908_v19 = vpop.f32.mrb[46].mxu1  ;;  %v1117_v62 = vunpack.c.l.bf16 %v1003_v42  ;;  %v1119_v63 = vunpack.c.l.bf16 %v1004_v43 }
 0x15d   : > { %v1233_v22 = vadd.f32 %v1105_v2, %v712_v10  ;;  %v1235_v23 = vadd.f32 %v1107_v3, %v905_v11  ;;  %v716_v24 = vadd.f32 %v715_v18, %v2096_v58  ;;  %v909_v25 = vadd.f32 %v908_v19, %v2098_v59  ;;  %v717_v26 = vpop.f32.mrb[47].mxu0  ;;  %v910_v27 = vpop.f32.mrb[47].mxu1 }
 0x15e   : > { %v1234_v28 = vadd.f32 %v1106_v8, %v714_v16  ;;  %v1236_v29 = vadd.f32 %v1108_v9, %v907_v17  ;;  %v718_v30 = vadd.f32 %v717_v26, %v2101_v60  ;;  %v911_v31 = vadd.f32 %v910_v27, %v2103_v61  ;;  %v1005_v16 = vld [vmem:[%s2089_s9 + $0x1a0] sm:$0xff]  ;;  %v1006_v17 = vld [vmem:[%s2089_s9 + $0x1a8] sm:$0xff]  ;;  %v1007_v26 = vld [vmem:[%s2089_s9 + $0x1b0] sm:$0xff] }
 0x15f   : > { %v1361_v34 = vmax.f32 %v1233_v22, 0.0  ;;  %v1363_v35 = vmax.f32 %v1235_v23, 0.0  ;;  %v1237_v36 = vadd.f32 %v1109_v14, %v716_v24  ;;  %v1239_v37 = vadd.f32 %v1111_v15, %v909_v25  ;;  %v1008_v27 = vld [vmem:[%s2089_s9 + $0x1b8] sm:$0xff] }
 0x160   : > { %v1362_v38 = vmax.f32 %v1234_v28, 0.0  ;;  %v1364_v39 = vmax.f32 %v1236_v29, 0.0  ;;  %v1238_v40 = vadd.f32 %v1110_v20, %v718_v30  ;;  %v1240_v41 = vadd.f32 %v1112_v21, %v911_v31 }
 0x161   : > { %1489 = vst [vmem:[%s2124_s12 + $0x2c0] sm:$0xff] %v1361_v34  ;;  %1491 = vst [vmem:[%s2124_s12 + $0x2d0] sm:$0xff] %v1363_v35  ;;  %v1365_v44 = vmax.f32 %v1237_v36, 0.0  ;;  %v1367_v45 = vmax.f32 %v1239_v37, 0.0  ;;  %v1118_v4 = vunpack.c.h.bf16 %v1003_v42  ;;  %v1120_v5 = vunpack.c.h.bf16 %v1004_v43 }
 0x162   : > { %1490 = vst [vmem:[%s2124_s12 + $0x2c8] sm:$0xff] %v1362_v38  ;;  %1492 = vst [vmem:[%s2124_s12 + $0x2d8] sm:$0xff] %v1364_v39  ;;  %v1366_v48 = vmax.f32 %v1238_v40, 0.0  ;;  %v1368_v49 = vmax.f32 %v1240_v41, 0.0  ;;  %v721_v50 = vpop.f32.mrb[48].mxu0  ;;  %v914_v51 = vpop.f32.mrb[48].mxu1  ;;  %v1121_v30 = vunpack.c.l.bf16 %v1005_v16  ;;  %v1123_v31 = vunpack.c.l.bf16 %v1006_v17 }
 0x163   : > { %1493 = vst [vmem:[%s2124_s12 + $0x2e0] sm:$0xff] %v1365_v44  ;;  %1495 = vst [vmem:[%s2124_s12 + $0x2f0] sm:$0xff] %v1367_v45  ;;  %v722_v54 = vadd.f32 %v721_v50, %v2096_v58  ;;  %v915_v55 = vadd.f32 %v914_v51, %v2098_v59  ;;  %v723_v56 = vpop.f32.mrb[49].mxu0  ;;  %v916_v57 = vpop.f32.mrb[49].mxu1  ;;  %v1122_v36 = vunpack.c.h.bf16 %v1005_v16  ;;  %v1124_v37 = vunpack.c.h.bf16 %v1006_v17 }
 0x164   : > { %1494 = vst [vmem:[%s2124_s12 + $0x2e8] sm:$0xff] %v1366_v48  ;;  %1496 = vst [vmem:[%s2124_s12 + $0x2f8] sm:$0xff] %v1368_v49  ;;  %v724_v0 = vadd.f32 %v723_v56, %v2101_v60  ;;  %v917_v1 = vadd.f32 %v916_v57, %v2103_v61  ;;  %v725_v2 = vpop.f32.mrb[50].mxu0  ;;  %v918_v3 = vpop.f32.mrb[50].mxu1  ;;  %v1125_v42 = vunpack.c.l.bf16 %v1007_v26  ;;  %v1127_v43 = vunpack.c.l.bf16 %v1008_v27 }
 0x165   : > { %v1241_v6 = vadd.f32 %v1113_v46, %v722_v54  ;;  %v1243_v7 = vadd.f32 %v1115_v47, %v915_v55  ;;  %v726_v8 = vadd.f32 %v725_v2, %v2096_v58  ;;  %v919_v9 = vadd.f32 %v918_v3, %v2098_v59  ;;  %v727_v10 = vpop.f32.mrb[51].mxu0  ;;  %v920_v11 = vpop.f32.mrb[51].mxu1 }
 0x166   : > { %v1242_v12 = vadd.f32 %v1114_v52, %v724_v0  ;;  %v1244_v13 = vadd.f32 %v1116_v53, %v917_v1  ;;  %v728_v14 = vadd.f32 %v727_v10, %v2101_v60  ;;  %v921_v15 = vadd.f32 %v920_v11, %v2103_v61  ;;  %v1009_v0 = vld [vmem:[%s2089_s9 + $0x1c0] sm:$0xff]  ;;  %v1010_v1 = vld [vmem:[%s2089_s9 + $0x1c8] sm:$0xff]  ;;  %v1011_v10 = vld [vmem:[%s2089_s9 + $0x1d0] sm:$0xff] }
 0x167   : > { %v1369_v18 = vmax.f32 %v1241_v6, 0.0  ;;  %v1371_v19 = vmax.f32 %v1243_v7, 0.0  ;;  %v1245_v20 = vadd.f32 %v1117_v62, %v726_v8  ;;  %v1247_v21 = vadd.f32 %v1119_v63, %v919_v9  ;;  %v1012_v11 = vld [vmem:[%s2089_s9 + $0x1d8] sm:$0xff] }
 0x168   : > { %v1370_v22 = vmax.f32 %v1242_v12, 0.0  ;;  %v1372_v23 = vmax.f32 %v1244_v13, 0.0  ;;  %v1246_v24 = vadd.f32 %v1118_v4, %v728_v14  ;;  %v1248_v25 = vadd.f32 %v1120_v5, %v921_v15 }
 0x169   : > { %1497 = vst [vmem:[%s2124_s12 + $0x300] sm:$0xff] %v1369_v18  ;;  %1499 = vst [vmem:[%s2124_s12 + $0x310] sm:$0xff] %v1371_v19  ;;  %v1373_v28 = vmax.f32 %v1245_v20, 0.0  ;;  %v1375_v29 = vmax.f32 %v1247_v21, 0.0  ;;  %v1126_v48 = vunpack.c.h.bf16 %v1007_v26  ;;  %v1128_v49 = vunpack.c.h.bf16 %v1008_v27 }
 0x16a   : > { %1498 = vst [vmem:[%s2124_s12 + $0x308] sm:$0xff] %v1370_v22  ;;  %1500 = vst [vmem:[%s2124_s12 + $0x318] sm:$0xff] %v1372_v23  ;;  %v1374_v32 = vmax.f32 %v1246_v24, 0.0  ;;  %v1376_v33 = vmax.f32 %v1248_v25, 0.0  ;;  %v731_v34 = vpop.f32.mrb[52].mxu0  ;;  %v924_v35 = vpop.f32.mrb[52].mxu1  ;;  %v1129_v14 = vunpack.c.l.bf16 %v1009_v0  ;;  %v1131_v15 = vunpack.c.l.bf16 %v1010_v1 }
 0x16b   : > { %1501 = vst [vmem:[%s2124_s12 + $0x320] sm:$0xff] %v1373_v28  ;;  %1503 = vst [vmem:[%s2124_s12 + $0x330] sm:$0xff] %v1375_v29  ;;  %v732_v38 = vadd.f32 %v731_v34, %v2096_v58  ;;  %v925_v39 = vadd.f32 %v924_v35, %v2098_v59  ;;  %v733_v40 = vpop.f32.mrb[53].mxu0  ;;  %v926_v41 = vpop.f32.mrb[53].mxu1  ;;  %v1130_v20 = vunpack.c.h.bf16 %v1009_v0  ;;  %v1132_v21 = vunpack.c.h.bf16 %v1010_v1 }
 0x16c   : > { %1502 = vst [vmem:[%s2124_s12 + $0x328] sm:$0xff] %v1374_v32  ;;  %1504 = vst [vmem:[%s2124_s12 + $0x338] sm:$0xff] %v1376_v33  ;;  %v734_v44 = vadd.f32 %v733_v40, %v2101_v60  ;;  %v927_v45 = vadd.f32 %v926_v41, %v2103_v61  ;;  %v735_v46 = vpop.f32.mrb[54].mxu0  ;;  %v928_v47 = vpop.f32.mrb[54].mxu1  ;;  %v1133_v26 = vunpack.c.l.bf16 %v1011_v10  ;;  %v1135_v27 = vunpack.c.l.bf16 %v1012_v11 }
 0x16d   : > { %v1249_v50 = vadd.f32 %v1121_v30, %v732_v38  ;;  %v1251_v51 = vadd.f32 %v1123_v31, %v925_v39  ;;  %v736_v52 = vadd.f32 %v735_v46, %v2096_v58  ;;  %v929_v53 = vadd.f32 %v928_v47, %v2098_v59  ;;  %v737_v54 = vpop.f32.mrb[55].mxu0  ;;  %v930_v55 = vpop.f32.mrb[55].mxu1 }
 0x16e   : > { %v1250_v56 = vadd.f32 %v1122_v36, %v734_v44  ;;  %v1252_v57 = vadd.f32 %v1124_v37, %v927_v45  ;;  %v738_v62 = vadd.f32 %v737_v54, %v2101_v60  ;;  %v931_v63 = vadd.f32 %v930_v55, %v2103_v61  ;;  %v1013_v44 = vld [vmem:[%s2089_s9 + $0x1e0] sm:$0xff]  ;;  %v1014_v45 = vld [vmem:[%s2089_s9 + $0x1e8] sm:$0xff]  ;;  %v1015_v54 = vld [vmem:[%s2089_s9 + $0x1f0] sm:$0xff] }
 0x16f   : > { %v1377_v2 = vmax.f32 %v1249_v50, 0.0  ;;  %v1379_v3 = vmax.f32 %v1251_v51, 0.0  ;;  %v1253_v4 = vadd.f32 %v1125_v42, %v736_v52  ;;  %v1255_v5 = vadd.f32 %v1127_v43, %v929_v53  ;;  %v1016_v55 = vld [vmem:[%s2089_s9 + $0x1f8] sm:$0xff] }
 0x170   : > { %v1378_v6 = vmax.f32 %v1250_v56, 0.0  ;;  %v1380_v7 = vmax.f32 %v1252_v57, 0.0  ;;  %v1254_v8 = vadd.f32 %v1126_v48, %v738_v62  ;;  %v1256_v9 = vadd.f32 %v1128_v49, %v931_v63 }
 0x171   : > { %1505 = vst [vmem:[%s2124_s12 + $0x340] sm:$0xff] %v1377_v2  ;;  %1507 = vst [vmem:[%s2124_s12 + $0x350] sm:$0xff] %v1379_v3  ;;  %v1381_v12 = vmax.f32 %v1253_v4, 0.0  ;;  %v1383_v13 = vmax.f32 %v1255_v5, 0.0  ;;  %v1134_v32 = vunpack.c.h.bf16 %v1011_v10  ;;  %v1136_v33 = vunpack.c.h.bf16 %v1012_v11 }
 0x172   : > { %1506 = vst [vmem:[%s2124_s12 + $0x348] sm:$0xff] %v1378_v6  ;;  %1508 = vst [vmem:[%s2124_s12 + $0x358] sm:$0xff] %v1380_v7  ;;  %v1382_v16 = vmax.f32 %v1254_v8, 0.0  ;;  %v1384_v17 = vmax.f32 %v1256_v9, 0.0  ;;  %v741_v18 = vpop.f32.mrb[56].mxu0  ;;  %v934_v19 = vpop.f32.mrb[56].mxu1  ;;  %v1137_v62 = vunpack.c.l.bf16 %v1013_v44  ;;  %v1139_v63 = vunpack.c.l.bf16 %v1014_v45 }
 0x173   : > { %1509 = vst [vmem:[%s2124_s12 + $0x360] sm:$0xff] %v1381_v12  ;;  %1511 = vst [vmem:[%s2124_s12 + $0x370] sm:$0xff] %v1383_v13  ;;  %v742_v22 = vadd.f32 %v741_v18, %v2096_v58  ;;  %v935_v23 = vadd.f32 %v934_v19, %v2098_v59  ;;  %v743_v24 = vpop.f32.mrb[57].mxu0  ;;  %v936_v25 = vpop.f32.mrb[57].mxu1  ;;  %v1138_v4 = vunpack.c.h.bf16 %v1013_v44  ;;  %v1140_v5 = vunpack.c.h.bf16 %v1014_v45 }
 0x174   : > { %1510 = vst [vmem:[%s2124_s12 + $0x368] sm:$0xff] %v1382_v16  ;;  %1512 = vst [vmem:[%s2124_s12 + $0x378] sm:$0xff] %v1384_v17  ;;  %v744_v28 = vadd.f32 %v743_v24, %v2101_v60  ;;  %v937_v29 = vadd.f32 %v936_v25, %v2103_v61  ;;  %v745_v30 = vpop.f32.mrb[58].mxu0  ;;  %v938_v31 = vpop.f32.mrb[58].mxu1  ;;  %v1141_v10 = vunpack.c.l.bf16 %v1015_v54  ;;  %v1143_v11 = vunpack.c.l.bf16 %v1016_v55 }
 0x175   : > { %v1257_v34 = vadd.f32 %v1129_v14, %v742_v22  ;;  %v1259_v35 = vadd.f32 %v1131_v15, %v935_v23  ;;  %v746_v36 = vadd.f32 %v745_v30, %v2096_v58  ;;  %v939_v37 = vadd.f32 %v938_v31, %v2098_v59  ;;  %v747_v38 = vpop.f32.mrb[59].mxu0  ;;  %v940_v39 = vpop.f32.mrb[59].mxu1 }
 0x176   : > { %v1258_v40 = vadd.f32 %v1130_v20, %v744_v28  ;;  %v1260_v41 = vadd.f32 %v1132_v21, %v937_v29  ;;  %v748_v42 = vadd.f32 %v747_v38, %v2101_v60  ;;  %v941_v43 = vadd.f32 %v940_v39, %v2103_v61 }
 0x177   : > { %v1385_v46 = vmax.f32 %v1257_v34, 0.0  ;;  %v1387_v47 = vmax.f32 %v1259_v35, 0.0  ;;  %v1261_v48 = vadd.f32 %v1133_v26, %v746_v36  ;;  %v1263_v49 = vadd.f32 %v1135_v27, %v939_v37 }
 0x178   : > { %v1386_v50 = vmax.f32 %v1258_v40, 0.0  ;;  %v1388_v51 = vmax.f32 %v1260_v41, 0.0  ;;  %v1262_v52 = vadd.f32 %v1134_v32, %v748_v42  ;;  %v1264_v53 = vadd.f32 %v1136_v33, %v941_v43 }
 0x179   : > { %1513 = vst [vmem:[%s2124_s12 + $0x380] sm:$0xff] %v1385_v46  ;;  %1515 = vst [vmem:[%s2124_s12 + $0x390] sm:$0xff] %v1387_v47  ;;  %v1389_v56 = vmax.f32 %v1261_v48, 0.0  ;;  %v1391_v57 = vmax.f32 %v1263_v49, 0.0  ;;  %v1142_v16 = vunpack.c.h.bf16 %v1015_v54  ;;  %v1144_v17 = vunpack.c.h.bf16 %v1016_v55 }
 0x17a   : > { %1514 = vst [vmem:[%s2124_s12 + $0x388] sm:$0xff] %v1386_v50  ;;  %1516 = vst [vmem:[%s2124_s12 + $0x398] sm:$0xff] %v1388_v51  ;;  %v1390_v0 = vmax.f32 %v1262_v52, 0.0  ;;  %v1392_v1 = vmax.f32 %v1264_v53, 0.0  ;;  %v751_v2 = vpop.f32.mrb[60].mxu0  ;;  %v944_v3 = vpop.f32.mrb[60].mxu1 }
 0x17b   : > { %1517 = vst [vmem:[%s2124_s12 + $0x3a0] sm:$0xff] %v1389_v56  ;;  %1519 = vst [vmem:[%s2124_s12 + $0x3b0] sm:$0xff] %v1391_v57  ;;  %v752_v6 = vadd.f32 %v751_v2, %v2096_v58  ;;  %v945_v7 = vadd.f32 %v944_v3, %v2098_v59  ;;  %v753_v8 = vpop.f32.mrb[61].mxu0  ;;  %v946_v9 = vpop.f32.mrb[61].mxu1 }
 0x17c   : > { %1518 = vst [vmem:[%s2124_s12 + $0x3a8] sm:$0xff] %v1390_v0  ;;  %1520 = vst [vmem:[%s2124_s12 + $0x3b8] sm:$0xff] %v1392_v1  ;;  %v754_v12 = vadd.f32 %v753_v8, %v2101_v60  ;;  %v947_v13 = vadd.f32 %v946_v9, %v2103_v61  ;;  %v755_v14 = vpop.f32.mrb[62].mxu0  ;;  %v948_v15 = vpop.f32.mrb[62].mxu1 }
 0x17d   : > { %v1265_v18 = vadd.f32 %v1137_v62, %v752_v6  ;;  %v1267_v19 = vadd.f32 %v1139_v63, %v945_v7  ;;  %v756_v20 = vadd.f32 %v755_v14, %v2096_v58  ;;  %v949_v21 = vadd.f32 %v948_v15, %v2098_v59  ;;  %v757_v22 = vpop.f32.mrb[63].mxu0  ;;  %v950_v23 = vpop.f32.mrb[63].mxu1 }
 0x17e   : > { %v1266_v24 = vadd.f32 %v1138_v4, %v754_v12  ;;  %v1268_v25 = vadd.f32 %v1140_v5, %v947_v13  ;;  %v758_v26 = vadd.f32 %v757_v22, %v2101_v60  ;;  %v951_v27 = vadd.f32 %v950_v23, %v2103_v61 }
 0x17f   : > { %v1393_v28 = vmax.f32 %v1265_v18, 0.0  ;;  %v1395_v29 = vmax.f32 %v1267_v19, 0.0  ;;  %v1269_v30 = vadd.f32 %v1141_v10, %v756_v20  ;;  %v1271_v58 = vadd.f32 %v1143_v11, %v949_v21 }
 0x180   : > { %v1394_v59 = vmax.f32 %v1266_v24, 0.0  ;;  %v1396_v31 = vmax.f32 %v1268_v25, 0.0  ;;  %v1270_v32 = vadd.f32 %v1142_v16, %v758_v26  ;;  %v1272_v33 = vadd.f32 %v1144_v17, %v951_v27 }
 0x181   : > { %1521 = vst [vmem:[%s2124_s12 + $0x3c0] sm:$0xff] %v1393_v28  ;;  %1523 = vst [vmem:[%s2124_s12 + $0x3d0] sm:$0xff] %v1395_v29  ;;  %v1397_v60 = vmax.f32 %v1269_v30, 0.0  ;;  %v1399_v61 = vmax.f32 %v1271_v58, 0.0 }
 0x182   : > { %1522 = vst [vmem:[%s2124_s12 + $0x3c8] sm:$0xff] %v1394_v59  ;;  %1524 = vst [vmem:[%s2124_s12 + $0x3d8] sm:$0xff] %v1396_v31  ;;  %v1398_v34 = vmax.f32 %v1270_v32, 0.0  ;;  %v1400_v35 = vmax.f32 %v1272_v33, 0.0 }
 0x183   : > { %1525 = vst [vmem:[%s2124_s12 + $0x3e0] sm:$0xff] %v1397_v60  ;;  %1527 = vst [vmem:[%s2124_s12 + $0x3f0] sm:$0xff] %v1399_v61 }
 0x184   : > { %1526 = vst [vmem:[%s2124_s12 + $0x3e8] sm:$0xff] %v1398_v34  ;;  %1528 = vst [vmem:[%s2124_s12 + $0x3f8] sm:$0xff] %v1400_v35 }
 0x185   : > { %1804 = shalt.err (!%p1801_p3)
}
 0x186   : > { %s1805_s7 = scalar_lea.hbm %s2429_s22, 16384  ;;  %s1809_s10 = scalar_lea.hbm %s2486_s4, 32768 }
 0x187   : > { %p1806_p4 = scmp.ne.s32.totalorder %s2429_s22, %s1805_s7  ;;  %p1810_p9 = scmp.lt.u32.totalorder %s2429_s22, %s2486_s4 }
 0x188   : > { %p1811_p10 = scmp.lt.u32.totalorder %s1809_s10, %s1805_s7  ;;  %p1813_p12 = scmp.lt.u32.totalorder %s1805_s7, %s2429_s22 }
 0x189   : > { %p1807_p7 = pnand %p1806_p4, %p1922_p5 }
 0x18a   : > { %p1812_p11 = por %p1811_p10, %p1810_p9 }
 0x18b   : > { %p1808_p8 = pneg %p1807_p7 }
 0x18c   : > { %p1814_p13 = por %p1813_p12, %p1812_p11 }
 0x18e   : > { %p1815_p0 = pnand %p1814_p13, %p1808_p8 }
 0x190   : > { %1818 = shalt.err (!%p1815_p0)
}
 0x191   : > { %s1857_s6 = smov 512   ;;  %s1858_s12 = smov 32  }
 0x192   : > { %1685 = dma.vmem_to_hbm [thread:$0]  (%p1922_p5), %s2431_s13, 16384, %s2429_s22, %s2441_s23, %s1857_s6, %s1857_s6, %s1858_s12  }
 0x193 PF: > { %p1691_p1 = scmp.ge.s32.totalorder %s1853_s18, 2  ;;  %s1559_s14 = sand.u32 1, %s1841_s15  }
 0x194   : > { %s1560_s19 = scalar_lea.sflag [#allocation3], %s1559_s14 }
 0x195   : > { %p1688_p2 = pnand %p1691_p1, %p1926_p6 }
 0x197   : > { %1836 = dma.done.wait (!%p1688_p2), %s1560_s19, 16384  }
 0x198   : > { %1838 = vsyncadd (!%p1688_p2), %s1560_s19, 4294950912  ;;  %p14_p3 = scmp.ge.s32.totalorder %s1909_s21, 4   ;;  %s2489_s15 = smov %s1845_s16 }
 0x199   : > { %s2490_s16 = smov %s1849_s17  ;;  %s2491_s17 = smov %s1920_s24 }
 0x19a   : > { %s2492_s18 = smov %s1909_s21  ;;  %16 = sbr.rel (!%p14_p3) target bundleno = 3 (0x3), region = 74 }
 0x1a1   :  { %1565 = vsyncpa [#allocation3], 1 }
 0x1a2   :  { %1567 = vsyncpa [#allocation3 + $0x1], 1 }

// kernel: bottleneck_forward.4
= control target key start
LH: loop header
LB: loop body
LE: loop exit
PB: predicated region body
PF: predicated region fallthrough
CT: control target
= control target key end

     0   :  { %s4892_s12 = smov 0   ;;  %s7227_s0 = inlined_call_operand.vmem [shape: bf16[8,8,8,128], index: 0, kind: input, shape index: {}]   ;;  %s7228_s1 = inlined_call_operand.vmem [shape: bf16[3,384,128], index: 1, kind: input, shape index: {}]   ;;  %s7229_s2 = inlined_call_operand.vmem [shape: f32[1,128], index: 2, kind: input, shape index: {}]   ;;  %s7230_s3 = inlined_call_operand.vmem [shape: bf16[8,8,8,128], index: 3, kind: output, shape index: {}]  }
   0x1 LB: > { %s4094_s13 = sadd.s32 4294967295, %s4869_s12   ;;  %p4098_p0 = scmp.ge.s32.totalorder %s4869_s12, 1  ;;  %s4869_s12 = sphi %s4892_s12, %s13_s12  }
   0x2   : > { %p139_p1 = scmp.lt.s32.totalorder %s4869_s12, 3 }
   0x4   : > { %p140_p2 = pnand %p4098_p0, %p139_p1 }
   0x6   : > { %143 = sbr.rel (%p140_p2) target bundleno = 855 (0x357), region = 32 }
   0xd   : > { %v4758_v0 = vld [vmem:[%s7228_s1] sm:$0xff]   ;;  %v7239_v1 = vmov 0   ;;  %s4099_s18 = sshll.u32 %s4094_s13, 2  ;;  %v4760_v3 = vld [vmem:[%s7228_s1 + $0x8] sm:$0xff]   ;;  %v4959_v5 = vld [vmem:[%s7228_s1 + $0x90] sm:$0xff]   ;;  %vm703_vm0 = vcmask 1046528  }
   0xe   : > { %1740 = vmatprep.subr.bf16.mxu0 %v7239_v1  ;;  %180 = vst [vmem:[#allocation2] sm:$0xff] %v7239_v1  ;;  %198 = vst [vmem:[#allocation2 + $0x10] sm:$0xf0] %v7239_v1  ;;  %v4940_v2 = vld [vmem:[%s7228_s1 + $0x80] sm:$0xff]   ;;  %p166_p3 = scmp.lt.s32.totalorder %s4099_s18, 7  ;;  %v4952_v4 = vld [vmem:[%s7228_s1 + $0x88] sm:$0xff]  }
   0xf   : > { %199 = vst [vmem:[#allocation2 + $0x18] sm:$0xf0] %v7239_v1  ;;  %200 = vst [vmem:[#allocation2 + $0x20] sm:$0xf0] %v7239_v1  ;;  %1741 = vmatpush1.bf16.msra.mxu0 %v4758_v0  ;;  %4733 = vmatprep.subr.bf16.mxu1 %v4940_v2  ;;  %v4762_v6 = vld [vmem:[%s7228_s1 + $0x10] sm:$0xff]   ;;  %v4972_v7 = vld [vmem:[%s7228_s1 + $0x98] sm:$0xff]  }
  0x10   : > { %201 = vst [vmem:[#allocation2 + $0x28] sm:$0xf0] %v7239_v1  ;;  %202 = vst [vmem:[#allocation2 + $0x30] sm:$0xf0] %v7239_v1  ;;  %1742 = vmatprep.subr.bf16.mxu0 %v7239_v1  ;;  %4741 = vmatpush3.bf16.msra.mxu1 %v4940_v2  ;;  %s7706_s18 = smov (!%p166_p3, %s4099_s18), 7  ;;  %v4764_v8 = vld [vmem:[%s7228_s1 + $0x18] sm:$0xff]  }
  0x11   : > { %203 = vst [vmem:[#allocation2 + $0x38] sm:$0xf0] %v7239_v1  ;;  %204 = vst [vmem:[#allocation2 + $0x40] sm:$0xf0] %v7239_v1  ;;  %4734 = vmatprep.subr.bf16.mxu1 %v4952_v4  ;;  %s4276_s4 = sshll.u32 %s7706_s18, 5  ;;  %v4984_v9 = vld [vmem:[%s7228_s1 + $0xa0] sm:$0xff]  }
  0x12   : > { %205 = vst [vmem:[#allocation2 + $0x48] sm:$0xf0] %v7239_v1  ;;  %206 = vst [vmem:[#allocation2 + $0x70] sm:$0xf0] %v7239_v1  ;;  %s4991_s9 = scalar_lea.vmem %s7227_s0, %s4276_s4  ;;  %v4766_v10 = vld [vmem:[%s7228_s1 + $0x20] sm:$0xff]   ;;  %v5005_v14 = vld [vmem:[%s7228_s1 + $0xa8] sm:$0xff]   ;;  %s7143_s25 = scalar_lea.vmem %s7230_s3, %s4276_s4 }
  0x13   : > { %207 = vst [vmem:[#allocation2 + $0x78] sm:$0xf0] %v7239_v1  ;;  %208 = vst [vmem:[#allocation2 + $0x80] sm:$0xf0] %v7239_v1  ;;  %1743 = vmatpush1.bf16.msra.mxu0 %v4760_v3  ;;  %v240_v11 = vld [vmem:[%s4991_s9 + $0x28] sm:$0xf] }
  0x14   : > { %209 = vst [vmem:[#allocation2 + $0x88] sm:$0xf0] %v7239_v1  ;;  %210 = vst [vmem:[#allocation2 + $0x90] sm:$0xf0] %v7239_v1  ;;  %1744 = vmatprep.subr.bf16.mxu0 %v7239_v1  ;;  %4742 = vmatpush3.bf16.msra.mxu1 %v4952_v4  ;;  %v241_v12 = vld [vmem:[%s4991_s9 + $0x2c] sm:$0xf] }
  0x15   : > { %211 = vst [vmem:[#allocation2 + $0x98] sm:$0xf0] %v7239_v1  ;;  %212 = vst [vmem:[#allocation2 + $0xa0] sm:$0xf0] %v7239_v1  ;;  %4735 = vmatprep.subr.bf16.mxu1 %v4959_v5  ;;  %v242_v13 = vld [vmem:[%s4991_s9 + $0x30] sm:$0xf] }
  0x16   : > { %213 = vst [vmem:[#allocation2 + $0xa8] sm:$0xf0] %v7239_v1  ;;  %214 = vst [vmem:[#allocation2 + $0xd0] sm:$0xf0] %v7239_v1  ;;  %v4768_v15 = vld [vmem:[%s7228_s1 + $0x28] sm:$0xff]   ;;  %v5012_v17 = vrot.slane %v7239_v1, 1 }
  0x17   : > { %215 = vst [vmem:[#allocation2 + $0xd8] sm:$0xf0] %v7239_v1  ;;  %216 = vst [vmem:[#allocation2 + $0xe0] sm:$0xf0] %v7239_v1  ;;  %1745 = vmatpush1.bf16.msra.mxu0 %v4762_v6  ;;  %v243_v16 = vld [vmem:[%s4991_s9 + $0x34] sm:$0xf] }
  0x18   : > { %217 = vst [vmem:[#allocation2 + $0xe8] sm:$0xf0] %v7239_v1  ;;  %218 = vst [vmem:[#allocation2 + $0xf0] sm:$0xf0] %v7239_v1  ;;  %1746 = vmatprep.subr.bf16.mxu0 %v7239_v1  ;;  %4743 = vmatpush3.bf16.msra.mxu1 %v4959_v5  ;;  %v1144_v18 = vshrl.u32 %v5012_v17, 16  ;;  %v5021_v19 = vld [vmem:[%s7228_s1 + $0xb0] sm:$0xff]  }
  0x19   : > { %219 = vst [vmem:[#allocation2 + $0xf8] sm:$0xf0] %v7239_v1  ;;  %220 = vst [vmem:[#allocation2 + $0x100] sm:$0xf0] %v7239_v1  ;;  %4736 = vmatprep.subr.bf16.mxu1 %v4972_v7  ;;  %v244_v20 = vld [vmem:[%s4991_s9 + $0x38] sm:$0xf] }
  0x1a   : > { %221 = vst [vmem:[#allocation2 + $0x108] sm:$0xf0] %v7239_v1  ;;  %222 = vst [vmem:[#allocation2 + $0x130] sm:$0xf0] %v7239_v1  ;;  %v4770_v21 = vld [vmem:[%s7228_s1 + $0x30] sm:$0xff]   ;;  %v5034_v26 = vrot.slane %v1144_v18, 7 }
  0x1b   : > { %223 = vst [vmem:[#allocation2 + $0x138] sm:$0xf0] %v7239_v1  ;;  %224 = vst [vmem:[#allocation2 + $0x140] sm:$0xf0] %v7239_v1  ;;  %1747 = vmatpush1.bf16.msra.mxu0 %v4764_v8  ;;  %v245_v22 = vld [vmem:[%s4991_s9 + $0x3c] sm:$0xf] }
  0x1c   : > { %225 = vst [vmem:[#allocation2 + $0x148] sm:$0xf0] %v7239_v1  ;;  %226 = vst [vmem:[#allocation2 + $0x150] sm:$0xf0] %v7239_v1  ;;  %1748 = vmatprep.subr.bf16.mxu0 %v7239_v1  ;;  %4744 = vmatpush3.bf16.msra.mxu1 %v4972_v7  ;;  %v5040_v27 = vld [vmem:[%s7228_s1 + $0xb8] sm:$0xff]   ;;  %v4774_v40 = vld [vmem:[%s7228_s1 + $0x40] sm:$0xff]  }
  0x1d   : > { %227 = vst [vmem:[#allocation2 + $0x158] sm:$0xf0] %v7239_v1  ;;  %228 = vst [vmem:[#allocation2 + $0x160] sm:$0xf0] %v7239_v1  ;;  %4737 = vmatprep.subr.bf16.mxu1 %v4984_v9  ;;  %v4772_v31 = vld [vmem:[%s7228_s1 + $0x38] sm:$0xff]   ;;  %v4775_v60 = vld [vmem:[%s7228_s1 + $0xc0] sm:$0xff]  }
  0x1e   : > { %229 = vst [vmem:[#allocation2 + $0x168] sm:$0xf0] %v7239_v1  ;;  %272 = vst [vmem:[#allocation2 + $0x80] sm:$0xf] %v240_v11  ;;  %vm795_vm1 = vsmask.f32 256 }
  0x1f   : > { %273 = vst [vmem:[#allocation2 + $0x88] sm:$0xf] %v241_v12  ;;  %274 = vst [vmem:[#allocation2 + $0x90] sm:$0xf] %v242_v13  ;;  %1749 = vmatpush1.bf16.msra.mxu0 %v4766_v10  ;;  %v246_v36 = vld [vmem:[%s4991_s9 + $0x40] sm:$0xf] }
  0x20   : > { %1750 = vmatprep.subr.bf16.mxu0 %v7239_v1  ;;  %275 = vst [vmem:[#allocation2 + $0x98] sm:$0xf] %v243_v16  ;;  %4745 = vmatpush3.bf16.msra.mxu1 %v4984_v9  ;;  %276 = vst [vmem:[#allocation2 + $0xa0] sm:$0xf] %v244_v20  ;;  %v247_v44 = vld [vmem:[%s4991_s9 + $0x44] sm:$0xf] }
  0x21   : > { %4738 = vmatprep.subr.bf16.mxu1 %v5005_v14  ;;  %277 = vst [vmem:[#allocation2 + $0xa8] sm:$0xf] %v245_v22  ;;  %278 = vst [vmem:[#allocation2 + $0xd0] sm:$0xf] %v246_v36  ;;  %vm342_vm2 = vsmask.f32 7424 }
  0x22   : > { %279 = vst [vmem:[#allocation2 + $0xd8] sm:$0xf] %v247_v44  ;;  %v248_v57 = vld [vmem:[%s4991_s9 + $0x48] sm:$0xf]  ;;  %v249_v6 = vld [vmem:[%s4991_s9 + $0x4c] sm:$0xf] }
  0x23   : > { %1751 = vmatpush1.bf16.msra.mxu0 %v4768_v15  ;;  %v4776_v61 = vld [vmem:[%s7228_s1 + $0x48] sm:$0xff]   ;;  %280 = vst [vmem:[#allocation2 + $0xe0] sm:$0xf] %v248_v57  ;;  %v4778_v13 = vld [vmem:[%s7228_s1 + $0x50] sm:$0xff]   ;;  %281 = vst [vmem:[#allocation2 + $0xe8] sm:$0xf] %v249_v6 }
  0x24   : > { %1752 = vmatprep.subr.bf16.mxu0 %v7239_v1  ;;  %4746 = vmatpush3.bf16.msra.mxu1 %v5005_v14  ;;  %v4777_v11 = vld [vmem:[%s7228_s1 + $0xc8] sm:$0xff]  }
  0x25   : > { %v5030_v23 = vld [vmem:[#allocation2 + $0x80] sm:$0xff]  ;;  %4739 = vmatprep.subr.bf16.mxu1 %v5021_v19 }
  0x26   : > { %v5032_v24 = vld [vmem:[#allocation2 + $0x88] sm:$0xff]  ;;  %v312_v25 = vld [vmem:[#allocation2 + $0x90] sm:$0xff]  ;;  %v7232_v28 = vrot.slane %v5030_v23, 1  ;;  %v7233_v41 = vshll.u32 %v5030_v23, 16  ;;  %v7236_v45 = vshrl.u32 %v5030_v23, 16 }
  0x27   : > { %v732_v29 = vrot.slane %v5032_v24, 1  ;;  %v734_v30 = vrot.slane %v312_v25, 1  ;;  %1753 = vmatpush1.bf16.msra.mxu0 %v4770_v21  ;;  %v313_v32 = vld [vmem:[#allocation2 + $0x98] sm:$0xff]  ;;  %v314_v43 = vld [vmem:[#allocation2 + $0xa0] sm:$0xff]  ;;  %v7235_v8 = vshll.u32 %v5032_v24, 16 }
  0x28   : > { %1754 = vmatprep.subr.bf16.mxu0 %v7239_v1  ;;  %v736_v35 = vrot.slane %v313_v32, 1  ;;  %4747 = vmatpush3.bf16.msra.mxu1 %v5021_v19  ;;  %v738_v50 = vrot.slane %v314_v43, 1  ;;  %v5068_v51 = vld [vmem:[#allocation2 + $0xa8] sm:$0xff]  ;;  %v5074_v55 = vrot.slane %v7233_v41, 1  ;;  %v320_v3 = vld [vmem:[#allocation2 + $0xd0] sm:$0xff] }
  0x29   : > { %v5051_v33 = vsel %vm703_vm0, %v7232_v28, %v732_v29  ;;  %v735_v34 = vsel %vm703_vm0, %v732_v29, %v734_v30  ;;  %4740 = vmatprep.subr.bf16.mxu1 %v5040_v27  ;;  %7367 = vst [vmem:[#allocation3_spill] sm:$0xff] %v5068_v51  ;;  %v7231_v54 = vrot.slane %v5068_v51, 1  ;;  %v747_v18 = vrot.slane %v320_v3, 1  ;;  %v321_v20 = vld [vmem:[#allocation2 + $0xd8] sm:$0xff]  ;;  %v258_v28 = vld [vmem:[%s4991_s9 + $0x70] sm:$0xf] }
  0x2a   : > { %v1041_v37 = vshrl.u32 %v5051_v33, 16  ;;  %v1060_v38 = vshrl.u32 %v735_v34, 16  ;;  %v1063_v39 = vshll.u32 %v735_v34, 16  ;;  %v737_v42 = vsel %vm703_vm0, %v734_v30, %v736_v35  ;;  %v230_v30 = vld [vmem:[%s4991_s9] sm:$0xf] }
  0x2b   : > { %1755 = vmatpush1.bf16.msra.mxu0 %v4772_v31  ;;  %v1079_v48 = vshrl.u32 %v737_v42, 16  ;;  %v1082_v49 = vshll.u32 %v737_v42, 16  ;;  %v739_v56 = vsel %vm703_vm0, %v736_v35, %v738_v50  ;;  %v741_v0 = vsel %vm703_vm0, %v738_v50, %v7231_v54  ;;  %v250_v31 = vld [vmem:[%s4991_s9 + $0x50] sm:$0xf]  ;;  %262 = vst [vmem:[#allocation2 + $0x10] sm:$0xf] %v230_v30 }
  0x2c   : > { %v5065_v46 = vrot.slane %v1041_v37, 7  ;;  %v1062_v47 = vrot.slane %v1060_v38, 7  ;;  %1756 = vmatprep.subr.bf16.mxu0 %v7239_v1  ;;  %4748 = vmatpush3.bf16.msra.mxu1 %v5040_v27  ;;  %v1098_v62 = vshrl.u32 %v739_v56, 16  ;;  %v1101_v63 = vshll.u32 %v739_v56, 16  ;;  %282 = vst [vmem:[#allocation2 + $0xf0] sm:$0xf] %v250_v31 }
  0x2d   : > { %v1081_v53 = vrot.slane %v1079_v48, 7  ;;  %2567 = vmatprep.subr.bf16.mxu1 %v7239_v1  ;;  %v1117_v15 = vshrl.u32 %v741_v0, 16  ;;  %v1120_v16 = vshll.u32 %v741_v0, 16  ;;  %v452_v21 = vor.u32 %v7236_v45, %v5074_v55  ;;  %v4779_v42 = vld [vmem:[%s7228_s1 + $0xd0] sm:$0xff]   ;;  %v322_v44 = vld [vmem:[#allocation2 + $0xe0] sm:$0xff] }
  0x2e   : > { %v1065_v52 = vor.u32 %v1063_v39, %v1062_v47  ;;  %v1100_v12 = vrot.slane %v1098_v62, 7  ;;  %v749_v29 = vrot.slane %v321_v20, 1  ;;  %v748_v32 = vsel %vm703_vm0, %v5012_v17, %v747_v18  ;;  %v231_v56 = vld [vmem:[%s4991_s9 + $0x4] sm:$0xf]  ;;  %v234_v54 = vld [vmem:[%s4991_s9 + $0x10] sm:$0xf] }
  0x2f   : > { %1757 = vmatpush1.bf16.msra.mxu0 %v4774_v40  ;;  %v1084_v59 = vor.u32 %v1082_v49, %v1081_v53  ;;  %v5109_v25 = vrot.slane %v1117_v15, 7  ;;  %v5118_v34 = vrot.slane %v7239_v1, 7  ;;  %v5122_v35 = vrot.slane %v7235_v8, 1  ;;  %v251_v40 = vld [vmem:[%s4991_s9 + $0x54] sm:$0xf]  ;;  %v4780_v49 = vld [vmem:[%s7228_s1 + $0x58] sm:$0xff]  }
  0x30   : > { %v5081_v58 = vsel %vm795_vm1, %v5065_v46, %v1065_v52  ;;  %1758 = vmatprep.subr.bf16.mxu0 %v7239_v1  ;;  %v1103_v22 = vor.u32 %v1101_v63, %v1100_v12  ;;  %v1148_v38 = vshrl.u32 %v748_v32, 16  ;;  %v1151_v39 = vshll.u32 %v748_v32, 16  ;;  %283 = vst [vmem:[#allocation2 + $0xf8] sm:$0xf] %v251_v40  ;;  %263 = vst [vmem:[#allocation2 + $0x18] sm:$0xf] %v231_v56 }
  0x31   : > { %7368 = vst [vmem:[#allocation4_spill] sm:$0xff] %v5081_v58  ;;  %4533 = vmatprep.mubr.bf16.mxu1 %v5081_v58  ;;  %v5097_v10 = vsel %vm795_vm1, %v1062_v47, %v1084_v59  ;;  %7370 = vst [vmem:[#allocation6_spill] sm:$0xff] %v5109_v25  ;;  %v1122_v37 = vor.u32 %v1120_v16, %v5109_v25  ;;  %v750_v43 = vsel %vm703_vm0, %v747_v18, %v749_v29  ;;  %v323_v59 = vld [vmem:[#allocation2 + $0xe8] sm:$0xff]  ;;  %v4781_v63 = vld [vmem:[%s7228_s1 + $0x60] sm:$0xff]  }
  0x32   : > { %7369 = vst [vmem:[#allocation5_spill] sm:$0xff] %v5097_v10  ;;  %4534 = vmatmul.mubr.bf16.vlgmr.msra.gmra.mrb[0].mxu1 %v5097_v10  ;;  %v5125_v36 = vsel %vm795_vm1, %v1081_v53, %v1103_v22  ;;  %v5136_v47 = vsel %vm342_vm2, %v452_v21, %v5122_v35  ;;  %v1150_v50 = vrot.slane %v1148_v38, 7  ;;  %v1167_v52 = vshrl.u32 %v750_v43, 16  ;;  %v4782_v15 = vld [vmem:[%s7228_s1 + $0xd8] sm:$0xff]   ;;  %v5160_v20 = vld [vmem:[#allocation2 + $0x10] sm:$0xff]  ;;  %v4783_v38 = vld [vmem:[%s7228_s1 + $0x68] sm:$0xff]  }
  0x33   : > { %2568 = vmatpush1.bf16.msra.mxu1 %v4775_v60  ;;  %1759 = vmatpush1.bf16.msra.mxu0 %v4776_v61  ;;  %7371 = vst [vmem:[#allocation7_spill] sm:$0xff] %v5125_v36  ;;  %v5139_v48 = vsel %vm795_vm1, %v1100_v12, %v1122_v37  ;;  %v1170_v53 = vshll.u32 %v750_v43, 16  ;;  %v751_v57 = vrot.slane %v322_v44, 1  ;;  %v252_v60 = vld [vmem:[%s4991_s9 + $0x58] sm:$0xf]  ;;  %v753_v3 = vrot.slane %v323_v59, 1 }
  0x34   : > { %2569 = vmatprep.subr.bf16.mxu1 %v7239_v1  ;;  %1760 = vmatprep.subr.bf16.mxu0 %v7239_v1  ;;  %7372 = vst [vmem:[#allocation8_spill] sm:$0xff] %v5139_v48  ;;  %v253_v61 = vld [vmem:[%s4991_s9 + $0x5c] sm:$0xf]  ;;  %v1153_v62 = vor.u32 %v1151_v39, %v1150_v50  ;;  %v1169_v0 = vrot.slane %v1167_v52, 7  ;;  %284 = vst [vmem:[#allocation2 + $0x100] sm:$0xf] %v252_v60 }
  0x35   : > { %4537 = vmatprep.mubr.bf16.mxu1 %v5125_v36  ;;  %285 = vst [vmem:[#allocation2 + $0x108] sm:$0xf] %v253_v61  ;;  %v752_v6 = vsel %vm703_vm0, %v749_v29, %v751_v57  ;;  %v324_v21 = vld [vmem:[#allocation2 + $0xf0] sm:$0xff]  ;;  %v754_v22 = vsel %vm703_vm0, %v751_v57, %v753_v3  ;;  %v351_v29 = vshll.u32 %v5160_v20, 16  ;;  %v355_v31 = vshrl.u32 %v5160_v20, 16  ;;  %v4784_v44 = vld [vmem:[%s7228_s1 + $0xe0] sm:$0xff]  }
  0x36   : > { %v1154_v12 = vsel %vm795_vm1, %v5034_v26, %v1153_v62  ;;  %v1186_v16 = vshrl.u32 %v752_v6, 16  ;;  %v1189_v18 = vshll.u32 %v752_v6, 16  ;;  %v755_v30 = vrot.slane %v324_v21, 1  ;;  %v254_v32 = vld [vmem:[%s4991_s9 + $0x60] sm:$0xf] }
  0x37   : > { %2570 = vmatpush1.bf16.msra.mxu1 %v4777_v11  ;;  %1761 = vmatpush1.bf16.msra.mxu0 %v4778_v13  ;;  %v232_v11 = vld [vmem:[%s4991_s9 + $0x8] sm:$0xf]  ;;  %v1172_v13 = vor.u32 %v1170_v53, %v1169_v0  ;;  %v1205_v40 = vshrl.u32 %v754_v22, 16  ;;  %286 = vst [vmem:[#allocation2 + $0x130] sm:$0xf] %v254_v32  ;;  %v353_v52 = vrot.slane %v351_v29, 1 }
  0x38   : > { %2571 = vmatprep.subr.bf16.mxu1 %v7239_v1  ;;  %1762 = vmatprep.subr.bf16.mxu0 %v7239_v1  ;;  %264 = vst [vmem:[#allocation2 + $0x20] sm:$0xf] %v232_v11  ;;  %v1188_v39 = vrot.slane %v1186_v16, 7  ;;  %v255_v43 = vld [vmem:[%s4991_s9 + $0x64] sm:$0xf]  ;;  %v5183_v61 = vld [vmem:[#allocation2 + $0x18] sm:$0xff] }
  0x39   : > { %v5169_v37 = vsel %vm795_vm1, %v1150_v50, %v1172_v13  ;;  %v756_v50 = vsel %vm703_vm0, %v753_v3, %v755_v30  ;;  %287 = vst [vmem:[#allocation2 + $0x138] sm:$0xf] %v255_v43  ;;  %v5181_v57 = vrot.slane %v1205_v40, 7  ;;  %v354_v62 = vsel %vm342_vm2, %v5012_v17, %v353_v52  ;;  %v233_v13 = vld [vmem:[%s4991_s9 + $0xc] sm:$0xf]  ;;  %v6008_v10 = vld [vmem:[#allocation2 + $0xf8] sm:$0xff] }
  0x3a   : > { %4538 = vmatmul.mubr.bf16.gmra.mrb[4].mxu1 %v5139_v48  ;;  %7373 = vst [vmem:[#allocation9_spill] sm:$0xff] %v5169_v37  ;;  %v1191_v56 = vor.u32 %v1189_v18, %v1188_v39  ;;  %v1224_v59 = vshrl.u32 %v756_v50, 16  ;;  %v1227_v60 = vshll.u32 %v756_v50, 16  ;;  %v7238_v6 = vshll.u32 %v5183_v61, 16  ;;  %265 = vst [vmem:[#allocation2 + $0x28] sm:$0xf] %v233_v13 }
  0x3b   : > { %2572 = vmatpush1.bf16.msra.mxu1 %v4779_v42  ;;  %1763 = vmatpush1.bf16.msra.mxu0 %v4780_v49  ;;  %v325_v42 = vld [vmem:[#allocation2 + $0xf8] sm:$0xff]  ;;  %v1208_v49 = vshll.u32 %v754_v22, 16  ;;  %v326_v11 = vld [vmem:[#allocation2 + $0x100] sm:$0xff]  ;;  %v808_v16 = vshrl.u32 %v354_v62, 16  ;;  %v811_v18 = vshll.u32 %v354_v62, 16  ;;  %v4786_v40 = vld [vmem:[%s7228_s1 + $0xe8] sm:$0xff]  }
  0x3c   : > { %1764 = vmatprep.subr.bf16.mxu0 %v7239_v1  ;;  %4541 = vmatprep.mubr.bf16.mxu1 %v1154_v12  ;;  %v757_v53 = vrot.slane %v325_v42, 1  ;;  %v5195_v12 = vld [vmem:[#allocation2 + $0x108] sm:$0xff]  ;;  %v5211_v42 = vrot.slane %v1224_v59, 7  ;;  %v361_v43 = vrot.slane %v7238_v6, 1  ;;  %v759_v50 = vrot.slane %v326_v11, 1 }
  0x3d   : > { %2573 = vmatprep.subr.bf16.mxu1 %v7239_v1  ;;  %7374 = vst [vmem:[#allocation10_spill] sm:$0xff] %v5195_v12  ;;  %v256_v21 = vld [vmem:[%s4991_s9 + $0x68] sm:$0xf]  ;;  %v257_v22 = vld [vmem:[%s4991_s9 + $0x6c] sm:$0xf]  ;;  %v1210_v32 = vor.u32 %v1208_v49, %v5181_v57  ;;  %v7234_v62 = vrot.slane %v5195_v12, 1 }
  0x3e   : > { %v5190_v3 = vsel %vm703_vm0, %v755_v30, %v757_v53  ;;  %v4785_v30 = vld [vmem:[%s7228_s1 + $0x70] sm:$0xff]   ;;  %288 = vst [vmem:[#allocation2 + $0x140] sm:$0xf] %v256_v21  ;;  %289 = vst [vmem:[#allocation2 + $0x148] sm:$0xf] %v257_v22  ;;  %v1229_v49 = vor.u32 %v1227_v60, %v5211_v42  ;;  %v760_v21 = vsel %vm703_vm0, %v757_v53, %v759_v50  ;;  %v7311_v58 = vshll.u32 %v6008_v10, 16 }
  0x3f   : > { %1765 = vmatpush1.bf16.msra.mxu0 %v4781_v63  ;;  %2574 = vmatpush1.bf16.msra.mxu1 %v4782_v15  ;;  %v357_v63 = vor.u32 %v355_v31, %v353_v52  ;;  %v5199_v15 = vsel %vm795_vm1, %v1169_v0, %v1191_v56  ;;  %v1243_v0 = vshrl.u32 %v5190_v3, 16  ;;  %v5216_v52 = vrot.slane %v808_v16, 7  ;;  %v259_v41 = vld [vmem:[%s4991_s9 + $0x74] sm:$0xf]  ;;  %266 = vst [vmem:[#allocation2 + $0x30] sm:$0xf] %v234_v54 }
  0x40   : > { %1766 = vmatprep.subr.bf16.mxu0 %v7239_v1  ;;  %2575 = vmatprep.subr.bf16.mxu1 %v7239_v1  ;;  %7375 = vst [vmem:[#allocation11_spill] sm:$0xff] %v5199_v15  ;;  %v1246_v56 = vshll.u32 %v5190_v3, 16  ;;  %v5233_v3 = vld [vmem:[#allocation2 + $0x130] sm:$0xff]  ;;  %v5242_v22 = vsel %vm703_vm0, %v759_v50, %v7234_v62  ;;  %290 = vst [vmem:[#allocation2 + $0x150] sm:$0xf] %v258_v28  ;;  %v5256_v53 = vsel %vm795_vm1, %v5181_v57, %v1229_v49 }
  0x41   : > { %v362_v59 = vsel %vm342_vm2, %v357_v63, %v361_v43  ;;  %v813_v11 = vor.u32 %v811_v18, %v5216_v52  ;;  %v5231_v13 = vrot.slane %v1243_v0, 7  ;;  %v5236_v63 = vsel %vm795_vm1, %v1188_v39, %v1210_v32  ;;  %v5251_v32 = vld [vmem:[#allocation2 + $0x138] sm:$0xff]  ;;  %291 = vst [vmem:[#allocation2 + $0x158] sm:$0xf] %v259_v41  ;;  %7377 = vst [vmem:[#allocation13_spill] sm:$0xff] %v5256_v53 }
  0x42   : > { %4542 = vmatmul.mubr.bf16.gmra.mrb[8].mxu1 %v5169_v37  ;;  %v831_v60 = vshrl.u32 %v362_v59, 16  ;;  %v834_v16 = vshll.u32 %v362_v59, 16  ;;  %7376 = vst [vmem:[#allocation12_spill] sm:$0xff] %v5236_v63  ;;  %v1262_v59 = vshrl.u32 %v760_v21, 16  ;;  %v1265_v39 = vshll.u32 %v760_v21, 16 }
  0x43   : > { %1767 = vmatpush1.bf16.msra.mxu0 %v4783_v38  ;;  %2576 = vmatpush1.bf16.msra.mxu1 %v4784_v44  ;;  %v5224_v38 = vld [vmem:[#allocation2 + $0x20] sm:$0xff]  ;;  %v4787_v44 = vld [vmem:[%s7228_s1 + $0x78] sm:$0xff]   ;;  %v814_v18 = vsel %vm795_vm1, %v5034_v26, %v813_v11  ;;  %v1281_v54 = vshrl.u32 %v5242_v22, 16  ;;  %v363_v28 = vshrl.u32 %v5183_v61, 16  ;;  %v768_v49 = vrot.slane %v5233_v3, 1 }
  0x44   : > { %1768 = vmatprep.subr.bf16.mxu0 %v7239_v1  ;;  %4545 = vmatprep.mubr.bf16.mxu1 %v5199_v15  ;;  %v5249_v0 = vrot.slane %v831_v60, 7  ;;  %v5269_v50 = vrot.slane %v1262_v59, 7  ;;  %v7237_v57 = vshll.u32 %v5224_v38, 16  ;;  %v4789_v11 = vld [vmem:[%s7228_s1 + $0xf8] sm:$0xff]   ;;  %v1284_v60 = vshll.u32 %v5242_v22, 16 }
  0x45   : > { %2577 = vmatprep.subr.bf16.mxu1 %v7239_v1  ;;  %1772 = vmatprep.mubr.bf16.mxu0 %v814_v18  ;;  %v365_v21 = vor.u32 %v363_v28, %v361_v43  ;;  %v235_v18 = vld [vmem:[%s4991_s9 + $0x14] sm:$0xf]  ;;  %v802_v59 = vsel %vm795_vm1, %v5118_v34, %v5118_v34  ;;  %v769_v22 = vsel %vm703_vm0, %v5012_v17, %v768_v49  ;;  %v5290_v43 = vld [vmem:[#allocation2 + $0x28] sm:$0xff]  ;;  %v5298_v45 = vld [vmem:[#allocation2 + $0x140] sm:$0xff]  ;;  %v371_v6 = vshrl.u32 %v5224_v38, 16 }
  0x46   : > { %v836_v41 = vor.u32 %v834_v16, %v5249_v0  ;;  %v770_v16 = vrot.slane %v5251_v32, 1  ;;  %v369_v62 = vrot.slane %v7237_v57, 1  ;;  %267 = vst [vmem:[#allocation2 + $0x38] sm:$0xf] %v235_v18  ;;  %v260_v32 = vld [vmem:[%s4991_s9 + $0x78] sm:$0xf] }
  0x47   : > { %1769 = vmatpush1.bf16.msra.mxu0 %v4785_v30  ;;  %2578 = vmatpush1.bf16.msra.mxu1 %v4786_v40  ;;  %v4788_v30 = vld [vmem:[%s7228_s1 + $0xf0] sm:$0xff]   ;;  %v5263_v40 = vrot.slane %v355_v31, 7  ;;  %v1248_v31 = vor.u32 %v1246_v56, %v5231_v13  ;;  %v1267_v56 = vor.u32 %v1265_v39, %v5269_v50  ;;  %v1312_v8 = vshrl.u32 %v769_v22, 16  ;;  %292 = vst [vmem:[#allocation2 + $0x160] sm:$0xf] %v260_v32 }
  0x48   : > { %1770 = vmatprep.subr.bf16.mxu0 %v7239_v1  ;;  %2579 = vmatprep.subr.bf16.mxu1 %v7239_v1  ;;  %v261_v39 = vld [vmem:[%s4991_s9 + $0x7c] sm:$0xf]  ;;  %v5305_v18 = vrot.slane %v1281_v54, 7  ;;  %v5325_v54 = vrot.slane %v363_v28, 7 }
  0x49   : > { %v828_v57 = vor.u32 %v5263_v40, %v351_v29  ;;  %293 = vst [vmem:[#allocation2 + $0x168] sm:$0xf] %v261_v39  ;;  %v5320_v20 = vsel %vm795_vm1, %v5231_v13, %v1267_v56  ;;  %v4790_v29 = vld [vmem:[%s7228_s1 + $0x100] sm:$0xff]   ;;  %v772_v13 = vrot.slane %v5298_v45, 1  ;;  %v335_v56 = vld [vmem:[#allocation2 + $0x148] sm:$0xff] }
  0x4a   : > { %4546 = vmatmul.mubr.bf16.gmra.mrb[12].mxu1 %v5236_v63  ;;  %7378 = vst [vmem:[#allocation14_spill] sm:$0xff] %v5305_v18  ;;  %7380 = vst [vmem:[#allocation16_spill] sm:$0xff] %v5320_v20  ;;  %v1286_v28 = vor.u32 %v1284_v60, %v5305_v18  ;;  %v7382_v18 = vshll.u32 %v5183_v61, 16 }
  0x4b   : > { %1771 = vmatpush1.bf16.msra.mxu0 %v4787_v44  ;;  %4549 = vmatprep.mubr.bf16.mxu1 %v5256_v53  ;;  %v5296_v44 = vsel %vm795_vm1, %v5216_v52, %v836_v41  ;;  %v5311_v52 = vsel %vm795_vm1, %v5211_v42, %v1248_v31  ;;  %v5327_v42 = vrot.slane %v1312_v8, 7  ;;  %v1315_v31 = vshll.u32 %v769_v22, 16  ;;  %v239_v53 = vld [vmem:[%s4991_s9 + $0x24] sm:$0xf] }
  0x4c   : > { %4493 = vmatprep.subr.bf16.mxu0 %v4940_v2  ;;  %2580 = vmatpush1.bf16.msra.mxu1 %v4788_v30  ;;  %v370_v30 = vsel %vm342_vm2, %v365_v21, %v369_v62  ;;  %7379 = vst [vmem:[#allocation15_spill] sm:$0xff] %v5311_v52  ;;  %v236_v21 = vld [vmem:[%s4991_s9 + $0x18] sm:$0xf]  ;;  %v7381_v8 = vmov 0   ;;  %v5343_v39 = vsel %vm703_vm0, %v770_v16, %v772_v13  ;;  %271 = vst [vmem:[#allocation2 + $0x78] sm:$0xf] %v239_v53 }
  0x4d   : > { %2581 = vmatprep.subr.bf16.mxu1 %v7239_v1  ;;  %v850_v41 = vshrl.u32 %v370_v30, 16  ;;  %v853_v32 = vshll.u32 %v370_v30, 16  ;;  %v5314_v1 = vsel %vm703_vm0, %v768_v49, %v770_v16  ;;  %268 = vst [vmem:[#allocation2 + $0x40] sm:$0xf] %v236_v21  ;;  %v237_v30 = vld [vmem:[%s4991_s9 + $0x1c] sm:$0xf]  ;;  %v5350_v60 = vsel %vm795_vm1, %v5118_v34, %v828_v57 }
  0x4e   : > { %1773 = vmatmul.mubr.bf16.vlgmr.msra.gmra.mrb[0].mxu0 %v802_v59  ;;  %v7241_v59 = vshll.u32 %v5290_v43, 16  ;;  %v1331_v22 = vshrl.u32 %v5314_v1, 16  ;;  %v1317_v21 = vor.u32 %v1315_v31, %v5327_v42  ;;  %v5357_v16 = vld [vmem:[#allocation2 + $0x30] sm:$0xff]  ;;  %269 = vst [vmem:[#allocation2 + $0x48] sm:$0xf] %v237_v30  ;;  %v5379_v61 = vsel %vm795_vm1, %v5269_v50, %v1286_v28  ;;  %v337_v28 = vld [vmem:[#allocation2 + $0x158] sm:$0xff] }
  0x4f   : > { %4494 = vmatpush3.bf16.msra.mxu0 %v4940_v2  ;;  %1779 = vmatprep.mubr.bf16.mxu0 %v5296_v44  ;;  %v5330_v49 = vrot.slane %v850_v41, 7  ;;  %v373_v2 = vor.u32 %v371_v6, %v369_v62  ;;  %v238_v41 = vld [vmem:[%s4991_s9 + $0x20] sm:$0xf]  ;;  %7383 = vst [vmem:[#allocation17_spill] sm:$0xff] %v5379_v61  ;;  %v4792_v53 = vld [vmem:[%s7228_s1 + $0x110] sm:$0xff]  }
  0x50   : > { %2582 = vmatpush1.bf16.msra.mxu1 %v4789_v11  ;;  %4495 = vmatprep.subr.bf16.mxu0 %v4952_v4  ;;  %v377_v62 = vrot.slane %v7241_v59, 1  ;;  %v774_v59 = vrot.slane %v335_v56, 1  ;;  %270 = vst [vmem:[#allocation2 + $0x70] sm:$0xf] %v238_v41  ;;  %v1350_v56 = vshrl.u32 %v5343_v39, 16  ;;  %v5416_v45 = vld [vmem:[#allocation2 + $0x160] sm:$0xff] }
  0x51   : > { %2583 = vmatprep.subr.bf16.mxu1 %v7381_v8  ;;  %v855_v11 = vor.u32 %v853_v32, %v5330_v49  ;;  %v4791_v32 = vld [vmem:[%s7228_s1 + $0x108] sm:$0xff]  }
  0x52   : > { %4550 = vmatmul.mubr.bf16.gmra.mrb[16].mxu1 %v5311_v52  ;;  %v378_v31 = vsel %vm342_vm2, %v373_v2, %v377_v62  ;;  %v336_v52 = vld [vmem:[#allocation2 + $0x150] sm:$0xff]  ;;  %v5395_v50 = vsel %vm703_vm0, %v772_v13, %v774_v59  ;;  %v5406_v13 = vld [vmem:[#allocation2] sm:$0xff] }
  0x53   : > { %4553 = vmatprep.mubr.bf16.mxu1 %v5320_v20  ;;  %4496 = vmatpush3.bf16.msra.mxu0 %v4952_v4  ;;  %v5363_v57 = vsel %vm795_vm1, %v5249_v0, %v855_v11  ;;  %v847_v20 = vor.u32 %v5325_v54, %v7382_v18  ;;  %v5372_v4 = vrot.slane %v1331_v22, 7  ;;  %v869_v30 = vshrl.u32 %v378_v31, 16 }
  0x54   : > { %2584 = vmatpush1.bf16.msra.mxu1 %v4790_v29  ;;  %v1334_v29 = vshll.u32 %v5314_v1, 16  ;;  %v872_v41 = vshll.u32 %v378_v31, 16  ;;  %4497 = vmatprep.subr.bf16.mxu0 %v4959_v5  ;;  %v5381_v0 = vrot.slane %v371_v6, 7  ;;  %v7384_v18 = vshrl.u32 %v5290_v43, 16 }
  0x55   : > { %2585 = vmatprep.subr.bf16.mxu1 %v7381_v8  ;;  %v7249_v8 = vshll.u32 %v5357_v16, 16  ;;  %v1318_v1 = vsel %vm795_vm1, %v5034_v26, %v1317_v21  ;;  %v5392_v22 = vrot.slane %v869_v30, 7  ;;  %v776_v6 = vrot.slane %v336_v52, 1 }
  0x56   : > { %1780 = vmatmul.mubr.bf16.gmra.mrb[4].mxu0 %v5350_v60  ;;  %v381_v2 = vor.u32 %v7384_v18, %v377_v62  ;;  %v5398_v11 = vrot.slane %v1350_v56, 7  ;;  %v1353_v62 = vshll.u32 %v5343_v39, 16  ;;  %v1336_v30 = vor.u32 %v1334_v29, %v5372_v4  ;;  %v5414_v18 = vld [vmem:[#allocation2 + $0x38] sm:$0xff] }
  0x57   : > { %1786 = vmatprep.mubr.bf16.mxu0 %v5363_v57  ;;  %4498 = vmatpush3.bf16.msra.mxu0 %v4959_v5  ;;  %v385_v21 = vrot.slane %v7249_v8, 1  ;;  %v874_v5 = vor.u32 %v872_v41, %v5392_v22  ;;  %v777_v52 = vsel %vm703_vm0, %v774_v59, %v776_v6  ;;  %v1369_v39 = vshrl.u32 %v5395_v50, 16  ;;  %v5490_v12 = vld [vmem:[#allocation2 + $0x70] sm:$0xff] }
  0x58   : > { %2586 = vmatpush1.bf16.msra.mxu1 %v4791_v32  ;;  %4499 = vmatprep.subr.bf16.mxu0 %v4972_v7  ;;  %v778_v56 = vrot.slane %v337_v28, 1  ;;  %v5420_v29 = vsel %vm795_vm1, %v5263_v40, %v847_v20  ;;  %v1388_v41 = vshrl.u32 %v777_v52, 16  ;;  %v1355_v31 = vor.u32 %v1353_v62, %v5398_v11  ;;  %v4793_v40 = vld [vmem:[%s7228_s1 + $0x118] sm:$0xff]  }
  0x59   : > { %2587 = vmatprep.subr.bf16.mxu1 %v5406_v13  ;;  %v386_v32 = vsel %vm342_vm2, %v381_v2, %v385_v21  ;;  %v5425_v59 = vsel %vm795_vm1, %v5330_v49, %v874_v5  ;;  %v7385_v2 = vshll.u32 %v5224_v38, 16  ;;  %v7387_v38 = vshrl.u32 %v5357_v16, 16 }
  0x5a   : > { %4554 = vmatmul.mubr.bf16.gmra.mrb[20].mxu1 %v5379_v61  ;;  %v888_v8 = vshrl.u32 %v386_v32, 16  ;;  %v891_v20 = vshll.u32 %v386_v32, 16  ;;  %v1371_v62 = vrot.slane %v1369_v39, 7  ;;  %v1372_v5 = vshll.u32 %v5395_v50, 16  ;;  %v4794_v32 = vld [vmem:[%s7228_s1 + $0x120] sm:$0xff]  }
  0x5b   : > { %4557 = vmatprep.mubr.bf16.mxu1 %v1318_v1  ;;  %4500 = vmatpush3.bf16.msra.mxu0 %v4972_v7  ;;  %v866_v28 = vor.u32 %v5381_v0, %v7385_v2  ;;  %v5437_v7 = vsel %vm795_vm1, %v5327_v42, %v1336_v30  ;;  %v389_v1 = vor.u32 %v7387_v38, %v385_v21  ;;  %v5454_v30 = vld [vmem:[#allocation2 + $0x168] sm:$0xff]  ;;  %v5457_v21 = vrot.slane %v1388_v41, 7 }
  0x5c   : > { %2588 = vmatpush1.bf16.msra.mxu1 %v4792_v53  ;;  %4501 = vmatprep.subr.bf16.mxu0 %v4984_v9  ;;  %7386 = vst [vmem:[#allocation18_spill] sm:$0xff] %v5437_v7  ;;  %v5440_v49 = vrot.slane %v888_v8, 7  ;;  %v7250_v53 = vshll.u32 %v5414_v18, 16  ;;  %v5451_v42 = vsel %vm703_vm0, %v776_v6, %v778_v56  ;;  %v780_v8 = vrot.slane %v5416_v45, 1  ;;  %7388 = vst [vmem:[#allocation19_spill] sm:$0xff] %v5454_v30 }
  0x5d   : > { %2589 = vmatprep.subr.bf16.mxu1 %v5406_v13  ;;  %v1391_v2 = vshll.u32 %v777_v52, 16  ;;  %v5465_v6 = vsel %vm795_vm1, %v5372_v4, %v1355_v31  ;;  %v5471_v41 = vsel %vm795_vm1, %v5325_v54, %v866_v28  ;;  %v1407_v52 = vshrl.u32 %v5451_v42, 16  ;;  %v5485_v28 = vld [vmem:[#allocation2 + $0x48] sm:$0xff] }
  0x5e   : > { %1787 = vmatmul.mubr.bf16.gmra.mrb[8].mxu0 %v5420_v29  ;;  %v393_v39 = vrot.slane %v7250_v53, 1  ;;  %7389 = vst [vmem:[#allocation20_spill] sm:$0xff] %v5465_v6  ;;  %v893_v45 = vor.u32 %v891_v20, %v5440_v49  ;;  %v781_v38 = vsel %vm703_vm0, %v778_v56, %v780_v8  ;;  %v1374_v4 = vor.u32 %v1372_v5, %v1371_v62 }
  0x5f   : > { %1793 = vmatprep.mubr.bf16.mxu0 %v5425_v59  ;;  %4502 = vmatpush3.bf16.msra.mxu0 %v4984_v9  ;;  %v5476_v9 = vld [vmem:[#allocation2 + $0x40] sm:$0xff]  ;;  %v7390_v31 = vshrl.u32 %v5290_v43, 16  ;;  %v1393_v20 = vor.u32 %v1391_v2, %v5457_v21  ;;  %v1426_v61 = vshrl.u32 %v781_v38, 16  ;;  %v7391_v2 = vshrl.u32 %v5414_v18, 16 }
  0x60   : > { %2590 = vmatpush1.bf16.msra.mxu1 %v4793_v40  ;;  %v394_v53 = vsel %vm342_vm2, %v389_v1, %v393_v39  ;;  %4503 = vmatprep.subr.bf16.mxu0 %v5005_v14  ;;  %v1410_v1 = vshll.u32 %v5451_v42, 16  ;;  %v5495_v5 = vsel %vm795_vm1, %v5392_v22, %v893_v45  ;;  %v5509_v45 = vld [vmem:[#allocation2 + $0x78] sm:$0xff] }
  0x61   : > { %2591 = vmatprep.subr.bf16.mxu1 %v5406_v13  ;;  %v5482_v56 = vrot.slane %v7390_v31, 7  ;;  %v907_v40 = vshrl.u32 %v394_v53, 16  ;;  %v910_v50 = vshll.u32 %v394_v53, 16  ;;  %v4795_v31 = vld [vmem:[%s7228_s1 + $0x128] sm:$0xff]   ;;  %v397_v42 = vor.u32 %v7391_v2, %v393_v39  ;;  %v4796_v2 = vld [vmem:[%s7228_s1 + $0x130] sm:$0xff]  }
  0x62   : > { %4558 = vmatmul.mubr.bf16.gmra.mrb[24].mxu1 %v5437_v7  ;;  %v7261_v53 = vshll.u32 %v5476_v9, 16  ;;  %v5528_v7 = vsel %vm795_vm1, %v5398_v11, %v1374_v4  ;;  %v7397_v11 = vshrl.u32 %v5476_v9, 16 }
  0x63   : > { %4561 = vmatprep.mubr.bf16.mxu1 %v5465_v6  ;;  %4504 = vmatpush3.bf16.msra.mxu0 %v5005_v14  ;;  %v5500_v54 = vrot.slane %v907_v40, 7  ;;  %v1409_v6 = vrot.slane %v1407_v52, 7  ;;  %v1429_v14 = vshll.u32 %v781_v38, 16  ;;  %v7392_v40 = vshll.u32 %v5290_v43, 16  ;;  %7394 = vst [vmem:[#allocation21_spill] sm:$0xff] %v5528_v7 }
  0x64   : > { %2592 = vmatpush1.bf16.msra.mxu1 %v4794_v32  ;;  %4505 = vmatprep.subr.bf16.mxu0 %v5021_v19  ;;  %v7393_v52 = vrot.slane %v5454_v30, 1  ;;  %v401_v22 = vrot.slane %v7261_v53, 1  ;;  %v7260_v32 = vshll.u32 %v5490_v12, 16  ;;  %v7395_v30 = vshll.u32 %v5485_v28, 16 }
  0x65   : > { %2593 = vmatprep.subr.bf16.mxu1 %v5406_v13  ;;  %v885_v39 = vor.u32 %v5482_v56, %v7392_v40  ;;  %v912_v43 = vor.u32 %v910_v50, %v5500_v54  ;;  %v5532_v40 = vrot.slane %v1426_v61, 7 }
  0x66   : > { %1794 = vmatmul.mubr.bf16.gmra.mrb[12].mxu0 %v5471_v41  ;;  %v5521_v38 = vsel %vm703_vm0, %v780_v8, %v7393_v52  ;;  %v5536_v63 = vrot.slane %v7395_v30, 1  ;;  %v5540_v8 = vsel %vm795_vm1, %v1371_v62, %v1393_v20  ;;  %v402_v52 = vsel %vm342_vm2, %v397_v42, %v401_v22 }
  0x67   : > { %1800 = vmatprep.mubr.bf16.mxu0 %v5495_v5  ;;  %4506 = vmatpush3.bf16.msra.mxu0 %v5021_v19  ;;  %7396 = vst [vmem:[#allocation22_spill] sm:$0xff] %v5540_v8  ;;  %v405_v4 = vor.u32 %v7397_v11, %v401_v22  ;;  %v1445_v61 = vshrl.u32 %v5521_v38, 16  ;;  %v926_v50 = vshrl.u32 %v402_v52, 16  ;;  %v5551_v19 = vsel %vm795_vm1, %v5381_v0, %v885_v39  ;;  %v4797_v39 = vld [vmem:[%s7228_s1 + $0x138] sm:$0xff]  }
  0x68   : > { %2594 = vmatpush1.bf16.msra.mxu1 %v4795_v31  ;;  %4507 = vmatprep.subr.bf16.mxu0 %v5040_v27  ;;  %v7398_v62 = vshrl.u32 %v5357_v16, 16  ;;  %v5559_v20 = vrot.slane %v7260_v32, 1  ;;  %v7262_v31 = vshll.u32 %v5509_v45, 16  ;;  %v1412_v42 = vor.u32 %v1410_v1, %v1409_v6  ;;  %v4831_v11 = vld [vmem:[%s7228_s1 + $0xb8] sm:$0xff]  }
  0x69   : > { %2595 = vmatprep.subr.bf16.mxu1 %v5406_v13  ;;  %v5565_v27 = vsel %vm795_vm1, %v5440_v49, %v912_v43  ;;  %v1431_v0 = vor.u32 %v1429_v14, %v5532_v40  ;;  %v1448_v22 = vshll.u32 %v5521_v38, 16  ;;  %v929_v1 = vshll.u32 %v402_v52, 16 }
  0x6a   : > { %4562 = vmatmul.mubr.bf16.gmra.mrb[28].mxu1 %v5528_v7  ;;  %v5555_v30 = vrot.slane %v7398_v62, 7  ;;  %v5575_v62 = vrot.slane %v926_v50, 7  ;;  %v410_v49 = vsel %vm342_vm2, %v405_v4, %v5536_v63  ;;  %v433_v14 = vsel %vm342_vm2, %v5012_v17, %v5559_v20 }
  0x6b   : > { %4565 = vmatprep.mubr.bf16.mxu1 %v5540_v8  ;;  %4508 = vmatpush3.bf16.msra.mxu0 %v4831_v11  ;;  %v5582_v38 = vrot.slane %v1445_v61, 7  ;;  %v972_v43 = vshrl.u32 %v433_v14, 16  ;;  %v975_v32 = vshll.u32 %v433_v14, 16  ;;  %v440_v11 = vrot.slane %v7262_v31, 1 }
  0x6c   : > { %2596 = vmatpush1.bf16.msra.mxu1 %v4796_v2  ;;  %v7400_v2 = vshll.u32 %v5357_v16, 16  ;;  %v7269_v4 = vshrl.u32 %v5509_v45, 16  ;;  %v1033_v50 = vshrl.u32 %v5136_v47, 16  ;;  %v5595_v61 = vsel %vm795_vm1, %v5457_v21, %v1412_v42 }
  0x6d   : > { %7399 = vst [vmem:[#allocation23_spill] sm:$0xff] %v5582_v38  ;;  %2597 = vmatprep.subr.bf16.mxu1 %v5406_v13  ;;  %7401 = vst [vmem:[#allocation24_spill] sm:$0xff] %v5595_v61  ;;  %v945_v14 = vshrl.u32 %v410_v49, 16  ;;  %v5598_v53 = vrot.slane %v972_v43, 7  ;;  %v5601_v31 = vsel %vm795_vm1, %v1409_v6, %v1431_v0  ;;  %v931_v16 = vor.u32 %v929_v1, %v5575_v62 }
  0x6e   : > { %1801 = vmatmul.mubr.bf16.gmra.mrb[16].mxu0 %v5551_v19  ;;  %v904_v52 = vor.u32 %v5555_v30, %v7400_v2  ;;  %7402 = vst [vmem:[#allocation25_spill] sm:$0xff] %v5601_v31  ;;  %v444_v2 = vor.u32 %v7269_v4, %v440_v11  ;;  %v7403_v8 = vshrl.u32 %v5414_v18, 16  ;;  %v1035_v42 = vrot.slane %v1033_v50, 7 }
  0x6f   : > { %1807 = vmatprep.mubr.bf16.mxu0 %v5565_v27  ;;  %v977_v21 = vor.u32 %v975_v32, %v5598_v53  ;;  %v7404_v43 = vshrl.u32 %v5032_v24, 16  ;;  %v948_v0 = vshll.u32 %v410_v49, 16  ;;  %v1450_v32 = vor.u32 %v1448_v22, %v5582_v38 }
  0x70   : > { %2598 = vmatpush1.bf16.msra.mxu1 %v4797_v39  ;;  %v922_v7 = vrot.slane %v7403_v8, 7  ;;  %v5616_v6 = vsel %vm795_vm1, %v5482_v56, %v904_v52  ;;  %v5620_v39 = vsel %vm342_vm2, %v444_v2, %v5074_v55  ;;  %v1036_v8 = vshll.u32 %v5136_v47, 16  ;;  %v5634_v55 = vld [vmem:[#allocation2 + $0x90] sm:$0xff] }
  0x71   : > { %3394 = vmatprep.subr.bf16.mxu1 %v5406_v13  ;;  %v460_v15 = vor.u32 %v7404_v43, %v5122_v35  ;;  %v5625_v1 = vrot.slane %v945_v14, 7  ;;  %v978_v35 = vsel %vm795_vm1, %v5034_v26, %v977_v21  ;;  %v1014_v50 = vshrl.u32 %v5620_v39, 16 }
  0x72   : > { %4566 = vmatmul.mubr.bf16.gmra.mrb[32].mxu1 %v5595_v61  ;;  %v5632_v56 = vsel %vm795_vm1, %v5500_v54, %v931_v16  ;;  %v1038_v49 = vor.u32 %v1036_v8, %v1035_v42  ;;  %v7270_v47 = vshll.u32 %v5634_v55, 16  ;;  %v7405_v52 = vmov %v7404_v43 }
  0x73   : > { %4569 = vmatprep.mubr.bf16.mxu1 %v5601_v31  ;;  %v5639_v2 = vrot.slane %v7405_v52, 7  ;;  %v434_v22 = vshrl.u32 %v5490_v12, 16  ;;  %v1016_v14 = vrot.slane %v1014_v50, 7  ;;  %v7406_v26 = vshrl.u32 %v5030_v23, 16 }
  0x74   : > { %v5649_v54 = vrot.slane %v7270_v47, 1  ;;  %v7407_v16 = vshll.u32 %v5032_v24, 16  ;;  %v5656_v8 = vsel %vm795_vm1, %v5532_v40, %v1450_v32  ;;  %v7409_v50 = vshll.u32 %v5414_v18, 16 }
  0x75   : > { %v5645_v21 = vrot.slane %v7406_v26, 7  ;;  %7408 = vst [vmem:[#allocation26_spill] sm:$0xff] %v5656_v8  ;;  %v5662_v26 = vsel %vm795_vm1, %v1016_v14, %v1038_v49  ;;  %v950_v4 = vor.u32 %v948_v0, %v5625_v1  ;;  %v436_v40 = vor.u32 %v434_v22, %v5559_v20 }
  0x76   : > { %1808 = vmatmul.mubr.bf16.gmra.mrb[20].mxu0 %v5616_v6  ;;  %v1049_v43 = vor.u32 %v5639_v2, %v7407_v16  ;;  %v923_v52 = vor.u32 %v922_v7, %v7409_v50  ;;  %7410 = vst [vmem:[#allocation27_spill] sm:$0xff] %v5662_v26  ;;  %v465_v47 = vsel %vm342_vm2, %v460_v15, %v5649_v54  ;;  %v7413_v0 = vshrl.u32 %v5476_v9, 16 }
  0x77   : > { %1814 = vmatprep.mubr.bf16.mxu0 %v5632_v56  ;;  %v1052_v32 = vshrl.u32 %v465_v47, 16  ;;  %v1055_v16 = vshll.u32 %v465_v47, 16  ;;  %v441_v20 = vsel %vm342_vm2, %v436_v40, %v440_v11 }
  0x78   : > { %v5669_v24 = vsel %vm795_vm1, %v5645_v21, %v1049_v43  ;;  %v5675_v18 = vsel %vm795_vm1, %v5555_v30, %v923_v52  ;;  %v5680_v49 = vrot.slane %v7413_v0, 7  ;;  %v5686_v43 = vsel %vm795_vm1, %v5575_v62, %v950_v4  ;;  %v4799_v4 = vld [vmem:[%s7228_s1 + $0x188] sm:$0xff]  }
  0x79   : > { %7411 = vst [vmem:[#allocation28_spill] sm:$0xff] %v5669_v24  ;;  %7412 = vst [vmem:[#allocation29_spill] sm:$0xff] %v5675_v18  ;;  %v5682_v15 = vrot.slane %v1052_v32, 7  ;;  %v7415_v30 = vshll.u32 %v5476_v9, 16  ;;  %v995_v62 = vshrl.u32 %v441_v20, 16  ;;  %v998_v40 = vshll.u32 %v441_v20, 16 }
  0x7a   : > { %4570 = vmatmul.mubr.bf16.gmra.mrb[36].mxu1 %v5656_v8  ;;  %7414 = vst [vmem:[#allocation30_spill] sm:$0xff] %v5686_v43  ;;  %v4801_v32 = vld [vmem:[%s7228_s1 + $0x198] sm:$0xff]   ;;  %v7418_v0 = vshll.u32 %v5490_v12, 16  ;;  %v4802_v20 = vld [vmem:[%s7228_s1 + $0x1a0] sm:$0xff]  }
  0x7b   : > { %2599 = vmatprep.mubr.bf16.mxu1 %v5296_v44  ;;  %v1057_v47 = vor.u32 %v1055_v16, %v5682_v15  ;;  %v4798_v44 = vld [vmem:[%s7228_s1 + $0x180] sm:$0xff]   ;;  %v942_v50 = vor.u32 %v5680_v49, %v7415_v30  ;;  %v997_v9 = vrot.slane %v995_v62, 7  ;;  %v1017_v16 = vshll.u32 %v5620_v39, 16 }
  0x7c   : > { %v7419_v39 = vshrl.u32 %v5509_v45, 16  ;;  %v7273_v30 = vshrl.u32 %v5634_v55, 16  ;;  %v7421_v62 = vshll.u32 %v5509_v45, 16  ;;  %v5769_v45 = vshll.u32 %v5406_v13, 16 }
  0x7d   : > { %v5699_v52 = vsel %vm795_vm1, %v1035_v42, %v1057_v47  ;;  %v5703_v11 = vsel %vm795_vm1, %v922_v7, %v942_v50  ;;  %v1000_v7 = vor.u32 %v998_v40, %v997_v9  ;;  %v991_v42 = vrot.slane %v434_v22, 7  ;;  %v5750_v50 = vld [vmem:[#allocation2 + $0x98] sm:$0xff] }
  0x7e   : > { %1815 = vmatmul.mubr.bf16.gmra.mrb[24].mxu0 %v5675_v18  ;;  %7416 = vst [vmem:[#allocation31_spill] sm:$0xff] %v5699_v52  ;;  %7417 = vst [vmem:[#allocation32_spill] sm:$0xff] %v5703_v11  ;;  %v1019_v47 = vor.u32 %v1017_v16, %v1016_v14  ;;  %v1010_v12 = vrot.slane %v7419_v39, 7  ;;  %v7272_v40 = vshrl.u32 %v5485_v28, 16  ;;  %v5787_v39 = vld [vmem:[#allocation2 + $0xa0] sm:$0xff] }
  0x7f   : > { %1821 = vmatprep.mubr.bf16.mxu0 %v5686_v43  ;;  %v992_v22 = vor.u32 %v991_v42, %v7418_v0  ;;  %7422 = vst [vmem:[#allocation34_spill] sm:$0xff] %v5769_v45 }
  0x80   : > { %v5746_v14 = vsel %vm795_vm1, %v997_v9, %v1019_v47  ;;  %v4804_v9 = vld [vmem:[%s7228_s1 + $0x1b0] sm:$0xff]   ;;  %v7278_v47 = vshrl.u32 %v5750_v50, 16 }
  0x81   : > { %7420 = vst [vmem:[#allocation33_spill] sm:$0xff] %v5746_v14 }
  0x82   : > { %2600 = vmatmul.mubr.bf16.vlgmr.msra.gmra.mrb[40].mxu1 %v5350_v60  ;;  %v4800_v60 = vld [vmem:[%s7228_s1 + $0x190] sm:$0xff]  }
  0x83   : > { %3395 = vmatpush1.bf16.msra.mxu1 %v4798_v44  ;;  %2606 = vmatprep.mubr.bf16.mxu1 %v5363_v57  ;;  %v4803_v44 = vld [vmem:[%s7228_s1 + $0x1a8] sm:$0xff]  }
  0x84   : > { %3396 = vmatprep.subr.bf16.mxu1 %v5406_v13 }
  0x86   : > { %1822 = vmatmul.mubr.bf16.gmra.mrb[28].mxu0 %v5703_v11 }
  0x87   : > { %1828 = vmatprep.mubr.bf16.mxu0 %v978_v35  ;;  %3397 = vmatpush1.bf16.msra.mxu1 %v4799_v4  ;;  %v5722_v35 = vsel %vm795_vm1, %v5598_v53, %v1000_v7  ;;  %v5737_v53 = vsel %vm795_vm1, %v5118_v34, %v992_v22  ;;  %v1011_v4 = vor.u32 %v1010_v12, %v7421_v62 }
  0x88   : > { %3398 = vmatprep.subr.bf16.mxu1 %v5406_v13  ;;  %v468_v7 = vor.u32 %v7273_v30, %v5649_v54  ;;  %v4805_v54 = vld [vmem:[%s7228_s1 + $0x1b8] sm:$0xff]   ;;  %v413_v22 = vor.u32 %v7272_v40, %v5536_v63  ;;  %v7425_v63 = vshll.u32 %v5030_v23, 16 }
  0x89   : > { %v5775_v0 = vsel %vm795_vm1, %v991_v42, %v1011_v4  ;;  %v7277_v42 = vshll.u32 %v5787_v39, 16 }
  0x8a   : > { %2607 = vmatmul.mubr.bf16.gmra.mrb[44].mxu1 %v5420_v29  ;;  %7423 = vst [vmem:[#allocation35_spill] sm:$0xff] %v5775_v0  ;;  %v1030_v4 = vor.u32 %v5645_v21, %v7425_v63  ;;  %v418_v40 = vsel %vm342_vm2, %v413_v22, %v5012_v17 }
  0x8b   : > { %2613 = vmatprep.mubr.bf16.mxu1 %v5425_v59  ;;  %3399 = vmatpush1.bf16.msra.mxu1 %v4800_v60  ;;  %v505_v60 = vshrl.u32 %v5406_v13, 16  ;;  %v2290_v38 = vshrl.u32 %v418_v40, 16  ;;  %v2293_v61 = vshll.u32 %v418_v40, 16 }
  0x8c   : > { %3400 = vmatprep.subr.bf16.mxu1 %v5406_v13  ;;  %v5824_v22 = vsel %vm795_vm1, %v1010_v12, %v1030_v4  ;;  %v5837_v4 = vld [vmem:[#allocation2 + $0xa8] sm:$0xff] }
  0x8d   : > { %v5772_v16 = vrot.slane %v505_v60, 7  ;;  %7426 = vst [vmem:[#allocation37_spill] sm:$0xff] %v5824_v22 }
  0x8e   : > { %1829 = vmatmul.mubr.bf16.gmra.mrb[32].mxu0 %v5118_v34  ;;  %v7271_v34 = vshll.u32 %v5750_v50, 16 }
  0x8f   : > { %1835 = vmatprep.mubr.bf16.mxu0 %v5722_v35  ;;  %3401 = vmatpush1.bf16.msra.mxu1 %v4801_v32  ;;  %v1129_v62 = vor.u32 %v5772_v16, %v5769_v45 }
  0x90   : > { %3402 = vmatprep.subr.bf16.mxu1 %v5406_v13  ;;  %v472_v32 = vrot.slane %v7271_v34, 1 }
  0x91   : > { %v5809_v30 = vsel %vm795_vm1, %v5772_v16, %v1129_v62 }
  0x92   : > { %2614 = vmatmul.mubr.bf16.gmra.mrb[48].mxu1 %v5471_v41  ;;  %v476_v21 = vor.u32 %v7278_v47, %v472_v32 }
  0x93   : > { %2620 = vmatprep.mubr.bf16.mxu1 %v5495_v5  ;;  %3403 = vmatpush1.bf16.msra.mxu1 %v4802_v20  ;;  %v473_v20 = vsel %vm342_vm2, %v468_v7, %v472_v32  ;;  %v7276_v7 = vshll.u32 %v5233_v3, 16 }
  0x94   : > { %3404 = vmatprep.subr.bf16.mxu1 %v5406_v13  ;;  %v1071_v34 = vshrl.u32 %v473_v20, 16  ;;  %v1074_v62 = vshll.u32 %v473_v20, 16 }
  0x96   : > { %1836 = vmatmul.mubr.bf16.gmra.mrb[36].mxu0 %v5737_v53 }
  0x97   : > { %1842 = vmatprep.mubr.bf16.mxu0 %v5746_v14  ;;  %3405 = vmatpush1.bf16.msra.mxu1 %v4803_v44  ;;  %v5791_v44 = vrot.slane %v5769_v45, 1  ;;  %v5820_v45 = vrot.slane %v7276_v7, 1  ;;  %v1073_v7 = vrot.slane %v1071_v34, 7  ;;  %v5844_v34 = vrot.slane %v2290_v38, 7 }
  0x98   : > { %3406 = vmatprep.subr.bf16.mxu1 %v5406_v13  ;;  %v7429_v38 = vshll.u32 %v5837_v4, 16 }
  0x99   : > { %7424 = vst [vmem:[#allocation36_spill] sm:$0xff] %v5791_v44  ;;  %v5816_v63 = vor.u32 %v505_v60, %v5791_v44  ;;  %v4807_v60 = vld [vmem:[%s7228_s1 + $0x1c8] sm:$0xff]   ;;  %7427 = vst [vmem:[#allocation38_spill] sm:$0xff] %v5844_v34 }
  0x9a   : > { %2621 = vmatmul.mubr.bf16.gmra.mrb[52].mxu1 %v5551_v19  ;;  %v5857_v48 = vrot.slane %v7429_v38, 1  ;;  %v5875_v38 = vld [vmem:[#allocation2 + $0xd0] sm:$0xff] }
  0x9b   : > { %2627 = vmatprep.mubr.bf16.mxu1 %v5565_v27  ;;  %3407 = vmatpush1.bf16.msra.mxu1 %v4804_v9  ;;  %v4806_v9 = vld [vmem:[%s7228_s1 + $0x1c0] sm:$0xff]   ;;  %v591_v32 = vsel %vm342_vm2, %v5816_v63, %v5820_v45  ;;  %v7291_v36 = vshll.u32 %v5875_v38, 16 }
  0x9c   : > { %3408 = vmatprep.subr.bf16.mxu1 %v5406_v13  ;;  %v1300_v47 = vshrl.u32 %v591_v32, 16  ;;  %v1303_v8 = vshll.u32 %v591_v32, 16  ;;  %v1076_v32 = vor.u32 %v1074_v62, %v1073_v7 }
  0x9e   : > { %1843 = vmatmul.mubr.bf16.gmra.mrb[40].mxu0 %v5775_v0  ;;  %v5841_v31 = vrot.slane %v1300_v47, 7  ;;  %v7428_v47 = vshrl.u32 %v5787_v39, 16  ;;  %v5869_v62 = vsel %vm795_vm1, %v5682_v15, %v1076_v32  ;;  %v7432_v15 = vshll.u32 %v5634_v55, 16 }
  0x9f   : > { %1849 = vmatprep.mubr.bf16.mxu0 %v5662_v26  ;;  %3409 = vmatpush1.bf16.msra.mxu1 %v4805_v54  ;;  %v480_v54 = vrot.slane %v7277_v42, 1  ;;  %v1132_v42 = vshrl.u32 %v5791_v44, 16  ;;  %7431 = vst [vmem:[#allocation39_spill] sm:$0xff] %v5869_v62 }
  0xa0   : > { %3410 = vmatprep.subr.bf16.mxu1 %v5406_v13 }
  0xa1   : > { %v481_v12 = vsel %vm342_vm2, %v476_v21, %v480_v54  ;;  %v4808_v21 = vld [vmem:[%s7228_s1 + $0x1d0] sm:$0xff]   ;;  %v5849_v37 = vrot.slane %v1132_v42, 7  ;;  %v484_v25 = vor.u32 %v7428_v47, %v480_v54  ;;  %v7430_v42 = vshrl.u32 %v5634_v55, 16  ;;  %v4809_v55 = vld [vmem:[%s7228_s1 + $0x1d8] sm:$0xff]  }
  0xa2   : > { %2628 = vmatmul.mubr.bf16.gmra.mrb[56].mxu1 %v5616_v6  ;;  %v1090_v20 = vshrl.u32 %v481_v12, 16  ;;  %v2295_v54 = vor.u32 %v2293_v61, %v5844_v34  ;;  %v1093_v47 = vshll.u32 %v481_v12, 16  ;;  %v7433_v61 = vshrl.u32 %v5485_v28, 16 }
  0xa3   : > { %2634 = vmatprep.mubr.bf16.mxu1 %v5632_v56  ;;  %3411 = vmatpush1.bf16.msra.mxu1 %v4806_v9  ;;  %v1305_v9 = vor.u32 %v1303_v8, %v5841_v31  ;;  %v1067_v8 = vrot.slane %v7430_v42, 7  ;;  %v511_v42 = vrot.slane %v7291_v36, 1 }
  0xa4   : > { %3412 = vmatprep.subr.bf16.mxu1 %v5406_v13  ;;  %v5888_v12 = vsel %vm795_vm1, %v5625_v1, %v2295_v54  ;;  %v7437_v1 = vshll.u32 %v5485_v28, 16 }
  0xa5   : > { %v5862_v40 = vsel %vm795_vm1, %v5849_v37, %v1305_v9  ;;  %v489_v9 = vsel %vm342_vm2, %v484_v25, %v5857_v48  ;;  %7435 = vst [vmem:[#allocation41_spill] sm:$0xff] %v5888_v12 }
  0xa6   : > { %1850 = vmatmul.mubr.bf16.gmra.mrb[44].mxu0 %v5824_v22  ;;  %v1109_v32 = vshrl.u32 %v489_v9, 16 }
  0xa7   : > { %1856 = vmatprep.mubr.bf16.mxu0 %v5699_v52  ;;  %3413 = vmatpush1.bf16.msra.mxu1 %v4807_v60  ;;  %v1092_v60 = vrot.slane %v1090_v20, 7  ;;  %v5884_v20 = vrot.slane %v7433_v61, 7 }
  0xa8   : > { %3414 = vmatprep.subr.bf16.mxu1 %v5406_v13  ;;  %v5909_v34 = vrot.slane %v1109_v32, 7 }
  0xa9   : > { %7434 = vst [vmem:[#allocation40_spill] sm:$0xff] %v5884_v20  ;;  %v1095_v25 = vor.u32 %v1093_v47, %v1092_v60  ;;  %v2287_v54 = vor.u32 %v5884_v20, %v7437_v1  ;;  %v7438_v47 = vshrl.u32 %v5750_v50, 16  ;;  %v5943_v20 = vld [vmem:[#allocation2 + $0xe0] sm:$0xff] }
  0xaa   : > { %2635 = vmatmul.mubr.bf16.gmra.mrb[60].mxu1 %v5675_v18 }
  0xab   : > { %2641 = vmatprep.mubr.bf16.mxu1 %v5686_v43  ;;  %3415 = vmatpush1.bf16.msra.mxu1 %v4808_v21  ;;  %v1068_v21 = vor.u32 %v1067_v8, %v7432_v15  ;;  %v1086_v61 = vrot.slane %v7438_v47, 7  ;;  %v5907_v36 = vsel %vm795_vm1, %v1073_v7, %v1095_v25  ;;  %v5921_v7 = vsel %vm795_vm1, %v5680_v49, %v2287_v54  ;;  %v6030_v43 = vld [vmem:[#allocation2 + $0x100] sm:$0xff] }
  0xac   : > { %3416 = vmatprep.subr.bf16.mxu1 %v5406_v13  ;;  %7439 = vst [vmem:[#allocation43_spill] sm:$0xff] %v5907_v36  ;;  %7440 = vst [vmem:[#allocation44_spill] sm:$0xff] %v5921_v7  ;;  %v7443_v49 = vshrl.u32 %v5787_v39, 16 }
  0xad   : > { %v5898_v15 = vsel %vm795_vm1, %v5639_v2, %v1068_v21  ;;  %v512_v2 = vsel %vm342_vm2, %v5816_v63, %v511_v42  ;;  %v513_v21 = vshrl.u32 %v5875_v38, 16 }
  0xae   : > { %1857 = vmatmul.mubr.bf16.gmra.mrb[48].mxu0 %v5669_v24  ;;  %7436 = vst [vmem:[#allocation42_spill] sm:$0xff] %v5898_v15  ;;  %v1136_v32 = vshrl.u32 %v512_v2, 16  ;;  %v5936_v54 = vrot.slane %v7443_v49, 7 }
  0xaf   : > { %1863 = vmatprep.mubr.bf16.mxu0 %v5869_v62  ;;  %3417 = vmatpush1.bf16.msra.mxu1 %v4809_v55  ;;  %v515_v55 = vor.u32 %v513_v21, %v511_v42 }
  0xb0   : > { %3418 = vmatprep.subr.bf16.mxu1 %v5406_v13 }
  0xb2   : > { %2642 = vmatmul.mubr.bf16.gmra.mrb[64].mxu1 %v5703_v11  ;;  %v1112_v11 = vshll.u32 %v489_v9, 16  ;;  %v7441_v9 = vshll.u32 %v5750_v50, 16 }
  0xb3   : > { %2648 = vmatprep.mubr.bf16.mxu1 %v5888_v12  ;;  %v5914_v12 = vld [vmem:[#allocation2 + $0xd8] sm:$0xff] }
  0xb4   : > { %v7295_v28 = vshll.u32 %v5914_v12, 16  ;;  %v1087_v25 = vor.u32 %v1086_v61, %v7441_v9  ;;  %v1114_v63 = vor.u32 %v1112_v11, %v5909_v34  ;;  %v1138_v11 = vrot.slane %v1136_v32, 7 }
  0xb5   : > { %v1139_v9 = vshll.u32 %v512_v2, 16 }
  0xb6   : > { %1864 = vmatmul.mubr.bf16.gmra.mrb[52].mxu0 %v5898_v15  ;;  %v519_v1 = vrot.slane %v7295_v28, 1  ;;  %v5931_v47 = vsel %vm795_vm1, %v1067_v8, %v1087_v25  ;;  %v5939_v50 = vsel %vm795_vm1, %v1092_v60, %v1114_v63  ;;  %v521_v28 = vshrl.u32 %v5914_v12, 16 }
  0xb7   : > { %1870 = vmatprep.mubr.bf16.mxu0 %v5907_v36  ;;  %7442 = vst [vmem:[#allocation45_spill] sm:$0xff] %v5931_v47  ;;  %7444 = vst [vmem:[#allocation46_spill] sm:$0xff] %v5939_v50  ;;  %v7297_v8 = vshll.u32 %v5943_v20, 16  ;;  %v1141_v60 = vor.u32 %v1139_v9, %v1138_v11 }
  0xb8   : > { %v520_v42 = vsel %vm342_vm2, %v515_v55, %v519_v1  ;;  %v523_v32 = vor.u32 %v521_v28, %v519_v1  ;;  %v4810_v55 = vld [vmem:[%s7228_s1 + $0x1e0] sm:$0xff]  }
  0xb9   : > { %v1159_v63 = vshrl.u32 %v520_v42, 16  ;;  %v527_v2 = vrot.slane %v7297_v8, 1  ;;  %3419 = vmatpush1.bf16.msra.mxu1 %v4810_v55  ;;  %v529_v8 = vshrl.u32 %v5943_v20, 16 }
  0xba   : > { %2649 = vmatmul.mubr.bf16.gmra.mrb[68].mxu1 %v5921_v7  ;;  %3420 = vmatprep.subr.bf16.mxu1 %v5406_v13 }
  0xbb   : > { %2655 = vmatprep.mubr.bf16.mxu1 %v5722_v35  ;;  %v7445_v35 = vshll.u32 %v5787_v39, 16  ;;  %v1142_v39 = vsel %vm795_vm1, %v5849_v37, %v1141_v60  ;;  %v1161_v9 = vrot.slane %v1159_v63, 7  ;;  %v528_v1 = vsel %vm342_vm2, %v523_v32, %v527_v2 }
  0xbc   : > { %v1181_v32 = vshll.u32 %v528_v1, 16 }
  0xbd   : > { %v1106_v25 = vor.u32 %v5936_v54, %v7445_v35  ;;  %v1162_v35 = vshll.u32 %v520_v42, 16  ;;  %v1155_v42 = vrot.slane %v513_v21, 7 }
  0xbe   : > { %1871 = vmatmul.mubr.bf16.gmra.mrb[56].mxu0 %v5931_v47 }
  0xbf   : > { %1877 = vmatprep.mubr.bf16.mxu0 %v5939_v50  ;;  %v5958_v49 = vsel %vm795_vm1, %v1086_v61, %v1106_v25  ;;  %v1164_v61 = vor.u32 %v1162_v35, %v1161_v9  ;;  %v1178_v25 = vshrl.u32 %v528_v1, 16  ;;  %v5979_v35 = vld [vmem:[#allocation2 + $0xf0] sm:$0xff]  ;;  %v5989_v1 = vld [vmem:[%s7228_s1 + $0x140] sm:$0xff]  }
  0xc0   : > { %7446 = vst [vmem:[#allocation47_spill] sm:$0xff] %v5958_v49  ;;  %4573 = vmatprep.subr.bf16.mxu0 %v5989_v1 }
  0xc1   : > { %v5975_v60 = vsel %vm795_vm1, %v1138_v11, %v1164_v61  ;;  %v1180_v63 = vrot.slane %v1178_v25, 7  ;;  %v1174_v25 = vrot.slane %v521_v28, 7 }
  0xc2   : > { %2656 = vmatmul.mubr.bf16.gmra.mrb[72].mxu1 %v5737_v53  ;;  %v5965_v53 = vld [vmem:[#allocation2 + $0xe8] sm:$0xff] }
  0xc3   : > { %2662 = vmatprep.mubr.bf16.mxu1 %v5746_v14  ;;  %v7300_v7 = vshll.u32 %v5965_v53, 16  ;;  %v531_v14 = vor.u32 %v529_v8, %v527_v2  ;;  %v7302_v2 = vshll.u32 %v5979_v35, 16 }
  0xc5   : > { %v535_v37 = vrot.slane %v7300_v7, 1  ;;  %v7447_v7 = vshll.u32 %v5875_v38, 16  ;;  %v543_v61 = vrot.slane %v7302_v2, 1  ;;  %v4812_v38 = vld [vmem:[%s7228_s1 + $0x1e8] sm:$0xff]  }
  0xc6   : > { %1878 = vmatmul.mubr.bf16.gmra.mrb[60].mxu0 %v5958_v49  ;;  %3421 = vmatpush1.bf16.msra.mxu1 %v4812_v38 }
  0xc7   : > { %1884 = vmatprep.mubr.bf16.mxu0 %v1142_v39  ;;  %v536_v55 = vsel %vm342_vm2, %v531_v14, %v535_v37  ;;  %v537_v39 = vshrl.u32 %v5965_v53, 16  ;;  %v1156_v21 = vor.u32 %v1155_v42, %v7447_v7  ;;  %3422 = vmatprep.subr.bf16.mxu1 %v5406_v13 }
  0xc8   : > { %v1197_v11 = vshrl.u32 %v536_v55, 16  ;;  %v1200_v2 = vshll.u32 %v536_v55, 16 }
  0xc9   : > { %v539_v14 = vor.u32 %v537_v39, %v535_v37  ;;  %v6000_v7 = vsel %vm795_vm1, %v5772_v16, %v1156_v21 }
  0xca   : > { %2663 = vmatmul.mubr.bf16.gmra.mrb[76].mxu1 %v5775_v0  ;;  %v545_v0 = vshrl.u32 %v5979_v35, 16 }
  0xcb   : > { %2669 = vmatprep.mubr.bf16.mxu1 %v5662_v26  ;;  %v1183_v26 = vor.u32 %v1181_v32, %v1180_v63  ;;  %v1199_v32 = vrot.slane %v1197_v11, 7  ;;  %v551_v11 = vrot.slane %v7311_v58, 1  ;;  %v553_v58 = vshrl.u32 %v6008_v10, 16 }
  0xcc   : > { %v547_v21 = vor.u32 %v545_v0, %v543_v61 }
  0xcd   : > { %v6004_v37 = vsel %vm795_vm1, %v1161_v9, %v1183_v26  ;;  %v7449_v26 = vshll.u32 %v5914_v12, 16  ;;  %v1202_v9 = vor.u32 %v1200_v2, %v1199_v32 }
  0xce   : > { %1885 = vmatmul.mubr.bf16.gmra.mrb[64].mxu0 %v5809_v30  ;;  %7448 = vst [vmem:[#allocation48_spill] sm:$0xff] %v6004_v37 }
  0xcf   : > { %1891 = vmatprep.mubr.bf16.mxu0 %v5975_v60  ;;  %v1175_v28 = vor.u32 %v1174_v25, %v7449_v26  ;;  %v6025_v51 = vsel %vm795_vm1, %v1180_v63, %v1202_v9  ;;  %v555_v9 = vor.u32 %v553_v58, %v551_v11 }
  0xd0   : > { %7451 = vst [vmem:[#allocation50_spill] sm:$0xff] %v6025_v51 }
  0xd1   : > { %v6021_v38 = vsel %vm795_vm1, %v1155_v42, %v1175_v28 }
  0xd2   : > { %2670 = vmatmul.mubr.bf16.gmra.mrb[80].mxu1 %v5824_v22  ;;  %v544_v22 = vsel %vm342_vm2, %v539_v14, %v543_v61  ;;  %v490_v14 = vshrl.u32 %v5837_v4, 16  ;;  %7450 = vst [vmem:[#allocation49_spill] sm:$0xff] %v6021_v38  ;;  %v552_v61 = vsel %vm342_vm2, %v547_v21, %v551_v11 }
  0xd3   : > { %2676 = vmatprep.mubr.bf16.mxu1 %v5699_v52  ;;  %v1216_v55 = vshrl.u32 %v544_v22, 16  ;;  %v1193_v52 = vrot.slane %v529_v8, 7  ;;  %v1219_v2 = vshll.u32 %v544_v22, 16  ;;  %v7452_v8 = vshll.u32 %v5943_v20, 16 }
  0xd4   : > { %v492_v26 = vor.u32 %v490_v14, %v5857_v48  ;;  %v1235_v28 = vshrl.u32 %v552_v61, 16  ;;  %v1212_v20 = vrot.slane %v537_v39, 7  ;;  %v1238_v11 = vshll.u32 %v552_v61, 16 }
  0xd5   : > { %v1218_v12 = vrot.slane %v1216_v55, 7  ;;  %v1194_v42 = vor.u32 %v1193_v52, %v7452_v8  ;;  %v4816_v55 = vld [vmem:[%s7228_s1 + $0x1f0] sm:$0xff]   ;;  %v7455_v39 = vshll.u32 %v5965_v53, 16 }
  0xd6   : > { %1892 = vmatmul.mubr.bf16.gmra.mrb[68].mxu0 %v6000_v7  ;;  %v497_v22 = vsel %vm342_vm2, %v492_v26, %v5791_v44  ;;  %v1237_v26 = vrot.slane %v1235_v28, 7  ;;  %3423 = vmatpush1.bf16.msra.mxu1 %v4816_v55  ;;  %v1231_v55 = vrot.slane %v545_v0, 7 }
  0xd7   : > { %1898 = vmatprep.mubr.bf16.mxu0 %v6004_v37  ;;  %v1221_v63 = vor.u32 %v1219_v2, %v1218_v12  ;;  %v6046_v21 = vsel %vm795_vm1, %v1174_v25, %v1194_v42  ;;  %v2309_v8 = vshrl.u32 %v497_v22, 16  ;;  %3424 = vmatprep.subr.bf16.mxu1 %v5406_v13  ;;  %v1213_v25 = vor.u32 %v1212_v20, %v7455_v39 }
  0xd8   : > { %7453 = vst [vmem:[#allocation51_spill] sm:$0xff] %v6046_v21  ;;  %v2312_v42 = vshll.u32 %v497_v22, 16 }
  0xd9   : > { %v6050_v2 = vsel %vm795_vm1, %v1199_v32, %v1221_v63  ;;  %v1240_v32 = vor.u32 %v1238_v11, %v1237_v26  ;;  %v6062_v61 = vrot.slane %v2309_v8, 7  ;;  %v6070_v13 = vsel %vm795_vm1, %v1193_v52, %v1213_v25 }
  0xda   : > { %2677 = vmatmul.mubr.bf16.gmra.mrb[84].mxu1 %v5669_v24  ;;  %v7314_v24 = vshll.u32 %v6030_v43, 16  ;;  %7454 = vst [vmem:[#allocation52_spill] sm:$0xff] %v6050_v2  ;;  %7457 = vst [vmem:[#allocation54_spill] sm:$0xff] %v6070_v13  ;;  %v7459_v52 = vshll.u32 %v5979_v35, 16  ;;  %v6083_v25 = vrot.slane %v490_v14, 7  ;;  %v7463_v35 = vshll.u32 %v5837_v4, 16 }
  0xdb   : > { %2683 = vmatprep.mubr.bf16.mxu1 %v5869_v62  ;;  %v6054_v62 = vld [vmem:[#allocation2 + $0x108] sm:$0xff]  ;;  %7456 = vst [vmem:[#allocation53_spill] sm:$0xff] %v6062_v61  ;;  %v6074_v53 = vsel %vm795_vm1, %v1218_v12, %v1240_v32  ;;  %v2314_v11 = vor.u32 %v2312_v42, %v6062_v61 }
  0xdc   : > { %v559_v48 = vrot.slane %v7314_v24, 1  ;;  %v7318_v18 = vshll.u32 %v6054_v62, 16  ;;  %7458 = vst [vmem:[#allocation55_spill] sm:$0xff] %v6074_v53  ;;  %v1232_v39 = vor.u32 %v1231_v55, %v7459_v52  ;;  %7460 = vst [vmem:[#allocation56_spill] sm:$0xff] %v6083_v25  ;;  %v2306_v14 = vor.u32 %v6083_v25, %v7463_v35 }
  0xdd   : > { %v6087_v0 = vsel %vm795_vm1, %v5909_v34, %v2314_v11 }
  0xde   : > { %1899 = vmatmul.mubr.bf16.gmra.mrb[72].mxu0 %v6021_v38  ;;  %v560_v24 = vsel %vm342_vm2, %v555_v9, %v559_v48  ;;  %v6066_v9 = vrot.slane %v7318_v18, 1  ;;  %7461 = vst [vmem:[#allocation57_spill] sm:$0xff] %v6087_v0  ;;  %v6094_v42 = vsel %vm795_vm1, %v1212_v20, %v1232_v39  ;;  %v6105_v18 = vld [vmem:[#allocation2 + $0x138] sm:$0xff]  ;;  %v6111_v4 = vsel %vm795_vm1, %v5936_v54, %v2306_v14 }
  0xdf   : > { %1905 = vmatprep.mubr.bf16.mxu0 %v6025_v51  ;;  %v1254_v63 = vshrl.u32 %v560_v24, 16  ;;  %v1257_v8 = vshll.u32 %v560_v24, 16  ;;  %v4819_v24 = vld [vmem:[%s7228_s1 + $0x1f8] sm:$0xff]   ;;  %7462 = vst [vmem:[#allocation58_spill] sm:$0xff] %v6094_v42  ;;  %v7320_v20 = vshll.u32 %v6105_v18, 16  ;;  %7465 = vst [vmem:[#allocation60_spill] sm:$0xff] %v6111_v4 }
  0xe0   : > { %3425 = vmatpush1.bf16.msra.mxu1 %v4819_v24  ;;  %v600_v35 = vshrl.u32 %v6105_v18, 16 }
  0xe1   : > { %v1256_v22 = vrot.slane %v1254_v63, 7  ;;  %v1250_v63 = vrot.slane %v553_v58, 7  ;;  %v7466_v58 = vshll.u32 %v6008_v10, 16 }
  0xe2   : > { %2684 = vmatmul.mubr.bf16.gmra.mrb[88].mxu1 %v5898_v15  ;;  %v561_v15 = vshrl.u32 %v6030_v43, 16 }
  0xe3   : > { %2690 = vmatprep.mubr.bf16.mxu1 %v5907_v36  ;;  %v1259_v12 = vor.u32 %v1257_v8, %v1256_v22  ;;  %v4844_v8 = vld [vmem:[#allocation2 + $0x130] sm:$0xff] }
  0xe4   : > { %v563_v28 = vor.u32 %v561_v15, %v559_v48  ;;  %v592_v52 = vshrl.u32 %v4844_v8, 16  ;;  %v6125_v54 = vrot.slane %v561_v15, 7 }
  0xe5   : > { %v6101_v34 = vsel %vm795_vm1, %v1237_v26, %v1259_v12  ;;  %v1251_v26 = vor.u32 %v1250_v63, %v7466_v58  ;;  %v598_v12 = vrot.slane %v7320_v20, 1 }
  0xe6   : > { %1906 = vmatmul.mubr.bf16.gmra.mrb[76].mxu0 %v6046_v21  ;;  %v568_v48 = vsel %vm342_vm2, %v563_v28, %v6066_v9  ;;  %7464 = vst [vmem:[#allocation59_spill] sm:$0xff] %v6101_v34  ;;  %v594_v39 = vor.u32 %v592_v52, %v5820_v45  ;;  %v6132_v45 = vld [vmem:[#allocation2 + $0x140] sm:$0xff]  ;;  %v1319_v20 = vrot.slane %v592_v52, 7 }
  0xe7   : > { %1912 = vmatprep.mubr.bf16.mxu0 %v6050_v2  ;;  %v1273_v32 = vshrl.u32 %v568_v48, 16  ;;  %v1276_v11 = vshll.u32 %v568_v48, 16  ;;  %v7319_v14 = vshll.u32 %v6132_v45, 16 }
  0xe8   : > { %v599_v10 = vsel %vm342_vm2, %v594_v39, %v598_v12  ;;  %v608_v39 = vshrl.u32 %v6132_v45, 16 }
  0xe9   : > { %v6103_v28 = vrot.slane %v1273_v32, 7  ;;  %v6122_v32 = vsel %vm795_vm1, %v1231_v55, %v1251_v26  ;;  %v7469_v55 = vshll.u32 %v6030_v43, 16  ;;  %v1326_v26 = vshll.u32 %v599_v10, 16 }
  0xea   : > { %2691 = vmatmul.mubr.bf16.gmra.mrb[92].mxu1 %v5931_v47  ;;  %7467 = vst [vmem:[#allocation61_spill] sm:$0xff] %v6122_v32 }
  0xeb   : > { %2697 = vmatprep.mubr.bf16.mxu1 %v5939_v50  ;;  %v1278_v48 = vor.u32 %v1276_v11, %v6103_v28  ;;  %v1270_v15 = vor.u32 %v6125_v54, %v7469_v55  ;;  %v602_v11 = vor.u32 %v600_v35, %v598_v12  ;;  %v6151_v55 = vld [vmem:[#allocation2 + $0x148] sm:$0xff] }
  0xec   : > { %v7324_v12 = vshll.u32 %v6151_v55, 16 }
  0xed   : > { %v6128_v24 = vsel %vm795_vm1, %v1256_v22, %v1278_v48  ;;  %v606_v22 = vrot.slane %v7319_v14, 1  ;;  %v6144_v8 = vsel %vm795_vm1, %v1250_v63, %v1270_v15 }
  0xee   : > { %1913 = vmatmul.mubr.bf16.gmra.mrb[80].mxu0 %v6070_v13  ;;  %7468 = vst [vmem:[#allocation62_spill] sm:$0xff] %v6128_v24  ;;  %7470 = vst [vmem:[#allocation63_spill] sm:$0xff] %v6144_v8 }
  0xef   : > { %1919 = vmatprep.mubr.bf16.mxu0 %v6074_v53  ;;  %v607_v43 = vsel %vm342_vm2, %v602_v11, %v606_v22  ;;  %v614_v11 = vrot.slane %v7324_v12, 1 }
  0xf2   : > { %2698 = vmatmul.mubr.bf16.gmra.mrb[96].mxu1 %v5958_v49 }
  0xf3   : > { %2704 = vmatprep.mubr.bf16.mxu1 %v6087_v0 }
  0xf6   : > { %1920 = vmatmul.mubr.bf16.gmra.mrb[84].mxu0 %v6094_v42 }
  0xf7   : > { %1926 = vmatprep.mubr.bf16.mxu0 %v6101_v34 }
  0xfa   : > { %2705 = vmatmul.mubr.bf16.gmra.mrb[100].mxu1 %v6111_v4 }
  0xfb   : > { %2711 = vmatprep.mubr.bf16.mxu1 %v5975_v60  ;;  %v1323_v60 = vshrl.u32 %v599_v10, 16  ;;  %v1342_v10 = vshrl.u32 %v607_v43, 16 }
  0xfd   : > { %v1325_v58 = vrot.slane %v1323_v60, 7  ;;  %v610_v60 = vor.u32 %v608_v39, %v606_v22  ;;  %v1344_v25 = vrot.slane %v1342_v10, 7  ;;  %v7328_v22 = vshrl.u32 %v6151_v55, 16 }
  0xfe   : > { %1927 = vmatmul.mubr.bf16.gmra.mrb[88].mxu0 %v6122_v32 }
  0xff   : > { %1933 = vmatprep.mubr.bf16.mxu0 %v6128_v24  ;;  %v1328_v15 = vor.u32 %v1326_v26, %v1325_v58  ;;  %v6170_v26 = vld [vmem:[#allocation2 + $0x150] sm:$0xff] }
 0x102   : > { %2712 = vmatmul.mubr.bf16.gmra.mrb[104].mxu1 %v6000_v7 }
 0x103   : > { %2718 = vmatprep.mubr.bf16.mxu1 %v6004_v37  ;;  %v6164_v37 = vsel %vm795_vm1, %v5841_v31, %v1328_v15  ;;  %v7471_v31 = vshll.u32 %v5233_v3, 16  ;;  %v7332_v3 = vshrl.u32 %v6170_v26, 16 }
 0x105   : > { %v6147_v48 = vpop.f32.mrb[0].mxu1 }
 0x106   : > { %v6154_v14 = vpop.f32.mrb[1].mxu1  ;;  %1934 = vmatmul.mubr.bf16.gmra.mrb[92].mxu0 %v6144_v8 }
 0x107   : > { %v4536_v7 = vpop.f32.mrb[2].mxu1  ;;  %1940 = vmatprep.mubr.bf16.mxu0 %v5862_v40  ;;  %v615_v40 = vsel %vm342_vm2, %v610_v60, %v614_v11  ;;  %v618_v60 = vor.u32 %v7328_v22, %v614_v11  ;;  %v6193_v11 = vld [vmem:[#allocation2 + $0x158] sm:$0xff] }
 0x108   : > { %v2118_v63 = vpop.f32.mrb[3].mxu1  ;;  %v1345_v7 = vshll.u32 %v607_v43, 16  ;;  %v1320_v43 = vor.u32 %v1319_v20, %v7471_v31 }
 0x109   : > { %v7327_v63 = vshll.u32 %v6170_v26, 16 }
 0x10a   : > { %2719 = vmatmul.mubr.bf16.gmra.mrb[108].mxu1 %v6021_v38  ;;  %v1347_v10 = vor.u32 %v1345_v7, %v1344_v25 }
 0x10b   : > { %2725 = vmatprep.mubr.bf16.mxu1 %v6025_v51  ;;  %v1361_v51 = vshrl.u32 %v615_v40, 16  ;;  %v622_v38 = vrot.slane %v7327_v63, 1 }
 0x10c   : > { %v6191_v7 = vsel %vm795_vm1, %v1325_v58, %v1347_v10  ;;  %v7473_v58 = vshll.u32 %v6105_v18, 16  ;;  %v1357_v18 = vrot.slane %v608_v39, 7 }
 0x10d   : > { %v6166_v4 = vpop.f32.mrb[4].mxu1  ;;  %7472 = vst [vmem:[#allocation64_spill] sm:$0xff] %v6191_v7  ;;  %v1363_v31 = vrot.slane %v1361_v51, 7  ;;  %v626_v63 = vor.u32 %v7332_v3, %v622_v38 }
 0x10e   : > { %v6173_v12 = vpop.f32.mrb[5].mxu1  ;;  %1941 = vmatmul.mubr.bf16.gmra.mrb[96].mxu0 %v5809_v30  ;;  %v6186_v30 = vsel %vm795_vm1, %v5772_v16, %v1320_v43 }
 0x10f   : > { %v4540_v52 = vpop.f32.mrb[6].mxu1  ;;  %1947 = vmatprep.mubr.bf16.mxu0 %v6164_v37 }
 0x110   : > { %v2132_v15 = vpop.f32.mrb[7].mxu1  ;;  %v1338_v52 = vrot.slane %v600_v35, 7 }
 0x111   : > { %v1364_v15 = vshll.u32 %v615_v40, 16 }
 0x112   : > { %2726 = vmatmul.mubr.bf16.gmra.mrb[112].mxu1 %v6046_v21  ;;  %v623_v21 = vsel %vm342_vm2, %v618_v60, %v622_v38  ;;  %v1339_v43 = vor.u32 %v1338_v52, %v7473_v58  ;;  %v7335_v60 = vshrl.u32 %v6054_v62, 16 }
 0x113   : > { %2732 = vmatprep.mubr.bf16.mxu1 %v6050_v2  ;;  %v1366_v40 = vor.u32 %v1364_v15, %v1363_v31  ;;  %v1380_v10 = vshrl.u32 %v623_v21, 16  ;;  %v7474_v2 = vshll.u32 %v6193_v11, 16 }
 0x115   : > { %v6196_v22 = vpop.f32.mrb[8].mxu1  ;;  %v630_v61 = vrot.slane %v7474_v2, 1  ;;  %v6216_v58 = vsel %vm795_vm1, %v1344_v25, %v1366_v40  ;;  %v1382_v15 = vrot.slane %v1380_v10, 7  ;;  %v571_v2 = vor.u32 %v7335_v60, %v6066_v9 }
 0x116   : > { %v6199_v16 = vpop.f32.mrb[9].mxu1  ;;  %1948 = vmatmul.mubr.bf16.gmra.mrb[100].mxu0 %v6186_v30  ;;  %7476 = vst [vmem:[#allocation66_spill] sm:$0xff] %v6216_v58 }
 0x117   : > { %v4544_v35 = vpop.f32.mrb[10].mxu1  ;;  %1954 = vmatprep.mubr.bf16.mxu0 %v6191_v7  ;;  %v631_v38 = vsel %vm342_vm2, %v626_v63, %v630_v61  ;;  %v576_v60 = vsel %vm342_vm2, %v571_v2, %v5791_v44 }
 0x118   : > { %v2146_v51 = vpop.f32.mrb[11].mxu1  ;;  %v6212_v35 = vsel %vm795_vm1, %v1319_v20, %v1339_v43  ;;  %v6225_v20 = vld [vmem:[#allocation2 + $0x160] sm:$0xff]  ;;  %v1399_v40 = vshrl.u32 %v631_v38, 16  ;;  %v1402_v2 = vshll.u32 %v631_v38, 16 }
 0x119   : > { %7475 = vst [vmem:[#allocation65_spill] sm:$0xff] %v6212_v35  ;;  %v1383_v51 = vshll.u32 %v623_v21, 16  ;;  %v7477_v21 = vshll.u32 %v6132_v45, 16  ;;  %v7479_v0 = vshll.u32 %v6225_v20, 16 }
 0x11a   : > { %2733 = vmatmul.mubr.bf16.gmra.mrb[116].mxu1 %v6070_v13  ;;  %v7339_v13 = vshrl.u32 %v6193_v11, 16 }
 0x11b   : > { %2739 = vmatprep.mubr.bf16.mxu1 %v6074_v53  ;;  %v1358_v63 = vor.u32 %v1357_v18, %v7477_v21  ;;  %v1385_v53 = vor.u32 %v1383_v51, %v1382_v15  ;;  %v638_v49 = vrot.slane %v7479_v0, 1  ;;  %v7481_v51 = vshrl.u32 %v6151_v55, 16 }
 0x11c   : > { %v634_v43 = vor.u32 %v7339_v13, %v630_v61  ;;  %v2328_v13 = vshrl.u32 %v576_v60, 16 }
 0x11d   : > { %v6219_v3 = vpop.f32.mrb[12].mxu1  ;;  %v6244_v45 = vsel %vm795_vm1, %v1338_v52, %v1358_v63  ;;  %v1376_v21 = vrot.slane %v7481_v51, 7  ;;  %v6250_v61 = vsel %vm795_vm1, %v1363_v31, %v1385_v53  ;;  %v7484_v53 = vshll.u32 %v6151_v55, 16 }
 0x11e   : > { %v6228_v39 = vpop.f32.mrb[13].mxu1  ;;  %1955 = vmatmul.mubr.bf16.gmra.mrb[104].mxu0 %v6212_v35  ;;  %7480 = vst [vmem:[#allocation68_spill] sm:$0xff] %v6244_v45  ;;  %7482 = vst [vmem:[#allocation69_spill] sm:$0xff] %v6250_v61  ;;  %v639_v63 = vsel %vm342_vm2, %v634_v43, %v638_v49  ;;  %v6265_v0 = vrot.slane %v2328_v13, 7 }
 0x11f   : > { %v4548_v25 = vpop.f32.mrb[14].mxu1  ;;  %1961 = vmatprep.mubr.bf16.mxu0 %v6216_v58  ;;  %v1377_v31 = vor.u32 %v1376_v21, %v7484_v53 }
 0x120   : > { %v2160_v10 = vpop.f32.mrb[15].mxu1  ;;  %7485 = vst [vmem:[#allocation71_spill] sm:$0xff] %v6265_v0 }
 0x121   : > { %v6234_v9 = vpop.f32.mrb[0].mxu0  ;;  %v1401_v10 = vrot.slane %v1399_v40, 7 }
 0x122   : > { %7478 = vst [vmem:[#allocation67_spill] sm:$0xff] %v6234_v9  ;;  %2740 = vmatmul.mubr.bf16.gmra.mrb[120].mxu1 %v6094_v42  ;;  %v1776_v25 = vpop.f32.mrb[1].mxu0  ;;  %v6253_v42 = vld [vmem:[#allocation2 + $0x168] sm:$0xff] }
 0x123   : > { %v1777_v50 = vpop.f32.mrb[2].mxu0  ;;  %2746 = vmatprep.mubr.bf16.mxu1 %v6101_v34  ;;  %v1404_v40 = vor.u32 %v1402_v2, %v1401_v10  ;;  %v7486_v34 = vshrl.u32 %v6225_v20, 16  ;;  %v7487_v43 = vshll.u32 %v6253_v42, 16  ;;  %v6277_v2 = vsel %vm795_vm1, %v1357_v18, %v1377_v31 }
 0x124   : > { %v1778_v9 = vpop.f32.mrb[3].mxu0  ;;  %v1418_v50 = vshrl.u32 %v639_v63, 16  ;;  %7489 = vst [vmem:[#allocation73_spill] sm:$0xff] %v6277_v2 }
 0x125   : > { %v6256_v52 = vpop.f32.mrb[16].mxu1  ;;  %v2331_v9 = vshll.u32 %v576_v60, 16  ;;  %v642_v47 = vor.u32 %v7486_v34, %v638_v49  ;;  %v6271_v44 = vrot.slane %v7487_v43, 1  ;;  %v6281_v13 = vsel %vm795_vm1, %v1382_v15, %v1404_v40 }
 0x126   : > { %7483 = vst [vmem:[#allocation70_spill] sm:$0xff] %v6256_v52  ;;  %v6259_v25 = vpop.f32.mrb[17].mxu1  ;;  %1962 = vmatmul.mubr.bf16.gmra.mrb[108].mxu0 %v6244_v45  ;;  %7490 = vst [vmem:[#allocation74_spill] sm:$0xff] %v6281_v13  ;;  %v7491_v49 = vshrl.u32 %v6170_v26, 16  ;;  %v1421_v43 = vshll.u32 %v639_v63, 16  ;;  %v7494_v15 = vshrl.u32 %v6054_v62, 16 }
 0x127   : > { %v4552_v38 = vpop.f32.mrb[18].mxu1  ;;  %1968 = vmatprep.mubr.bf16.mxu0 %v6250_v61  ;;  %v2333_v53 = vor.u32 %v2331_v9, %v6265_v0  ;;  %v7496_v9 = vshll.u32 %v6170_v26, 16 }
 0x128   : > { %v2174_v51 = vpop.f32.mrb[19].mxu1  ;;  %v1395_v34 = vrot.slane %v7491_v49, 7  ;;  %v6295_v31 = vrot.slane %v7494_v15, 7 }
 0x129   : > { %v6273_v36 = vpop.f32.mrb[4].mxu0  ;;  %v1420_v51 = vrot.slane %v1418_v50, 7 }
 0x12a   : > { %7488 = vst [vmem:[#allocation72_spill] sm:$0xff] %v6273_v36  ;;  %2747 = vmatmul.mubr.bf16.gmra.mrb[124].mxu1 %v6122_v32  ;;  %v1783_v38 = vpop.f32.mrb[5].mxu0  ;;  %7495 = vst [vmem:[#allocation77_spill] sm:$0xff] %v6295_v31  ;;  %v1396_v50 = vor.u32 %v1395_v34, %v7496_v9  ;;  %v7500_v9 = vshll.u32 %v6054_v62, 16 }
 0x12b   : > { %v1784_v55 = vpop.f32.mrb[6].mxu0  ;;  %2753 = vmatprep.mubr.bf16.mxu1 %v6128_v24  ;;  %v647_v38 = vsel %vm342_vm2, %v642_v47, %v6271_v44  ;;  %v6302_v47 = vsel %vm795_vm1, %v6103_v28, %v2333_v53  ;;  %v6306_v24 = vld [vmem:[#allocation2] sm:$0xff]  ;;  %v7501_v53 = vshrl.u32 %v6193_v11, 16 }
 0x12c   : > { %v1785_v60 = vpop.f32.mrb[7].mxu0  ;;  %v1437_v63 = vshrl.u32 %v647_v38, 16  ;;  %7497 = vst [vmem:[#allocation78_spill] sm:$0xff] %v6302_v47  ;;  %7499 = vst [vmem:[#allocation80_spill] sm:$0xff] %v6306_v24  ;;  %v6309_v15 = vrot.slane %v6306_v24, 1  ;;  %v6316_v28 = vsel %vm795_vm1, %v1376_v21, %v1396_v50 }
 0x12d   : > { %v6288_v55 = vpop.f32.mrb[20].mxu1  ;;  %v1423_v60 = vor.u32 %v1421_v43, %v1420_v51  ;;  %v1414_v43 = vrot.slane %v7501_v53, 7  ;;  %v4854_v53 = vld [vmem:[#allocation2 + $0x18] sm:$0xff] }
 0x12e   : > { %7492 = vst [vmem:[#allocation75_spill] sm:$0xff] %v6288_v55  ;;  %v6290_v18 = vpop.f32.mrb[21].mxu1  ;;  %1969 = vmatmul.mubr.bf16.gmra.mrb[112].mxu0 %v6277_v2  ;;  %v1440_v55 = vshll.u32 %v647_v38, 16  ;;  %v7505_v38 = vshll.u32 %v6193_v11, 16 }
 0x12f   : > { %7493 = vst [vmem:[#allocation76_spill] sm:$0xff] %v6290_v18  ;;  %v4556_v40 = vpop.f32.mrb[22].mxu1  ;;  %1975 = vmatprep.mubr.bf16.mxu0 %v6281_v13 }
 0x130   : > { %v2188_v49 = vpop.f32.mrb[23].mxu1  ;;  %v4853_v40 = vld [vmem:[#allocation2 + $0x10] sm:$0xff] }
 0x131   : > { %v6304_v0 = vpop.f32.mrb[8].mxu0  ;;  %v705_v36 = vrot.slane %v4853_v40, 1  ;;  %v2325_v49 = vor.u32 %v6295_v31, %v7500_v9 }
 0x132   : > { %7498 = vst [vmem:[#allocation79_spill] sm:$0xff] %v6304_v0  ;;  %2754 = vmatmul.mubr.bf16.gmra.mrb[128].mxu1 %v6144_v8  ;;  %v1790_v26 = vpop.f32.mrb[9].mxu0  ;;  %v6321_v0 = vrot.slane %v1437_v63, 7  ;;  %v6324_v8 = vsel %vm795_vm1, %v1401_v10, %v1423_v60  ;;  %v1415_v10 = vor.u32 %v1414_v43, %v7505_v38 }
 0x133   : > { %v1791_v32 = vpop.f32.mrb[10].mxu0  ;;  %2760 = vmatprep.mubr.bf16.mxu1 %v6302_v47  ;;  %v706_v62 = vsel %vm703_vm0, %v6309_v15, %v705_v36  ;;  %v6335_v50 = vsel %vm795_vm1, %v6125_v54, %v2325_v49  ;;  %v4855_v47 = vld [vmem:[#allocation2 + $0x20] sm:$0xff] }
 0x134   : > { %v1792_v40 = vpop.f32.mrb[11].mxu0  ;;  %7504 = vst [vmem:[#allocation83_spill] sm:$0xff] %v6335_v50  ;;  %v1442_v63 = vor.u32 %v1440_v55, %v6321_v0  ;;  %v820_v9 = vshrl.u32 %v706_v62, 16  ;;  %v6345_v49 = vsel %vm795_vm1, %v1395_v34, %v1415_v10  ;;  %v7507_v55 = vshrl.u32 %v6225_v20, 16 }
 0x135   : > { %v6326_v26 = vpop.f32.mrb[24].mxu1  ;;  %v707_v40 = vrot.slane %v4854_v53, 1  ;;  %v816_v53 = vshrl.u32 %v6309_v15, 16 }
 0x136   : > { %7502 = vst [vmem:[#allocation81_spill] sm:$0xff] %v6326_v26  ;;  %v6330_v32 = vpop.f32.mrb[25].mxu1  ;;  %1976 = vmatmul.mubr.bf16.gmra.mrb[116].mxu0 %v6316_v28  ;;  %v709_v26 = vrot.slane %v4855_v47, 1  ;;  %v6349_v11 = vsel %vm795_vm1, %v1420_v51, %v1442_v63  ;;  %v6353_v38 = vrot.slane %v7507_v55, 7  ;;  %v822_v47 = vrot.slane %v820_v9, 7 }
 0x137   : > { %7503 = vst [vmem:[#allocation82_spill] sm:$0xff] %v6330_v32  ;;  %v4560_v21 = vpop.f32.mrb[26].mxu1  ;;  %1982 = vmatprep.mubr.bf16.mxu0 %v6324_v8  ;;  %v7510_v51 = vshll.u32 %v6225_v20, 16 }
 0x138   : > { %v2202_v60 = vpop.f32.mrb[27].mxu1  ;;  %v710_v34 = vsel %vm703_vm0, %v707_v40, %v709_v26 }
 0x139   : > { %v6341_v31 = vpop.f32.mrb[12].mxu0  ;;  %v1434_v63 = vor.u32 %v6353_v38, %v7510_v51  ;;  %v861_v52 = vshll.u32 %v710_v34, 16 }
 0x13a   : > { %7506 = vst [vmem:[#allocation84_spill] sm:$0xff] %v6341_v31  ;;  %2761 = vmatmul.mubr.bf16.gmra.mrb[132].mxu1 %v6335_v50  ;;  %v1797_v21 = vpop.f32.mrb[13].mxu0  ;;  %v823_v31 = vshll.u32 %v706_v62, 16  ;;  %v6367_v62 = vrot.slane %v816_v53, 7  ;;  %v4856_v50 = vld [vmem:[#allocation2 + $0x28] sm:$0xff] }
 0x13b   : > { %v1798_v54 = vpop.f32.mrb[14].mxu0  ;;  %2767 = vmatprep.mubr.bf16.mxu1 %v6164_v37  ;;  %v708_v21 = vsel %vm703_vm0, %v705_v36, %v707_v40  ;;  %v6373_v20 = vsel %vm795_vm1, %v1414_v43, %v1434_v63 }
 0x13c   : > { %v1799_v60 = vpop.f32.mrb[15].mxu0  ;;  %v839_v55 = vshrl.u32 %v708_v21, 16  ;;  %v825_v36 = vor.u32 %v823_v31, %v822_v47  ;;  %7512 = vst [vmem:[#allocation88_spill] sm:$0xff] %v6373_v20  ;;  %v842_v53 = vshll.u32 %v708_v21, 16 }
 0x13d   : > { %v6357_v54 = vpop.f32.mrb[28].mxu1  ;;  %v858_v60 = vshrl.u32 %v710_v34, 16 }
 0x13e   : > { %7508 = vst [vmem:[#allocation85_spill] sm:$0xff] %v6357_v54  ;;  %v6360_v10 = vpop.f32.mrb[29].mxu1  ;;  %1983 = vmatmul.mubr.bf16.gmra.mrb[120].mxu0 %v6345_v49  ;;  %v711_v54 = vrot.slane %v4856_v50, 1  ;;  %v841_v51 = vrot.slane %v839_v55, 7  ;;  %v826_v31 = vsel %vm795_vm1, %v6367_v62, %v825_v36  ;;  %v4858_v36 = vld [vmem:[#allocation2 + $0x38] sm:$0xff] }
 0x13f   : > { %7509 = vst [vmem:[#allocation86_spill] sm:$0xff] %v6360_v10  ;;  %v4564_v37 = vpop.f32.mrb[30].mxu1  ;;  %1989 = vmatprep.mubr.bf16.mxu0 %v6349_v11  ;;  %v4857_v10 = vld [vmem:[#allocation2 + $0x30] sm:$0xff]  ;;  %v860_v50 = vrot.slane %v858_v60, 7  ;;  %v715_v60 = vrot.slane %v4858_v36, 1 }
 0x140   : > { %v2216_v9 = vpop.f32.mrb[31].mxu1  ;;  %v713_v32 = vrot.slane %v4857_v10, 1  ;;  %v844_v63 = vor.u32 %v842_v53, %v841_v51 }
 0x141   : > { %v6369_v40 = vpop.f32.mrb[16].mxu0 }
 0x142   : > { %7511 = vst [vmem:[#allocation87_spill] sm:$0xff] %v6369_v40  ;;  %2768 = vmatmul.mubr.bf16.gmra.mrb[136].mxu1 %v6186_v30  ;;  %v1804_v37 = vpop.f32.mrb[17].mxu0  ;;  %v712_v40 = vsel %vm703_vm0, %v709_v26, %v711_v54  ;;  %v714_v30 = vsel %vm703_vm0, %v711_v54, %v713_v32  ;;  %v4859_v26 = vld [vmem:[#allocation2 + $0x40] sm:$0xff] }
 0x143   : > { %v1805_v18 = vpop.f32.mrb[18].mxu0  ;;  %2774 = vmatprep.mubr.bf16.mxu1 %v6191_v7  ;;  %v877_v21 = vshrl.u32 %v712_v40, 16  ;;  %v863_v37 = vor.u32 %v861_v52, %v860_v50  ;;  %v717_v7 = vrot.slane %v4859_v26, 1  ;;  %v4813_v52 = vld [vmem:[%s7228_s1 + $0x148] sm:$0xff]   ;;  %v899_v26 = vshll.u32 %v714_v30, 16 }
 0x144   : > { %v1806_v9 = vpop.f32.mrb[19].mxu0 }
 0x145   : > { %v6379_v10 = vpop.f32.mrb[32].mxu1  ;;  %v896_v9 = vshrl.u32 %v714_v30, 16  ;;  %v879_v53 = vrot.slane %v877_v21, 7 }
 0x146   : > { %7513 = vst [vmem:[#allocation89_spill] sm:$0xff] %v6379_v10  ;;  %v6382_v18 = vpop.f32.mrb[33].mxu1  ;;  %1990 = vmatmul.mubr.bf16.gmra.mrb[124].mxu0 %v6373_v20 }
 0x147   : > { %7514 = vst [vmem:[#allocation90_spill] sm:$0xff] %v6382_v18  ;;  %v4568_v43 = vpop.f32.mrb[34].mxu1  ;;  %4509 = vmatprep.mubr.bf16.mxu0 %v826_v31  ;;  %v6389_v18 = vsel %vm795_vm1, %v822_v47, %v844_v63  ;;  %v880_v31 = vshll.u32 %v712_v40, 16  ;;  %v898_v36 = vrot.slane %v896_v9, 7  ;;  %v718_v47 = vsel %vm703_vm0, %v715_v60, %v717_v7 }
 0x148   : > { %v2230_v55 = vpop.f32.mrb[35].mxu1  ;;  %v934_v9 = vshrl.u32 %v718_v47, 16 }
 0x149   : > { %v6385_v34 = vpop.f32.mrb[20].mxu0  ;;  %v6396_v55 = vsel %vm795_vm1, %v841_v51, %v863_v37  ;;  %v882_v21 = vor.u32 %v880_v31, %v879_v53  ;;  %v901_v30 = vor.u32 %v899_v26, %v898_v36 }
 0x14a   : > { %7515 = vst [vmem:[#allocation91_spill] sm:$0xff] %v6385_v34  ;;  %2775 = vmatmul.mubr.bf16.gmra.mrb[140].mxu1 %v6212_v35  ;;  %v1811_v54 = vpop.f32.mrb[21].mxu0 }
 0x14b   : > { %v1812_v10 = vpop.f32.mrb[22].mxu0  ;;  %2781 = vmatprep.mubr.bf16.mxu1 %v6216_v58  ;;  %v716_v54 = vsel %vm703_vm0, %v713_v32, %v715_v60  ;;  %v4814_v32 = vld [vmem:[%s7228_s1 + $0x150] sm:$0xff]   ;;  %v6410_v60 = vld [vmem:[#allocation2 + $0x48] sm:$0xff] }
 0x14c   : > { %v1813_v43 = vpop.f32.mrb[23].mxu0  ;;  %v915_v51 = vshrl.u32 %v716_v54, 16  ;;  %v918_v34 = vshll.u32 %v716_v54, 16 }
 0x14d   : > { %v6399_v10 = vpop.f32.mrb[36].mxu1  ;;  %v6421_v43 = vsel %vm795_vm1, %v879_v53, %v901_v30 }
 0x14e   : > { %7516 = vst [vmem:[#allocation92_spill] sm:$0xff] %v6399_v10  ;;  %v6402_v63 = vpop.f32.mrb[37].mxu1  ;;  %4510 = vmatmul.mubr.bf16.vlgmr.msra.gmra.mrb[128].mxu0 %v6389_v18  ;;  %v917_v26 = vrot.slane %v915_v51, 7 }
 0x14f   : > { %v4572_v40 = vpop.f32.mrb[38].mxu1  ;;  %4574 = vmatpush3.bf16.msra.mxu0 %v5989_v1  ;;  %4513 = vmatprep.mubr.bf16.mxu0 %v6396_v55 }
 0x150   : > { %v2244_v37 = vpop.f32.mrb[39].mxu1  ;;  %4575 = vmatprep.subr.bf16.mxu0 %v4813_v52  ;;  %v4861_v40 = vld [vmem:[#allocation2 + $0x70] sm:$0xff] }
 0x151   : > { %v6413_v58 = vpop.f32.mrb[24].mxu0  ;;  %v726_v1 = vrot.slane %v4861_v40, 1  ;;  %v6417_v37 = vsel %vm795_vm1, %v860_v50, %v882_v21  ;;  %v4815_v40 = vld [vmem:[%s7228_s1 + $0x158] sm:$0xff]   ;;  %v920_v21 = vor.u32 %v918_v34, %v917_v26 }
 0x152   : > { %7517 = vst [vmem:[#allocation93_spill] sm:$0xff] %v6413_v58  ;;  %2782 = vmatmul.mubr.bf16.gmra.mrb[144].mxu1 %v6244_v45  ;;  %v1818_v31 = vpop.f32.mrb[25].mxu0  ;;  %v936_v45 = vrot.slane %v934_v9, 7 }
 0x153   : > { %v1819_v35 = vpop.f32.mrb[26].mxu0  ;;  %4576 = vmatpush3.bf16.msra.mxu0 %v4813_v52  ;;  %2788 = vmatprep.mubr.bf16.mxu1 %v6250_v61  ;;  %v937_v31 = vshll.u32 %v718_v47, 16  ;;  %v727_v54 = vsel %vm703_vm0, %v6309_v15, %v726_v1 }
 0x154   : > { %v1820_v10 = vpop.f32.mrb[27].mxu0  ;;  %4577 = vmatprep.subr.bf16.mxu0 %v4814_v32  ;;  %v7518_v35 = vrot.slane %v6410_v60, 1  ;;  %v984_v9 = vshrl.u32 %v727_v54, 16 }
 0x155   : > { %v6429_v52 = vpop.f32.mrb[40].mxu1  ;;  %v939_v47 = vor.u32 %v937_v31, %v936_v45 }
 0x156   : > { %v720_v50 = vsel %vm703_vm0, %v717_v7, %v7518_v35  ;;  %7519 = vst [vmem:[#allocation94_spill] sm:$0xff] %v6429_v52  ;;  %v2603_v10 = vpop.f32.mrb[41].mxu1  ;;  %4514 = vmatmul.mubr.bf16.gmra.mrb[132].mxu0 %v6417_v37  ;;  %v4817_v7 = vld [vmem:[%s7228_s1 + $0x160] sm:$0xff]   ;;  %v4862_v35 = vld [vmem:[#allocation2 + $0x78] sm:$0xff] }
 0x157   : > { %v2604_v53 = vpop.f32.mrb[42].mxu1  ;;  %4578 = vmatpush3.bf16.msra.mxu0 %v4814_v32  ;;  %4517 = vmatprep.mubr.bf16.mxu0 %v6421_v43  ;;  %v953_v51 = vshrl.u32 %v720_v50, 16  ;;  %v728_v52 = vrot.slane %v4862_v35, 1  ;;  %v7357_v10 = vshrl.u32 %v6253_v42, 16  ;;  %v956_v58 = vshll.u32 %v720_v50, 16  ;;  %v4818_v32 = vld [vmem:[%s7228_s1 + $0x168] sm:$0xff]  }
 0x158   : > { %v2605_v30 = vpop.f32.mrb[43].mxu1  ;;  %4579 = vmatprep.subr.bf16.mxu0 %v4815_v40  ;;  %v7523_v50 = vshll.u32 %v6306_v24, 16 }
 0x159   : > { %v6438_v61 = vpop.f32.mrb[28].mxu0  ;;  %v6444_v30 = vsel %vm795_vm1, %v898_v36, %v920_v21  ;;  %v6447_v31 = vrot.slane %v953_v51, 7  ;;  %v729_v36 = vsel %vm703_vm0, %v726_v1, %v728_v52 }
 0x15a   : > { %7520 = vst [vmem:[#allocation95_spill] sm:$0xff] %v6438_v61  ;;  %2789 = vmatmul.mubr.bf16.gmra.mrb[148].mxu1 %v6277_v2  ;;  %v1825_v34 = vpop.f32.mrb[29].mxu0  ;;  %v6450_v61 = vsel %vm795_vm1, %v917_v26, %v939_v47  ;;  %v650_v26 = vor.u32 %v7357_v10, %v6271_v44  ;;  %v6466_v47 = vrot.slane %v7523_v50, 1  ;;  %v4820_v44 = vld [vmem:[%s7228_s1 + $0x170] sm:$0xff]  }
 0x15b   : > { %v1826_v53 = vpop.f32.mrb[30].mxu0  ;;  %2795 = vmatprep.mubr.bf16.mxu1 %v6281_v13  ;;  %4580 = vmatpush3.bf16.msra.mxu0 %v4815_v40  ;;  %v986_v34 = vrot.slane %v984_v9, 7  ;;  %v7522_v40 = vrot.slane %v5030_v23, 1  ;;  %v958_v1 = vor.u32 %v956_v58, %v6447_v31  ;;  %v1003_v23 = vshrl.u32 %v729_v36, 16 }
 0x15c   : > { %v1827_v35 = vpop.f32.mrb[31].mxu0  ;;  %4581 = vmatprep.subr.bf16.mxu0 %v4817_v7  ;;  %v987_v53 = vshll.u32 %v727_v54, 16  ;;  %7524 = vst [vmem:[#allocation97_spill] sm:$0xff] %v6466_v47 }
 0x15d   : > { %v6456_v21 = vpop.f32.mrb[44].mxu1  ;;  %v731_v51 = vsel %vm703_vm0, %v728_v52, %v7522_v40  ;;  %v6480_v58 = vsel %vm795_vm1, %v936_v45, %v958_v1 }
 0x15e   : > { %7521 = vst [vmem:[#allocation96_spill] sm:$0xff] %v6456_v21  ;;  %v2610_v35 = vpop.f32.mrb[45].mxu1  ;;  %4518 = vmatmul.mubr.bf16.gmra.mrb[136].mxu0 %v6444_v30  ;;  %v989_v52 = vor.u32 %v987_v53, %v986_v34  ;;  %v1022_v40 = vshrl.u32 %v731_v51, 16  ;;  %v1006_v53 = vshll.u32 %v729_v36, 16  ;;  %v1025_v2 = vshll.u32 %v731_v51, 16  ;;  %v4822_v51 = vld [vmem:[%s7228_s1 + $0x200] sm:$0xff]  }
 0x15f   : > { %v2611_v54 = vpop.f32.mrb[46].mxu1  ;;  %4521 = vmatprep.mubr.bf16.mxu0 %v6450_v61  ;;  %4582 = vmatpush3.bf16.msra.mxu0 %v4817_v7  ;;  %v655_v35 = vsel %vm342_vm2, %v650_v26, %v6466_v47  ;;  %v1005_v7 = vrot.slane %v1003_v23, 7 }
 0x160   : > { %v2612_v9 = vpop.f32.mrb[47].mxu1  ;;  %4583 = vmatprep.subr.bf16.mxu0 %v4818_v32  ;;  %v990_v13 = vsel %vm795_vm1, %v6367_v62, %v989_v52  ;;  %v1024_v21 = vrot.slane %v1022_v40, 7  ;;  %v2347_v26 = vshrl.u32 %v655_v35, 16  ;;  %v2350_v40 = vshll.u32 %v655_v35, 16 }
 0x161   : > { %v6474_v50 = vpop.f32.mrb[32].mxu0  ;;  %v1008_v36 = vor.u32 %v1006_v53, %v1005_v7 }
 0x162   : > { %2796 = vmatmul.mubr.bf16.gmra.mrb[152].mxu1 %v6316_v28  ;;  %v1832_v54 = vpop.f32.mrb[33].mxu0  ;;  %v1027_v23 = vor.u32 %v1025_v2, %v1024_v21  ;;  %v6491_v52 = vrot.slane %v2347_v26, 7  ;;  %v1044_v2 = vshll.u32 %v5051_v33, 16  ;;  %v7526_v33 = vshrl.u32 %v6253_v42, 16 }
 0x163   : > { %v1833_v10 = vpop.f32.mrb[34].mxu0  ;;  %2802 = vmatprep.mubr.bf16.mxu1 %v6324_v8  ;;  %4584 = vmatpush3.bf16.msra.mxu0 %v4818_v32 }
 0x164   : > { %v1834_v9 = vpop.f32.mrb[35].mxu0  ;;  %4585 = vmatprep.subr.bf16.mxu0 %v4820_v44  ;;  %v4821_v10 = vld [vmem:[%s7228_s1 + $0x178] sm:$0xff]   ;;  %7525 = vst [vmem:[#allocation98_spill] sm:$0xff] %v6491_v52  ;;  %v6505_v35 = vsel %vm795_vm1, %v1005_v7, %v1027_v23  ;;  %v2352_v53 = vor.u32 %v2350_v40, %v6491_v52  ;;  %v7604_v52 = vld [vmem:[#allocation24_spill] sm:$0xff] }
 0x165   : > { %v6488_v54 = vpop.f32.mrb[48].mxu1 }
 0x166   : > { %v2617_v45 = vpop.f32.mrb[49].mxu1  ;;  %4522 = vmatmul.mubr.bf16.gmra.mrb[140].mxu0 %v6480_v58  ;;  %v6519_v7 = vsel %vm795_vm1, %v6321_v0, %v2352_v53 }
 0x167   : > { %v2618_v32 = vpop.f32.mrb[50].mxu1  ;;  %4525 = vmatprep.mubr.bf16.mxu0 %v990_v13  ;;  %4586 = vmatpush3.bf16.msra.mxu0 %v4820_v44  ;;  %v6500_v13 = vsel %vm795_vm1, %v986_v34, %v1008_v36  ;;  %v1046_v34 = vor.u32 %v1044_v2, %v5065_v46  ;;  %7528 = vst [vmem:[#allocation100_spill] sm:$0xff] %v6519_v7  ;;  %v7529_v46 = vshll.u32 %v6253_v42, 16 }
 0x168   : > { %v2619_v1 = vpop.f32.mrb[51].mxu1  ;;  %4587 = vmatprep.subr.bf16.mxu0 %v4821_v10 }
 0x169   : > { %v6496_v9 = vpop.f32.mrb[36].mxu0 }
 0x16a   : > { %2803 = vmatmul.mubr.bf16.gmra.mrb[156].mxu1 %v6345_v49  ;;  %v1839_v45 = vpop.f32.mrb[37].mxu0 }
 0x16b   : > { %v1840_v47 = vpop.f32.mrb[38].mxu0  ;;  %2809 = vmatprep.mubr.bf16.mxu1 %v6349_v11  ;;  %4588 = vmatpush3.bf16.msra.mxu0 %v4821_v10  ;;  %v6515_v10 = vrot.slane %v7526_v33, 7  ;;  %v6525_v45 = vsel %vm795_vm1, %v1024_v21, %v1046_v34 }
 0x16c   : > { %v1841_v44 = vpop.f32.mrb[39].mxu0  ;;  %4653 = vmatprep.subr.bf16.mxu0 %v4822_v51 }
 0x16d   : > { %v6508_v26 = vpop.f32.mrb[52].mxu1  ;;  %7527 = vst [vmem:[#allocation99_spill] sm:$0xff] %v6515_v10  ;;  %v2344_v2 = vor.u32 %v6515_v10, %v7529_v46 }
 0x16e   : > { %v2624_v32 = vpop.f32.mrb[53].mxu1  ;;  %4526 = vmatmul.mubr.bf16.gmra.mrb[144].mxu0 %v6500_v13 }
 0x16f   : > { %v2625_v47 = vpop.f32.mrb[54].mxu1  ;;  %4529 = vmatprep.mubr.bf16.mxu0 %v6505_v35 }
 0x170   : > { %v2626_v36 = vpop.f32.mrb[55].mxu1  ;;  %v6536_v47 = vsel %vm795_vm1, %v6353_v38, %v2344_v2 }
 0x171   : > { %v6521_v1 = vpop.f32.mrb[40].mxu0  ;;  %7530 = vst [vmem:[#allocation101_spill] sm:$0xff] %v6536_v47 }
 0x172   : > { %2810 = vmatmul.mubr.bf16.gmra.mrb[160].mxu1 %v6373_v20  ;;  %v1846_v23 = vpop.f32.mrb[41].mxu0 }
 0x173   : > { %v1847_v40 = vpop.f32.mrb[42].mxu0  ;;  %2816 = vmatprep.mubr.bf16.mxu1 %v6519_v7  ;;  %v4823_v23 = vld [vmem:[%s7228_s1 + $0x208] sm:$0xff]  }
 0x174   : > { %v1848_v44 = vpop.f32.mrb[43].mxu0 }
 0x175   : > { %v6531_v32 = vpop.f32.mrb[56].mxu1 }
 0x176   : > { %v2631_v0 = vpop.f32.mrb[57].mxu1  ;;  %4530 = vmatmul.mubr.bf16.gmra.mrb[148].mxu0 %v6525_v45 }
 0x177   : > { %v2632_v53 = vpop.f32.mrb[58].mxu1  ;;  %4589 = vmatprep.mubr.bf16.mxu0 %v6389_v18 }
 0x178   : > { %v2633_v21 = vpop.f32.mrb[59].mxu1 }
 0x179   : > { %v6539_v34 = vpop.f32.mrb[44].mxu0  ;;  %v7532_v21 = vrot.slane %v6410_v60, 1  ;;  %v4826_v60 = vld [vmem:[%s7228_s1 + $0x220] sm:$0xff]  }
 0x17a   : > { %2817 = vmatmul.mubr.bf16.gmra.mrb[164].mxu1 %v6536_v47  ;;  %v1853_v42 = vpop.f32.mrb[45].mxu0  ;;  %v7603_v47 = vld [vmem:[#allocation22_spill] sm:$0xff] }
 0x17b   : > { %v1854_v33 = vpop.f32.mrb[46].mxu0  ;;  %3426 = vmatprep.mubr.bf16.mxu1 %v5363_v57  ;;  %v4824_v57 = vld [vmem:[%s7228_s1 + $0x210] sm:$0xff]   ;;  %v722_v42 = vsel %vm703_vm0, %v7532_v21, %v6309_v15 }
 0x17c   : > { %v1855_v36 = vpop.f32.mrb[47].mxu0  ;;  %v4825_v33 = vld [vmem:[%s7228_s1 + $0x218] sm:$0xff]  }
 0x17d   : > { %v6546_v40 = vpop.f32.mrb[60].mxu1 }
 0x17e   : > { %v2638_v38 = vpop.f32.mrb[61].mxu1  ;;  %4590 = vmatmul.mubr.bf16.vlgmr.msra.gmra.mrb[152].mxu0 %v6396_v55 }
 0x17f   : > { %v2639_v18 = vpop.f32.mrb[62].mxu1  ;;  %4654 = vmatpush3.bf16.msra.mxu0 %v4822_v51  ;;  %4593 = vmatprep.mubr.bf16.mxu0 %v6417_v37 }
 0x180   : > { %v2640_v46 = vpop.f32.mrb[63].mxu1  ;;  %4655 = vmatprep.subr.bf16.mxu0 %v4823_v23 }
 0x181   : > { %v1858_v2 = vpop.f32.mrb[48].mxu0 }
 0x182   : > { %3427 = vmatmul.mubr.bf16.vlgmr.msra.gmra.mrb[168].mxu1 %v5420_v29  ;;  %v6555_v44 = vadd.f32 %v6154_v14, %v1858_v2  ;;  %v1860_v0 = vpop.f32.mrb[49].mxu0 }
 0x183   : > { %v1861_v53 = vpop.f32.mrb[50].mxu0  ;;  %3433 = vmatprep.mubr.bf16.mxu1 %v5425_v59  ;;  %4656 = vmatpush3.bf16.msra.mxu0 %v4823_v23  ;;  %v2298_v59 = vshrl.u32 %v722_v42, 16 }
 0x184   : > { %7531 = vst [vmem:[#allocation102_spill] sm:$0xff] %v6555_v44  ;;  %v1862_v51 = vpop.f32.mrb[51].mxu0  ;;  %4657 = vmatprep.subr.bf16.mxu0 %v4824_v57  ;;  %v2301_v53 = vshll.u32 %v722_v42, 16  ;;  %v4828_v42 = vld [vmem:[%s7228_s1 + $0x230] sm:$0xff]  }
 0x185   : > { %v6565_v29 = vpop.f32.mrb[64].mxu1  ;;  %v6577_v0 = vrot.slane %v2298_v59, 7  ;;  %v4827_v51 = vld [vmem:[%s7228_s1 + $0x228] sm:$0xff]  }
 0x186   : > { %7533 = vst [vmem:[#allocation103_spill] sm:$0xff] %v6565_v29  ;;  %v2645_v14 = vpop.f32.mrb[65].mxu1  ;;  %4594 = vmatmul.mubr.bf16.gmra.mrb[156].mxu0 %v6421_v43  ;;  %v7608_v29 = vld [vmem:[#allocation57_spill] sm:$0xff] }
 0x187   : > { %v2646_v36 = vpop.f32.mrb[66].mxu1  ;;  %4597 = vmatprep.mubr.bf16.mxu0 %v6444_v30  ;;  %4658 = vmatpush3.bf16.msra.mxu0 %v4824_v57 }
 0x188   : > { %v2647_v23 = vpop.f32.mrb[67].mxu1  ;;  %4659 = vmatprep.subr.bf16.mxu0 %v4825_v33 }
 0x189   : > { %v1865_v38 = vpop.f32.mrb[52].mxu0 }
 0x18a   : > { %3434 = vmatmul.mubr.bf16.gmra.mrb[172].mxu1 %v5471_v41  ;;  %v6574_v18 = vadd.f32 %v6147_v48, %v1865_v38  ;;  %v1867_v46 = vpop.f32.mrb[53].mxu0 }
 0x18b   : > { %v1868_v2 = vpop.f32.mrb[54].mxu0  ;;  %3440 = vmatprep.mubr.bf16.mxu1 %v5495_v5  ;;  %4660 = vmatpush3.bf16.msra.mxu0 %v4825_v33  ;;  %v2303_v5 = vor.u32 %v2301_v53, %v6577_v0  ;;  %v4829_v46 = vld [vmem:[%s7228_s1 + $0x238] sm:$0xff]  }
 0x18c   : > { %7534 = vst [vmem:[#allocation104_spill] sm:$0xff] %v6574_v18  ;;  %v1869_v57 = vpop.f32.mrb[55].mxu0  ;;  %4661 = vmatprep.subr.bf16.mxu0 %v4826_v60 }
 0x18d   : > { %v6582_v21 = vpop.f32.mrb[68].mxu1  ;;  %v6596_v38 = vsel %vm795_vm1, %v6447_v31, %v2303_v5 }
 0x18e   : > { %7535 = vst [vmem:[#allocation105_spill] sm:$0xff] %v6582_v21  ;;  %v2652_v41 = vpop.f32.mrb[69].mxu1  ;;  %4598 = vmatmul.mubr.bf16.gmra.mrb[160].mxu0 %v6450_v61 }
 0x18f   : > { %v2653_v48 = vpop.f32.mrb[70].mxu1  ;;  %4601 = vmatprep.mubr.bf16.mxu0 %v6480_v58  ;;  %4662 = vmatpush3.bf16.msra.mxu0 %v4826_v60 }
 0x190   : > { %v2654_v14 = vpop.f32.mrb[71].mxu1  ;;  %4663 = vmatprep.subr.bf16.mxu0 %v4827_v51  ;;  %v6612_v48 = vshrl.u32 %v6306_v24, 16  ;;  %v7594_v24 = vld [vmem:[#allocation21_spill] sm:$0xff] }
 0x191   : > { %v1872_v33 = vpop.f32.mrb[56].mxu0 }
 0x192   : > { %3441 = vmatmul.mubr.bf16.gmra.mrb[176].mxu1 %v5551_v19  ;;  %v6592_v36 = vadd.f32 %v6173_v12, %v1872_v33  ;;  %v1874_v59 = vpop.f32.mrb[57].mxu0  ;;  %v7540_v33 = vld [vmem:[#allocation29_spill] sm:$0xff] }
 0x193   : > { %v1875_v23 = vpop.f32.mrb[58].mxu0  ;;  %3447 = vmatprep.mubr.bf16.mxu1 %v5565_v27  ;;  %4664 = vmatpush3.bf16.msra.mxu0 %v4827_v51 }
 0x194   : > { %7536 = vst [vmem:[#allocation106_spill] sm:$0xff] %v6592_v36  ;;  %v1876_v60 = vpop.f32.mrb[59].mxu0  ;;  %4665 = vmatprep.subr.bf16.mxu0 %v4828_v42 }
 0x195   : > { %v6602_v2 = vpop.f32.mrb[72].mxu1  ;;  %v7542_v60 = vld [vmem:[#allocation30_spill] sm:$0xff] }
 0x196   : > { %7537 = vst [vmem:[#allocation107_spill] sm:$0xff] %v6602_v2  ;;  %v2659_v19 = vpop.f32.mrb[73].mxu1  ;;  %4602 = vmatmul.mubr.bf16.gmra.mrb[164].mxu0 %v6596_v38 }
 0x197   : > { %v2660_v12 = vpop.f32.mrb[74].mxu1  ;;  %4605 = vmatprep.mubr.bf16.mxu0 %v6500_v13  ;;  %4666 = vmatpush3.bf16.msra.mxu0 %v4828_v42  ;;  %v7543_v19 = vld [vmem:[#allocation3_spill] sm:$0xff] }
 0x198   : > { %v2661_v31 = vpop.f32.mrb[75].mxu1  ;;  %4667 = vmatprep.subr.bf16.mxu0 %v4829_v46  ;;  %v7544_v12 = vrot.slane %v7543_v19, 1  ;;  %v7550_v19 = vld [vmem:[#allocation41_spill] sm:$0xff] }
 0x199   : > { %v1879_v53 = vpop.f32.mrb[60].mxu0 }
 0x19a   : > { %3448 = vmatmul.mubr.bf16.gmra.mrb[180].mxu1 %v5616_v6  ;;  %v6608_v27 = vadd.f32 %v6166_v4, %v1879_v53  ;;  %v1881_v57 = vpop.f32.mrb[61].mxu0  ;;  %v421_v4 = vor.u32 %v5012_v17, %v6612_v48  ;;  %v743_v31 = vsel %vm703_vm0, %v7544_v12, %v6309_v15 }
 0x19b   : > { %v1882_v51 = vpop.f32.mrb[62].mxu0  ;;  %3454 = vmatprep.mubr.bf16.mxu1 %v5632_v56  ;;  %4668 = vmatpush3.bf16.msra.mxu0 %v4829_v46 }
 0x19c   : > { %7538 = vst [vmem:[#allocation108_spill] sm:$0xff] %v6608_v27  ;;  %v1883_v41 = vpop.f32.mrb[63].mxu0  ;;  %v3117_v53 = vshrl.u32 %v421_v4, 16  ;;  %v7546_v51 = vld [vmem:[#allocation4_spill] sm:$0xff] }
 0x19d   : > { %v6614_v5 = vpop.f32.mrb[76].mxu1  ;;  %v7553_v27 = vld [vmem:[#allocation8_spill] sm:$0xff] }
 0x19e   : > { %7539 = vst [vmem:[#allocation109_spill] sm:$0xff] %v6614_v5  ;;  %v2666_v13 = vpop.f32.mrb[77].mxu1  ;;  %4606 = vmatmul.mubr.bf16.gmra.mrb[168].mxu0 %v6505_v35 }
 0x19f   : > { %v2667_v14 = vpop.f32.mrb[78].mxu1  ;;  %4609 = vmatprep.mubr.bf16.mxu0 %v6525_v45  ;;  %v7547_v13 = vld [vmem:[#allocation5_spill] sm:$0xff] }
 0x1a0   : > { %v2668_v6 = vpop.f32.mrb[79].mxu1 }
 0x1a1   : > { %v1886_v42 = vpop.f32.mrb[64].mxu0  ;;  %v3119_v6 = vrot.slane %v3117_v53, 7  ;;  %v7552_v53 = vld [vmem:[#allocation7_spill] sm:$0xff] }
 0x1a2   : > { %3455 = vmatmul.mubr.bf16.gmra.mrb[184].mxu1 %v7540_v33  ;;  %v6622_v56 = vadd.f32 %v6199_v16, %v1886_v42  ;;  %v1888_v59 = vpop.f32.mrb[65].mxu0  ;;  %v2317_v16 = vshrl.u32 %v743_v31, 16  ;;  %v3120_v42 = vshll.u32 %v421_v4, 16 }
 0x1a3   : > { %v1889_v23 = vpop.f32.mrb[66].mxu0  ;;  %3461 = vmatprep.mubr.bf16.mxu1 %v7542_v60  ;;  %v7548_v59 = vld [vmem:[#allocation32_spill] sm:$0xff] }
 0x1a4   : > { %7541 = vst [vmem:[#allocation29_spill] sm:$0xff] %v6622_v56  ;;  %v1890_v46 = vpop.f32.mrb[67].mxu0  ;;  %v6638_v12 = vrot.slane %v2317_v16, 7  ;;  %v3122_v56 = vor.u32 %v3120_v42, %v3119_v6 }
 0x1a5   : > { %v6629_v57 = vpop.f32.mrb[80].mxu1 }
 0x1a6   : > { %7545 = vst [vmem:[#allocation30_spill] sm:$0xff] %v6629_v57  ;;  %v2673_v17 = vpop.f32.mrb[81].mxu1  ;;  %4610 = vmatmul.mubr.bf16.gmra.mrb[172].mxu0 %v7546_v51  ;;  %v7579_v57 = vld [vmem:[#allocation16_spill] sm:$0xff] }
 0x1a7   : > { %v2674_v41 = vpop.f32.mrb[82].mxu1  ;;  %4613 = vmatprep.mubr.bf16.mxu0 %v7547_v13  ;;  %v2320_v17 = vshll.u32 %v743_v31, 16 }
 0x1a8   : > { %v2675_v14 = vpop.f32.mrb[83].mxu1 }
 0x1a9   : > { %v1893_v33 = vpop.f32.mrb[68].mxu0 }
 0x1aa   : > { %3462 = vmatmul.mubr.bf16.gmra.mrb[188].mxu1 %v7548_v59  ;;  %v6635_v23 = vadd.f32 %v6196_v22, %v1893_v33  ;;  %v1895_v60 = vpop.f32.mrb[69].mxu0  ;;  %v2322_v22 = vor.u32 %v2320_v17, %v6638_v12  ;;  %v6646_v33 = vrot.slane %v6612_v48, 7 }
 0x1ab   : > { %v1896_v46 = vpop.f32.mrb[70].mxu0  ;;  %3468 = vmatprep.mubr.bf16.mxu1 %v7550_v19  ;;  %v7554_v60 = vld [vmem:[#allocation38_spill] sm:$0xff] }
 0x1ac   : > { %7549 = vst [vmem:[#allocation3_spill] sm:$0xff] %v6635_v23  ;;  %v1897_v41 = vpop.f32.mrb[71].mxu0  ;;  %v3123_v16 = vsel %vm795_vm1, %v7554_v60, %v3122_v56  ;;  %v7555_v46 = vld [vmem:[#allocation44_spill] sm:$0xff] }
 0x1ad   : > { %v6640_v36 = vpop.f32.mrb[84].mxu1  ;;  %v7557_v41 = vld [vmem:[#allocation6_spill] sm:$0xff]  ;;  %v7559_v60 = vld [vmem:[#allocation40_spill] sm:$0xff] }
 0x1ae   : > { %7551 = vst [vmem:[#allocation4_spill] sm:$0xff] %v6640_v36  ;;  %v2680_v14 = vpop.f32.mrb[85].mxu1  ;;  %4614 = vmatmul.mubr.bf16.gmra.mrb[176].mxu0 %v7552_v53  ;;  %v7580_v36 = vld [vmem:[#allocation17_spill] sm:$0xff] }
 0x1af   : > { %v2681_v4 = vpop.f32.mrb[86].mxu1  ;;  %4617 = vmatprep.mubr.bf16.mxu0 %v7553_v27  ;;  %v6656_v14 = vsel %vm795_vm1, %v7557_v41, %v2322_v22  ;;  %v7562_v41 = vld [vmem:[#allocation33_spill] sm:$0xff] }
 0x1b0   : > { %v2682_v59 = vpop.f32.mrb[87].mxu1 }
 0x1b1   : > { %v1900_v31 = vpop.f32.mrb[72].mxu0 }
 0x1b2   : > { %3469 = vmatmul.mubr.bf16.gmra.mrb[192].mxu1 %v7555_v46  ;;  %v6652_v6 = vadd.f32 %v6228_v39, %v1900_v31  ;;  %v1902_v42 = vpop.f32.mrb[73].mxu0  ;;  %v3115_v46 = vsel %vm795_vm1, %v7559_v60, %v6646_v33  ;;  %v7560_v39 = vld [vmem:[#allocation9_spill] sm:$0xff]  ;;  %v7565_v60 = vld [vmem:[#allocation12_spill] sm:$0xff] }
 0x1b3   : > { %v1903_v19 = vpop.f32.mrb[74].mxu0  ;;  %3475 = vmatprep.mubr.bf16.mxu1 %v3123_v16 }
 0x1b4   : > { %7556 = vst [vmem:[#allocation5_spill] sm:$0xff] %v6652_v6  ;;  %v1904_v17 = vpop.f32.mrb[75].mxu0  ;;  %v7564_v6 = vld [vmem:[#allocation11_spill] sm:$0xff] }
 0x1b5   : > { %v6658_v4 = vpop.f32.mrb[88].mxu1 }
 0x1b6   : > { %7558 = vst [vmem:[#allocation32_spill] sm:$0xff] %v6658_v4  ;;  %v2687_v59 = vpop.f32.mrb[89].mxu1  ;;  %4618 = vmatmul.mubr.bf16.gmra.mrb[180].mxu0 %v6656_v14  ;;  %v7566_v4 = vld [vmem:[#allocation35_spill] sm:$0xff] }
 0x1b7   : > { %v2688_v56 = vpop.f32.mrb[90].mxu1  ;;  %4621 = vmatprep.mubr.bf16.mxu0 %v7560_v39 }
 0x1b8   : > { %v2689_v31 = vpop.f32.mrb[91].mxu1 }
 0x1b9   : > { %v1907_v42 = vpop.f32.mrb[76].mxu0 }
 0x1ba   : > { %3476 = vmatmul.mubr.bf16.gmra.mrb[196].mxu1 %v3115_v46  ;;  %v6666_v22 = vadd.f32 %v6219_v3, %v1907_v42  ;;  %v1909_v16 = vpop.f32.mrb[77].mxu0 }
 0x1bb   : > { %v1910_v19 = vpop.f32.mrb[78].mxu0  ;;  %3482 = vmatprep.mubr.bf16.mxu1 %v7562_v41  ;;  %v7568_v16 = vld [vmem:[#allocation27_spill] sm:$0xff]  ;;  %v7569_v41 = vld [vmem:[#allocation10_spill] sm:$0xff] }
 0x1bc   : > { %7561 = vst [vmem:[#allocation41_spill] sm:$0xff] %v6666_v22  ;;  %v1911_v17 = vpop.f32.mrb[79].mxu0 }
 0x1bd   : > { %v6669_v59 = vpop.f32.mrb[92].mxu1  ;;  %v7570_v17 = vrot.slane %v7569_v41, 1 }
 0x1be   : > { %7563 = vst [vmem:[#allocation7_spill] sm:$0xff] %v6669_v59  ;;  %v2694_v56 = vpop.f32.mrb[93].mxu1  ;;  %4622 = vmatmul.mubr.bf16.gmra.mrb[184].mxu0 %v7564_v6  ;;  %v7577_v59 = vld [vmem:[#allocation31_spill] sm:$0xff] }
 0x1bf   : > { %v2695_v23 = vpop.f32.mrb[94].mxu1  ;;  %4625 = vmatprep.mubr.bf16.mxu0 %v7565_v60  ;;  %v764_v56 = vsel %vm703_vm0, %v7570_v17, %v6309_v15 }
 0x1c0   : > { %v2696_v39 = vpop.f32.mrb[95].mxu1 }
 0x1c1   : > { %v1914_v31 = vpop.f32.mrb[80].mxu0  ;;  %v7572_v39 = vld [vmem:[#allocation13_spill] sm:$0xff] }
 0x1c2   : > { %3483 = vmatmul.mubr.bf16.gmra.mrb[200].mxu1 %v7566_v4  ;;  %v6675_v3 = vadd.f32 %v6259_v25, %v1914_v31  ;;  %v1916_v46 = vpop.f32.mrb[81].mxu0  ;;  %v7573_v4 = vld [vmem:[#allocation15_spill] sm:$0xff]  ;;  %v2336_v25 = vshrl.u32 %v764_v56, 16 }
 0x1c3   : > { %v1917_v42 = vpop.f32.mrb[82].mxu0  ;;  %3489 = vmatprep.mubr.bf16.mxu1 %v7568_v16  ;;  %v7575_v16 = vld [vmem:[#allocation70_spill] sm:$0xff] }
 0x1c4   : > { %7567 = vst [vmem:[#allocation8_spill] sm:$0xff] %v6675_v3  ;;  %v1918_v19 = vpop.f32.mrb[83].mxu0  ;;  %v7574_v42 = vld [vmem:[#allocation37_spill] sm:$0xff]  ;;  %v6691_v17 = vrot.slane %v2336_v25, 7 }
 0x1c5   : > { %v6682_v23 = vpop.f32.mrb[96].mxu1 }
 0x1c6   : > { %7571 = vst [vmem:[#allocation38_spill] sm:$0xff] %v6682_v23  ;;  %v2701_v22 = vpop.f32.mrb[97].mxu1  ;;  %4626 = vmatmul.mubr.bf16.gmra.mrb[188].mxu0 %v7572_v39 }
 0x1c7   : > { %v2702_v44 = vpop.f32.mrb[98].mxu1  ;;  %4629 = vmatprep.mubr.bf16.mxu0 %v7573_v4  ;;  %v2339_v22 = vshll.u32 %v764_v56, 16 }
 0x1c8   : > { %v2703_v31 = vpop.f32.mrb[99].mxu1 }
 0x1c9   : > { %v1921_v46 = vpop.f32.mrb[84].mxu0 }
 0x1ca   : > { %3490 = vmatmul.mubr.bf16.gmra.mrb[204].mxu1 %v7574_v42  ;;  %v6688_v19 = vadd.f32 %v7575_v16, %v1921_v46  ;;  %v1923_v3 = vpop.f32.mrb[85].mxu0  ;;  %v2341_v42 = vor.u32 %v2339_v22, %v6691_v17 }
 0x1cb   : > { %v1924_v41 = vpop.f32.mrb[86].mxu0  ;;  %3496 = vmatprep.mubr.bf16.mxu1 %v7577_v59  ;;  %v7581_v3 = vld [vmem:[#allocation28_spill] sm:$0xff] }
 0x1cc   : > { %7576 = vst [vmem:[#allocation44_spill] sm:$0xff] %v6688_v19  ;;  %v1925_v23 = vpop.f32.mrb[87].mxu0  ;;  %v7582_v41 = vld [vmem:[#allocation76_spill] sm:$0xff] }
 0x1cd   : > { %v6693_v18 = vpop.f32.mrb[100].mxu1  ;;  %v7584_v23 = vld [vmem:[#allocation14_spill] sm:$0xff] }
 0x1ce   : > { %7578 = vst [vmem:[#allocation6_spill] sm:$0xff] %v6693_v18  ;;  %v2708_v44 = vpop.f32.mrb[101].mxu1  ;;  %4630 = vmatmul.mubr.bf16.gmra.mrb[192].mxu0 %v7579_v57  ;;  %v6704_v19 = vsel %vm795_vm1, %v7584_v23, %v2341_v42 }
 0x1cf   : > { %v2709_v31 = vpop.f32.mrb[102].mxu1  ;;  %4633 = vmatprep.mubr.bf16.mxu0 %v7580_v36  ;;  %v7585_v44 = vld [vmem:[#allocation39_spill] sm:$0xff] }
 0x1d0   : > { %v2710_v46 = vpop.f32.mrb[103].mxu1 }
 0x1d1   : > { %v1928_v16 = vpop.f32.mrb[88].mxu0  ;;  %v7587_v46 = vld [vmem:[#allocation18_spill] sm:$0xff] }
 0x1d2   : > { %3497 = vmatmul.mubr.bf16.gmra.mrb[208].mxu1 %v7581_v3  ;;  %v6700_v59 = vadd.f32 %v7582_v41, %v1928_v16  ;;  %v1930_v25 = vpop.f32.mrb[89].mxu0  ;;  %v7588_v41 = vld [vmem:[#allocation42_spill] sm:$0xff] }
 0x1d3   : > { %v1931_v56 = vpop.f32.mrb[90].mxu0  ;;  %3503 = vmatprep.mubr.bf16.mxu1 %v7585_v44  ;;  %v7589_v25 = vld [vmem:[#allocation75_spill] sm:$0xff] }
 0x1d4   : > { %7583 = vst [vmem:[#allocation40_spill] sm:$0xff] %v6700_v59  ;;  %v1932_v31 = vpop.f32.mrb[91].mxu0  ;;  %v7591_v59 = vld [vmem:[#allocation43_spill] sm:$0xff] }
 0x1d5   : > { %v6707_v18 = vpop.f32.mrb[104].mxu1 }
 0x1d6   : > { %7586 = vst [vmem:[#allocation9_spill] sm:$0xff] %v6707_v18  ;;  %v2715_v10 = vpop.f32.mrb[105].mxu1  ;;  %4634 = vmatmul.mubr.bf16.gmra.mrb[196].mxu0 %v6704_v19  ;;  %v7593_v18 = vld [vmem:[#allocation20_spill] sm:$0xff] }
 0x1d7   : > { %v2716_v22 = vpop.f32.mrb[106].mxu1  ;;  %4637 = vmatprep.mubr.bf16.mxu0 %v7587_v46 }
 0x1d8   : > { %v2717_v3 = vpop.f32.mrb[107].mxu1 }
 0x1d9   : > { %v1935_v16 = vpop.f32.mrb[92].mxu0  ;;  %v7595_v3 = vld [vmem:[#allocation36_spill] sm:$0xff] }
 0x1da   : > { %3504 = vmatmul.mubr.bf16.gmra.mrb[212].mxu1 %v7588_v41  ;;  %v6713_v56 = vadd.f32 %v7589_v25, %v1935_v16  ;;  %v1937_v42 = vpop.f32.mrb[93].mxu0  ;;  %v500_v41 = vor.u32 %v7595_v3, %v6612_v48  ;;  %v7596_v16 = vld [vmem:[#allocation45_spill] sm:$0xff]  ;;  %v7597_v25 = vld [vmem:[#allocation82_spill] sm:$0xff] }
 0x1db   : > { %v1938_v23 = vpop.f32.mrb[94].mxu0  ;;  %3510 = vmatprep.mubr.bf16.mxu1 %v7591_v59 }
 0x1dc   : > { %7590 = vst [vmem:[#allocation33_spill] sm:$0xff] %v6713_v56  ;;  %v1939_v44 = vpop.f32.mrb[95].mxu0  ;;  %v7600_v56 = vld [vmem:[#allocation19_spill] sm:$0xff] }
 0x1dd   : > { %v6716_v31 = vpop.f32.mrb[108].mxu1  ;;  %v7599_v44 = vld [vmem:[#allocation46_spill] sm:$0xff] }
 0x1de   : > { %7592 = vst [vmem:[#allocation11_spill] sm:$0xff] %v6716_v31  ;;  %v2722_v10 = vpop.f32.mrb[109].mxu1  ;;  %4638 = vmatmul.mubr.bf16.gmra.mrb[200].mxu0 %v7593_v18 }
 0x1df   : > { %v2723_v22 = vpop.f32.mrb[110].mxu1  ;;  %4641 = vmatprep.mubr.bf16.mxu0 %v7594_v24 }
 0x1e0   : > { %v2724_v46 = vpop.f32.mrb[111].mxu1  ;;  %v7601_v22 = vrot.slane %v7600_v56, 1 }
 0x1e1   : > { %v1942_v2 = vpop.f32.mrb[96].mxu0  ;;  %v3136_v46 = vshrl.u32 %v500_v41, 16 }
 0x1e2   : > { %3511 = vmatmul.mubr.bf16.gmra.mrb[216].mxu1 %v7596_v16  ;;  %v6724_v42 = vadd.f32 %v7597_v25, %v1942_v2  ;;  %v1944_v59 = vpop.f32.mrb[97].mxu0  ;;  %v785_v31 = vsel %vm703_vm0, %v7601_v22, %v6309_v15 }
 0x1e3   : > { %v1945_v23 = vpop.f32.mrb[98].mxu0  ;;  %3517 = vmatprep.mubr.bf16.mxu1 %v7599_v44  ;;  %v2355_v2 = vshrl.u32 %v785_v31, 16  ;;  %v3138_v59 = vrot.slane %v3136_v46, 7 }
 0x1e4   : > { %7598 = vst [vmem:[#allocation12_spill] sm:$0xff] %v6724_v42  ;;  %v1946_v10 = vpop.f32.mrb[99].mxu0  ;;  %v3139_v23 = vshll.u32 %v500_v41, 16  ;;  %v7606_v42 = vld [vmem:[#allocation81_spill] sm:$0xff] }
 0x1e5   : > { %v6731_v5 = vpop.f32.mrb[112].mxu1  ;;  %v7605_v10 = vld [vmem:[#allocation47_spill] sm:$0xff]  ;;  %v7610_v41 = vld [vmem:[#allocation25_spill] sm:$0xff] }
 0x1e6   : > { %7602 = vst [vmem:[#allocation35_spill] sm:$0xff] %v6731_v5  ;;  %v2729_v3 = vpop.f32.mrb[113].mxu1  ;;  %4642 = vmatmul.mubr.bf16.gmra.mrb[204].mxu0 %v7603_v47  ;;  %v2358_v5 = vshll.u32 %v785_v31, 16  ;;  %v6742_v21 = vor.u32 %v3139_v23, %v3138_v59  ;;  %v7613_v31 = vld [vmem:[#allocation60_spill] sm:$0xff]  ;;  %v7614_v59 = vld [vmem:[#allocation86_spill] sm:$0xff] }
 0x1e7   : > { %v2730_v16 = vpop.f32.mrb[114].mxu1  ;;  %4645 = vmatprep.mubr.bf16.mxu0 %v7604_v52  ;;  %v6740_v3 = vrot.slane %v2355_v2, 7 }
 0x1e8   : > { %v2731_v25 = vpop.f32.mrb[115].mxu1 }
 0x1e9   : > { %v1949_v44 = vpop.f32.mrb[100].mxu0 }
 0x1ea   : > { %3518 = vmatmul.mubr.bf16.gmra.mrb[220].mxu1 %v7605_v10  ;;  %v6737_v56 = vadd.f32 %v7606_v42, %v1949_v44  ;;  %v1951_v22 = vpop.f32.mrb[101].mxu0  ;;  %v7611_v10 = vld [vmem:[#allocation26_spill] sm:$0xff]  ;;  %v2360_v42 = vor.u32 %v2358_v5, %v6740_v3 }
 0x1eb   : > { %v1952_v7 = vpop.f32.mrb[102].mxu0  ;;  %3524 = vmatprep.mubr.bf16.mxu1 %v7608_v29 }
 0x1ec   : > { %7607 = vst [vmem:[#allocation27_spill] sm:$0xff] %v6737_v56  ;;  %v1953_v16 = vpop.f32.mrb[103].mxu0  ;;  %v7612_v7 = vld [vmem:[#allocation53_spill] sm:$0xff]  ;;  %v7617_v56 = vld [vmem:[#allocation34_spill] sm:$0xff] }
 0x1ed   : > { %v6744_v20 = vpop.f32.mrb[116].mxu1  ;;  %v3142_v29 = vsel %vm795_vm1, %v7612_v7, %v6742_v21  ;;  %v6762_v5 = vor.u32 %v6646_v33, %v7617_v56 }
 0x1ee   : > { %7609 = vst [vmem:[#allocation10_spill] sm:$0xff] %v6744_v20  ;;  %v2736_v46 = vpop.f32.mrb[117].mxu1  ;;  %4646 = vmatmul.mubr.bf16.gmra.mrb[208].mxu0 %v7610_v41 }
 0x1ef   : > { %v2737_v25 = vpop.f32.mrb[118].mxu1  ;;  %4649 = vmatprep.mubr.bf16.mxu0 %v7611_v10  ;;  %v7616_v46 = vld [vmem:[#allocation23_spill] sm:$0xff] }
 0x1f0   : > { %v2738_v44 = vpop.f32.mrb[119].mxu1  ;;  %v6758_v25 = vsel %vm795_vm1, %v7616_v46, %v2360_v42 }
 0x1f1   : > { %v1956_v2 = vpop.f32.mrb[104].mxu0 }
 0x1f2   : > { %3525 = vmatmul.mubr.bf16.gmra.mrb[224].mxu1 %v7613_v31  ;;  %v6754_v23 = vadd.f32 %v7614_v59, %v1956_v2  ;;  %v1958_v22 = vpop.f32.mrb[105].mxu0  ;;  %v7619_v2 = vld [vmem:[#allocation56_spill] sm:$0xff] }
 0x1f3   : > { %v1959_v16 = vpop.f32.mrb[106].mxu0  ;;  %3531 = vmatprep.mubr.bf16.mxu1 %v3142_v29  ;;  %v3134_v59 = vsel %vm795_vm1, %v7619_v2, %v6762_v5  ;;  %v7620_v29 = vld [vmem:[#allocation85_spill] sm:$0xff] }
 0x1f4   : > { %7615 = vst [vmem:[#allocation13_spill] sm:$0xff] %v6754_v23  ;;  %v1960_v44 = vpop.f32.mrb[107].mxu0 }
 0x1f5   : > { %v6764_v20 = vpop.f32.mrb[120].mxu1  ;;  %v7622_v44 = vld [vmem:[#allocation48_spill] sm:$0xff] }
 0x1f6   : > { %7618 = vst [vmem:[#allocation15_spill] sm:$0xff] %v6764_v20  ;;  %v2743_v7 = vpop.f32.mrb[121].mxu1  ;;  %4650 = vmatmul.mubr.bf16.gmra.mrb[212].mxu0 %v6758_v25 }
 0x1f7   : > { %v2744_v31 = vpop.f32.mrb[122].mxu1  ;;  %4669 = vmatprep.mubr.bf16.mxu0 %v6396_v55 }
 0x1f8   : > { %v2745_v42 = vpop.f32.mrb[123].mxu1 }
 0x1f9   : > { %v1963_v22 = vpop.f32.mrb[108].mxu0  ;;  %v7623_v42 = vld [vmem:[#allocation49_spill] sm:$0xff] }
 0x1fa   : > { %3532 = vmatmul.mubr.bf16.gmra.mrb[228].mxu1 %v3134_v59  ;;  %v6772_v16 = vadd.f32 %v7620_v29, %v1963_v22  ;;  %v1965_v56 = vpop.f32.mrb[109].mxu0  ;;  %v7624_v59 = vld [vmem:[#allocation90_spill] sm:$0xff] }
 0x1fb   : > { %v1966_v46 = vpop.f32.mrb[110].mxu0  ;;  %3538 = vmatprep.mubr.bf16.mxu1 %v7622_v44 }
 0x1fc   : > { %7621 = vst [vmem:[#allocation37_spill] sm:$0xff] %v6772_v16  ;;  %v1967_v7 = vpop.f32.mrb[111].mxu0  ;;  %v7626_v46 = vld [vmem:[#allocation50_spill] sm:$0xff] }
 0x1fd   : > { %v6775_v23 = vpop.f32.mrb[124].mxu1  ;;  %v724_v7 = vsel %vm703_vm0, %v6309_v15, %v6309_v15 }
 0x1fe   : > { %v2750_v31 = vpop.f32.mrb[125].mxu1  ;;  %4670 = vmatmul.mubr.bf16.vlgmr.msra.gmra.mrb[216].mxu0 %v6417_v37  ;;  %v3128_v16 = vshll.u32 %v724_v7, 16 }
 0x1ff   : > { %v2751_v20 = vpop.f32.mrb[126].mxu1  ;;  %4673 = vmatprep.mubr.bf16.mxu0 %v6421_v43  ;;  %v3125_v31 = vshrl.u32 %v724_v7, 16 }
 0x200   : > { %v2752_v55 = vpop.f32.mrb[127].mxu1 }
 0x201   : > { %v1970_v2 = vpop.f32.mrb[112].mxu0 }
 0x202   : > { %3539 = vmatmul.mubr.bf16.gmra.mrb[232].mxu1 %v7623_v42  ;;  %v6781_v22 = vadd.f32 %v7624_v59, %v1970_v2  ;;  %v1972_v29 = vpop.f32.mrb[113].mxu0  ;;  %v7628_v42 = vld [vmem:[#allocation51_spill] sm:$0xff]  ;;  %v7629_v59 = vld [vmem:[#allocation89_spill] sm:$0xff] }
 0x203   : > { %v1973_v56 = vpop.f32.mrb[114].mxu0  ;;  %3545 = vmatprep.mubr.bf16.mxu1 %v7626_v46 }
 0x204   : > { %7625 = vst [vmem:[#allocation70_spill] sm:$0xff] %v6781_v22  ;;  %v1974_v44 = vpop.f32.mrb[115].mxu0  ;;  %v3127_v22 = vrot.slane %v3125_v31, 7 }
 0x205   : > { %v6787_v37 = vpop.f32.mrb[128].mxu1  ;;  %v7630_v44 = vld [vmem:[#allocation52_spill] sm:$0xff] }
 0x206   : > { %7627 = vst [vmem:[#allocation31_spill] sm:$0xff] %v6787_v37  ;;  %v2757_v20 = vpop.f32.mrb[129].mxu1  ;;  %4674 = vmatmul.mubr.bf16.gmra.mrb[220].mxu0 %v6444_v30 }
 0x207   : > { %v2758_v43 = vpop.f32.mrb[130].mxu1  ;;  %4677 = vmatprep.mubr.bf16.mxu0 %v6450_v61 }
 0x208   : > { %v2759_v55 = vpop.f32.mrb[131].mxu1  ;;  %v6800_v43 = vor.u32 %v3128_v16, %v3127_v22 }
 0x209   : > { %v1977_v2 = vpop.f32.mrb[116].mxu0 }
 0x20a   : > { %3546 = vmatmul.mubr.bf16.gmra.mrb[236].mxu1 %v7628_v42  ;;  %v6793_v29 = vadd.f32 %v7629_v59, %v1977_v2  ;;  %v1979_v56 = vpop.f32.mrb[117].mxu0  ;;  %v7631_v42 = vld [vmem:[#allocation54_spill] sm:$0xff] }
 0x20b   : > { %v1980_v46 = vpop.f32.mrb[118].mxu0  ;;  %3552 = vmatprep.mubr.bf16.mxu1 %v7630_v44  ;;  %v7632_v56 = vld [vmem:[#allocation55_spill] sm:$0xff] }
 0x20c   : > { %v1981_v20 = vpop.f32.mrb[119].mxu0 }
 0x20d   : > { %v6796_v37 = vpop.f32.mrb[132].mxu1 }
 0x20e   : > { %v2764_v30 = vpop.f32.mrb[133].mxu1  ;;  %4678 = vmatmul.mubr.bf16.gmra.mrb[224].mxu0 %v6480_v58  ;;  %v3131_v58 = vsel %vm795_vm1, %v6577_v0, %v6800_v43 }
 0x20f   : > { %v2765_v61 = vpop.f32.mrb[134].mxu1  ;;  %4681 = vmatprep.mubr.bf16.mxu0 %v6596_v38  ;;  %v7634_v30 = vld [vmem:[#allocation92_spill] sm:$0xff] }
 0x210   : > { %v2766_v55 = vpop.f32.mrb[135].mxu1 }
 0x211   : > { %v1984_v2 = vpop.f32.mrb[120].mxu0 }
 0x212   : > { %3553 = vmatmul.mubr.bf16.gmra.mrb[240].mxu1 %v7631_v42  ;;  %v6804_v59 = vadd.f32 %v6402_v63, %v1984_v2  ;;  %v1986_v31 = vpop.f32.mrb[121].mxu0  ;;  %v7633_v63 = vld [vmem:[#allocation58_spill] sm:$0xff]  ;;  %v7635_v42 = vld [vmem:[#allocation59_spill] sm:$0xff] }
 0x213   : > { %v1987_v7 = vpop.f32.mrb[122].mxu0  ;;  %3559 = vmatprep.mubr.bf16.mxu1 %v7632_v56 }
 0x214   : > { %v1988_v46 = vpop.f32.mrb[123].mxu0 }
 0x215   : > { %v6810_v44 = vpop.f32.mrb[136].mxu1  ;;  %v7636_v46 = vld [vmem:[#allocation61_spill] sm:$0xff] }
 0x216   : > { %v2771_v38 = vpop.f32.mrb[137].mxu1  ;;  %4682 = vmatmul.mubr.bf16.gmra.mrb[228].mxu0 %v3131_v58 }
 0x217   : > { %v2772_v16 = vpop.f32.mrb[138].mxu1  ;;  %4685 = vmatprep.mubr.bf16.mxu0 %v6505_v35  ;;  %v7637_v38 = vld [vmem:[#allocation72_spill] sm:$0xff] }
 0x218   : > { %v2773_v22 = vpop.f32.mrb[139].mxu1 }
 0x219   : > { %v1991_v20 = vpop.f32.mrb[124].mxu0 }
 0x21a   : > { %3560 = vmatmul.mubr.bf16.gmra.mrb[244].mxu1 %v7633_v63  ;;  %v6815_v61 = vadd.f32 %v7634_v30, %v1991_v20  ;;  %v1993_v55 = vpop.f32.mrb[125].mxu0  ;;  %v7638_v20 = vld [vmem:[#allocation67_spill] sm:$0xff] }
 0x21b   : > { %v1994_v2 = vpop.f32.mrb[126].mxu0  ;;  %3566 = vmatprep.mubr.bf16.mxu1 %v7635_v42  ;;  %v7639_v55 = vld [vmem:[#allocation62_spill] sm:$0xff] }
 0x21c   : > { %v1995_v0 = vpop.f32.mrb[127].mxu0 }
 0x21d   : > { %v6818_v31 = vpop.f32.mrb[140].mxu1 }
 0x21e   : > { %v2778_v7 = vpop.f32.mrb[141].mxu1  ;;  %4686 = vmatmul.mubr.bf16.gmra.mrb[232].mxu0 %v6525_v45 }
 0x21f   : > { %v2779_v56 = vpop.f32.mrb[142].mxu1  ;;  %4689 = vmatprep.mubr.bf16.mxu0 %v7546_v51 }
 0x220   : > { %v2780_v35 = vpop.f32.mrb[143].mxu1  ;;  %v7640_v56 = vld [vmem:[#allocation63_spill] sm:$0xff] }
 0x221   : > { %v4511_v58 = vpop.f32.mrb[128].mxu0  ;;  %v7641_v35 = vld [vmem:[#allocation84_spill] sm:$0xff] }
 0x222   : > { %3567 = vmatmul.mubr.bf16.gmra.mrb[248].mxu1 %v7636_v46  ;;  %v6824_v16 = vadd.f32 %v4511_v58, %v7637_v38  ;;  %v2031_v22 = vpop.f32.mrb[129].mxu0  ;;  %v7642_v38 = vld [vmem:[#allocation79_spill] sm:$0xff] }
 0x223   : > { %v6827_v63 = vadd.f32 %v2031_v22, %v7638_v20  ;;  %v4512_v30 = vpop.f32.mrb[130].mxu0  ;;  %3573 = vmatprep.mubr.bf16.mxu1 %v7639_v55 }
 0x224   : > { %v2034_v2 = vpop.f32.mrb[131].mxu0  ;;  %v7643_v30 = vld [vmem:[#allocation78_spill] sm:$0xff] }
 0x225   : > { %v6830_v42 = vpop.f32.mrb[144].mxu1 }
 0x226   : > { %v2785_v45 = vpop.f32.mrb[145].mxu1  ;;  %4690 = vmatmul.mubr.bf16.gmra.mrb[236].mxu0 %v7547_v13 }
 0x227   : > { %v2786_v51 = vpop.f32.mrb[146].mxu1  ;;  %4693 = vmatprep.mubr.bf16.mxu0 %v7552_v53 }
 0x228   : > { %v2787_v0 = vpop.f32.mrb[147].mxu1  ;;  %v7644_v51 = vld [vmem:[#allocation71_spill] sm:$0xff] }
 0x229   : > { %v4515_v7 = vpop.f32.mrb[132].mxu0  ;;  %v3161_v0 = vsel %vm795_vm1, %v7644_v51, %v6742_v21 }
 0x22a   : > { %3574 = vmatmul.mubr.bf16.gmra.mrb[252].mxu1 %v7640_v56  ;;  %v6836_v58 = vadd.f32 %v4515_v7, %v7641_v35  ;;  %v2045_v46 = vpop.f32.mrb[133].mxu0  ;;  %v7645_v56 = vld [vmem:[#allocation83_spill] sm:$0xff] }
 0x22b   : > { %v6839_v22 = vadd.f32 %v2045_v46, %v7642_v38  ;;  %v4516_v20 = vpop.f32.mrb[134].mxu0  ;;  %3580 = vmatprep.mubr.bf16.mxu1 %v7643_v30  ;;  %v7646_v35 = vld [vmem:[#allocation91_spill] sm:$0xff] }
 0x22c   : > { %v2048_v55 = vpop.f32.mrb[135].mxu0  ;;  %v7647_v20 = vld [vmem:[#allocation87_spill] sm:$0xff] }
 0x22d   : > { %v6842_v2 = vpop.f32.mrb[148].mxu1 }
 0x22e   : > { %v2792_v13 = vpop.f32.mrb[149].mxu1  ;;  %4694 = vmatmul.mubr.bf16.gmra.mrb[240].mxu0 %v7553_v27  ;;  %v3150_v27 = vsel %vm795_vm1, %v6638_v12, %v6800_v43  ;;  %v7650_v12 = vld [vmem:[#allocation93_spill] sm:$0xff] }
 0x22f   : > { %v2793_v53 = vpop.f32.mrb[150].mxu1  ;;  %4697 = vmatprep.mubr.bf16.mxu0 %v6656_v14 }
 0x230   : > { %v2794_v45 = vpop.f32.mrb[151].mxu1 }
 0x231   : > { %v4519_v7 = vpop.f32.mrb[136].mxu0  ;;  %v7648_v45 = vld [vmem:[#allocation77_spill] sm:$0xff] }
 0x232   : > { %3581 = vmatmul.mubr.bf16.gmra.mrb[0].mxu1 %v7645_v56  ;;  %v6851_v46 = vadd.f32 %v4519_v7, %v7646_v35  ;;  %v2059_v38 = vpop.f32.mrb[137].mxu0  ;;  %v3153_v51 = vsel %vm795_vm1, %v7648_v45, %v6762_v5  ;;  %v7652_v45 = vld [vmem:[#allocation65_spill] sm:$0xff] }
 0x233   : > { %v6854_v30 = vadd.f32 %v2059_v38, %v7647_v20  ;;  %v4520_v55 = vpop.f32.mrb[138].mxu0  ;;  %3587 = vmatprep.mubr.bf16.mxu1 %v3161_v0  ;;  %v7649_v0 = vld [vmem:[#allocation95_spill] sm:$0xff] }
 0x234   : > { %v2062_v14 = vpop.f32.mrb[139].mxu0  ;;  %v7651_v55 = vld [vmem:[#allocation64_spill] sm:$0xff] }
 0x235   : > { %v6859_v13 = vpop.f32.mrb[152].mxu1 }
 0x236   : > { %v2799_v21 = vpop.f32.mrb[153].mxu1  ;;  %4698 = vmatmul.mubr.bf16.gmra.mrb[244].mxu0 %v3150_v27 }
 0x237   : > { %v2800_v53 = vpop.f32.mrb[154].mxu1  ;;  %4701 = vmatprep.mubr.bf16.mxu0 %v7564_v6 }
 0x238   : > { %v2801_v7 = vpop.f32.mrb[155].mxu1 }
 0x239   : > { %v4523_v56 = vpop.f32.mrb[140].mxu0 }
 0x23a   : > { %3588 = vmatmul.mubr.bf16.gmra.mrb[4].mxu1 %v3153_v51  ;;  %v6866_v35 = vadd.f32 %v4523_v56, %v7649_v0  ;;  %v2073_v38 = vpop.f32.mrb[141].mxu0 }
 0x23b   : > { %v6869_v43 = vadd.f32 %v2073_v38, %v7650_v12  ;;  %v4524_v20 = vpop.f32.mrb[142].mxu0  ;;  %3594 = vmatprep.mubr.bf16.mxu1 %v7651_v55  ;;  %v7653_v38 = vld [vmem:[#allocation66_spill] sm:$0xff] }
 0x23c   : > { %v2076_v27 = vpop.f32.mrb[143].mxu0 }
 0x23d   : > { %v6872_v14 = vpop.f32.mrb[156].mxu1 }
 0x23e   : > { %v2806_v21 = vpop.f32.mrb[157].mxu1  ;;  %4702 = vmatmul.mubr.bf16.gmra.mrb[248].mxu0 %v7565_v60 }
 0x23f   : > { %v2807_v6 = vpop.f32.mrb[158].mxu1  ;;  %4705 = vmatprep.mubr.bf16.mxu0 %v7572_v39 }
 0x240   : > { %v2808_v5 = vpop.f32.mrb[159].mxu1 }
 0x241   : > { %v4527_v53 = vpop.f32.mrb[144].mxu0 }
 0x242   : > { %3595 = vmatmul.mubr.bf16.gmra.mrb[8].mxu1 %v7652_v45  ;;  %v6878_v51 = vadd.f32 %v4527_v53, %v6496_v9  ;;  %v2087_v7 = vpop.f32.mrb[145].mxu0  ;;  %v7654_v9 = vld [vmem:[#allocation68_spill] sm:$0xff]  ;;  %v7655_v53 = vld [vmem:[#allocation69_spill] sm:$0xff]  ;;  %v3166_v45 = vshll.u32 %v6309_v15, 16 }
 0x243   : > { %v6881_v56 = vadd.f32 %v2087_v7, %v6474_v50  ;;  %v4528_v0 = vpop.f32.mrb[146].mxu0  ;;  %3601 = vmatprep.mubr.bf16.mxu1 %v7653_v38 }
 0x244   : > { %v2090_v12 = vpop.f32.mrb[147].mxu0 }
 0x245   : > { %v6884_v20 = vpop.f32.mrb[160].mxu1 }
 0x246   : > { %v2813_v60 = vpop.f32.mrb[161].mxu1  ;;  %4706 = vmatmul.mubr.bf16.gmra.mrb[252].mxu0 %v7573_v4 }
 0x247   : > { %v2814_v39 = vpop.f32.mrb[162].mxu1  ;;  %4709 = vmatprep.mubr.bf16.mxu0 %v7579_v57  ;;  %v7656_v60 = vld [vmem:[#allocation73_spill] sm:$0xff] }
 0x248   : > { %v2815_v55 = vpop.f32.mrb[163].mxu1  ;;  %v7657_v39 = vld [vmem:[#allocation96_spill] sm:$0xff] }
 0x249   : > { %v4531_v27 = vpop.f32.mrb[148].mxu0 }
 0x24a   : > { %3602 = vmatmul.mubr.bf16.gmra.mrb[12].mxu1 %v7654_v9  ;;  %v6890_v21 = vadd.f32 %v4531_v27, %v6539_v34  ;;  %v2101_v50 = vpop.f32.mrb[149].mxu0  ;;  %v6902_v34 = vor.u32 %v3166_v45, %v6367_v62  ;;  %v7658_v62 = vld [vmem:[#allocation94_spill] sm:$0xff] }
 0x24b   : > { %v6893_v6 = vadd.f32 %v2101_v50, %v6521_v1  ;;  %v4532_v5 = vpop.f32.mrb[150].mxu0  ;;  %3608 = vmatprep.mubr.bf16.mxu1 %v7655_v53  ;;  %v6907_v1 = vld [vmem:[%s7229_s2] ss:$0 sm:$0xff]  ;;  %v7659_v50 = vld [vmem:[#allocation74_spill] sm:$0xff] }
 0x24c   : > { %v2104_v4 = vpop.f32.mrb[151].mxu0  ;;  %v2255_v15 = vadd.f32 %v6907_v1, %v6824_v16  ;;  %v3169_v5 = vsel %vm795_vm1, %v6691_v17, %v6902_v34 }
 0x24d   : > { %v6897_v7 = vpop.f32.mrb[164].mxu1 }
 0x24e   : > { %v2820_v57 = vpop.f32.mrb[165].mxu1  ;;  %4710 = vmatmul.mubr.bf16.gmra.mrb[0].mxu0 %v7580_v36 }
 0x24f   : > { %v2821_v0 = vpop.f32.mrb[166].mxu1  ;;  %4713 = vmatprep.mubr.bf16.mxu0 %v6704_v19  ;;  %v2254_v19 = vadd.f32 %v6907_v1, %v6827_v63 }
 0x250   : > { %v2822_v38 = vpop.f32.mrb[167].mxu1 }
 0x251   : > { %v4591_v12 = vpop.f32.mrb[152].mxu0 }
 0x252   : > { %3609 = vmatmul.mubr.bf16.gmra.mrb[16].mxu1 %v7656_v60  ;;  %v2866_v36 = vadd.f32 %v4591_v12, %v7657_v39  ;;  %v2858_v55 = vpop.f32.mrb[153].mxu0  ;;  %v2257_v12 = vadd.f32 %v6907_v1, %v6836_v58  ;;  %v2256_v60 = vadd.f32 %v6907_v1, %v6839_v22  ;;  %v7660_v22 = vld [vmem:[#allocation97_spill] sm:$0xff] }
 0x253   : > { %v2859_v27 = vadd.f32 %v2858_v55, %v7658_v62  ;;  %v4592_v9 = vpop.f32.mrb[154].mxu0  ;;  %3615 = vmatprep.mubr.bf16.mxu1 %v7659_v50 }
 0x254   : > { %v6920_v53 = vadd.f32 %v2866_v36, %v2255_v15  ;;  %v2861_v16 = vpop.f32.mrb[155].mxu0 }
 0x255   : > { %v6922_v45 = vadd.f32 %v2859_v27, %v2254_v19  ;;  %v6924_v4 = vpop.f32.mrb[168].mxu1 }
 0x256   : > { %v3430_v57 = vpop.f32.mrb[169].mxu1  ;;  %4714 = vmatmul.mubr.bf16.gmra.mrb[4].mxu0 %v3169_v5  ;;  %v2258_v5 = vadd.f32 %v6907_v1, %v6854_v30 }
 0x257   : > { %v3431_v0 = vpop.f32.mrb[170].mxu1  ;;  %4717 = vmatprep.mubr.bf16.mxu0 %v7593_v18 }
 0x258   : > { %v3432_v63 = vpop.f32.mrb[171].mxu1 }
 0x259   : > { %v4595_v38 = vpop.f32.mrb[156].mxu0 }
 0x25a   : > { %3616 = vmatmul.mubr.bf16.gmra.mrb[20].mxu1 %v6316_v28  ;;  %v2880_v17 = vadd.f32 %v4595_v38, %v6508_v26  ;;  %v2872_v15 = vpop.f32.mrb[157].mxu0 }
 0x25b   : > { %v2873_v39 = vadd.f32 %v2872_v15, %v6488_v54  ;;  %v4596_v36 = vpop.f32.mrb[158].mxu0  ;;  %3622 = vmatprep.mubr.bf16.mxu1 %v6324_v8  ;;  %v658_v54 = vor.u32 %v7660_v22, %v6612_v48  ;;  %v2259_v8 = vadd.f32 %v6907_v1, %v6851_v46 }
 0x25c   : > { %v6935_v55 = vadd.f32 %v2880_v17, %v2257_v12  ;;  %v2875_v18 = vpop.f32.mrb[159].mxu0  ;;  %v7661_v12 = vld [vmem:[#allocation88_spill] sm:$0xff]  ;;  %v7662_v17 = vld [vmem:[#allocation105_spill] sm:$0xff]  ;;  %v7663_v36 = vld [vmem:[#allocation103_spill] sm:$0xff] }
 0x25d   : > { %v6937_v19 = vadd.f32 %v2873_v39, %v2256_v60  ;;  %v6939_v62 = vpop.f32.mrb[172].mxu1  ;;  %v3174_v57 = vshrl.u32 %v658_v54, 16  ;;  %v2260_v39 = vadd.f32 %v6907_v1, %v6869_v43 }
 0x25e   : > { %v3437_v58 = vpop.f32.mrb[173].mxu1  ;;  %4718 = vmatmul.mubr.bf16.gmra.mrb[8].mxu0 %v7594_v24 }
 0x25f   : > { %v3438_v28 = vpop.f32.mrb[174].mxu1  ;;  %4721 = vmatprep.mubr.bf16.mxu0 %v7603_v47  ;;  %v3176_v63 = vrot.slane %v3174_v57, 7  ;;  %v7664_v58 = vld [vmem:[#allocation100_spill] sm:$0xff] }
 0x260   : > { %v3439_v26 = vpop.f32.mrb[175].mxu1 }
 0x261   : > { %v4599_v27 = vpop.f32.mrb[160].mxu0 }
 0x262   : > { %3623 = vmatmul.mubr.bf16.gmra.mrb[24].mxu1 %v6345_v49  ;;  %v2894_v9 = vadd.f32 %v4599_v27, %v6546_v40  ;;  %v2886_v50 = vpop.f32.mrb[161].mxu0 }
 0x263   : > { %v2887_v24 = vadd.f32 %v2886_v50, %v6531_v32  ;;  %v4600_v16 = vpop.f32.mrb[162].mxu0  ;;  %3629 = vmatprep.mubr.bf16.mxu1 %v6349_v11  ;;  %v3177_v32 = vshll.u32 %v658_v54, 16  ;;  %v2261_v11 = vadd.f32 %v6907_v1, %v6866_v35 }
 0x264   : > { %v6953_v47 = vadd.f32 %v2894_v9, %v2259_v8  ;;  %v2889_v48 = vpop.f32.mrb[163].mxu0  ;;  %v7665_v8 = vld [vmem:[#allocation98_spill] sm:$0xff]  ;;  %v7667_v16 = vld [vmem:[#allocation109_spill] sm:$0xff] }
 0x265   : > { %v6955_v0 = vadd.f32 %v2887_v24, %v2258_v5  ;;  %v6957_v46 = vpop.f32.mrb[176].mxu1  ;;  %v3179_v26 = vor.u32 %v3177_v32, %v3176_v63  ;;  %v2263_v5 = vadd.f32 %v6907_v1, %v6878_v51  ;;  %v7666_v24 = vld [vmem:[#allocation101_spill] sm:$0xff]  ;;  %v7669_v63 = vld [vmem:[#allocation80_spill] sm:$0xff] }
 0x266   : > { %v3444_v49 = vpop.f32.mrb[177].mxu1  ;;  %4722 = vmatmul.mubr.bf16.gmra.mrb[12].mxu0 %v7604_v52  ;;  %v7670_v32 = vshll.u32 %v7669_v63, 16 }
 0x267   : > { %v3445_v40 = vpop.f32.mrb[178].mxu1  ;;  %4725 = vmatprep.mubr.bf16.mxu0 %v7610_v41  ;;  %v3180_v9 = vsel %vm795_vm1, %v7665_v8, %v3179_v26  ;;  %v2262_v49 = vadd.f32 %v6907_v1, %v6881_v56 }
 0x268   : > { %v3446_v30 = vpop.f32.mrb[179].mxu1  ;;  %v3171_v51 = vor.u32 %v6646_v33, %v7670_v32  ;;  %v7672_v33 = vld [vmem:[#allocation4_spill] sm:$0xff] }
 0x269   : > { %v4603_v38 = vpop.f32.mrb[164].mxu0 }
 0x26a   : > { %3630 = vmatmul.mubr.bf16.gmra.mrb[28].mxu1 %v7661_v12  ;;  %v2908_v15 = vadd.f32 %v4603_v38, %v7662_v17  ;;  %v2900_v60 = vpop.f32.mrb[165].mxu0 }
 0x26b   : > { %v2901_v52 = vadd.f32 %v2900_v60, %v7663_v36  ;;  %v4604_v18 = vpop.f32.mrb[166].mxu0  ;;  %3636 = vmatprep.mubr.bf16.mxu1 %v7664_v58  ;;  %v7671_v60 = vld [vmem:[#allocation99_spill] sm:$0xff]  ;;  %v2264_v58 = vadd.f32 %v6907_v1, %v6893_v6 }
 0x26c   : > { %v6969_v41 = vadd.f32 %v2908_v15, %v2261_v11  ;;  %v2903_v28 = vpop.f32.mrb[167].mxu0 }
 0x26d   : > { %v6971_v22 = vadd.f32 %v2901_v52, %v2260_v39  ;;  %v6973_v35 = vpop.f32.mrb[180].mxu1  ;;  %v3172_v39 = vsel %vm795_vm1, %v7671_v60, %v3171_v51  ;;  %v7673_v28 = vld [vmem:[#allocation30_spill] sm:$0xff] }
 0x26e   : > { %v3451_v54 = vpop.f32.mrb[181].mxu1  ;;  %4726 = vmatmul.mubr.bf16.gmra.mrb[16].mxu0 %v7611_v10  ;;  %v7668_v10 = vld [vmem:[#allocation107_spill] sm:$0xff] }
 0x26f   : > { %v3452_v27 = vpop.f32.mrb[182].mxu1  ;;  %4729 = vmatprep.mubr.bf16.mxu0 %v6758_v25  ;;  %v3188_v25 = vsel %vm795_vm1, %v6740_v3, %v6902_v34  ;;  %v2265_v3 = vadd.f32 %v6907_v1, %v6890_v21 }
 0x270   : > { %v3453_v43 = vpop.f32.mrb[183].mxu1 }
 0x271   : > { %v4607_v50 = vpop.f32.mrb[168].mxu0 }
 0x272   : > { %3637 = vmatmul.mubr.bf16.gmra.mrb[32].mxu1 %v7666_v24  ;;  %v2922_v48 = vadd.f32 %v4607_v50, %v7667_v16  ;;  %v2914_v57 = vpop.f32.mrb[169].mxu0  ;;  %v7674_v16 = vld [vmem:[#allocation104_spill] sm:$0xff] }
 0x273   : > { %v2915_v40 = vadd.f32 %v2914_v57, %v7668_v10  ;;  %v4608_v30 = vpop.f32.mrb[170].mxu0  ;;  %3643 = vmatprep.mubr.bf16.mxu1 %v3180_v9  ;;  %v7675_v57 = vld [vmem:[#allocation7_spill] sm:$0xff]  ;;  %v7676_v10 = vld [vmem:[#allocation102_spill] sm:$0xff] }
 0x274   : > { %v6992_v38 = vadd.f32 %v2922_v48, %v2263_v5  ;;  %v2917_v11 = vpop.f32.mrb[171].mxu0  ;;  %v2267_v48 = vadd.f32 %v6907_v1, %v7674_v16  ;;  %v7677_v30 = vld [vmem:[#allocation32_spill] sm:$0xff] }
 0x275   : > { %v6994_v12 = vadd.f32 %v2915_v40, %v2262_v49  ;;  %v6996_v17 = vpop.f32.mrb[184].mxu1  ;;  %v2266_v40 = vadd.f32 %v6907_v1, %v7676_v10 }
 0x276   : > { %v3458_v56 = vpop.f32.mrb[185].mxu1  ;;  %4730 = vmatmul.mubr.bf16.gmra.mrb[20].mxu0 %v3188_v25 }
 0x277   : > { %v3459_v15 = vpop.f32.mrb[186].mxu1 }
 0x278   : > { %v3460_v36 = vpop.f32.mrb[187].mxu1 }
 0x279   : > { %v4611_v52 = vpop.f32.mrb[172].mxu0 }
 0x27a   : > { %3644 = vmatmul.mubr.bf16.gmra.mrb[36].mxu1 %v3172_v39  ;;  %v2936_v34 = vadd.f32 %v4611_v52, %v7672_v33  ;;  %v2928_v18 = vpop.f32.mrb[173].mxu0  ;;  %v7678_v52 = vld [vmem:[#allocation108_spill] sm:$0xff]  ;;  %v7679_v33 = vld [vmem:[#allocation6_spill] sm:$0xff] }
 0x27b   : > { %v2929_v26 = vadd.f32 %v2928_v18, %v7673_v28  ;;  %v4612_v54 = vpop.f32.mrb[174].mxu0 }
 0x27c   : > { %v7006_v27 = vadd.f32 %v2936_v34, %v2265_v3  ;;  %v2931_v43 = vpop.f32.mrb[175].mxu0  ;;  %v2269_v3 = vadd.f32 %v6907_v1, %v7678_v52 }
 0x27d   : > { %v7008_v8 = vadd.f32 %v2929_v26, %v2264_v58  ;;  %v7010_v9 = vpop.f32.mrb[188].mxu1  ;;  %v7680_v58 = vld [vmem:[#allocation106_spill] sm:$0xff] }
 0x27e   : > { %v3465_v50 = vpop.f32.mrb[189].mxu1  ;;  %v2268_v28 = vadd.f32 %v6907_v1, %v7680_v58  ;;  %v7681_v26 = vld [vmem:[#allocation38_spill] sm:$0xff] }
 0x27f   : > { %v3466_v5 = vpop.f32.mrb[190].mxu1 }
 0x280   : > { %v3467_v21 = vpop.f32.mrb[191].mxu1 }
 0x281   : > { %v4615_v24 = vpop.f32.mrb[176].mxu0 }
 0x282   : > { %v2950_v49 = vadd.f32 %v4615_v24, %v7675_v57  ;;  %v2942_v6 = vpop.f32.mrb[177].mxu0 }
 0x283   : > { %v2943_v25 = vadd.f32 %v2942_v6, %v7677_v30  ;;  %v4616_v63 = vpop.f32.mrb[178].mxu0  ;;  %v7682_v6 = vld [vmem:[#allocation3_spill] sm:$0xff] }
 0x284   : > { %v7018_v32 = vadd.f32 %v2950_v49, %v2267_v48  ;;  %v2945_v51 = vpop.f32.mrb[179].mxu0  ;;  %v2271_v10 = vadd.f32 %v6907_v1, %v7682_v6  ;;  %v7684_v63 = vld [vmem:[#allocation29_spill] sm:$0xff] }
 0x285   : > { %v7020_v11 = vadd.f32 %v2943_v25, %v2266_v40  ;;  %v7022_v56 = vpop.f32.mrb[192].mxu1  ;;  %v7683_v40 = vld [vmem:[#allocation11_spill] sm:$0xff]  ;;  %v2270_v51 = vadd.f32 %v6907_v1, %v7684_v63 }
 0x286   : > { %v3472_v15 = vpop.f32.mrb[193].mxu1 }
 0x287   : > { %v3473_v60 = vpop.f32.mrb[194].mxu1  ;;  %v7685_v15 = vld [vmem:[#allocation9_spill] sm:$0xff] }
 0x288   : > { %v3474_v39 = vpop.f32.mrb[195].mxu1 }
 0x289   : > { %v4619_v36 = vpop.f32.mrb[180].mxu0 }
 0x28a   : > { %v2964_v34 = vadd.f32 %v4619_v36, %v7679_v33  ;;  %v2956_v18 = vpop.f32.mrb[181].mxu0 }
 0x28b   : > { %v2957_v54 = vadd.f32 %v2956_v18, %v7681_v26  ;;  %v4620_v43 = vpop.f32.mrb[182].mxu0  ;;  %v7686_v26 = vld [vmem:[#allocation41_spill] sm:$0xff] }
 0x28c   : > { %v7030_v50 = vadd.f32 %v2964_v34, %v2269_v3  ;;  %v2959_v5 = vpop.f32.mrb[183].mxu0  ;;  %v7687_v43 = vld [vmem:[#allocation10_spill] sm:$0xff] }
 0x28d   : > { %v7032_v21 = vadd.f32 %v2957_v54, %v2268_v28  ;;  %v7034_v24 = vpop.f32.mrb[196].mxu1  ;;  %v2273_v54 = vadd.f32 %v6907_v1, %v7686_v26 }
 0x28e   : > { %v3479_v16 = vpop.f32.mrb[197].mxu1 }
 0x28f   : > { %v3480_v48 = vpop.f32.mrb[198].mxu1 }
 0x290   : > { %v3481_v57 = vpop.f32.mrb[199].mxu1  ;;  %v7688_v48 = vld [vmem:[#allocation5_spill] sm:$0xff] }
 0x291   : > { %v4623_v49 = vpop.f32.mrb[184].mxu0  ;;  %v2272_v57 = vadd.f32 %v6907_v1, %v7688_v48 }
 0x292   : > { %v2978_v30 = vadd.f32 %v4623_v49, %v7683_v40  ;;  %v2970_v25 = vpop.f32.mrb[185].mxu0  ;;  %v7689_v49 = vld [vmem:[#allocation35_spill] sm:$0xff] }
 0x293   : > { %v2971_v60 = vadd.f32 %v2970_v25, %v7685_v15  ;;  %v4624_v39 = vpop.f32.mrb[186].mxu0 }
 0x294   : > { %v7042_v36 = vadd.f32 %v2978_v30, %v2271_v10  ;;  %v2973_v52 = vpop.f32.mrb[187].mxu0 }
 0x295   : > { %v7044_v3 = vadd.f32 %v2971_v60, %v2270_v51  ;;  %v7046_v33 = vpop.f32.mrb[200].mxu1  ;;  %v7690_v52 = vld [vmem:[#allocation44_spill] sm:$0xff] }
 0x296   : > { %v3486_v34 = vpop.f32.mrb[201].mxu1 }
 0x297   : > { %v3487_v18 = vpop.f32.mrb[202].mxu1  ;;  %v2275_v34 = vadd.f32 %v6907_v1, %v7690_v52  ;;  %v7695_v52 = vld [vmem:[#allocation40_spill] sm:$0xff] }
 0x298   : > { %v3488_v58 = vpop.f32.mrb[203].mxu1 }
 0x299   : > { %v4627_v28 = vpop.f32.mrb[188].mxu0 }
 0x29a   : > { %v2992_v5 = vadd.f32 %v4627_v28, %v7687_v43  ;;  %v2984_v16 = vpop.f32.mrb[189].mxu0  ;;  %v7691_v28 = vld [vmem:[#allocation8_spill] sm:$0xff] }
 0x29b   : > { %v2985_v6 = vadd.f32 %v2984_v16, %v7689_v49  ;;  %v4628_v10 = vpop.f32.mrb[190].mxu0  ;;  %v2274_v26 = vadd.f32 %v6907_v1, %v7691_v28 }
 0x29c   : > { %v7054_v40 = vadd.f32 %v2992_v5, %v2273_v54  ;;  %v2987_v30 = vpop.f32.mrb[191].mxu0  ;;  %v7692_v54 = vld [vmem:[#allocation15_spill] sm:$0xff] }
 0x29d   : > { %v7056_v25 = vadd.f32 %v2985_v6, %v2272_v57  ;;  %v7058_v63 = vpop.f32.mrb[204].mxu1 }
 0x29e   : > { %v3493_v51 = vpop.f32.mrb[205].mxu1 }
 0x29f   : > { %v3494_v15 = vpop.f32.mrb[206].mxu1 }
 0x2a0   : > { %v3495_v60 = vpop.f32.mrb[207].mxu1  ;;  %v7694_v15 = vld [vmem:[#allocation33_spill] sm:$0xff] }
 0x2a1   : > { %v4631_v39 = vpop.f32.mrb[192].mxu0 }
 0x2a2   : > { %v3006_v18 = vadd.f32 %v4631_v39, %v6775_v23  ;;  %v2998_v58 = vpop.f32.mrb[193].mxu0  ;;  %v2277_v23 = vadd.f32 %v6907_v1, %v7694_v15  ;;  %v7698_v15 = vld [vmem:[#allocation27_spill] sm:$0xff] }
 0x2a3   : > { %v2999_v43 = vadd.f32 %v2998_v58, %v7692_v54  ;;  %v4632_v5 = vpop.f32.mrb[194].mxu0  ;;  %v2276_v58 = vadd.f32 %v6907_v1, %v7695_v52 }
 0x2a4   : > { %v7066_v16 = vadd.f32 %v3006_v18, %v2275_v34  ;;  %v3001_v48 = vpop.f32.mrb[195].mxu0  ;;  %v7696_v34 = vld [vmem:[#allocation31_spill] sm:$0xff] }
 0x2a5   : > { %v7068_v57 = vadd.f32 %v2999_v43, %v2274_v26  ;;  %v7070_v49 = vpop.f32.mrb[208].mxu1 }
 0x2a6   : > { %v3500_v6 = vpop.f32.mrb[209].mxu1 }
 0x2a7   : > { %7693 = vst [vmem:[#allocation16_spill] sm:$0xff] %v7068_v57  ;;  %v3501_v10 = vpop.f32.mrb[210].mxu1  ;;  %v7699_v57 = vld [vmem:[#allocation12_spill] sm:$0xff] }
 0x2a8   : > { %v3502_v30 = vpop.f32.mrb[211].mxu1 }
 0x2a9   : > { %v4635_v51 = vpop.f32.mrb[196].mxu0 }
 0x2aa   : > { %v3020_v60 = vadd.f32 %v4635_v51, %v6796_v37  ;;  %v3012_v39 = vpop.f32.mrb[197].mxu0  ;;  %v2279_v37 = vadd.f32 %v6907_v1, %v7698_v15  ;;  %v7700_v15 = vld [vmem:[#allocation37_spill] sm:$0xff] }
 0x2ab   : > { %v3013_v18 = vadd.f32 %v3012_v39, %v7696_v34  ;;  %v4636_v28 = vpop.f32.mrb[198].mxu0  ;;  %v2278_v39 = vadd.f32 %v6907_v1, %v7699_v57 }
 0x2ac   : > { %v7078_v26 = vadd.f32 %v3020_v60, %v2277_v23  ;;  %v3015_v54 = vpop.f32.mrb[199].mxu0 }
 0x2ad   : > { %v7080_v43 = vadd.f32 %v3013_v18, %v2276_v58  ;;  %v7082_v5 = vpop.f32.mrb[212].mxu1 }
 0x2ae   : > { %v3507_v48 = vpop.f32.mrb[213].mxu1 }
 0x2af   : > { %7697 = vst [vmem:[#allocation17_spill] sm:$0xff] %v7080_v43  ;;  %v3508_v6 = vpop.f32.mrb[214].mxu1  ;;  %v7701_v43 = vld [vmem:[#allocation13_spill] sm:$0xff] }
 0x2b0   : > { %v3509_v10 = vpop.f32.mrb[215].mxu1 }
 0x2b1   : > { %v4639_v30 = vpop.f32.mrb[200].mxu0 }
 0x2b2   : > { %v3034_v51 = vadd.f32 %v4639_v30, %v6818_v31  ;;  %v3026_v52 = vpop.f32.mrb[201].mxu0  ;;  %v2281_v31 = vadd.f32 %v6907_v1, %v7700_v15  ;;  %v7702_v15 = vld [vmem:[#allocation70_spill] sm:$0xff] }
 0x2b3   : > { %v3027_v23 = vadd.f32 %v3026_v52, %v6810_v44  ;;  %v4640_v60 = vpop.f32.mrb[202].mxu0  ;;  %v2280_v44 = vadd.f32 %v6907_v1, %v7701_v43 }
 0x2b4   : > { %v7090_v58 = vadd.f32 %v3034_v51, %v2279_v37  ;;  %v3029_v34 = vpop.f32.mrb[203].mxu0 }
 0x2b5   : > { %v7092_v18 = vadd.f32 %v3027_v23, %v2278_v39  ;;  %v7094_v28 = vpop.f32.mrb[216].mxu1 }
 0x2b6   : > { %v3514_v54 = vpop.f32.mrb[217].mxu1 }
 0x2b7   : > { %v3515_v48 = vpop.f32.mrb[218].mxu1 }
 0x2b8   : > { %v3516_v6 = vpop.f32.mrb[219].mxu1 }
 0x2b9   : > { %v4643_v10 = vpop.f32.mrb[204].mxu0 }
 0x2ba   : > { %v3048_v30 = vadd.f32 %v4643_v10, %v6842_v2  ;;  %v3040_v57 = vpop.f32.mrb[205].mxu0  ;;  %v2283_v2 = vadd.f32 %v6907_v1, %v6793_v29 }
 0x2bb   : > { %v3041_v37 = vadd.f32 %v3040_v57, %v6830_v42  ;;  %v4644_v51 = vpop.f32.mrb[206].mxu0  ;;  %v2282_v42 = vadd.f32 %v6907_v1, %v7702_v15 }
 0x2bc   : > { %v7102_v52 = vadd.f32 %v3048_v30, %v2281_v31  ;;  %v3043_v39 = vpop.f32.mrb[207].mxu0 }
 0x2bd   : > { %v7104_v23 = vadd.f32 %v3041_v37, %v2280_v44  ;;  %v7106_v60 = vpop.f32.mrb[220].mxu1 }
 0x2be   : > { %v3521_v34 = vpop.f32.mrb[221].mxu1 }
 0x2bf   : > { %v3522_v54 = vpop.f32.mrb[222].mxu1 }
 0x2c0   : > { %v3523_v48 = vpop.f32.mrb[223].mxu1 }
 0x2c1   : > { %v4647_v6 = vpop.f32.mrb[208].mxu0 }
 0x2c2   : > { %v3062_v10 = vadd.f32 %v4647_v6, %v6872_v14  ;;  %v3054_v43 = vpop.f32.mrb[209].mxu0  ;;  %v2285_v14 = vadd.f32 %v6907_v1, %v6815_v61 }
 0x2c3   : > { %v3055_v31 = vadd.f32 %v3054_v43, %v6859_v13  ;;  %v4648_v30 = vpop.f32.mrb[210].mxu0  ;;  %v2284_v13 = vadd.f32 %v6907_v1, %v6804_v59 }
 0x2c4   : > { %v7114_v57 = vadd.f32 %v3062_v10, %v2283_v2  ;;  %v3057_v44 = vpop.f32.mrb[211].mxu0 }
 0x2c5   : > { %v7116_v37 = vadd.f32 %v3055_v31, %v2282_v42  ;;  %v7118_v51 = vpop.f32.mrb[224].mxu1 }
 0x2c6   : > { %v3528_v39 = vpop.f32.mrb[225].mxu1 }
 0x2c7   : > { %v3529_v34 = vpop.f32.mrb[226].mxu1 }
 0x2c8   : > { %v3530_v54 = vpop.f32.mrb[227].mxu1 }
 0x2c9   : > { %v4651_v29 = vpop.f32.mrb[212].mxu0 }
 0x2ca   : > { %v3076_v48 = vadd.f32 %v4651_v29, %v6897_v7  ;;  %v3068_v6 = vpop.f32.mrb[213].mxu0 }
 0x2cb   : > { %v3069_v2 = vadd.f32 %v3068_v6, %v6884_v20  ;;  %v4652_v10 = vpop.f32.mrb[214].mxu0 }
 0x2cc   : > { %v7126_v43 = vadd.f32 %v3076_v48, %v2285_v14  ;;  %v3071_v15 = vpop.f32.mrb[215].mxu0 }
 0x2cd   : > { %v7128_v42 = vadd.f32 %v3069_v2, %v2284_v13  ;;  %v7130_v31 = vpop.f32.mrb[228].mxu1 }
 0x2ce   : > { %v3535_v30 = vpop.f32.mrb[229].mxu1 }
 0x2cf   : > { %v3536_v44 = vpop.f32.mrb[230].mxu1 }
 0x2d0   : > { %v3537_v61 = vpop.f32.mrb[231].mxu1 }
 0x2d1   : > { %v4671_v39 = vpop.f32.mrb[216].mxu0 }
 0x2d2   : > { %v3693_v7 = vadd.f32 %v4671_v39, %v6939_v62  ;;  %v3685_v34 = vpop.f32.mrb[217].mxu0 }
 0x2d3   : > { %v3686_v59 = vadd.f32 %v3685_v34, %v6924_v4  ;;  %v4672_v1 = vpop.f32.mrb[218].mxu0 }
 0x2d4   : > { %v3909_v20 = vadd.f32 %v3693_v7, %v6920_v53  ;;  %v3688_v54 = vpop.f32.mrb[219].mxu0 }
 0x2d5   : > { %v7135_v29 = vpop.f32.mrb[232].mxu1  ;;  %v3908_v14 = vadd.f32 %v3686_v59, %v6922_v45 }
 0x2d6   : > { %v3941_v48 = vmax.f32 %v3909_v20, 0.0  ;;  %v3542_v6 = vpop.f32.mrb[233].mxu1 }
 0x2d7   : > { %v3940_v13 = vmax.f32 %v3908_v14, 0.0  ;;  %v3543_v2 = vpop.f32.mrb[234].mxu1 }
 0x2d8   : > { %v3544_v4 = vpop.f32.mrb[235].mxu1 }
 0x2d9   : > { %v4281_v62 = vpack.c.bf16 %v3941_v48, %v3940_v13  ;;  %v4675_v10 = vpop.f32.mrb[220].mxu0 }
 0x2da   : > { %v3707_v53 = vadd.f32 %v4675_v10, %v6973_v35  ;;  %v3699_v15 = vpop.f32.mrb[221].mxu0 }
 0x2db   : > { %4282 = vst [vmem:[%s7143_s25] sm:$0xff] %v4281_v62   ;;  %v3700_v45 = vadd.f32 %v3699_v15, %v6957_v46  ;;  %v4676_v30 = vpop.f32.mrb[222].mxu0 }
 0x2dc   : > { %v3911_v44 = vadd.f32 %v3707_v53, %v6935_v55  ;;  %v3702_v61 = vpop.f32.mrb[223].mxu0 }
 0x2dd   : > { %v7149_v39 = vpop.f32.mrb[236].mxu1  ;;  %v3910_v7 = vadd.f32 %v3700_v45, %v6937_v19 }
 0x2de   : > { %v3943_v34 = vmax.f32 %v3911_v44, 0.0  ;;  %v3549_v59 = vpop.f32.mrb[237].mxu1 }
 0x2df   : > { %v3942_v1 = vmax.f32 %v3910_v7, 0.0  ;;  %v3550_v20 = vpop.f32.mrb[238].mxu1 }
 0x2e0   : > { %v3551_v54 = vpop.f32.mrb[239].mxu1 }
 0x2e1   : > { %v4286_v14 = vpack.c.bf16 %v3943_v34, %v3942_v1  ;;  %v4679_v35 = vpop.f32.mrb[224].mxu0 }
 0x2e2   : > { %v3721_v48 = vadd.f32 %v4679_v35, %v7010_v9  ;;  %v3713_v6 = vpop.f32.mrb[225].mxu0 }
 0x2e3   : > { %4358 = vst [vmem:[%s7143_s25 + $0x8] sm:$0xff] %v4286_v14   ;;  %v3714_v46 = vadd.f32 %v3713_v6, %v6996_v17  ;;  %v4680_v55 = vpop.f32.mrb[226].mxu0 }
 0x2e4   : > { %v3913_v13 = vadd.f32 %v3721_v48, %v6953_v47  ;;  %v3716_v2 = vpop.f32.mrb[227].mxu0 }
 0x2e5   : > { %v7156_v4 = vpop.f32.mrb[240].mxu1  ;;  %v3912_v19 = vadd.f32 %v3714_v46, %v6955_v0 }
 0x2e6   : > { %v3945_v62 = vmax.f32 %v3913_v13, 0.0  ;;  %v3556_v10 = vpop.f32.mrb[241].mxu1 }
 0x2e7   : > { %v3944_v53 = vmax.f32 %v3912_v19, 0.0  ;;  %v3557_v15 = vpop.f32.mrb[242].mxu1 }
 0x2e8   : > { %v3558_v45 = vpop.f32.mrb[243].mxu1 }
 0x2e9   : > { %v4291_v30 = vpack.c.bf16 %v3945_v62, %v3944_v53  ;;  %v4683_v9 = vpop.f32.mrb[228].mxu0 }
 0x2ea   : > { %v3735_v44 = vadd.f32 %v4683_v9, %v7034_v24  ;;  %v3727_v61 = vpop.f32.mrb[229].mxu0 }
 0x2eb   : > { %4359 = vst [vmem:[%s7143_s25 + $0x10] sm:$0xff] %v4291_v30   ;;  %v3728_v17 = vadd.f32 %v3727_v61, %v7022_v56  ;;  %v4684_v47 = vpop.f32.mrb[230].mxu0 }
 0x2ec   : > { %v3915_v7 = vadd.f32 %v3735_v44, %v6969_v41  ;;  %v3730_v34 = vpop.f32.mrb[231].mxu0 }
 0x2ed   : > { %v7163_v59 = vpop.f32.mrb[244].mxu1  ;;  %v3914_v0 = vadd.f32 %v3728_v17, %v6971_v22 }
 0x2ee   : > { %v3947_v1 = vmax.f32 %v3915_v7, 0.0  ;;  %v3563_v20 = vpop.f32.mrb[245].mxu1 }
 0x2ef   : > { %v3946_v54 = vmax.f32 %v3914_v0, 0.0  ;;  %v3564_v14 = vpop.f32.mrb[246].mxu1 }
 0x2f0   : > { %v3565_v35 = vpop.f32.mrb[247].mxu1 }
 0x2f1   : > { %v4296_v48 = vpack.c.bf16 %v3947_v1, %v3946_v54  ;;  %v4687_v24 = vpop.f32.mrb[232].mxu0 }
 0x2f2   : > { %v3749_v6 = vadd.f32 %v4687_v24, %v7058_v63  ;;  %v3741_v46 = vpop.f32.mrb[233].mxu0 }
 0x2f3   : > { %4360 = vst [vmem:[%s7143_s25 + $0x18] sm:$0xff] %v4296_v48   ;;  %v3742_v56 = vadd.f32 %v3741_v46, %v7046_v33  ;;  %v4688_v41 = vpop.f32.mrb[234].mxu0 }
 0x2f4   : > { %v3917_v55 = vadd.f32 %v3749_v6, %v6992_v38  ;;  %v3744_v13 = vpop.f32.mrb[235].mxu0 }
 0x2f5   : > { %v7170_v2 = vpop.f32.mrb[248].mxu1  ;;  %v3916_v22 = vadd.f32 %v3742_v56, %v6994_v12 }
 0x2f6   : > { %v3949_v19 = vmax.f32 %v3917_v55, 0.0  ;;  %v3570_v62 = vpop.f32.mrb[249].mxu1 }
 0x2f7   : > { %v3948_v10 = vmax.f32 %v3916_v22, 0.0  ;;  %v3571_v53 = vpop.f32.mrb[250].mxu1 }
 0x2f8   : > { %v3572_v15 = vpop.f32.mrb[251].mxu1 }
 0x2f9   : > { %v4301_v45 = vpack.c.bf16 %v3949_v19, %v3948_v10  ;;  %v4691_v63 = vpop.f32.mrb[236].mxu0 }
 0x2fa   : > { %v3763_v30 = vadd.f32 %v4691_v63, %v7082_v5  ;;  %v3755_v9 = vpop.f32.mrb[237].mxu0 }
 0x2fb   : > { %4361 = vst [vmem:[%s7143_s25 + $0x20] sm:$0xff] %v4301_v45   ;;  %v3756_v33 = vadd.f32 %v3755_v9, %v7070_v49  ;;  %v4692_v38 = vpop.f32.mrb[238].mxu0 }
 0x2fc   : > { %v3919_v44 = vadd.f32 %v3763_v30, %v7006_v27  ;;  %v3758_v61 = vpop.f32.mrb[239].mxu0 }
 0x2fd   : > { %v7177_v17 = vpop.f32.mrb[252].mxu1  ;;  %v3918_v12 = vadd.f32 %v3756_v33, %v7008_v8 }
 0x2fe   : > { %v3951_v47 = vmax.f32 %v3919_v44, 0.0  ;;  %v3577_v7 = vpop.f32.mrb[253].mxu1 }
 0x2ff   : > { %v3950_v34 = vmax.f32 %v3918_v12, 0.0  ;;  %v3578_v0 = vpop.f32.mrb[254].mxu1 }
 0x300   : > { %v3579_v1 = vpop.f32.mrb[255].mxu1 }
 0x301   : > { %v4306_v20 = vpack.c.bf16 %v3951_v47, %v3950_v34  ;;  %v4695_v5 = vpop.f32.mrb[240].mxu0 }
 0x302   : > { %v3777_v54 = vadd.f32 %v4695_v5, %v7106_v60  ;;  %v3769_v14 = vpop.f32.mrb[241].mxu0 }
 0x303   : > { %4362 = vst [vmem:[%s7143_s25 + $0x28] sm:$0xff] %v4306_v20   ;;  %v3770_v49 = vadd.f32 %v3769_v14, %v7094_v28  ;;  %v4696_v27 = vpop.f32.mrb[242].mxu0 }
 0x304   : > { %v3921_v35 = vadd.f32 %v3777_v54, %v7018_v32  ;;  %v3772_v48 = vpop.f32.mrb[243].mxu0 }
 0x305   : > { %v7184_v24 = vpop.f32.mrb[0].mxu1  ;;  %v3920_v8 = vadd.f32 %v3770_v49, %v7020_v11 }
 0x306   : > { %v3953_v6 = vmax.f32 %v3921_v35, 0.0  ;;  %v3584_v46 = vpop.f32.mrb[1].mxu1 }
 0x307   : > { %v3952_v56 = vmax.f32 %v3920_v8, 0.0  ;;  %v3585_v41 = vpop.f32.mrb[2].mxu1 }
 0x308   : > { %v3586_v55 = vpop.f32.mrb[3].mxu1 }
 0x309   : > { %v4311_v13 = vpack.c.bf16 %v3953_v6, %v3952_v56  ;;  %v4699_v60 = vpop.f32.mrb[244].mxu0 }
 0x30a   : > { %v3791_v22 = vadd.f32 %v4699_v60, %v7130_v31  ;;  %v3783_v19 = vpop.f32.mrb[245].mxu0 }
 0x30b   : > { %4363 = vst [vmem:[%s7143_s25 + $0x30] sm:$0xff] %v4311_v13   ;;  %v3784_v28 = vadd.f32 %v3783_v19, %v7118_v51  ;;  %v4700_v32 = vpop.f32.mrb[246].mxu0 }
 0x30c   : > { %v3923_v62 = vadd.f32 %v3791_v22, %v7030_v50  ;;  %v3786_v10 = vpop.f32.mrb[247].mxu0 }
 0x30d   : > { %v3589_v53 = vpop.f32.mrb[4].mxu1  ;;  %v3922_v11 = vadd.f32 %v3784_v28, %v7032_v21 }
 0x30e   : > { %v3955_v15 = vmax.f32 %v3923_v62, 0.0  ;;  %v3591_v45 = vpop.f32.mrb[5].mxu1 }
 0x30f   : > { %v3954_v63 = vmax.f32 %v3922_v11, 0.0  ;;  %v3592_v30 = vpop.f32.mrb[6].mxu1 }
 0x310   : > { %v3593_v9 = vpop.f32.mrb[7].mxu1 }
 0x311   : > { %v4316_v33 = vpack.c.bf16 %v3955_v15, %v3954_v63  ;;  %v4703_v38 = vpop.f32.mrb[248].mxu0 }
 0x312   : > { %v3805_v31 = vadd.f32 %v4703_v38, %v7149_v39  ;;  %v3797_v44 = vpop.f32.mrb[249].mxu0 }
 0x313   : > { %4364 = vst [vmem:[%s7143_s25 + $0x38] sm:$0xff] %v4316_v33   ;;  %v3798_v51 = vadd.f32 %v3797_v44, %v7135_v29  ;;  %v4704_v61 = vpop.f32.mrb[250].mxu0 }
 0x314   : > { %v3925_v50 = vadd.f32 %v3805_v31, %v7042_v36  ;;  %v3800_v12 = vpop.f32.mrb[251].mxu0  ;;  %v7704_v31 = vld [vmem:[#allocation17_spill] sm:$0xff] }
 0x315   : > { %v3596_v47 = vpop.f32.mrb[8].mxu1  ;;  %v3924_v21 = vadd.f32 %v3798_v51, %v7044_v3 }
 0x316   : > { %v3957_v7 = vmax.f32 %v3925_v50, 0.0  ;;  %v3598_v34 = vpop.f32.mrb[9].mxu1 }
 0x317   : > { %v3956_v0 = vmax.f32 %v3924_v21, 0.0  ;;  %v3599_v1 = vpop.f32.mrb[10].mxu1 }
 0x318   : > { %v3600_v20 = vpop.f32.mrb[11].mxu1 }
 0x319   : > { %v4321_v5 = vpack.c.bf16 %v3957_v7, %v3956_v0  ;;  %v4707_v54 = vpop.f32.mrb[252].mxu0 }
 0x31a   : > { %v3819_v39 = vadd.f32 %v4707_v54, %v7163_v59  ;;  %v3811_v14 = vpop.f32.mrb[253].mxu0 }
 0x31b   : > { %4365 = vst [vmem:[%s7143_s25 + $0x40] sm:$0xff] %v4321_v5   ;;  %v3812_v29 = vadd.f32 %v3811_v14, %v7156_v4  ;;  %v4708_v49 = vpop.f32.mrb[254].mxu0 }
 0x31c   : > { %v3927_v36 = vadd.f32 %v3819_v39, %v7054_v40  ;;  %v3814_v27 = vpop.f32.mrb[255].mxu0 }
 0x31d   : > { %v3603_v35 = vpop.f32.mrb[12].mxu1  ;;  %v3926_v3 = vadd.f32 %v3812_v29, %v7056_v25  ;;  %v7703_v25 = vld [vmem:[#allocation16_spill] sm:$0xff] }
 0x31e   : > { %v3959_v48 = vmax.f32 %v3927_v36, 0.0  ;;  %v3605_v8 = vpop.f32.mrb[13].mxu1 }
 0x31f   : > { %v3958_v6 = vmax.f32 %v3926_v3, 0.0  ;;  %v3606_v46 = vpop.f32.mrb[14].mxu1 }
 0x320   : > { %v3607_v56 = vpop.f32.mrb[15].mxu1 }
 0x321   : > { %v4326_v41 = vpack.c.bf16 %v3959_v48, %v3958_v6  ;;  %v4711_v55 = vpop.f32.mrb[0].mxu0 }
 0x322   : > { %v3833_v59 = vadd.f32 %v4711_v55, %v7177_v17  ;;  %v3825_v13 = vpop.f32.mrb[1].mxu0 }
 0x323   : > { %4366 = vst [vmem:[%s7143_s25 + $0x48] sm:$0xff] %v4326_v41   ;;  %v3826_v4 = vadd.f32 %v3825_v13, %v7170_v2  ;;  %v4712_v60 = vpop.f32.mrb[2].mxu0 }
 0x324   : > { %v3929_v40 = vadd.f32 %v3833_v59, %v7066_v16  ;;  %v3828_v22 = vpop.f32.mrb[3].mxu0 }
 0x325   : > { %v3610_v19 = vpop.f32.mrb[16].mxu1  ;;  %v3928_v28 = vadd.f32 %v3826_v4, %v7703_v25 }
 0x326   : > { %v3961_v32 = vmax.f32 %v3929_v40, 0.0  ;;  %v3612_v62 = vpop.f32.mrb[17].mxu1 }
 0x327   : > { %v3960_v10 = vmax.f32 %v3928_v28, 0.0  ;;  %v3613_v11 = vpop.f32.mrb[18].mxu1 }
 0x328   : > { %v3614_v15 = vpop.f32.mrb[19].mxu1 }
 0x329   : > { %v4331_v45 = vpack.c.bf16 %v3961_v32, %v3960_v10  ;;  %v4715_v63 = vpop.f32.mrb[4].mxu0 }
 0x32a   : > { %v3847_v17 = vadd.f32 %v4715_v63, %v3589_v53  ;;  %v3839_v30 = vpop.f32.mrb[5].mxu0 }
 0x32b   : > { %4367 = vst [vmem:[%s7143_s25 + $0x50] sm:$0xff] %v4331_v45   ;;  %v3840_v2 = vadd.f32 %v3839_v30, %v7184_v24  ;;  %v4716_v9 = vpop.f32.mrb[6].mxu0 }
 0x32c   : > { %v3931_v16 = vadd.f32 %v3847_v17, %v7078_v26  ;;  %v3842_v33 = vpop.f32.mrb[7].mxu0 }
 0x32d   : > { %v3617_v38 = vpop.f32.mrb[20].mxu1  ;;  %v3930_v44 = vadd.f32 %v3840_v2, %v7704_v31 }
 0x32e   : > { %v3963_v51 = vmax.f32 %v3931_v16, 0.0  ;;  %v3619_v61 = vpop.f32.mrb[21].mxu1 }
 0x32f   : > { %v3962_v50 = vmax.f32 %v3930_v44, 0.0  ;;  %v3620_v12 = vpop.f32.mrb[22].mxu1 }
 0x330   : > { %v3621_v21 = vpop.f32.mrb[23].mxu1 }
 0x331   : > { %v4336_v7 = vpack.c.bf16 %v3963_v51, %v3962_v50  ;;  %v4719_v34 = vpop.f32.mrb[8].mxu0 }
 0x332   : > { %v3861_v53 = vadd.f32 %v4719_v34, %v3603_v35  ;;  %v3853_v0 = vpop.f32.mrb[9].mxu0 }
 0x333   : > { %4368 = vst [vmem:[%s7143_s25 + $0x58] sm:$0xff] %v4336_v7   ;;  %v3854_v1 = vadd.f32 %v3853_v0, %v3596_v47  ;;  %v4720_v24 = vpop.f32.mrb[10].mxu0 }
 0x334   : > { %v3933_v20 = vadd.f32 %v3861_v53, %v7090_v58  ;;  %v3856_v26 = vpop.f32.mrb[11].mxu0 }
 0x335   : > { %v3624_v5 = vpop.f32.mrb[24].mxu1  ;;  %v3932_v54 = vadd.f32 %v3854_v1, %v7092_v18 }
 0x336   : > { %v3965_v39 = vmax.f32 %v3933_v20, 0.0  ;;  %v3626_v14 = vpop.f32.mrb[25].mxu1 }
 0x337   : > { %v3964_v29 = vmax.f32 %v3932_v54, 0.0  ;;  %v3627_v49 = vpop.f32.mrb[26].mxu1 }
 0x338   : > { %v3628_v36 = vpop.f32.mrb[27].mxu1 }
 0x339   : > { %v4341_v27 = vpack.c.bf16 %v3965_v39, %v3964_v29  ;;  %v4723_v3 = vpop.f32.mrb[12].mxu0 }
 0x33a   : > { %v3875_v48 = vadd.f32 %v4723_v3, %v3617_v38  ;;  %v3867_v35 = vpop.f32.mrb[13].mxu0 }
 0x33b   : > { %4369 = vst [vmem:[%s7143_s25 + $0x60] sm:$0xff] %v4341_v27   ;;  %v3868_v8 = vadd.f32 %v3867_v35, %v3610_v19  ;;  %v4724_v47 = vpop.f32.mrb[14].mxu0 }
 0x33c   : > { %v3935_v6 = vadd.f32 %v3875_v48, %v7102_v52  ;;  %v3870_v58 = vpop.f32.mrb[15].mxu0 }
 0x33d   : > { %v3631_v46 = vpop.f32.mrb[28].mxu1  ;;  %v3934_v56 = vadd.f32 %v3868_v8, %v7104_v23 }
 0x33e   : > { %v3967_v18 = vmax.f32 %v3935_v6, 0.0  ;;  %v3633_v41 = vpop.f32.mrb[29].mxu1 }
 0x33f   : > { %v3966_v55 = vmax.f32 %v3934_v56, 0.0  ;;  %v3634_v59 = vpop.f32.mrb[30].mxu1 }
 0x340   : > { %v3635_v13 = vpop.f32.mrb[31].mxu1 }
 0x341   : > { %v4346_v4 = vpack.c.bf16 %v3967_v18, %v3966_v55  ;;  %v4727_v60 = vpop.f32.mrb[16].mxu0 }
 0x342   : > { %v3889_v40 = vadd.f32 %v4727_v60, %v3631_v46  ;;  %v3881_v22 = vpop.f32.mrb[17].mxu0 }
 0x343   : > { %4370 = vst [vmem:[%s7143_s25 + $0x68] sm:$0xff] %v4346_v4   ;;  %v3882_v25 = vadd.f32 %v3881_v22, %v3624_v5  ;;  %v4728_v19 = vpop.f32.mrb[18].mxu0 }
 0x344   : > { %v3937_v28 = vadd.f32 %v3889_v40, %v7114_v57  ;;  %v3884_v52 = vpop.f32.mrb[19].mxu0 }
 0x345   : > { %v3638_v32 = vpop.f32.mrb[32].mxu1  ;;  %v3936_v62 = vadd.f32 %v3882_v25, %v7116_v37 }
 0x346   : > { %v3969_v23 = vmax.f32 %v3937_v28, 0.0  ;;  %v3640_v10 = vpop.f32.mrb[33].mxu1 }
 0x347   : > { %v3968_v11 = vmax.f32 %v3936_v62, 0.0  ;;  %v3641_v15 = vpop.f32.mrb[34].mxu1 }
 0x348   : > { %v3642_v45 = vpop.f32.mrb[35].mxu1 }
 0x349   : > { %v4351_v63 = vpack.c.bf16 %v3969_v23, %v3968_v11  ;;  %v4731_v17 = vpop.f32.mrb[20].mxu0 }
 0x34a   : > { %v3895_v30 = vpop.f32.mrb[21].mxu0 }
 0x34b   : > { %4371 = vst [vmem:[%s7143_s25 + $0x70] sm:$0xff] %v4351_v63   ;;  %v3896_v2 = vadd.f32 %v3895_v30, %v3638_v32  ;;  %v4732_v9 = vpop.f32.mrb[22].mxu0 }
 0x34c   : > { %v3898_v16 = vpop.f32.mrb[23].mxu0 }
 0x34d   : > { %v3645_v33 = vpop.f32.mrb[36].mxu1  ;;  %v3938_v57 = vadd.f32 %v3896_v2, %v7128_v42 }
 0x34e   : > { %v3903_v38 = vadd.f32 %v4731_v17, %v3645_v33  ;;  %v3647_v31 = vpop.f32.mrb[37].mxu1 }
 0x34f   : > { %v3648_v44 = vpop.f32.mrb[38].mxu1  ;;  %v3970_v51 = vmax.f32 %v3938_v57, 0.0 }
 0x350   : > { %v3939_v37 = vadd.f32 %v3903_v38, %v7126_v43  ;;  %v3649_v61 = vpop.f32.mrb[39].mxu1 }
 0x352   : > { %v3971_v50 = vmax.f32 %v3939_v37, 0.0 }
 0x354   : > { %v4356_v12 = vpack.c.bf16 %v3971_v50, %v3970_v51 }
 0x356   : > { %4372 = vst [vmem:[%s7143_s25 + $0x78] sm:$0xff] %v4356_v12  }
 0x357 PF: > { %s13_s12 = sadd.s32 1, %s4869_s12  }
 0x358   : > { %p10_p4 = scmp.ge.s32.totalorder %s13_s12, 4  }
 0x35a   :  { %12 = sbr.rel (!%p10_p4) target bundleno = 1 (0x1), region = 66 }

</bundles_post_ra>
